<compile_context>
chip_gen: v6e
topology: v6e:2x2x1
jax: 0.10.0
libtpu: 0.0.40
codegen_flags: <defaults>
</compile_context>

<pallas_src>
import math

import jax
import jax.numpy as jnp
from jax import lax
from jax.experimental import pallas as pl
from jax.experimental.pallas import tpu as pltpu


# ----------------------------- LSTM kernel -------------------------------- #

def lstm_kernel(x_ref, z_ref, h0_ref, c0_ref,
                w_ih0x_ref, w_ih0z_ref, w_hh0_ref, b0_ref,
                w_ih1_ref, w_hh1_ref, b1_ref,
                hs_ref, hN_ref, cN_ref,
                gates_buf, const0_buf):
    """One time-chunk of a 2-layer LSTM (gate order i, f, g, o -- PyTorch).

    grid = (S // Ts,), "arbitrary".  The (h, c) carry of both layers lives in
    the resident hN/cN output blocks (constant index_map), so it persists
    across grid steps.  Layer-0 input gates for the chunk are one hoisted
    (Ts*B, E) @ (E, 4H) matmul; the serial loop is a wavefront: iteration t
    runs layer-1 at step t-1 and layer-0 at step t (independent), so the two
    cells' dots and sigmoid/tanh chains interleave.
    """
    Ts, B, E = x_ref.shape
    H = w_hh0_ref.shape[0]
    k = pl.program_id(0)

    @pl.when(k == 0)
    def _init():
        # z-conditioning is sequence-invariant: its gate contribution (B, 4H)
        # plus the combined layer-0 bias is computed ONCE and folded into the
        # per-step gate add instead of a full (S, B, 4H) broadcast add.
        const0_buf[...] = (
            jnp.dot(z_ref[...], w_ih0z_ref[...],
                    preferred_element_type=jnp.float32) + b0_ref[...])
        hN_ref[...] = h0_ref[...]
        cN_ref[...] = c0_ref[...]

    # Hoisted layer-0 input gates for this chunk: one (Ts*B, E) @ (E, 4H).
    x_all = x_ref[...].reshape(Ts * B, E)
    gates_buf[...] = jnp.dot(
        x_all, w_ih0x_ref[...],
        preferred_element_type=jnp.float32).reshape(Ts, B, 4 * H)

    w_hh0 = w_hh0_ref[...]
    w_ih1 = w_ih1_ref[...]
    w_hh1 = w_hh1_ref[...]
    b1 = b1_ref[...]
    g0_const = const0_buf[...]

    def gate_math(gates, c):
        # H is a multiple of 128 -> lane-aligned gate slices.
        i = jax.nn.sigmoid(gates[:, 0 * H:1 * H])
        f = jax.nn.sigmoid(gates[:, 1 * H:2 * H])
        g = jnp.tanh(gates[:, 2 * H:3 * H])
        o = jax.nn.sigmoid(gates[:, 3 * H:4 * H])
        c_new = f * c + i * g
        h_new = o * jnp.tanh(c_new)
        return h_new, c_new

    def cell0(t, h, c):
        gates = (gates_buf[t] + g0_const
                 + jnp.dot(h.astype(w_hh0.dtype), w_hh0,
                           preferred_element_type=jnp.float32))
        return gate_math(gates, c)

    def cell1(h_in, h, c):
        gates = (b1
                 + jnp.dot(h_in.astype(w_ih1.dtype), w_ih1,
                           preferred_element_type=jnp.float32)
                 + jnp.dot(h.astype(w_hh1.dtype), w_hh1,
                           preferred_element_type=jnp.float32))
        return gate_math(gates, c)

    # Load the carry (state at the end of the previous chunk).
    h0, c0 = hN_ref[0], cN_ref[0]
    h1, c1 = hN_ref[1], cN_ref[1]

    # Prologue: layer-0, local step 0.
    h0, c0 = cell0(0, h0, c0)

    def body(t, carry):
        h0, c0, h1, c1 = carry
        # Layer-1 at step t-1 consumes h0 (= layer-0 hidden at t-1) and is
        # independent of layer-0 at step t -> interleavable on MXU/EUP.
        h1n, c1n = cell1(h0, h1, c1)
        hs_ref[t - 1] = h1n.astype(hs_ref.dtype)
        h0n, c0n = cell0(t, h0, c0)
        return (h0n, c0n, h1n, c1n)

    # Unroll is bounded by the chunk size (Ts <= 16), not by S.
    h0, c0, h1, c1 = lax.fori_loop(1, Ts, body, (h0, c0, h1, c1), unroll=True)

    # Epilogue: layer-1 at the chunk's last step.
    h1, c1 = cell1(h0, h1, c1)
    hs_ref[Ts - 1] = h1.astype(hs_ref.dtype)

    # Store the carry for the next chunk (final state after the last chunk).
    hN_ref[0] = h0
    hN_ref[1] = h1
    cN_ref[0] = c0
    cN_ref[1] = c1


# ------------------------ vocab projection kernel -------------------------- #

def proj_kernel(hs_ref, w_ref, b_ref, out_ref):
    h = hs_ref[...].astype(w_ref.dtype)
    out_ref[...] = (jnp.dot(h, w_ref[...], preferred_element_type=jnp.float32)
                    + b_ref[...]).astype(out_ref.dtype)


# ------------------------------ helpers ------------------------------------ #

def _pick_tile(n, candidates):
    for c in candidates:
        if n >= c and n % c == 0:
            return c
    return n


def _vmem_limit(need_bytes):
    """Clamp a requested scoped-VMEM budget to the chip's physical VMEM
    (v7x: 64 MiB / TensorCore) leaving ~15% headroom for compiler temps."""
    try:
        cap = int(pltpu.get_tpu_info().vmem_capacity_bytes)
    except Exception:
        cap = 64 << 20                    # conservative fallback (v7x per-core)
    cap = int(cap * 0.85)
    return max(min(int(need_bytes), cap), 1 << 20)


# ------------------------------ Wrapper ------------------------------------ #

def decoder_forward(decoder_input, z, drop_prob, weights,
                    initial_state=None, dropout_key=None,
                    compute_dtype=jnp.float32):
    """JAX/Pallas equivalent of Decoder.forward.

    decoder_input: [B, S, E]   (batch-first, like PyTorch)
    z:             [B, L]
    returns (logits [B, S, V], (h_n [2, B, H], c_n [2, B, H]))
    """
    B, S, E = decoder_input.shape
    L = z.shape[-1]
    H = weights["w_hh0"].shape[-1]
    V = weights["fc_w"].shape[0]
    cdt = compute_dtype

    x = decoder_input.astype(jnp.float32)
    if drop_prob > 0.0:
        # TODO(synk): F.dropout semantics (inverted dropout); RNG stream differs from torch.
        if dropout_key is None:
            raise ValueError("drop_prob > 0 requires dropout_key")
        keep = 1.0 - drop_prob
        mask = jax.random.bernoulli(dropout_key, keep, x.shape)
        x = jnp.where(mask, x / keep, 0.0)

    # Pad batch to a multiple of 8 sublanes; padded rows are sliced off later.
    B_pad = ((B + 7) // 8) * 8
    pad = B_pad - B
    z_p = z.astype(jnp.float32)
    if pad:
        x = jnp.pad(x, ((0, pad), (0, 0), (0, 0)))
        z_p = jnp.pad(z_p, ((0, pad), (0, 0)))

    if initial_state is None:
        h0 = jnp.zeros((2, B_pad, H), jnp.float32)
        c0 = jnp.zeros((2, B_pad, H), jnp.float32)
    else:
        h0, c0 = initial_state
        h0 = jnp.pad(h0.astype(jnp.float32), ((0, 0), (0, pad), (0, 0)))
        c0 = jnp.pad(c0.astype(jnp.float32), ((0, 0), (0, pad), (0, 0)))

    x_tm = jnp.transpose(x, (1, 0, 2)).astype(cdt)         # [S, B_pad, E]
    z_p = z_p.astype(cdt)

    # Weight prep: split W_ih0 into embedding / z halves, pre-transpose.
    w_ih0 = weights["w_ih0"]                               # (4H, E+L)
    w_ih0x_t = w_ih0[:, :E].T.astype(cdt)                  # (E, 4H)
    w_ih0z_t = w_ih0[:, E:].T.astype(cdt)                  # (L, 4H)
    w_hh0_t = weights["w_hh0"].T.astype(cdt)               # (H, 4H)
    b0 = (weights["b_ih0"] + weights["b_hh0"]).astype(jnp.float32)[None, :]
    w_ih1_t = weights["w_ih1"].T.astype(cdt)               # (H, 4H)
    w_hh1_t = weights["w_hh1"].T.astype(cdt)               # (H, 4H)
    b1 = (weights["b_ih1"] + weights["b_hh1"]).astype(jnp.float32)[None, :]
    fc_w_t = weights["fc_w"].T.astype(cdt)                 # (H, V)
    fc_b = weights["fc_b"].astype(jnp.float32)[None, :]    # (1, V)

    # hs intermediate stored in compute_dtype (bf16 halves its HBM round trip
    # on v6e/v7x); cell state / gate math / accumulation stay f32.
    hs_dtype = cdt

    # Time chunk size: keeps VMEM O(Ts*B*4H) and bounds the unroll.
    Ts = _pick_tile(S, (8, 16, 4, 2, 1))

    itemsize = jnp.dtype(cdt).itemsize
    weight_bytes = sum(int(a.size) * a.dtype.itemsize for a in
                       (z_p, h0, c0, w_ih0x_t, w_ih0z_t, w_hh0_t, b0,
                        w_ih1_t, w_hh1_t, b1))
    lstm_need = (2 * weight_bytes
                 + 2 * Ts * B_pad * E * itemsize                      # x (dbl buf)
                 + 2 * Ts * B_pad * H * jnp.dtype(hs_dtype).itemsize  # hs (dbl buf)
                 + 4 * (Ts * B_pad * 4 * H + B_pad * 4 * H)           # scratch
                 + 4 * (2 * 2 * B_pad * H)                            # hN/cN
                 + (8 << 20))                                         # headroom

    vmem_full = pl.BlockSpec(memory_space=pltpu.MemorySpace.VMEM)

    # TODO(synk): for B_pad >= 16 on v7x, add a leading "parallel" grid axis
    # over batch chunks so both TensorCores run the recurrence.
    hs_tm, h_n, c_n = pl.pallas_call(
        lstm_kernel,
        out_shape=(
            jax.ShapeDtypeStruct((S, B_pad, H), hs_dtype),
            jax.ShapeDtypeStruct((2, B_pad, H), jnp.float32),
            jax.ShapeDtypeStruct((2, B_pad, H), jnp.float32),
        ),
        grid=(S // Ts,),
        in_specs=[
            pl.BlockSpec((Ts, B_pad, E), lambda k: (k, 0, 0)),   # x chunk (pipelined)
            vmem_full,   # z
            vmem_full,   # h0
            vmem_full,   # c0
            vmem_full,   # w_ih0x
            vmem_full,   # w_ih0z
            vmem_full,   # w_hh0
            vmem_full,   # b0
            vmem_full,   # w_ih1
            vmem_full,   # w_hh1
            vmem_full,   # b1
        ],
        out_specs=(
            pl.BlockSpec((Ts, B_pad, H), lambda k: (k, 0, 0)),   # hs chunk (pipelined)
            pl.BlockSpec((2, B_pad, H), lambda k: (0, 0, 0)),    # resident carry / h_n
            pl.BlockSpec((2, B_pad, H), lambda k: (0, 0, 0)),    # resident carry / c_n
        ),
        scratch_shapes=[
            pltpu.VMEM((Ts, B_pad, 4 * H), jnp.float32),         # chunk input gates
            pltpu.VMEM((B_pad, 4 * H), jnp.float32),             # z-gate + bias const
        ],
        compiler_params=pltpu.CompilerParams(
            dimension_semantics=("arbitrary",),
            vmem_limit_bytes=_vmem_limit(lstm_need)),
    )(x_tm, z_p, h0, c0, w_ih0x_t, w_ih0z_t, w_hh0_t, b0,
      w_ih1_t, w_hh1_t, b1)

    # --- vocab projection ---------------------------------------------------
    # Transpose the SMALL (H-wide) hidden states to batch-major before the
    # projection so the LARGE (V-wide) logits come out directly in [B, S, V]
    # layout -- no post-hoc transpose of the biggest tensor.
    M = B_pad * S
    hs_bm = jnp.transpose(hs_tm, (1, 0, 2)).reshape(M, H)

    tm = _pick_tile(M, (1024, 512, 256, 128, 64, 32, 16, 8))
    tn = _pick_tile(V, (512, 256, 128))

    proj_need = (2 * (tm * H * itemsize + H * tn * itemsize + 4 * tn)
                 + 2 * tm * tn * 4 + (8 << 20))

    # grid = (V-tiles, M-tiles): the fc_w block index depends only on the
    # OUTER axis, so it stays resident across the whole inner M sweep instead
    # of being re-streamed from HBM every step; the small hs operand streams.
    logits_flat = pl.pallas_call(
        proj_kernel,
        out_shape=jax.ShapeDtypeStruct((M, V), jnp.float32),
        grid=(V // tn, M // tm),
        in_specs=[
            pl.BlockSpec((tm, H), lambda j, i: (i, 0)),
            pl.BlockSpec((H, tn), lambda j, i: (0, j)),
            pl.BlockSpec((1, tn), lambda j, i: (0, j)),
        ],
        out_specs=pl.BlockSpec((tm, tn), lambda j, i: (i, j)),
        compiler_params=pltpu.CompilerParams(
            dimension_semantics=("parallel", "parallel"),
            vmem_limit_bytes=_vmem_limit(proj_need)),
    )(hs_bm, fc_w_t, fc_b)

    logits = logits_flat.reshape(B_pad, S, V)[:B]          # [B, S, V]
    return logits, (h_n[:, :B], c_n[:, :B])


# --------------------------- Pure-JAX reference ----------------------------- #

def decoder_reference(decoder_input, z, weights):
    B, S, E = decoder_input.shape
    L = z.shape[-1]
    H = weights["w_hh0"].shape[-1]
    z_rep = jnp.broadcast_to(z[:, None, :], (B, S, L))
    x = jnp.concatenate([decoder_input, z_rep], axis=2)

    def run_layer(xs, w_ih, w_hh, b_ih, b_hh):
        def step(carry, x_t):
            h, c = carry
            gates = x_t @ w_ih.T + b_ih + h @ w_hh.T + b_hh
            i, f, g, o = jnp.split(gates, 4, axis=-1)
            i, f, o = jax.nn.sigmoid(i), jax.nn.sigmoid(f), jax.nn.sigmoid(o)
            g = jnp.tanh(g)
            c = f * c + i * g
            h = o * jnp.tanh(c)
            return (h, c), h
        h0 = jnp.zeros((B, H), jnp.float32)
        c0 = jnp.zeros((B, H), jnp.float32)
        (hT, cT), hs = lax.scan(step, (h0, c0), jnp.transpose(xs, (1, 0, 2)))
        return jnp.transpose(hs, (1, 0, 2)), hT, cT

    y0, h0T, c0T = run_layer(x, weights["w_ih0"], weights["w_hh0"],
                             weights["b_ih0"], weights["b_hh0"])
    y1, h1T, c1T = run_layer(y0, weights["w_ih1"], weights["w_hh1"],
                             weights["b_ih1"], weights["b_hh1"])
    logits = y1 @ weights["fc_w"].T + weights["fc_b"]
    h_n = jnp.stack([h0T, h1T], axis=0)
    c_n = jnp.stack([c0T, c1T], axis=0)
    return logits, (h_n, c_n)


# --------------------------------- Main ------------------------------------- #

if __name__ == "__main__":
    # "params" of the original module (small, TPU-aligned synthetic sizes).
    word_embed_size = 32
    latent_variable_size = 32
    decoder_rnn_size = 128       # H  (multiple of 128 -> lane-aligned gates)
    decoder_num_layers = 2
    word_vocab_size = 1024       # V  (multiple of 128 -> lane-dense logits)

    B, S = 4, 16                 # batch gets padded to 8 inside the wrapper
    D_in = word_embed_size + latent_variable_size
    H, V = decoder_rnn_size, word_vocab_size

    key = jax.random.PRNGKey(0)
    keys = jax.random.split(key, 16)
    k_lstm = 1.0 / math.sqrt(H)

    def uni(k, shape, bound):
        return jax.random.uniform(k, shape, jnp.float32, -bound, bound)

    weights = {
        "w_ih0": uni(keys[0], (4 * H, D_in), k_lstm),
        "w_hh0": uni(keys[1], (4 * H, H), k_lstm),
        "b_ih0": uni(keys[2], (4 * H,), k_lstm),
        "b_hh0": uni(keys[3], (4 * H,), k_lstm),
        "w_ih1": uni(keys[4], (4 * H, H), k_lstm),
        "w_hh1": uni(keys[5], (4 * H, H), k_lstm),
        "b_ih1": uni(keys[6], (4 * H,), k_lstm),
        "b_hh1": uni(keys[7], (4 * H,), k_lstm),
        "fc_w": uni(keys[8], (V, H), k_lstm),
        "fc_b": uni(keys[9], (V,), k_lstm),
    }

    decoder_input = jax.random.normal(keys[10], (B, S, word_embed_size), jnp.float32)
    z = jax.random.normal(keys[11], (B, latent_variable_size), jnp.float32)

    # drop_prob=0.0 -> deterministic (dropout is identity), matching the reference.
    logits, (h_n, c_n) = decoder_forward(decoder_input, z, 0.0, weights)
    jax.block_until_ready((logits, h_n, c_n))

    ref_logits, (ref_h, ref_c) = decoder_reference(decoder_input, z, weights)

    assert logits.shape == (B, S, V)
    assert h_n.shape == (decoder_num_layers, B, H)
    assert c_n.shape == (decoder_num_layers, B, H)
    assert jnp.allclose(logits, ref_logits, atol=2e-4, rtol=2e-4)
    assert jnp.allclose(h_n, ref_h, atol=2e-4, rtol=2e-4)
    assert jnp.allclose(c_n, ref_c, atol=2e-4, rtol=2e-4)

    # bf16 MXU path (v6e/v7x perf mode): f32 state/accumulation, loose check.
    logits_bf, (h_bf, c_bf) = decoder_forward(decoder_input, z, 0.0, weights,
                                              compute_dtype=jnp.bfloat16)
    jax.block_until_ready((logits_bf, h_bf, c_bf))
    assert logits_bf.shape == (B, S, V)
    assert bool(jnp.all(jnp.isfinite(logits_bf)))
    assert jnp.allclose(logits_bf, ref_logits, atol=0.5)

    print("KERNEL_OK")
</pallas_src>

<mosaic_0001>
module attributes {stable_mosaic.version = 11 : i64} {
  func.func @lstm_kernel(%arg0: i32, %arg1: memref<8x8x32xf32, #tpu.memory_space<vmem>>, %arg2: memref<8x32xf32, #tpu.memory_space<vmem>>, %arg3: memref<2x8x128xf32, #tpu.memory_space<vmem>>, %arg4: memref<2x8x128xf32, #tpu.memory_space<vmem>>, %arg5: memref<32x512xf32, #tpu.memory_space<vmem>>, %arg6: memref<32x512xf32, #tpu.memory_space<vmem>>, %arg7: memref<128x512xf32, #tpu.memory_space<vmem>>, %arg8: memref<1x512xf32, #tpu.memory_space<vmem>>, %arg9: memref<128x512xf32, #tpu.memory_space<vmem>>, %arg10: memref<128x512xf32, #tpu.memory_space<vmem>>, %arg11: memref<1x512xf32, #tpu.memory_space<vmem>>, %arg12: memref<8x8x128xf32, #tpu.memory_space<vmem>>, %arg13: memref<2x8x128xf32, #tpu.memory_space<vmem>>, %arg14: memref<2x8x128xf32, #tpu.memory_space<vmem>>, %arg15: memref<8x8x512xf32, #tpu.memory_space<vmem>>, %arg16: memref<8x512xf32, #tpu.memory_space<vmem>>) attributes {dimension_semantics = [#tpu.dimension_semantics<arbitrary>], iteration_bounds = array<i64: 2>, scalar_prefetch = 0 : i64, scratch_operands = 2 : i64, tpu.core_type = #tpu.core_type<tc>, window_params = [{transform_indices = @transform_0, window_bounds = array<i64: 8, 8, 32>}, {pipeline_mode = #tpu.pipeline_mode<synchronous>, transform_indices = @transform_1, window_bounds = array<i64: 8, 32>}, {pipeline_mode = #tpu.pipeline_mode<synchronous>, transform_indices = @transform_2, window_bounds = array<i64: 2, 8, 128>}, {pipeline_mode = #tpu.pipeline_mode<synchronous>, transform_indices = @transform_3, window_bounds = array<i64: 2, 8, 128>}, {pipeline_mode = #tpu.pipeline_mode<synchronous>, transform_indices = @transform_4, window_bounds = array<i64: 32, 512>}, {pipeline_mode = #tpu.pipeline_mode<synchronous>, transform_indices = @transform_5, window_bounds = array<i64: 32, 512>}, {pipeline_mode = #tpu.pipeline_mode<synchronous>, transform_indices = @transform_6, window_bounds = array<i64: 128, 512>}, {pipeline_mode = #tpu.pipeline_mode<synchronous>, transform_indices = @transform_7, window_bounds = array<i64: 1, 512>}, {pipeline_mode = #tpu.pipeline_mode<synchronous>, transform_indices = @transform_8, window_bounds = array<i64: 128, 512>}, {pipeline_mode = #tpu.pipeline_mode<synchronous>, transform_indices = @transform_9, window_bounds = array<i64: 128, 512>}, {pipeline_mode = #tpu.pipeline_mode<synchronous>, transform_indices = @transform_10, window_bounds = array<i64: 1, 512>}, {transform_indices = @transform_11, window_bounds = array<i64: 8, 8, 128>}, {pipeline_mode = #tpu.pipeline_mode<synchronous>, transform_indices = @transform_12, window_bounds = array<i64: 2, 8, 128>}, {pipeline_mode = #tpu.pipeline_mode<synchronous>, transform_indices = @transform_13, window_bounds = array<i64: 2, 8, 128>}]} {
    %c0_i32 = arith.constant 0 : i32
    %0 = arith.cmpi eq, %arg0, %c0_i32 : i32
    %1 = arith.extui %0 : i1 to i32
    %c0_i32_0 = arith.constant 0 : i32
    %2 = arith.cmpi ne, %1, %c0_i32_0 : i32
    scf.if %2 {
      %c0_154 = arith.constant 0 : index
      %c0_155 = arith.constant 0 : index
      %559 = vector.load %arg2[%c0_154, %c0_155] : memref<8x32xf32, #tpu.memory_space<vmem>>, vector<8x32xf32>
      %c0_156 = arith.constant 0 : index
      %c0_157 = arith.constant 0 : index
      %560 = vector.load %arg6[%c0_156, %c0_157] : memref<32x512xf32, #tpu.memory_space<vmem>>, vector<32x512xf32>
      %cst_158 = arith.constant dense<0.000000e+00> : vector<8x512xf32>
      %561 = tpu.matmul %559, %560, %cst_158 {dimension_numbers = #tpu.dot_dimension_numbers<[1], [0], [0], [1], [0, 0, 1, 1], [], []>} : vector<8x32xf32>, vector<32x512xf32>, vector<8x512xf32> -> vector<8x512xf32>
      %c0_159 = arith.constant 0 : index
      %c0_160 = arith.constant 0 : index
      %562 = vector.load %arg8[%c0_159, %c0_160] : memref<1x512xf32, #tpu.memory_space<vmem>>, vector<1x512xf32>
      %563 = vector.broadcast %562 : vector<1x512xf32> to vector<8x512xf32>
      %564 = arith.addf %561, %563 : vector<8x512xf32>
      %c0_161 = arith.constant 0 : index
      %c0_162 = arith.constant 0 : index
      %565 = vector.load %arg16[%c0_161, %c0_162] : memref<8x512xf32, #tpu.memory_space<vmem>>, vector<8x512xf32>
      tpu.vector_store %arg16[%c0_161, %c0_162], %564 {strides = array<i32>} : memref<8x512xf32, #tpu.memory_space<vmem>>, vector<8x512xf32>,
      %c0_163 = arith.constant 0 : index
      %c0_164 = arith.constant 0 : index
      %c0_165 = arith.constant 0 : index
      %566 = vector.load %arg3[%c0_163, %c0_164, %c0_165] : memref<2x8x128xf32, #tpu.memory_space<vmem>>, vector<2x8x128xf32>
      %c0_166 = arith.constant 0 : index
      %c0_167 = arith.constant 0 : index
      %c0_168 = arith.constant 0 : index
      %567 = vector.load %arg13[%c0_166, %c0_167, %c0_168] : memref<2x8x128xf32, #tpu.memory_space<vmem>>, vector<2x8x128xf32>
      tpu.vector_store %arg13[%c0_166, %c0_167, %c0_168], %566 {strides = array<i32>} : memref<2x8x128xf32, #tpu.memory_space<vmem>>, vector<2x8x128xf32>,
      %c0_169 = arith.constant 0 : index
      %c0_170 = arith.constant 0 : index
      %c0_171 = arith.constant 0 : index
      %568 = vector.load %arg4[%c0_169, %c0_170, %c0_171] : memref<2x8x128xf32, #tpu.memory_space<vmem>>, vector<2x8x128xf32>
      %c0_172 = arith.constant 0 : index
      %c0_173 = arith.constant 0 : index
      %c0_174 = arith.constant 0 : index
      %569 = vector.load %arg14[%c0_172, %c0_173, %c0_174] : memref<2x8x128xf32, #tpu.memory_space<vmem>>, vector<2x8x128xf32>
      tpu.vector_store %arg14[%c0_172, %c0_173, %c0_174], %568 {strides = array<i32>} : memref<2x8x128xf32, #tpu.memory_space<vmem>>, vector<2x8x128xf32>,
    } else {
    }
    %c0 = arith.constant 0 : index
    %c0_1 = arith.constant 0 : index
    %c0_2 = arith.constant 0 : index
    %3 = vector.load %arg1[%c0, %c0_1, %c0_2] : memref<8x8x32xf32, #tpu.memory_space<vmem>>, vector<8x8x32xf32>
    %4 = vector.shape_cast %3 : vector<8x8x32xf32> to vector<64x32xf32>
    %c0_3 = arith.constant 0 : index
    %c0_4 = arith.constant 0 : index
    %5 = vector.load %arg5[%c0_3, %c0_4] : memref<32x512xf32, #tpu.memory_space<vmem>>, vector<32x512xf32>
    %cst = arith.constant dense<0.000000e+00> : vector<64x512xf32>
    %6 = tpu.matmul %4, %5, %cst {dimension_numbers = #tpu.dot_dimension_numbers<[1], [0], [0], [1], [0, 0, 1, 1], [], []>} : vector<64x32xf32>, vector<32x512xf32>, vector<64x512xf32> -> vector<64x512xf32>
    %7 = vector.shape_cast %6 : vector<64x512xf32> to vector<8x8x512xf32>
    %c0_5 = arith.constant 0 : index
    %c0_6 = arith.constant 0 : index
    %c0_7 = arith.constant 0 : index
    %8 = vector.load %arg15[%c0_5, %c0_6, %c0_7] : memref<8x8x512xf32, #tpu.memory_space<vmem>>, vector<8x8x512xf32>
    tpu.vector_store %arg15[%c0_5, %c0_6, %c0_7], %7 {strides = array<i32>} : memref<8x8x512xf32, #tpu.memory_space<vmem>>, vector<8x8x512xf32>,
    %c0_8 = arith.constant 0 : index
    %c0_9 = arith.constant 0 : index
    %9 = vector.load %arg7[%c0_8, %c0_9] : memref<128x512xf32, #tpu.memory_space<vmem>>, vector<128x512xf32>
    %c0_10 = arith.constant 0 : index
    %c0_11 = arith.constant 0 : index
    %10 = vector.load %arg9[%c0_10, %c0_11] : memref<128x512xf32, #tpu.memory_space<vmem>>, vector<128x512xf32>
    %c0_12 = arith.constant 0 : index
    %c0_13 = arith.constant 0 : index
    %11 = vector.load %arg10[%c0_12, %c0_13] : memref<128x512xf32, #tpu.memory_space<vmem>>, vector<128x512xf32>
    %c0_14 = arith.constant 0 : index
    %c0_15 = arith.constant 0 : index
    %12 = vector.load %arg11[%c0_14, %c0_15] : memref<1x512xf32, #tpu.memory_space<vmem>>, vector<1x512xf32>
    %c0_16 = arith.constant 0 : index
    %c0_17 = arith.constant 0 : index
    %13 = vector.load %arg16[%c0_16, %c0_17] : memref<8x512xf32, #tpu.memory_space<vmem>>, vector<8x512xf32>
    %c0_18 = arith.constant 0 : index
    %c0_19 = arith.constant 0 : index
    %c0_20 = arith.constant 0 : index
    %14 = vector.load %arg13[%c0_18, %c0_19, %c0_20] : memref<2x8x128xf32, #tpu.memory_space<vmem>>, vector<1x8x128xf32>
    %15 = vector.shape_cast %14 : vector<1x8x128xf32> to vector<8x128xf32>
    %c0_21 = arith.constant 0 : index
    %c0_22 = arith.constant 0 : index
    %c0_23 = arith.constant 0 : index
    %16 = vector.load %arg14[%c0_21, %c0_22, %c0_23] : memref<2x8x128xf32, #tpu.memory_space<vmem>>, vector<1x8x128xf32>
    %17 = vector.shape_cast %16 : vector<1x8x128xf32> to vector<8x128xf32>
    %c1 = arith.constant 1 : index
    %c0_24 = arith.constant 0 : index
    %c0_25 = arith.constant 0 : index
    %18 = vector.load %arg13[%c1, %c0_24, %c0_25] : memref<2x8x128xf32, #tpu.memory_space<vmem>>, vector<1x8x128xf32>
    %19 = vector.shape_cast %18 : vector<1x8x128xf32> to vector<8x128xf32>
    %c1_26 = arith.constant 1 : index
    %c0_27 = arith.constant 0 : index
    %c0_28 = arith.constant 0 : index
    %20 = vector.load %arg14[%c1_26, %c0_27, %c0_28] : memref<2x8x128xf32, #tpu.memory_space<vmem>>, vector<1x8x128xf32>
    %21 = vector.shape_cast %20 : vector<1x8x128xf32> to vector<8x128xf32>
    %c0_29 = arith.constant 0 : index
    %c0_30 = arith.constant 0 : index
    %c0_31 = arith.constant 0 : index
    %22 = vector.load %arg15[%c0_29, %c0_30, %c0_31] : memref<8x8x512xf32, #tpu.memory_space<vmem>>, vector<1x8x512xf32>
    %23 = vector.shape_cast %22 : vector<1x8x512xf32> to vector<8x512xf32>
    %24 = arith.addf %23, %13 : vector<8x512xf32>
    %cst_32 = arith.constant dense<0.000000e+00> : vector<8x512xf32>
    %25 = tpu.matmul %15, %9, %cst_32 {dimension_numbers = #tpu.dot_dimension_numbers<[1], [0], [0], [1], [0, 0, 1, 1], [], []>} : vector<8x128xf32>, vector<128x512xf32>, vector<8x512xf32> -> vector<8x512xf32>
    %26 = arith.addf %24, %25 : vector<8x512xf32>
    %27 = vector.extract_strided_slice %26 {offsets = [0, 0], sizes = [8, 128], strides = [1, 1]} : vector<8x512xf32> to vector<8x128xf32>
    %28 = arith.negf %27 : vector<8x128xf32>
    %29 = math.exp %28 : vector<8x128xf32>
    %cst_33 = arith.constant 1.000000e+00 : f32
    %30 = vector.broadcast %cst_33 : f32 to vector<8x128xf32>
    %31 = arith.addf %30, %29 : vector<8x128xf32>
    %32 = arith.divf %30, %31 : vector<8x128xf32>
    %33 = vector.extract_strided_slice %26 {offsets = [0, 128], sizes = [8, 128], strides = [1, 1]} : vector<8x512xf32> to vector<8x128xf32>
    %34 = arith.negf %33 : vector<8x128xf32>
    %35 = math.exp %34 : vector<8x128xf32>
    %cst_34 = arith.constant 1.000000e+00 : f32
    %36 = vector.broadcast %cst_34 : f32 to vector<8x128xf32>
    %37 = arith.addf %36, %35 : vector<8x128xf32>
    %38 = arith.divf %36, %37 : vector<8x128xf32>
    %39 = vector.extract_strided_slice %26 {offsets = [0, 256], sizes = [8, 128], strides = [1, 1]} : vector<8x512xf32> to vector<8x128xf32>
    %40 = math.tanh %39 : vector<8x128xf32>
    %41 = vector.extract_strided_slice %26 {offsets = [0, 384], sizes = [8, 128], strides = [1, 1]} : vector<8x512xf32> to vector<8x128xf32>
    %42 = arith.negf %41 : vector<8x128xf32>
    %43 = math.exp %42 : vector<8x128xf32>
    %cst_35 = arith.constant 1.000000e+00 : f32
    %44 = vector.broadcast %cst_35 : f32 to vector<8x128xf32>
    %45 = arith.addf %44, %43 : vector<8x128xf32>
    %46 = arith.divf %44, %45 : vector<8x128xf32>
    %47 = arith.mulf %38, %17 : vector<8x128xf32>
    %48 = arith.mulf %32, %40 : vector<8x128xf32>
    %49 = arith.addf %47, %48 : vector<8x128xf32>
    %50 = math.tanh %49 : vector<8x128xf32>
    %51 = arith.mulf %46, %50 : vector<8x128xf32>
    %c1_i32 = arith.constant 1 : i32
    %cst_36 = arith.constant dense<0.000000e+00> : vector<8x512xf32>
    %52 = tpu.matmul %51, %10, %cst_36 {dimension_numbers = #tpu.dot_dimension_numbers<[1], [0], [0], [1], [0, 0, 1, 1], [], []>} : vector<8x128xf32>, vector<128x512xf32>, vector<8x512xf32> -> vector<8x512xf32>
    %53 = vector.broadcast %12 : vector<1x512xf32> to vector<8x512xf32>
    %54 = arith.addf %53, %52 : vector<8x512xf32>
    %cst_37 = arith.constant dense<0.000000e+00> : vector<8x512xf32>
    %55 = tpu.matmul %19, %11, %cst_37 {dimension_numbers = #tpu.dot_dimension_numbers<[1], [0], [0], [1], [0, 0, 1, 1], [], []>} : vector<8x128xf32>, vector<128x512xf32>, vector<8x512xf32> -> vector<8x512xf32>
    %56 = arith.addf %54, %55 : vector<8x512xf32>
    %57 = vector.extract_strided_slice %56 {offsets = [0, 0], sizes = [8, 128], strides = [1, 1]} : vector<8x512xf32> to vector<8x128xf32>
    %58 = arith.negf %57 : vector<8x128xf32>
    %59 = math.exp %58 : vector<8x128xf32>
    %cst_38 = arith.constant 1.000000e+00 : f32
    %60 = vector.broadcast %cst_38 : f32 to vector<8x128xf32>
    %61 = arith.addf %60, %59 : vector<8x128xf32>
    %62 = arith.divf %60, %61 : vector<8x128xf32>
    %63 = vector.extract_strided_slice %56 {offsets = [0, 128], sizes = [8, 128], strides = [1, 1]} : vector<8x512xf32> to vector<8x128xf32>
    %64 = arith.negf %63 : vector<8x128xf32>
    %65 = math.exp %64 : vector<8x128xf32>
    %cst_39 = arith.constant 1.000000e+00 : f32
    %66 = vector.broadcast %cst_39 : f32 to vector<8x128xf32>
    %67 = arith.addf %66, %65 : vector<8x128xf32>
    %68 = arith.divf %66, %67 : vector<8x128xf32>
    %69 = vector.extract_strided_slice %56 {offsets = [0, 256], sizes = [8, 128], strides = [1, 1]} : vector<8x512xf32> to vector<8x128xf32>
    %70 = math.tanh %69 : vector<8x128xf32>
    %71 = vector.extract_strided_slice %56 {offsets = [0, 384], sizes = [8, 128], strides = [1, 1]} : vector<8x512xf32> to vector<8x128xf32>
    %72 = arith.negf %71 : vector<8x128xf32>
    %73 = math.exp %72 : vector<8x128xf32>
    %cst_40 = arith.constant 1.000000e+00 : f32
    %74 = vector.broadcast %cst_40 : f32 to vector<8x128xf32>
    %75 = arith.addf %74, %73 : vector<8x128xf32>
    %76 = arith.divf %74, %75 : vector<8x128xf32>
    %77 = arith.mulf %68, %21 : vector<8x128xf32>
    %78 = arith.mulf %62, %70 : vector<8x128xf32>
    %79 = arith.addf %77, %78 : vector<8x128xf32>
    %80 = math.tanh %79 : vector<8x128xf32>
    %81 = arith.mulf %76, %80 : vector<8x128xf32>
    %c1_i32_41 = arith.constant 1 : i32
    %82 = arith.subi %c1_i32, %c1_i32_41 : i32
    %83 = arith.index_cast %82 : i32 to index
    %c0_42 = arith.constant 0 : index
    %c0_43 = arith.constant 0 : index
    %84 = vector.load %arg12[%83, %c0_42, %c0_43] : memref<8x8x128xf32, #tpu.memory_space<vmem>>, vector<1x8x128xf32>
    %85 = vector.shape_cast %84 : vector<1x8x128xf32> to vector<8x128xf32>
    %86 = vector.shape_cast %81 : vector<8x128xf32> to vector<1x8x128xf32>
    tpu.vector_store %arg12[%83, %c0_42, %c0_43], %86 {strides = array<i32>} : memref<8x8x128xf32, #tpu.memory_space<vmem>>, vector<1x8x128xf32>,
    %87 = arith.index_cast %c1_i32 : i32 to index
    %c0_44 = arith.constant 0 : index
    %c0_45 = arith.constant 0 : index
    %88 = vector.load %arg15[%87, %c0_44, %c0_45] : memref<8x8x512xf32, #tpu.memory_space<vmem>>, vector<1x8x512xf32>
    %89 = vector.shape_cast %88 : vector<1x8x512xf32> to vector<8x512xf32>
    %90 = arith.addf %89, %13 : vector<8x512xf32>
    %cst_46 = arith.constant dense<0.000000e+00> : vector<8x512xf32>
    %91 = tpu.matmul %51, %9, %cst_46 {dimension_numbers = #tpu.dot_dimension_numbers<[1], [0], [0], [1], [0, 0, 1, 1], [], []>} : vector<8x128xf32>, vector<128x512xf32>, vector<8x512xf32> -> vector<8x512xf32>
    %92 = arith.addf %90, %91 : vector<8x512xf32>
    %93 = vector.extract_strided_slice %92 {offsets = [0, 0], sizes = [8, 128], strides = [1, 1]} : vector<8x512xf32> to vector<8x128xf32>
    %94 = arith.negf %93 : vector<8x128xf32>
    %95 = math.exp %94 : vector<8x128xf32>
    %cst_47 = arith.constant 1.000000e+00 : f32
    %96 = vector.broadcast %cst_47 : f32 to vector<8x128xf32>
    %97 = arith.addf %96, %95 : vector<8x128xf32>
    %98 = arith.divf %96, %97 : vector<8x128xf32>
    %99 = vector.extract_strided_slice %92 {offsets = [0, 128], sizes = [8, 128], strides = [1, 1]} : vector<8x512xf32> to vector<8x128xf32>
    %100 = arith.negf %99 : vector<8x128xf32>
    %101 = math.exp %100 : vector<8x128xf32>
    %cst_48 = arith.constant 1.000000e+00 : f32
    %102 = vector.broadcast %cst_48 : f32 to vector<8x128xf32>
    %103 = arith.addf %102, %101 : vector<8x128xf32>
    %104 = arith.divf %102, %103 : vector<8x128xf32>
    %105 = vector.extract_strided_slice %92 {offsets = [0, 256], sizes = [8, 128], strides = [1, 1]} : vector<8x512xf32> to vector<8x128xf32>
    %106 = math.tanh %105 : vector<8x128xf32>
    %107 = vector.extract_strided_slice %92 {offsets = [0, 384], sizes = [8, 128], strides = [1, 1]} : vector<8x512xf32> to vector<8x128xf32>
    %108 = arith.negf %107 : vector<8x128xf32>
    %109 = math.exp %108 : vector<8x128xf32>
    %cst_49 = arith.constant 1.000000e+00 : f32
    %110 = vector.broadcast %cst_49 : f32 to vector<8x128xf32>
    %111 = arith.addf %110, %109 : vector<8x128xf32>
    %112 = arith.divf %110, %111 : vector<8x128xf32>
    %113 = arith.mulf %104, %49 : vector<8x128xf32>
    %114 = arith.mulf %98, %106 : vector<8x128xf32>
    %115 = arith.addf %113, %114 : vector<8x128xf32>
    %116 = math.tanh %115 : vector<8x128xf32>
    %117 = arith.mulf %112, %116 : vector<8x128xf32>
    %c2_i32 = arith.constant 2 : i32
    %cst_50 = arith.constant dense<0.000000e+00> : vector<8x512xf32>
    %118 = tpu.matmul %117, %10, %cst_50 {dimension_numbers = #tpu.dot_dimension_numbers<[1], [0], [0], [1], [0, 0, 1, 1], [], []>} : vector<8x128xf32>, vector<128x512xf32>, vector<8x512xf32> -> vector<8x512xf32>
    %119 = vector.broadcast %12 : vector<1x512xf32> to vector<8x512xf32>
    %120 = arith.addf %119, %118 : vector<8x512xf32>
    %cst_51 = arith.constant dense<0.000000e+00> : vector<8x512xf32>
    %121 = tpu.matmul %81, %11, %cst_51 {dimension_numbers = #tpu.dot_dimension_numbers<[1], [0], [0], [1], [0, 0, 1, 1], [], []>} : vector<8x128xf32>, vector<128x512xf32>, vector<8x512xf32> -> vector<8x512xf32>
    %122 = arith.addf %120, %121 : vector<8x512xf32>
    %123 = vector.extract_strided_slice %122 {offsets = [0, 0], sizes = [8, 128], strides = [1, 1]} : vector<8x512xf32> to vector<8x128xf32>
    %124 = arith.negf %123 : vector<8x128xf32>
    %125 = math.exp %124 : vector<8x128xf32>
    %cst_52 = arith.constant 1.000000e+00 : f32
    %126 = vector.broadcast %cst_52 : f32 to vector<8x128xf32>
    %127 = arith.addf %126, %125 : vector<8x128xf32>
    %128 = arith.divf %126, %127 : vector<8x128xf32>
    %129 = vector.extract_strided_slice %122 {offsets = [0, 128], sizes = [8, 128], strides = [1, 1]} : vector<8x512xf32> to vector<8x128xf32>
    %130 = arith.negf %129 : vector<8x128xf32>
    %131 = math.exp %130 : vector<8x128xf32>
    %cst_53 = arith.constant 1.000000e+00 : f32
    %132 = vector.broadcast %cst_53 : f32 to vector<8x128xf32>
    %133 = arith.addf %132, %131 : vector<8x128xf32>
    %134 = arith.divf %132, %133 : vector<8x128xf32>
    %135 = vector.extract_strided_slice %122 {offsets = [0, 256], sizes = [8, 128], strides = [1, 1]} : vector<8x512xf32> to vector<8x128xf32>
    %136 = math.tanh %135 : vector<8x128xf32>
    %137 = vector.extract_strided_slice %122 {offsets = [0, 384], sizes = [8, 128], strides = [1, 1]} : vector<8x512xf32> to vector<8x128xf32>
    %138 = arith.negf %137 : vector<8x128xf32>
    %139 = math.exp %138 : vector<8x128xf32>
    %cst_54 = arith.constant 1.000000e+00 : f32
    %140 = vector.broadcast %cst_54 : f32 to vector<8x128xf32>
    %141 = arith.addf %140, %139 : vector<8x128xf32>
    %142 = arith.divf %140, %141 : vector<8x128xf32>
    %143 = arith.mulf %134, %79 : vector<8x128xf32>
    %144 = arith.mulf %128, %136 : vector<8x128xf32>
    %145 = arith.addf %143, %144 : vector<8x128xf32>
    %146 = math.tanh %145 : vector<8x128xf32>
    %147 = arith.mulf %142, %146 : vector<8x128xf32>
    %c1_i32_55 = arith.constant 1 : i32
    %148 = arith.subi %c2_i32, %c1_i32_55 : i32
    %149 = arith.index_cast %148 : i32 to index
    %c0_56 = arith.constant 0 : index
    %c0_57 = arith.constant 0 : index
    %150 = vector.load %arg12[%149, %c0_56, %c0_57] : memref<8x8x128xf32, #tpu.memory_space<vmem>>, vector<1x8x128xf32>
    %151 = vector.shape_cast %150 : vector<1x8x128xf32> to vector<8x128xf32>
    %152 = vector.shape_cast %147 : vector<8x128xf32> to vector<1x8x128xf32>
    tpu.vector_store %arg12[%149, %c0_56, %c0_57], %152 {strides = array<i32>} : memref<8x8x128xf32, #tpu.memory_space<vmem>>, vector<1x8x128xf32>,
    %153 = arith.index_cast %c2_i32 : i32 to index
    %c0_58 = arith.constant 0 : index
    %c0_59 = arith.constant 0 : index
    %154 = vector.load %arg15[%153, %c0_58, %c0_59] : memref<8x8x512xf32, #tpu.memory_space<vmem>>, vector<1x8x512xf32>
    %155 = vector.shape_cast %154 : vector<1x8x512xf32> to vector<8x512xf32>
    %156 = arith.addf %155, %13 : vector<8x512xf32>
    %cst_60 = arith.constant dense<0.000000e+00> : vector<8x512xf32>
    %157 = tpu.matmul %117, %9, %cst_60 {dimension_numbers = #tpu.dot_dimension_numbers<[1], [0], [0], [1], [0, 0, 1, 1], [], []>} : vector<8x128xf32>, vector<128x512xf32>, vector<8x512xf32> -> vector<8x512xf32>
    %158 = arith.addf %156, %157 : vector<8x512xf32>
    %159 = vector.extract_strided_slice %158 {offsets = [0, 0], sizes = [8, 128], strides = [1, 1]} : vector<8x512xf32> to vector<8x128xf32>
    %160 = arith.negf %159 : vector<8x128xf32>
    %161 = math.exp %160 : vector<8x128xf32>
    %cst_61 = arith.constant 1.000000e+00 : f32
    %162 = vector.broadcast %cst_61 : f32 to vector<8x128xf32>
    %163 = arith.addf %162, %161 : vector<8x128xf32>
    %164 = arith.divf %162, %163 : vector<8x128xf32>
    %165 = vector.extract_strided_slice %158 {offsets = [0, 128], sizes = [8, 128], strides = [1, 1]} : vector<8x512xf32> to vector<8x128xf32>
    %166 = arith.negf %165 : vector<8x128xf32>
    %167 = math.exp %166 : vector<8x128xf32>
    %cst_62 = arith.constant 1.000000e+00 : f32
    %168 = vector.broadcast %cst_62 : f32 to vector<8x128xf32>
    %169 = arith.addf %168, %167 : vector<8x128xf32>
    %170 = arith.divf %168, %169 : vector<8x128xf32>
    %171 = vector.extract_strided_slice %158 {offsets = [0, 256], sizes = [8, 128], strides = [1, 1]} : vector<8x512xf32> to vector<8x128xf32>
    %172 = math.tanh %171 : vector<8x128xf32>
    %173 = vector.extract_strided_slice %158 {offsets = [0, 384], sizes = [8, 128], strides = [1, 1]} : vector<8x512xf32> to vector<8x128xf32>
    %174 = arith.negf %173 : vector<8x128xf32>
    %175 = math.exp %174 : vector<8x128xf32>
    %cst_63 = arith.constant 1.000000e+00 : f32
    %176 = vector.broadcast %cst_63 : f32 to vector<8x128xf32>
    %177 = arith.addf %176, %175 : vector<8x128xf32>
    %178 = arith.divf %176, %177 : vector<8x128xf32>
    %179 = arith.mulf %170, %115 : vector<8x128xf32>
    %180 = arith.mulf %164, %172 : vector<8x128xf32>
    %181 = arith.addf %179, %180 : vector<8x128xf32>
    %182 = math.tanh %181 : vector<8x128xf32>
    %183 = arith.mulf %178, %182 : vector<8x128xf32>
    %c3_i32 = arith.constant 3 : i32
    %cst_64 = arith.constant dense<0.000000e+00> : vector<8x512xf32>
    %184 = tpu.matmul %183, %10, %cst_64 {dimension_numbers = #tpu.dot_dimension_numbers<[1], [0], [0], [1], [0, 0, 1, 1], [], []>} : vector<8x128xf32>, vector<128x512xf32>, vector<8x512xf32> -> vector<8x512xf32>
    %185 = vector.broadcast %12 : vector<1x512xf32> to vector<8x512xf32>
    %186 = arith.addf %185, %184 : vector<8x512xf32>
    %cst_65 = arith.constant dense<0.000000e+00> : vector<8x512xf32>
    %187 = tpu.matmul %147, %11, %cst_65 {dimension_numbers = #tpu.dot_dimension_numbers<[1], [0], [0], [1], [0, 0, 1, 1], [], []>} : vector<8x128xf32>, vector<128x512xf32>, vector<8x512xf32> -> vector<8x512xf32>
    %188 = arith.addf %186, %187 : vector<8x512xf32>
    %189 = vector.extract_strided_slice %188 {offsets = [0, 0], sizes = [8, 128], strides = [1, 1]} : vector<8x512xf32> to vector<8x128xf32>
    %190 = arith.negf %189 : vector<8x128xf32>
    %191 = math.exp %190 : vector<8x128xf32>
    %cst_66 = arith.constant 1.000000e+00 : f32
    %192 = vector.broadcast %cst_66 : f32 to vector<8x128xf32>
    %193 = arith.addf %192, %191 : vector<8x128xf32>
    %194 = arith.divf %192, %193 : vector<8x128xf32>
    %195 = vector.extract_strided_slice %188 {offsets = [0, 128], sizes = [8, 128], strides = [1, 1]} : vector<8x512xf32> to vector<8x128xf32>
    %196 = arith.negf %195 : vector<8x128xf32>
    %197 = math.exp %196 : vector<8x128xf32>
    %cst_67 = arith.constant 1.000000e+00 : f32
    %198 = vector.broadcast %cst_67 : f32 to vector<8x128xf32>
    %199 = arith.addf %198, %197 : vector<8x128xf32>
    %200 = arith.divf %198, %199 : vector<8x128xf32>
    %201 = vector.extract_strided_slice %188 {offsets = [0, 256], sizes = [8, 128], strides = [1, 1]} : vector<8x512xf32> to vector<8x128xf32>
    %202 = math.tanh %201 : vector<8x128xf32>
    %203 = vector.extract_strided_slice %188 {offsets = [0, 384], sizes = [8, 128], strides = [1, 1]} : vector<8x512xf32> to vector<8x128xf32>
    %204 = arith.negf %203 : vector<8x128xf32>
    %205 = math.exp %204 : vector<8x128xf32>
    %cst_68 = arith.constant 1.000000e+00 : f32
    %206 = vector.broadcast %cst_68 : f32 to vector<8x128xf32>
    %207 = arith.addf %206, %205 : vector<8x128xf32>
    %208 = arith.divf %206, %207 : vector<8x128xf32>
    %209 = arith.mulf %200, %145 : vector<8x128xf32>
    %210 = arith.mulf %194, %202 : vector<8x128xf32>
    %211 = arith.addf %209, %210 : vector<8x128xf32>
    %212 = math.tanh %211 : vector<8x128xf32>
    %213 = arith.mulf %208, %212 : vector<8x128xf32>
    %c1_i32_69 = arith.constant 1 : i32
    %214 = arith.subi %c3_i32, %c1_i32_69 : i32
    %215 = arith.index_cast %214 : i32 to index
    %c0_70 = arith.constant 0 : index
    %c0_71 = arith.constant 0 : index
    %216 = vector.load %arg12[%215, %c0_70, %c0_71] : memref<8x8x128xf32, #tpu.memory_space<vmem>>, vector<1x8x128xf32>
    %217 = vector.shape_cast %216 : vector<1x8x128xf32> to vector<8x128xf32>
    %218 = vector.shape_cast %213 : vector<8x128xf32> to vector<1x8x128xf32>
    tpu.vector_store %arg12[%215, %c0_70, %c0_71], %218 {strides = array<i32>} : memref<8x8x128xf32, #tpu.memory_space<vmem>>, vector<1x8x128xf32>,
    %219 = arith.index_cast %c3_i32 : i32 to index
    %c0_72 = arith.constant 0 : index
    %c0_73 = arith.constant 0 : index
    %220 = vector.load %arg15[%219, %c0_72, %c0_73] : memref<8x8x512xf32, #tpu.memory_space<vmem>>, vector<1x8x512xf32>
    %221 = vector.shape_cast %220 : vector<1x8x512xf32> to vector<8x512xf32>
    %222 = arith.addf %221, %13 : vector<8x512xf32>
    %cst_74 = arith.constant dense<0.000000e+00> : vector<8x512xf32>
    %223 = tpu.matmul %183, %9, %cst_74 {dimension_numbers = #tpu.dot_dimension_numbers<[1], [0], [0], [1], [0, 0, 1, 1], [], []>} : vector<8x128xf32>, vector<128x512xf32>, vector<8x512xf32> -> vector<8x512xf32>
    %224 = arith.addf %222, %223 : vector<8x512xf32>
    %225 = vector.extract_strided_slice %224 {offsets = [0, 0], sizes = [8, 128], strides = [1, 1]} : vector<8x512xf32> to vector<8x128xf32>
    %226 = arith.negf %225 : vector<8x128xf32>
    %227 = math.exp %226 : vector<8x128xf32>
    %cst_75 = arith.constant 1.000000e+00 : f32
    %228 = vector.broadcast %cst_75 : f32 to vector<8x128xf32>
    %229 = arith.addf %228, %227 : vector<8x128xf32>
    %230 = arith.divf %228, %229 : vector<8x128xf32>
    %231 = vector.extract_strided_slice %224 {offsets = [0, 128], sizes = [8, 128], strides = [1, 1]} : vector<8x512xf32> to vector<8x128xf32>
    %232 = arith.negf %231 : vector<8x128xf32>
    %233 = math.exp %232 : vector<8x128xf32>
    %cst_76 = arith.constant 1.000000e+00 : f32
    %234 = vector.broadcast %cst_76 : f32 to vector<8x128xf32>
    %235 = arith.addf %234, %233 : vector<8x128xf32>
    %236 = arith.divf %234, %235 : vector<8x128xf32>
    %237 = vector.extract_strided_slice %224 {offsets = [0, 256], sizes = [8, 128], strides = [1, 1]} : vector<8x512xf32> to vector<8x128xf32>
    %238 = math.tanh %237 : vector<8x128xf32>
    %239 = vector.extract_strided_slice %224 {offsets = [0, 384], sizes = [8, 128], strides = [1, 1]} : vector<8x512xf32> to vector<8x128xf32>
    %240 = arith.negf %239 : vector<8x128xf32>
    %241 = math.exp %240 : vector<8x128xf32>
    %cst_77 = arith.constant 1.000000e+00 : f32
    %242 = vector.broadcast %cst_77 : f32 to vector<8x128xf32>
    %243 = arith.addf %242, %241 : vector<8x128xf32>
    %244 = arith.divf %242, %243 : vector<8x128xf32>
    %245 = arith.mulf %236, %181 : vector<8x128xf32>
    %246 = arith.mulf %230, %238 : vector<8x128xf32>
    %247 = arith.addf %245, %246 : vector<8x128xf32>
    %248 = math.tanh %247 : vector<8x128xf32>
    %249 = arith.mulf %244, %248 : vector<8x128xf32>
    %c4_i32 = arith.constant 4 : i32
    %cst_78 = arith.constant dense<0.000000e+00> : vector<8x512xf32>
    %250 = tpu.matmul %249, %10, %cst_78 {dimension_numbers = #tpu.dot_dimension_numbers<[1], [0], [0], [1], [0, 0, 1, 1], [], []>} : vector<8x128xf32>, vector<128x512xf32>, vector<8x512xf32> -> vector<8x512xf32>
    %251 = vector.broadcast %12 : vector<1x512xf32> to vector<8x512xf32>
    %252 = arith.addf %251, %250 : vector<8x512xf32>
    %cst_79 = arith.constant dense<0.000000e+00> : vector<8x512xf32>
    %253 = tpu.matmul %213, %11, %cst_79 {dimension_numbers = #tpu.dot_dimension_numbers<[1], [0], [0], [1], [0, 0, 1, 1], [], []>} : vector<8x128xf32>, vector<128x512xf32>, vector<8x512xf32> -> vector<8x512xf32>
    %254 = arith.addf %252, %253 : vector<8x512xf32>
    %255 = vector.extract_strided_slice %254 {offsets = [0, 0], sizes = [8, 128], strides = [1, 1]} : vector<8x512xf32> to vector<8x128xf32>
    %256 = arith.negf %255 : vector<8x128xf32>
    %257 = math.exp %256 : vector<8x128xf32>
    %cst_80 = arith.constant 1.000000e+00 : f32
    %258 = vector.broadcast %cst_80 : f32 to vector<8x128xf32>
    %259 = arith.addf %258, %257 : vector<8x128xf32>
    %260 = arith.divf %258, %259 : vector<8x128xf32>
    %261 = vector.extract_strided_slice %254 {offsets = [0, 128], sizes = [8, 128], strides = [1, 1]} : vector<8x512xf32> to vector<8x128xf32>
    %262 = arith.negf %261 : vector<8x128xf32>
    %263 = math.exp %262 : vector<8x128xf32>
    %cst_81 = arith.constant 1.000000e+00 : f32
    %264 = vector.broadcast %cst_81 : f32 to vector<8x128xf32>
    %265 = arith.addf %264, %263 : vector<8x128xf32>
    %266 = arith.divf %264, %265 : vector<8x128xf32>
    %267 = vector.extract_strided_slice %254 {offsets = [0, 256], sizes = [8, 128], strides = [1, 1]} : vector<8x512xf32> to vector<8x128xf32>
    %268 = math.tanh %267 : vector<8x128xf32>
    %269 = vector.extract_strided_slice %254 {offsets = [0, 384], sizes = [8, 128], strides = [1, 1]} : vector<8x512xf32> to vector<8x128xf32>
    %270 = arith.negf %269 : vector<8x128xf32>
    %271 = math.exp %270 : vector<8x128xf32>
    %cst_82 = arith.constant 1.000000e+00 : f32
    %272 = vector.broadcast %cst_82 : f32 to vector<8x128xf32>
    %273 = arith.addf %272, %271 : vector<8x128xf32>
    %274 = arith.divf %272, %273 : vector<8x128xf32>
    %275 = arith.mulf %266, %211 : vector<8x128xf32>
    %276 = arith.mulf %260, %268 : vector<8x128xf32>
    %277 = arith.addf %275, %276 : vector<8x128xf32>
    %278 = math.tanh %277 : vector<8x128xf32>
    %279 = arith.mulf %274, %278 : vector<8x128xf32>
    %c1_i32_83 = arith.constant 1 : i32
    %280 = arith.subi %c4_i32, %c1_i32_83 : i32
    %281 = arith.index_cast %280 : i32 to index
    %c0_84 = arith.constant 0 : index
    %c0_85 = arith.constant 0 : index
    %282 = vector.load %arg12[%281, %c0_84, %c0_85] : memref<8x8x128xf32, #tpu.memory_space<vmem>>, vector<1x8x128xf32>
    %283 = vector.shape_cast %282 : vector<1x8x128xf32> to vector<8x128xf32>
    %284 = vector.shape_cast %279 : vector<8x128xf32> to vector<1x8x128xf32>
    tpu.vector_store %arg12[%281, %c0_84, %c0_85], %284 {strides = array<i32>} : memref<8x8x128xf32, #tpu.memory_space<vmem>>, vector<1x8x128xf32>,
    %285 = arith.index_cast %c4_i32 : i32 to index
    %c0_86 = arith.constant 0 : index
    %c0_87 = arith.constant 0 : index
    %286 = vector.load %arg15[%285, %c0_86, %c0_87] : memref<8x8x512xf32, #tpu.memory_space<vmem>>, vector<1x8x512xf32>
    %287 = vector.shape_cast %286 : vector<1x8x512xf32> to vector<8x512xf32>
    %288 = arith.addf %287, %13 : vector<8x512xf32>
    %cst_88 = arith.constant dense<0.000000e+00> : vector<8x512xf32>
    %289 = tpu.matmul %249, %9, %cst_88 {dimension_numbers = #tpu.dot_dimension_numbers<[1], [0], [0], [1], [0, 0, 1, 1], [], []>} : vector<8x128xf32>, vector<128x512xf32>, vector<8x512xf32> -> vector<8x512xf32>
    %290 = arith.addf %288, %289 : vector<8x512xf32>
    %291 = vector.extract_strided_slice %290 {offsets = [0, 0], sizes = [8, 128], strides = [1, 1]} : vector<8x512xf32> to vector<8x128xf32>
    %292 = arith.negf %291 : vector<8x128xf32>
    %293 = math.exp %292 : vector<8x128xf32>
    %cst_89 = arith.constant 1.000000e+00 : f32
    %294 = vector.broadcast %cst_89 : f32 to vector<8x128xf32>
    %295 = arith.addf %294, %293 : vector<8x128xf32>
    %296 = arith.divf %294, %295 : vector<8x128xf32>
    %297 = vector.extract_strided_slice %290 {offsets = [0, 128], sizes = [8, 128], strides = [1, 1]} : vector<8x512xf32> to vector<8x128xf32>
    %298 = arith.negf %297 : vector<8x128xf32>
    %299 = math.exp %298 : vector<8x128xf32>
    %cst_90 = arith.constant 1.000000e+00 : f32
    %300 = vector.broadcast %cst_90 : f32 to vector<8x128xf32>
    %301 = arith.addf %300, %299 : vector<8x128xf32>
    %302 = arith.divf %300, %301 : vector<8x128xf32>
    %303 = vector.extract_strided_slice %290 {offsets = [0, 256], sizes = [8, 128], strides = [1, 1]} : vector<8x512xf32> to vector<8x128xf32>
    %304 = math.tanh %303 : vector<8x128xf32>
    %305 = vector.extract_strided_slice %290 {offsets = [0, 384], sizes = [8, 128], strides = [1, 1]} : vector<8x512xf32> to vector<8x128xf32>
    %306 = arith.negf %305 : vector<8x128xf32>
    %307 = math.exp %306 : vector<8x128xf32>
    %cst_91 = arith.constant 1.000000e+00 : f32
    %308 = vector.broadcast %cst_91 : f32 to vector<8x128xf32>
    %309 = arith.addf %308, %307 : vector<8x128xf32>
    %310 = arith.divf %308, %309 : vector<8x128xf32>
    %311 = arith.mulf %302, %247 : vector<8x128xf32>
    %312 = arith.mulf %296, %304 : vector<8x128xf32>
    %313 = arith.addf %311, %312 : vector<8x128xf32>
    %314 = math.tanh %313 : vector<8x128xf32>
    %315 = arith.mulf %310, %314 : vector<8x128xf32>
    %c5_i32 = arith.constant 5 : i32
    %cst_92 = arith.constant dense<0.000000e+00> : vector<8x512xf32>
    %316 = tpu.matmul %315, %10, %cst_92 {dimension_numbers = #tpu.dot_dimension_numbers<[1], [0], [0], [1], [0, 0, 1, 1], [], []>} : vector<8x128xf32>, vector<128x512xf32>, vector<8x512xf32> -> vector<8x512xf32>
    %317 = vector.broadcast %12 : vector<1x512xf32> to vector<8x512xf32>
    %318 = arith.addf %317, %316 : vector<8x512xf32>
    %cst_93 = arith.constant dense<0.000000e+00> : vector<8x512xf32>
    %319 = tpu.matmul %279, %11, %cst_93 {dimension_numbers = #tpu.dot_dimension_numbers<[1], [0], [0], [1], [0, 0, 1, 1], [], []>} : vector<8x128xf32>, vector<128x512xf32>, vector<8x512xf32> -> vector<8x512xf32>
    %320 = arith.addf %318, %319 : vector<8x512xf32>
    %321 = vector.extract_strided_slice %320 {offsets = [0, 0], sizes = [8, 128], strides = [1, 1]} : vector<8x512xf32> to vector<8x128xf32>
    %322 = arith.negf %321 : vector<8x128xf32>
    %323 = math.exp %322 : vector<8x128xf32>
    %cst_94 = arith.constant 1.000000e+00 : f32
    %324 = vector.broadcast %cst_94 : f32 to vector<8x128xf32>
    %325 = arith.addf %324, %323 : vector<8x128xf32>
    %326 = arith.divf %324, %325 : vector<8x128xf32>
    %327 = vector.extract_strided_slice %320 {offsets = [0, 128], sizes = [8, 128], strides = [1, 1]} : vector<8x512xf32> to vector<8x128xf32>
    %328 = arith.negf %327 : vector<8x128xf32>
    %329 = math.exp %328 : vector<8x128xf32>
    %cst_95 = arith.constant 1.000000e+00 : f32
    %330 = vector.broadcast %cst_95 : f32 to vector<8x128xf32>
    %331 = arith.addf %330, %329 : vector<8x128xf32>
    %332 = arith.divf %330, %331 : vector<8x128xf32>
    %333 = vector.extract_strided_slice %320 {offsets = [0, 256], sizes = [8, 128], strides = [1, 1]} : vector<8x512xf32> to vector<8x128xf32>
    %334 = math.tanh %333 : vector<8x128xf32>
    %335 = vector.extract_strided_slice %320 {offsets = [0, 384], sizes = [8, 128], strides = [1, 1]} : vector<8x512xf32> to vector<8x128xf32>
    %336 = arith.negf %335 : vector<8x128xf32>
    %337 = math.exp %336 : vector<8x128xf32>
    %cst_96 = arith.constant 1.000000e+00 : f32
    %338 = vector.broadcast %cst_96 : f32 to vector<8x128xf32>
    %339 = arith.addf %338, %337 : vector<8x128xf32>
    %340 = arith.divf %338, %339 : vector<8x128xf32>
    %341 = arith.mulf %332, %277 : vector<8x128xf32>
    %342 = arith.mulf %326, %334 : vector<8x128xf32>
    %343 = arith.addf %341, %342 : vector<8x128xf32>
    %344 = math.tanh %343 : vector<8x128xf32>
    %345 = arith.mulf %340, %344 : vector<8x128xf32>
    %c1_i32_97 = arith.constant 1 : i32
    %346 = arith.subi %c5_i32, %c1_i32_97 : i32
    %347 = arith.index_cast %346 : i32 to index
    %c0_98 = arith.constant 0 : index
    %c0_99 = arith.constant 0 : index
    %348 = vector.load %arg12[%347, %c0_98, %c0_99] : memref<8x8x128xf32, #tpu.memory_space<vmem>>, vector<1x8x128xf32>
    %349 = vector.shape_cast %348 : vector<1x8x128xf32> to vector<8x128xf32>
    %350 = vector.shape_cast %345 : vector<8x128xf32> to vector<1x8x128xf32>
    tpu.vector_store %arg12[%347, %c0_98, %c0_99], %350 {strides = array<i32>} : memref<8x8x128xf32, #tpu.memory_space<vmem>>, vector<1x8x128xf32>,
    %351 = arith.index_cast %c5_i32 : i32 to index
    %c0_100 = arith.constant 0 : index
    %c0_101 = arith.constant 0 : index
    %352 = vector.load %arg15[%351, %c0_100, %c0_101] : memref<8x8x512xf32, #tpu.memory_space<vmem>>, vector<1x8x512xf32>
    %353 = vector.shape_cast %352 : vector<1x8x512xf32> to vector<8x512xf32>
    %354 = arith.addf %353, %13 : vector<8x512xf32>
    %cst_102 = arith.constant dense<0.000000e+00> : vector<8x512xf32>
    %355 = tpu.matmul %315, %9, %cst_102 {dimension_numbers = #tpu.dot_dimension_numbers<[1], [0], [0], [1], [0, 0, 1, 1], [], []>} : vector<8x128xf32>, vector<128x512xf32>, vector<8x512xf32> -> vector<8x512xf32>
    %356 = arith.addf %354, %355 : vector<8x512xf32>
    %357 = vector.extract_strided_slice %356 {offsets = [0, 0], sizes = [8, 128], strides = [1, 1]} : vector<8x512xf32> to vector<8x128xf32>
    %358 = arith.negf %357 : vector<8x128xf32>
    %359 = math.exp %358 : vector<8x128xf32>
    %cst_103 = arith.constant 1.000000e+00 : f32
    %360 = vector.broadcast %cst_103 : f32 to vector<8x128xf32>
    %361 = arith.addf %360, %359 : vector<8x128xf32>
    %362 = arith.divf %360, %361 : vector<8x128xf32>
    %363 = vector.extract_strided_slice %356 {offsets = [0, 128], sizes = [8, 128], strides = [1, 1]} : vector<8x512xf32> to vector<8x128xf32>
    %364 = arith.negf %363 : vector<8x128xf32>
    %365 = math.exp %364 : vector<8x128xf32>
    %cst_104 = arith.constant 1.000000e+00 : f32
    %366 = vector.broadcast %cst_104 : f32 to vector<8x128xf32>
    %367 = arith.addf %366, %365 : vector<8x128xf32>
    %368 = arith.divf %366, %367 : vector<8x128xf32>
    %369 = vector.extract_strided_slice %356 {offsets = [0, 256], sizes = [8, 128], strides = [1, 1]} : vector<8x512xf32> to vector<8x128xf32>
    %370 = math.tanh %369 : vector<8x128xf32>
    %371 = vector.extract_strided_slice %356 {offsets = [0, 384], sizes = [8, 128], strides = [1, 1]} : vector<8x512xf32> to vector<8x128xf32>
    %372 = arith.negf %371 : vector<8x128xf32>
    %373 = math.exp %372 : vector<8x128xf32>
    %cst_105 = arith.constant 1.000000e+00 : f32
    %374 = vector.broadcast %cst_105 : f32 to vector<8x128xf32>
    %375 = arith.addf %374, %373 : vector<8x128xf32>
    %376 = arith.divf %374, %375 : vector<8x128xf32>
    %377 = arith.mulf %368, %313 : vector<8x128xf32>
    %378 = arith.mulf %362, %370 : vector<8x128xf32>
    %379 = arith.addf %377, %378 : vector<8x128xf32>
    %380 = math.tanh %379 : vector<8x128xf32>
    %381 = arith.mulf %376, %380 : vector<8x128xf32>
    %c6_i32 = arith.constant 6 : i32
    %cst_106 = arith.constant dense<0.000000e+00> : vector<8x512xf32>
    %382 = tpu.matmul %381, %10, %cst_106 {dimension_numbers = #tpu.dot_dimension_numbers<[1], [0], [0], [1], [0, 0, 1, 1], [], []>} : vector<8x128xf32>, vector<128x512xf32>, vector<8x512xf32> -> vector<8x512xf32>
    %383 = vector.broadcast %12 : vector<1x512xf32> to vector<8x512xf32>
    %384 = arith.addf %383, %382 : vector<8x512xf32>
    %cst_107 = arith.constant dense<0.000000e+00> : vector<8x512xf32>
    %385 = tpu.matmul %345, %11, %cst_107 {dimension_numbers = #tpu.dot_dimension_numbers<[1], [0], [0], [1], [0, 0, 1, 1], [], []>} : vector<8x128xf32>, vector<128x512xf32>, vector<8x512xf32> -> vector<8x512xf32>
    %386 = arith.addf %384, %385 : vector<8x512xf32>
    %387 = vector.extract_strided_slice %386 {offsets = [0, 0], sizes = [8, 128], strides = [1, 1]} : vector<8x512xf32> to vector<8x128xf32>
    %388 = arith.negf %387 : vector<8x128xf32>
    %389 = math.exp %388 : vector<8x128xf32>
    %cst_108 = arith.constant 1.000000e+00 : f32
    %390 = vector.broadcast %cst_108 : f32 to vector<8x128xf32>
    %391 = arith.addf %390, %389 : vector<8x128xf32>
    %392 = arith.divf %390, %391 : vector<8x128xf32>
    %393 = vector.extract_strided_slice %386 {offsets = [0, 128], sizes = [8, 128], strides = [1, 1]} : vector<8x512xf32> to vector<8x128xf32>
    %394 = arith.negf %393 : vector<8x128xf32>
    %395 = math.exp %394 : vector<8x128xf32>
    %cst_109 = arith.constant 1.000000e+00 : f32
    %396 = vector.broadcast %cst_109 : f32 to vector<8x128xf32>
    %397 = arith.addf %396, %395 : vector<8x128xf32>
    %398 = arith.divf %396, %397 : vector<8x128xf32>
    %399 = vector.extract_strided_slice %386 {offsets = [0, 256], sizes = [8, 128], strides = [1, 1]} : vector<8x512xf32> to vector<8x128xf32>
    %400 = math.tanh %399 : vector<8x128xf32>
    %401 = vector.extract_strided_slice %386 {offsets = [0, 384], sizes = [8, 128], strides = [1, 1]} : vector<8x512xf32> to vector<8x128xf32>
    %402 = arith.negf %401 : vector<8x128xf32>
    %403 = math.exp %402 : vector<8x128xf32>
    %cst_110 = arith.constant 1.000000e+00 : f32
    %404 = vector.broadcast %cst_110 : f32 to vector<8x128xf32>
    %405 = arith.addf %404, %403 : vector<8x128xf32>
    %406 = arith.divf %404, %405 : vector<8x128xf32>
    %407 = arith.mulf %398, %343 : vector<8x128xf32>
    %408 = arith.mulf %392, %400 : vector<8x128xf32>
    %409 = arith.addf %407, %408 : vector<8x128xf32>
    %410 = math.tanh %409 : vector<8x128xf32>
    %411 = arith.mulf %406, %410 : vector<8x128xf32>
    %c1_i32_111 = arith.constant 1 : i32
    %412 = arith.subi %c6_i32, %c1_i32_111 : i32
    %413 = arith.index_cast %412 : i32 to index
    %c0_112 = arith.constant 0 : index
    %c0_113 = arith.constant 0 : index
    %414 = vector.load %arg12[%413, %c0_112, %c0_113] : memref<8x8x128xf32, #tpu.memory_space<vmem>>, vector<1x8x128xf32>
    %415 = vector.shape_cast %414 : vector<1x8x128xf32> to vector<8x128xf32>
    %416 = vector.shape_cast %411 : vector<8x128xf32> to vector<1x8x128xf32>
    tpu.vector_store %arg12[%413, %c0_112, %c0_113], %416 {strides = array<i32>} : memref<8x8x128xf32, #tpu.memory_space<vmem>>, vector<1x8x128xf32>,
    %417 = arith.index_cast %c6_i32 : i32 to index
    %c0_114 = arith.constant 0 : index
    %c0_115 = arith.constant 0 : index
    %418 = vector.load %arg15[%417, %c0_114, %c0_115] : memref<8x8x512xf32, #tpu.memory_space<vmem>>, vector<1x8x512xf32>
    %419 = vector.shape_cast %418 : vector<1x8x512xf32> to vector<8x512xf32>
    %420 = arith.addf %419, %13 : vector<8x512xf32>
    %cst_116 = arith.constant dense<0.000000e+00> : vector<8x512xf32>
    %421 = tpu.matmul %381, %9, %cst_116 {dimension_numbers = #tpu.dot_dimension_numbers<[1], [0], [0], [1], [0, 0, 1, 1], [], []>} : vector<8x128xf32>, vector<128x512xf32>, vector<8x512xf32> -> vector<8x512xf32>
    %422 = arith.addf %420, %421 : vector<8x512xf32>
    %423 = vector.extract_strided_slice %422 {offsets = [0, 0], sizes = [8, 128], strides = [1, 1]} : vector<8x512xf32> to vector<8x128xf32>
    %424 = arith.negf %423 : vector<8x128xf32>
    %425 = math.exp %424 : vector<8x128xf32>
    %cst_117 = arith.constant 1.000000e+00 : f32
    %426 = vector.broadcast %cst_117 : f32 to vector<8x128xf32>
    %427 = arith.addf %426, %425 : vector<8x128xf32>
    %428 = arith.divf %426, %427 : vector<8x128xf32>
    %429 = vector.extract_strided_slice %422 {offsets = [0, 128], sizes = [8, 128], strides = [1, 1]} : vector<8x512xf32> to vector<8x128xf32>
    %430 = arith.negf %429 : vector<8x128xf32>
    %431 = math.exp %430 : vector<8x128xf32>
    %cst_118 = arith.constant 1.000000e+00 : f32
    %432 = vector.broadcast %cst_118 : f32 to vector<8x128xf32>
    %433 = arith.addf %432, %431 : vector<8x128xf32>
    %434 = arith.divf %432, %433 : vector<8x128xf32>
    %435 = vector.extract_strided_slice %422 {offsets = [0, 256], sizes = [8, 128], strides = [1, 1]} : vector<8x512xf32> to vector<8x128xf32>
    %436 = math.tanh %435 : vector<8x128xf32>
    %437 = vector.extract_strided_slice %422 {offsets = [0, 384], sizes = [8, 128], strides = [1, 1]} : vector<8x512xf32> to vector<8x128xf32>
    %438 = arith.negf %437 : vector<8x128xf32>
    %439 = math.exp %438 : vector<8x128xf32>
    %cst_119 = arith.constant 1.000000e+00 : f32
    %440 = vector.broadcast %cst_119 : f32 to vector<8x128xf32>
    %441 = arith.addf %440, %439 : vector<8x128xf32>
    %442 = arith.divf %440, %441 : vector<8x128xf32>
    %443 = arith.mulf %434, %379 : vector<8x128xf32>
    %444 = arith.mulf %428, %436 : vector<8x128xf32>
    %445 = arith.addf %443, %444 : vector<8x128xf32>
    %446 = math.tanh %445 : vector<8x128xf32>
    %447 = arith.mulf %442, %446 : vector<8x128xf32>
    %c7_i32 = arith.constant 7 : i32
    %cst_120 = arith.constant dense<0.000000e+00> : vector<8x512xf32>
    %448 = tpu.matmul %447, %10, %cst_120 {dimension_numbers = #tpu.dot_dimension_numbers<[1], [0], [0], [1], [0, 0, 1, 1], [], []>} : vector<8x128xf32>, vector<128x512xf32>, vector<8x512xf32> -> vector<8x512xf32>
    %449 = vector.broadcast %12 : vector<1x512xf32> to vector<8x512xf32>
    %450 = arith.addf %449, %448 : vector<8x512xf32>
    %cst_121 = arith.constant dense<0.000000e+00> : vector<8x512xf32>
    %451 = tpu.matmul %411, %11, %cst_121 {dimension_numbers = #tpu.dot_dimension_numbers<[1], [0], [0], [1], [0, 0, 1, 1], [], []>} : vector<8x128xf32>, vector<128x512xf32>, vector<8x512xf32> -> vector<8x512xf32>
    %452 = arith.addf %450, %451 : vector<8x512xf32>
    %453 = vector.extract_strided_slice %452 {offsets = [0, 0], sizes = [8, 128], strides = [1, 1]} : vector<8x512xf32> to vector<8x128xf32>
    %454 = arith.negf %453 : vector<8x128xf32>
    %455 = math.exp %454 : vector<8x128xf32>
    %cst_122 = arith.constant 1.000000e+00 : f32
    %456 = vector.broadcast %cst_122 : f32 to vector<8x128xf32>
    %457 = arith.addf %456, %455 : vector<8x128xf32>
    %458 = arith.divf %456, %457 : vector<8x128xf32>
    %459 = vector.extract_strided_slice %452 {offsets = [0, 128], sizes = [8, 128], strides = [1, 1]} : vector<8x512xf32> to vector<8x128xf32>
    %460 = arith.negf %459 : vector<8x128xf32>
    %461 = math.exp %460 : vector<8x128xf32>
    %cst_123 = arith.constant 1.000000e+00 : f32
    %462 = vector.broadcast %cst_123 : f32 to vector<8x128xf32>
    %463 = arith.addf %462, %461 : vector<8x128xf32>
    %464 = arith.divf %462, %463 : vector<8x128xf32>
    %465 = vector.extract_strided_slice %452 {offsets = [0, 256], sizes = [8, 128], strides = [1, 1]} : vector<8x512xf32> to vector<8x128xf32>
    %466 = math.tanh %465 : vector<8x128xf32>
    %467 = vector.extract_strided_slice %452 {offsets = [0, 384], sizes = [8, 128], strides = [1, 1]} : vector<8x512xf32> to vector<8x128xf32>
    %468 = arith.negf %467 : vector<8x128xf32>
    %469 = math.exp %468 : vector<8x128xf32>
    %cst_124 = arith.constant 1.000000e+00 : f32
    %470 = vector.broadcast %cst_124 : f32 to vector<8x128xf32>
    %471 = arith.addf %470, %469 : vector<8x128xf32>
    %472 = arith.divf %470, %471 : vector<8x128xf32>
    %473 = arith.mulf %464, %409 : vector<8x128xf32>
    %474 = arith.mulf %458, %466 : vector<8x128xf32>
    %475 = arith.addf %473, %474 : vector<8x128xf32>
    %476 = math.tanh %475 : vector<8x128xf32>
    %477 = arith.mulf %472, %476 : vector<8x128xf32>
    %c1_i32_125 = arith.constant 1 : i32
    %478 = arith.subi %c7_i32, %c1_i32_125 : i32
    %479 = arith.index_cast %478 : i32 to index
    %c0_126 = arith.constant 0 : index
    %c0_127 = arith.constant 0 : index
    %480 = vector.load %arg12[%479, %c0_126, %c0_127] : memref<8x8x128xf32, #tpu.memory_space<vmem>>, vector<1x8x128xf32>
    %481 = vector.shape_cast %480 : vector<1x8x128xf32> to vector<8x128xf32>
    %482 = vector.shape_cast %477 : vector<8x128xf32> to vector<1x8x128xf32>
    tpu.vector_store %arg12[%479, %c0_126, %c0_127], %482 {strides = array<i32>} : memref<8x8x128xf32, #tpu.memory_space<vmem>>, vector<1x8x128xf32>,
    %483 = arith.index_cast %c7_i32 : i32 to index
    %c0_128 = arith.constant 0 : index
    %c0_129 = arith.constant 0 : index
    %484 = vector.load %arg15[%483, %c0_128, %c0_129] : memref<8x8x512xf32, #tpu.memory_space<vmem>>, vector<1x8x512xf32>
    %485 = vector.shape_cast %484 : vector<1x8x512xf32> to vector<8x512xf32>
    %486 = arith.addf %485, %13 : vector<8x512xf32>
    %cst_130 = arith.constant dense<0.000000e+00> : vector<8x512xf32>
    %487 = tpu.matmul %447, %9, %cst_130 {dimension_numbers = #tpu.dot_dimension_numbers<[1], [0], [0], [1], [0, 0, 1, 1], [], []>} : vector<8x128xf32>, vector<128x512xf32>, vector<8x512xf32> -> vector<8x512xf32>
    %488 = arith.addf %486, %487 : vector<8x512xf32>
    %489 = vector.extract_strided_slice %488 {offsets = [0, 0], sizes = [8, 128], strides = [1, 1]} : vector<8x512xf32> to vector<8x128xf32>
    %490 = arith.negf %489 : vector<8x128xf32>
    %491 = math.exp %490 : vector<8x128xf32>
    %cst_131 = arith.constant 1.000000e+00 : f32
    %492 = vector.broadcast %cst_131 : f32 to vector<8x128xf32>
    %493 = arith.addf %492, %491 : vector<8x128xf32>
    %494 = arith.divf %492, %493 : vector<8x128xf32>
    %495 = vector.extract_strided_slice %488 {offsets = [0, 128], sizes = [8, 128], strides = [1, 1]} : vector<8x512xf32> to vector<8x128xf32>
    %496 = arith.negf %495 : vector<8x128xf32>
    %497 = math.exp %496 : vector<8x128xf32>
    %cst_132 = arith.constant 1.000000e+00 : f32
    %498 = vector.broadcast %cst_132 : f32 to vector<8x128xf32>
    %499 = arith.addf %498, %497 : vector<8x128xf32>
    %500 = arith.divf %498, %499 : vector<8x128xf32>
    %501 = vector.extract_strided_slice %488 {offsets = [0, 256], sizes = [8, 128], strides = [1, 1]} : vector<8x512xf32> to vector<8x128xf32>
    %502 = math.tanh %501 : vector<8x128xf32>
    %503 = vector.extract_strided_slice %488 {offsets = [0, 384], sizes = [8, 128], strides = [1, 1]} : vector<8x512xf32> to vector<8x128xf32>
    %504 = arith.negf %503 : vector<8x128xf32>
    %505 = math.exp %504 : vector<8x128xf32>
    %cst_133 = arith.constant 1.000000e+00 : f32
    %506 = vector.broadcast %cst_133 : f32 to vector<8x128xf32>
    %507 = arith.addf %506, %505 : vector<8x128xf32>
    %508 = arith.divf %506, %507 : vector<8x128xf32>
    %509 = arith.mulf %500, %445 : vector<8x128xf32>
    %510 = arith.mulf %494, %502 : vector<8x128xf32>
    %511 = arith.addf %509, %510 : vector<8x128xf32>
    %512 = math.tanh %511 : vector<8x128xf32>
    %513 = arith.mulf %508, %512 : vector<8x128xf32>
    %c7_i32_134 = arith.constant 7 : i32
    %cst_135 = arith.constant dense<0.000000e+00> : vector<8x512xf32>
    %514 = tpu.matmul %513, %10, %cst_135 {dimension_numbers = #tpu.dot_dimension_numbers<[1], [0], [0], [1], [0, 0, 1, 1], [], []>} : vector<8x128xf32>, vector<128x512xf32>, vector<8x512xf32> -> vector<8x512xf32>
    %515 = vector.broadcast %12 : vector<1x512xf32> to vector<8x512xf32>
    %516 = arith.addf %515, %514 : vector<8x512xf32>
    %cst_136 = arith.constant dense<0.000000e+00> : vector<8x512xf32>
    %517 = tpu.matmul %477, %11, %cst_136 {dimension_numbers = #tpu.dot_dimension_numbers<[1], [0], [0], [1], [0, 0, 1, 1], [], []>} : vector<8x128xf32>, vector<128x512xf32>, vector<8x512xf32> -> vector<8x512xf32>
    %518 = arith.addf %516, %517 : vector<8x512xf32>
    %519 = vector.extract_strided_slice %518 {offsets = [0, 0], sizes = [8, 128], strides = [1, 1]} : vector<8x512xf32> to vector<8x128xf32>
    %520 = arith.negf %519 : vector<8x128xf32>
    %521 = math.exp %520 : vector<8x128xf32>
    %cst_137 = arith.constant 1.000000e+00 : f32
    %522 = vector.broadcast %cst_137 : f32 to vector<8x128xf32>
    %523 = arith.addf %522, %521 : vector<8x128xf32>
    %524 = arith.divf %522, %523 : vector<8x128xf32>
    %525 = vector.extract_strided_slice %518 {offsets = [0, 128], sizes = [8, 128], strides = [1, 1]} : vector<8x512xf32> to vector<8x128xf32>
    %526 = arith.negf %525 : vector<8x128xf32>
    %527 = math.exp %526 : vector<8x128xf32>
    %cst_138 = arith.constant 1.000000e+00 : f32
    %528 = vector.broadcast %cst_138 : f32 to vector<8x128xf32>
    %529 = arith.addf %528, %527 : vector<8x128xf32>
    %530 = arith.divf %528, %529 : vector<8x128xf32>
    %531 = vector.extract_strided_slice %518 {offsets = [0, 256], sizes = [8, 128], strides = [1, 1]} : vector<8x512xf32> to vector<8x128xf32>
    %532 = math.tanh %531 : vector<8x128xf32>
    %533 = vector.extract_strided_slice %518 {offsets = [0, 384], sizes = [8, 128], strides = [1, 1]} : vector<8x512xf32> to vector<8x128xf32>
    %534 = arith.negf %533 : vector<8x128xf32>
    %535 = math.exp %534 : vector<8x128xf32>
    %cst_139 = arith.constant 1.000000e+00 : f32
    %536 = vector.broadcast %cst_139 : f32 to vector<8x128xf32>
    %537 = arith.addf %536, %535 : vector<8x128xf32>
    %538 = arith.divf %536, %537 : vector<8x128xf32>
    %539 = arith.mulf %530, %475 : vector<8x128xf32>
    %540 = arith.mulf %524, %532 : vector<8x128xf32>
    %541 = arith.addf %539, %540 : vector<8x128xf32>
    %542 = math.tanh %541 : vector<8x128xf32>
    %543 = arith.mulf %538, %542 : vector<8x128xf32>
    %c7 = arith.constant 7 : index
    %c0_140 = arith.constant 0 : index
    %c0_141 = arith.constant 0 : index
    %544 = vector.load %arg12[%c7, %c0_140, %c0_141] : memref<8x8x128xf32, #tpu.memory_space<vmem>>, vector<1x8x128xf32>
    %545 = vector.shape_cast %544 : vector<1x8x128xf32> to vector<8x128xf32>
    %546 = vector.shape_cast %543 : vector<8x128xf32> to vector<1x8x128xf32>
    tpu.vector_store %arg12[%c7, %c0_140, %c0_141], %546 {strides = array<i32>} : memref<8x8x128xf32, #tpu.memory_space<vmem>>, vector<1x8x128xf32>,
    %c0_142 = arith.constant 0 : index
    %c0_143 = arith.constant 0 : index
    %c0_144 = arith.constant 0 : index
    %547 = vector.load %arg13[%c0_142, %c0_143, %c0_144] : memref<2x8x128xf32, #tpu.memory_space<vmem>>, vector<1x8x128xf32>
    %548 = vector.shape_cast %547 : vector<1x8x128xf32> to vector<8x128xf32>
    %549 = vector.shape_cast %513 : vector<8x128xf32> to vector<1x8x128xf32>
    tpu.vector_store %arg13[%c0_142, %c0_143, %c0_144], %549 {strides = array<i32>} : memref<2x8x128xf32, #tpu.memory_space<vmem>>, vector<1x8x128xf32>,
    %c1_145 = arith.constant 1 : index
    %c0_146 = arith.constant 0 : index
    %c0_147 = arith.constant 0 : index
    %550 = vector.load %arg13[%c1_145, %c0_146, %c0_147] : memref<2x8x128xf32, #tpu.memory_space<vmem>>, vector<1x8x128xf32>
    %551 = vector.shape_cast %550 : vector<1x8x128xf32> to vector<8x128xf32>
    %552 = vector.shape_cast %543 : vector<8x128xf32> to vector<1x8x128xf32>
    tpu.vector_store %arg13[%c1_145, %c0_146, %c0_147], %552 {strides = array<i32>} : memref<2x8x128xf32, #tpu.memory_space<vmem>>, vector<1x8x128xf32>,
    %c0_148 = arith.constant 0 : index
    %c0_149 = arith.constant 0 : index
    %c0_150 = arith.constant 0 : index
    %553 = vector.load %arg14[%c0_148, %c0_149, %c0_150] : memref<2x8x128xf32, #tpu.memory_space<vmem>>, vector<1x8x128xf32>
    %554 = vector.shape_cast %553 : vector<1x8x128xf32> to vector<8x128xf32>
    %555 = vector.shape_cast %511 : vector<8x128xf32> to vector<1x8x128xf32>
    tpu.vector_store %arg14[%c0_148, %c0_149, %c0_150], %555 {strides = array<i32>} : memref<2x8x128xf32, #tpu.memory_space<vmem>>, vector<1x8x128xf32>,
    %c1_151 = arith.constant 1 : index
    %c0_152 = arith.constant 0 : index
    %c0_153 = arith.constant 0 : index
    %556 = vector.load %arg14[%c1_151, %c0_152, %c0_153] : memref<2x8x128xf32, #tpu.memory_space<vmem>>, vector<1x8x128xf32>
    %557 = vector.shape_cast %556 : vector<1x8x128xf32> to vector<8x128xf32>
    %558 = vector.shape_cast %541 : vector<8x128xf32> to vector<1x8x128xf32>
    tpu.vector_store %arg14[%c1_151, %c0_152, %c0_153], %558 {strides = array<i32>} : memref<2x8x128xf32, #tpu.memory_space<vmem>>, vector<1x8x128xf32>,
    return
  }
  func.func @transform_0(%arg0: i32) -> (i32, i32, i32) {
    %c0_i32 = arith.constant 0 : i32
    %c0_i32_0 = arith.constant 0 : i32
    %c0_i32_1 = arith.constant 0 : i32
    return %arg0, %c0_i32, %c0_i32_0 : i32, i32, i32
  }
  func.func @transform_1(%arg0: i32) -> (i32, i32) {
    %c0_i32 = arith.constant 0 : i32
    %c0_i32_0 = arith.constant 0 : i32
    %c0_i32_1 = arith.constant 0 : i32
    return %c0_i32, %c0_i32_0 : i32, i32
  }
  func.func @transform_2(%arg0: i32) -> (i32, i32, i32) {
    %c0_i32 = arith.constant 0 : i32
    %c0_i32_0 = arith.constant 0 : i32
    %c0_i32_1 = arith.constant 0 : i32
    %c0_i32_2 = arith.constant 0 : i32
    return %c0_i32, %c0_i32_0, %c0_i32_1 : i32, i32, i32
  }
  func.func @transform_3(%arg0: i32) -> (i32, i32, i32) {
    %c0_i32 = arith.constant 0 : i32
    %c0_i32_0 = arith.constant 0 : i32
    %c0_i32_1 = arith.constant 0 : i32
    %c0_i32_2 = arith.constant 0 : i32
    return %c0_i32, %c0_i32_0, %c0_i32_1 : i32, i32, i32
  }
  func.func @transform_4(%arg0: i32) -> (i32, i32) {
    %c0_i32 = arith.constant 0 : i32
    %c0_i32_0 = arith.constant 0 : i32
    %c0_i32_1 = arith.constant 0 : i32
    return %c0_i32, %c0_i32_0 : i32, i32
  }
  func.func @transform_5(%arg0: i32) -> (i32, i32) {
    %c0_i32 = arith.constant 0 : i32
    %c0_i32_0 = arith.constant 0 : i32
    %c0_i32_1 = arith.constant 0 : i32
    return %c0_i32, %c0_i32_0 : i32, i32
  }
  func.func @transform_6(%arg0: i32) -> (i32, i32) {
    %c0_i32 = arith.constant 0 : i32
    %c0_i32_0 = arith.constant 0 : i32
    %c0_i32_1 = arith.constant 0 : i32
    return %c0_i32, %c0_i32_0 : i32, i32
  }
  func.func @transform_7(%arg0: i32) -> (i32, i32) {
    %c0_i32 = arith.constant 0 : i32
    %c0_i32_0 = arith.constant 0 : i32
    %c0_i32_1 = arith.constant 0 : i32
    return %c0_i32, %c0_i32_0 : i32, i32
  }
  func.func @transform_8(%arg0: i32) -> (i32, i32) {
    %c0_i32 = arith.constant 0 : i32
    %c0_i32_0 = arith.constant 0 : i32
    %c0_i32_1 = arith.constant 0 : i32
    return %c0_i32, %c0_i32_0 : i32, i32
  }
  func.func @transform_9(%arg0: i32) -> (i32, i32) {
    %c0_i32 = arith.constant 0 : i32
    %c0_i32_0 = arith.constant 0 : i32
    %c0_i32_1 = arith.constant 0 : i32
    return %c0_i32, %c0_i32_0 : i32, i32
  }
  func.func @transform_10(%arg0: i32) -> (i32, i32) {
    %c0_i32 = arith.constant 0 : i32
    %c0_i32_0 = arith.constant 0 : i32
    %c0_i32_1 = arith.constant 0 : i32
    return %c0_i32, %c0_i32_0 : i32, i32
  }
  func.func @transform_11(%arg0: i32) -> (i32, i32, i32) {
    %c0_i32 = arith.constant 0 : i32
    %c0_i32_0 = arith.constant 0 : i32
    %c0_i32_1 = arith.constant 0 : i32
    return %arg0, %c0_i32, %c0_i32_0 : i32, i32, i32
  }
  func.func @transform_12(%arg0: i32) -> (i32, i32, i32) {
    %c0_i32 = arith.constant 0 : i32
    %c0_i32_0 = arith.constant 0 : i32
    %c0_i32_1 = arith.constant 0 : i32
    %c0_i32_2 = arith.constant 0 : i32
    return %c0_i32, %c0_i32_0, %c0_i32_1 : i32, i32, i32
  }
  func.func @transform_13(%arg0: i32) -> (i32, i32, i32) {
    %c0_i32 = arith.constant 0 : i32
    %c0_i32_0 = arith.constant 0 : i32
    %c0_i32_1 = arith.constant 0 : i32
    %c0_i32_2 = arith.constant 0 : i32
    return %c0_i32, %c0_i32_0, %c0_i32_1 : i32, i32, i32
  }
}

</mosaic_0001>

<bundles_post_ra>
// kernel: tpu_custom_call.1
= control target key start
LH: loop header
LB: loop body
LE: loop exit
PB: predicated region body
PF: predicated region fallthrough
CT: control target
= control target key end

     0   :  { %s10759_s0 = inlined_call_operand.hbm [shape: f32[16,8,32], index: 0, kind: input, shape index: {}]   ;;  %s10760_s1 = inlined_call_operand.hbm [shape: f32[8,32], index: 1, kind: input, shape index: {}]   ;;  %s10761_s2 = inlined_call_operand.hbm [shape: f32[2,8,128], index: 2, kind: input, shape index: {}]   ;;  %s10762_s3 = inlined_call_operand.hbm [shape: f32[2,8,128], index: 3, kind: input, shape index: {}]   ;;  %s10763_s4 = inlined_call_operand.hbm [shape: f32[32,512], index: 4, kind: input, shape index: {}]   ;;  %s10764_s5 = inlined_call_operand.hbm [shape: f32[32,512], index: 5, kind: input, shape index: {}]   ;;  %s10765_s6 = inlined_call_operand.hbm [shape: f32[128,512], index: 6, kind: input, shape index: {}]   ;;  %s10766_s7 = inlined_call_operand.vmem [shape: f32[1,512], index: 7, kind: input, shape index: {}]   ;;  %s10767_s8 = inlined_call_operand.hbm [shape: f32[128,512], index: 8, kind: input, shape index: {}]   ;;  %s10768_s9 = inlined_call_operand.hbm [shape: f32[128,512], index: 9, kind: input, shape index: {}]   ;;  %s10769_s10 = inlined_call_operand.vmem [shape: f32[1,512], index: 10, kind: input, shape index: {}]   ;;  %s10770_s11 = inlined_call_operand.hbm [shape: f32[16,8,128], index: 11, kind: output, shape index: {0}]   ;;  %s10771_s12 = inlined_call_operand.hbm [shape: f32[2,8,128], index: 12, kind: output, shape index: {1}]   ;;  %s10772_s13 = inlined_call_operand.hbm [shape: f32[2,8,128], index: 13, kind: output, shape index: {2}]  }
   0x1   :  { %11319 = sst [smem:[#allocation190_spill]] %s10760_s1 }
   0x2   :  { %11320 = sst [smem:[#allocation191_spill]] %s10761_s2 }
   0x3   :  { %11321 = sst [smem:[#allocation192_spill]] %s10762_s3 }
   0x4   :  { %11322 = sst [smem:[#allocation193_spill]] %s10763_s4 }
   0x5   :  { %11323 = sst [smem:[#allocation194_spill]] %s10764_s5 }
   0x6   :  { %11324 = sst [smem:[#allocation195_spill]] %s10765_s6 }
   0x7   :  { %11325 = sst [smem:[#allocation196_spill]] %s10767_s8 }
   0x8   :  { %11326 = sst [smem:[#allocation197_spill]] %s10768_s9 }
   0x9   :  { %19 = vsyncpa [#allocation5], 0 }
   0xa   :  { %21 = vsyncpa [#allocation5 + $0x1], 0 }
   0xb   :  { %22 = vsyncpa [#allocation8], 0 }
   0xc   :  { %23 = vsyncpa [#allocation11], 0 }
   0xd   :  { %24 = vsyncpa [#allocation14], 0 }
   0xe   :  { %25 = vsyncpa [#allocation17], 0 }
   0xf   :  { %26 = vsyncpa [#allocation6], 0 }
  0x10   :  { %28 = vsyncpa [#allocation6 + $0x1], 0 }
  0x11   :  { %29 = vsyncpa [#allocation21], 0  ;;  %s7062_s25 = smov 0   ;;  %s7064_s26 = smov 0  }
  0x12   :  { %s7066_s27 = smov 0   ;;  %s7068_s28 = smov 0  }
  0x13 LB: > { %s6972_s29 = smov [#allocation7]   ;;  %s7083_s14 = sadd.s32 4294967295, %s6970_s28   ;;  %s6970_s28 = sphi %s7068_s28, %s12488_s28   ;;  %s6966_s27 = sphi %s7066_s27, %s12487_s27   ;;  %s6962_s26 = sphi %s7064_s26, %s12486_s26   ;;  %s6958_s25 = sphi %s7062_s25, %s12485_s25  }
  0x14   : > { %s357_s30 = sshll.u32 %s6972_s29, 4  ;;  %p5492_p0 = scmp.ge.s32.totalorder %s6970_s28, 1  ;;  %s358_s30 = int_to_ptr.vmem [resolvable:$true] %s357_s30 }
  0x15   : > { %p10773_p1 = scmp.eq.s32.totalorder %s7083_s14, 0  ;;  %p344_p2 = scmp.lt.s32.totalorder %s6970_s28, 3 }
  0x16   : > { %s6973_s16 = smov [#allocation10]   ;;  %s6974_s19 = smov [#allocation13]  }
  0x17   : > { %p7089_p4 = pnand %p5492_p0, %p344_p2  ;;  %s380_s17 = sshll.u32 %s6973_s16, 4  ;;  %s381_s17 = int_to_ptr.vmem [resolvable:$true] %s380_s17 }
  0x18   : > { %s406_s20 = sshll.u32 %s6974_s19, 4  ;;  %s6613_s22 = scalar_lea.vmem %s358_s30, 128  ;;  %s407_s20 = int_to_ptr.vmem [resolvable:$true] %s406_s20 }
  0x19   : > { %s11327_s15 = scalar_select %p7089_p4, 1, 0 }
  0x1a   : > { %p5645_p6 = pneg %p7089_p4  ;;  %p6614_p9 = scmp.ne.s32.totalorder %s358_s30, %s6613_s22 }
  0x1b   : > { %p6621_p12 = scmp.lt.s32.totalorder %s358_s30, %s358_s30  ;;  %p6622_p13 = scmp.lt.s32.totalorder %s6613_s22, %s6613_s22 }
  0x1c   : > { %p7098_p7 = pnand %p5645_p6, %p10773_p1 }
  0x1d   : > { %p6623_p0 = por %p6622_p13, %p6621_p12 }
  0x1e   : > { %p7104_p8 = pneg %p7098_p7 }
  0x20   : > { %p6616_p10 = pnand %p6614_p9, %p7104_p8 }
  0x22   : > { %p6617_p11 = pneg %p6616_p10 }
  0x24   : > { %p6624_p2 = pnand %p6623_p0, %p6617_p11 }
  0x26   : > { %6627 = shalt.err (!%p6624_p2)
}
  0x27   : > { %s11330_s1 = sld [smem:[#allocation190_spill]]  ;;  %s6639_s29 = scalar_lea.vmem %s381_s17, 256 }
  0x28   : > { %p6640_p6 = scmp.ne.s32.totalorder %s381_s17, %s6639_s29  ;;  %p6647_p1 = scmp.lt.s32.totalorder %s381_s17, %s381_s17 }
  0x29   : > { %p6648_p9 = scmp.lt.s32.totalorder %s6639_s29, %s6639_s29 }
  0x2a   : > { %p6642_p5 = pnand %p6640_p6, %p7104_p8 }
  0x2b   : > { %p6649_p10 = por %p6648_p9, %p6647_p1 }
  0x2c   : > { %p6643_p3 = pneg %p6642_p5 }
  0x2d   : > { %5648 = dma.hbm_to_vmem [thread:$0]  (!%p7098_p7), %s11330_s1, 128, %s358_s30, [#allocation8]  }
  0x2e   : > { %p6650_p4 = pnand %p6649_p10, %p6643_p3 }
  0x30   : > { %6653 = shalt.err (!%p6650_p4)
}
  0x31   : > { %s10775_s16 = smov 128   ;;  %s10777_s19 = smov 8  }
  0x32   : > { %s11331_s3 = sld [smem:[#allocation192_spill]]  ;;  %s6665_s23 = scalar_lea.vmem %s407_s20, 2048 }
  0x33   : > { %p6666_p5 = scmp.ne.s32.totalorder %s407_s20, %s6665_s23  ;;  %p6673_p3 = scmp.lt.s32.totalorder %s407_s20, %s407_s20 }
  0x34   : > { %p6674_p4 = scmp.lt.s32.totalorder %s6665_s23, %s6665_s23 }
  0x35   : > { %p6668_p11 = pnand %p6666_p5, %p7104_p8 }
  0x36   : > { %p6675_p12 = por %p6674_p4, %p6673_p3 }
  0x37   : > { %p6669_p1 = pneg %p6668_p11 }
  0x38   : > { %5654 = dma.hbm_to_vmem [thread:$0]  (!%p7098_p7), %s11331_s3, 256, %s381_s17, [#allocation11], %s10775_s16, %s10775_s16, %s10777_s19  }
  0x39   : > { %p6676_p13 = pnand %p6675_p12, %p6669_p1 }
  0x3b   : > { %6679 = shalt.err (!%p6676_p13)
}
  0x3c   : > { %s10779_s24 = smov 512   ;;  %s10781_s29 = smov 32  }
  0x3d   : > { %s11332_s5 = sld [smem:[#allocation194_spill]]  ;;  %s6979_s30 = smov [#allocation16]  }
  0x3e   : > { %s435_s16 = sshll.u32 %s6979_s30, 4  ;;  %s6980_s19 = smov [#allocation9]   ;;  %s436_s16 = int_to_ptr.vmem [resolvable:$true] %s435_s16 }
  0x3f   : > { %s367_s23 = sshll.u32 %s6980_s19, 4  ;;  %s6691_s1 = scalar_lea.vmem %s436_s16, 8192  ;;  %s368_s23 = int_to_ptr.vmem [resolvable:$true] %s367_s23 }
  0x40   : > { %p6692_p0 = scmp.ne.s32.totalorder %s436_s16, %s6691_s1  ;;  %p6699_p9 = scmp.lt.s32.totalorder %s436_s16, %s436_s16 }
  0x41   : > { %p6700_p10 = scmp.lt.s32.totalorder %s6691_s1, %s6691_s1 }
  0x42   : > { %p6694_p2 = pnand %p6692_p0, %p7104_p8 }
  0x43   : > { %5660 = dma.hbm_to_vmem [thread:$0]  (!%p7098_p7), %s11332_s5, 2048, %s407_s20, [#allocation14], %s10779_s24, %s10779_s24, %s10781_s29  }
  0x44   : > { %p6695_p6 = pneg %p6694_p2  ;;  %p6701_p5 = por %p6700_p10, %p6699_p9 }
  0x46   : > { %p6702_p11 = pnand %p6701_p5, %p6695_p6 }
  0x48   : > { %6705 = shalt.err (!%p6702_p11)
}
  0x49   : > { %s11333_s8 = sld [smem:[#allocation196_spill]]  ;;  %s6717_s19 = scalar_lea.vmem %s368_s23, 256 }
  0x4a   : > { %p6718_p1 = scmp.ne.s32.totalorder %s368_s23, %s6717_s19  ;;  %p6725_p12 = scmp.lt.s32.totalorder %s368_s23, %s368_s23 }
  0x4b   : > { %p6726_p13 = scmp.lt.s32.totalorder %s6717_s19, %s6717_s19 }
  0x4c   : > { %p6720_p3 = pnand %p6718_p1, %p7104_p8 }
  0x4d   : > { %p6727_p0 = por %p6726_p13, %p6725_p12 }
  0x4e   : > { %p6721_p4 = pneg %p6720_p3 }
  0x4f   : > { %5666 = dma.hbm_to_vmem [thread:$0]  (!%p7098_p7), %s11333_s8, 8192, %s436_s16, [#allocation17], %s10779_s24, %s10779_s24, %s10781_s29  }
  0x50   : > { %p6728_p2 = pnand %p6727_p0, %p6721_p4 }
  0x52   : > { %6731 = shalt.err (!%p6728_p2)
}
  0x53   : > { %s11334_s1 = smov 8   ;;  %s11335_s22 = smov 128  }
  0x54   : > { %s11336_s2 = sld [smem:[#allocation191_spill]]  ;;  %s6981_s16 = smov [#allocation12]  }
  0x55   : > { %s393_s17 = sshll.u32 %s6981_s16, 4  ;;  %s6982_s24 = smov [#allocation15]   ;;  %s394_s17 = int_to_ptr.vmem [resolvable:$true] %s393_s17 }
  0x56   : > { %s419_s29 = sshll.u32 %s6982_s24, 4  ;;  %s6743_s3 = scalar_lea.vmem %s394_s17, 2048  ;;  %s420_s29 = int_to_ptr.vmem [resolvable:$true] %s419_s29 }
  0x57   : > { %p6744_p6 = scmp.ne.s32.totalorder %s394_s17, %s6743_s3  ;;  %p6751_p5 = scmp.lt.s32.totalorder %s394_s17, %s394_s17 }
  0x58   : > { %p6752_p11 = scmp.lt.s32.totalorder %s6743_s3, %s6743_s3 }
  0x59   : > { %p6746_p9 = pnand %p6744_p6, %p7104_p8 }
  0x5a   : > { %5651 = dma.hbm_to_vmem [thread:$0]  (!%p7098_p7), %s11336_s2, 256, %s368_s23, [#allocation8], %s11335_s22, %s11335_s22, %s11334_s1  }
  0x5b   : > { %p6747_p10 = pneg %p6746_p9  ;;  %p6753_p1 = por %p6752_p11, %p6751_p5 }
  0x5d   : > { %p6754_p3 = pnand %p6753_p1, %p6747_p10 }
  0x5f   : > { %6757 = shalt.err (!%p6754_p3)
}
  0x60   : > { %s11337_s19 = smov 32   ;;  %s11338_s30 = smov 512  }
  0x61   : > { %s11339_s4 = sld [smem:[#allocation193_spill]]  ;;  %s6769_s24 = scalar_lea.vmem %s420_s29, 8192 }
  0x62   : > { %p6770_p4 = scmp.ne.s32.totalorder %s420_s29, %s6769_s24  ;;  %p6777_p0 = scmp.lt.s32.totalorder %s420_s29, %s420_s29 }
  0x63   : > { %p6778_p2 = scmp.lt.s32.totalorder %s6769_s24, %s6769_s24 }
  0x64   : > { %p6772_p12 = pnand %p6770_p4, %p7104_p8 }
  0x65   : > { %p6779_p6 = por %p6778_p2, %p6777_p0 }
  0x66   : > { %p6773_p13 = pneg %p6772_p12 }
  0x67   : > { %5657 = dma.hbm_to_vmem [thread:$0]  (!%p7098_p7), %s11339_s4, 2048, %s394_s17, [#allocation11], %s11338_s30, %s11338_s30, %s11337_s19  }
  0x68   : > { %p6780_p9 = pnand %p6779_p6, %p6773_p13 }
  0x6a   : > { %6783 = shalt.err (!%p6780_p9)
}
  0x6b   : > { %s11340_s6 = sld [smem:[#allocation195_spill]]  ;;  %s6983_s17 = smov [#allocation18]  }
  0x6c   : > { %s448_s23 = sshll.u32 %s6983_s17, 4  ;;  %s449_s23 = int_to_ptr.vmem [resolvable:$true] %s448_s23 }
  0x6d   : > { %s6795_s20 = scalar_lea.vmem %s449_s23, 8192  ;;  %p6803_p1 = scmp.lt.s32.totalorder %s449_s23, %s449_s23 }
  0x6e   : > { %p6796_p10 = scmp.ne.s32.totalorder %s449_s23, %s6795_s20  ;;  %p6804_p3 = scmp.lt.s32.totalorder %s6795_s20, %s6795_s20 }
  0x70   : > { %p6798_p5 = pnand %p6796_p10, %p7104_p8  ;;  %p6805_p4 = por %p6804_p3, %p6803_p1 }
  0x71   : > { %5663 = dma.hbm_to_vmem [thread:$0]  (!%p7098_p7), %s11340_s6, 8192, %s420_s29, [#allocation14], %s11338_s30, %s11338_s30, %s11337_s19  }
  0x72   : > { %p6799_p11 = pneg %p6798_p5 }
  0x74   : > { %p6806_p12 = pnand %p6805_p4, %p6799_p11 }
  0x76   : > { %6809 = shalt.err (!%p6806_p12)
}
  0x77   : > { %s11341_s9 = sld [smem:[#allocation197_spill]]  ;;  %s5491_s18 = sadd.s32 4294967294, %s6970_s28  }
  0x78   : > { %s7187_s21 = sadd.s32 1, %s6970_s28   ;;  %s42_s16 = sadd.s32 1, %s6966_s27 }
  0x79   : > { %s39_s3 = ssub.s32 %s6970_s28, %s7187_s21  ;;  %p49_p13 = scmp.ne.s32.totalorder %s6966_s27, %s6962_s26 }
  0x7a   : > { %p40_p8 = scmp.eq.s32.totalorder %s39_s3, 0  ;;  %p50_p0 = scmp.eq.s32.totalorder %s6970_s28, 0 }
  0x7b   : > { %p55_p2 = scmp.ne.s32.totalorder %s6962_s26, %s6958_s25  ;;  %p11344_p9 = scmp.eq.s32.totalorder %s7083_s14, 0 }
  0x7c   : > { %s7198_s17 = scalar_select %p40_p8, %s6966_s27, %s42_s16  }
  0x7d   : > { %5669 = dma.hbm_to_vmem [thread:$0]  (!%p7098_p7), %s11341_s9, 8192, %s449_s23, [#allocation17], %s11338_s30, %s11338_s30, %s11337_s19  }
  0x7e   : > { %11342 = sst [smem:[#allocation30_spill]] %s7198_s17  ;;  %p7200_p6 = por %p50_p0, %p49_p13 }
  0x7f   : > { %p7206_p7 = por %p11344_p9, %p55_p2  ;;  %p10783_p10 = scmp.eq.s32.totalorder %s7083_s14, 1 }
  0x80   : > { %p295_p5 = scmp.eq.s32.totalorder %s5491_s18, 1  ;;  %p5686_p11 = scmp.lt.s32.totalorder %s6970_s28, 2 }
  0x81   : > { %s11345_s19 = scalar_select %p7206_p7, 1, 0 }
  0x82   : > { %s465_s30 = sand.u32 1, %s6966_s27   ;;  %p7215_p1 = por %p10783_p10, %p49_p13 }
  0x83   : > { %p7219_p3 = por %p295_p5, %p55_p2  ;;  %s5502_s29 = sshll.u32 %s465_s30, 6 }
  0x84   : > { %s11346_s23 = scalar_select %p7215_p1, 1, 0 }
  0x85   : > { %s11347_s24 = scalar_select %p7219_p3, 1, 0 }
  0x86   : > { %s5599_s3 = sshll.u32 %s6970_s28, 10  ;;  %s469_s18 = scalar_lea.vmem [#allocation4], %s5502_s29 }
  0x87   : > { %s7227_s4 = scalar_lea.hbm %s10759_s0, %s5599_s3  ;;  %s476_s5 = sshll.u32 %s469_s18, 4  ;;  %s7229_s5 = int_to_ptr.vmem [resolvable:$true] %s476_s5 }
  0x88   : > { %p7233_p4 = pnand %p5686_p11, %p7200_p6  ;;  %s7237_s8 = scalar_lea.sflag [#allocation5], %s465_s30 }
  0x89   : > { %s6810_s9 = scalar_lea.hbm %s7227_s4, 1024  ;;  %s6815_s29 = scalar_lea.hbm %s10759_s0, 2048 }
  0x8a   : > { %p6811_p12 = scmp.ne.s32.totalorder %s7227_s4, %s6810_s9  ;;  %p6812_p8 = pneg %p7233_p4 }
  0x8b   : > { %p6816_p2 = scmp.lt.s32.totalorder %s7227_s4, %s10759_s0  ;;  %p6817_p6 = scmp.lt.s32.totalorder %s6815_s29, %s6810_s9 }
  0x8c   : > { %p6813_p13 = pnand %p6812_p8, %p6811_p12 }
  0x8d   : > { %p6818_p9 = por %p6817_p6, %p6816_p2 }
  0x8e   : > { %p6814_p0 = pneg %p6813_p13 }
  0x90   : > { %p6819_p5 = pnand %p6818_p9, %p6814_p0 }
  0x92   : > { %6822 = shalt.err (!%p6819_p5)
}
  0x93   : > { %s6823_s20 = scalar_lea.vmem %s7229_s5, 1024  ;;  %s6984_s30 = smov [#allocation4]  }
  0x94   : > { %p6824_p11 = scmp.ne.s32.totalorder %s7229_s5, %s6823_s20  ;;  %s6828_s17 = sshll.u32 %s6984_s30, 4  ;;  %s6829_s17 = int_to_ptr.vmem [resolvable:$false] %s6828_s17 }
  0x95   : > { %s6830_s2 = scalar_lea.vmem %s6829_s17, 2048  ;;  %p6831_p13 = scmp.lt.s32.totalorder %s7229_s5, %s6829_s17 }
  0x96   : > { %p6826_p10 = pnand %p6824_p11, %p6812_p8  ;;  %p6832_p3 = scmp.lt.s32.totalorder %s6830_s2, %s6823_s20 }
  0x98   : > { %p6827_p12 = pneg %p6826_p10  ;;  %p6833_p1 = por %p6832_p3, %p6831_p13 }
  0x9a   : > { %p6834_p7 = pnand %p6833_p1, %p6827_p12 }
  0x9c   : > { %6837 = shalt.err (!%p6834_p7)
}
  0x9d   : > { %5673 = dma.hbm_to_vmem [thread:$0]  (!%p7233_p4), %s7227_s4, 1024, %s7229_s5, %s7237_s8, %s11335_s22, %s11335_s22, %s11334_s1  }
  0x9e   : > { %p11349_p10 = scmp.ne.s32.totalorder %s11327_s15, 0 }
  0xa0   : > { %488 = sbr.rel (%p11349_p10) target bundleno = 3241 (0xca9), region = 64 }
  0xa5   : > { %s7264_s9 = sand.u32 1, %s6962_s26   ;;  %p11350_p7 = scmp.ne.s32.totalorder %s11345_s19, 0 }
  0xa6   : > { %s5506_s17 = sshll.u32 %s7264_s9, 6  ;;  %s491_s3 = scalar_lea.sflag [#allocation5], %s7264_s9 }
  0xa7   : > { %s7268_s29 = scalar_lea.vmem [#allocation4], %s5506_s17 }
  0xa8   : > { %6929 = dma.done.wait (%p11350_p7), %s491_s3, 1024  }
  0xa9   : > { %6931 = vsyncadd (%p11350_p7), %s491_s3, 4294966272  ;;  %p11351_p1 = scmp.eq.s32.totalorder %s7083_s14, 0 }
  0xab   : > { %6933 = dma.done.wait (%p11351_p1), [#allocation8], 384   ;;  %p11352_p3 = pmov %p11351_p1 }
  0xac   : > { %p11353_p4 = pmov %p11351_p1 }
  0xad   : > { %6935 = vsyncadd (%p11352_p3), [#allocation8], 4294966912 }
  0xae   : > { %6937 = dma.done.wait (%p11353_p4), [#allocation11], 2304   ;;  %p11354_p8 = pmov %p11351_p1 }
  0xaf   : > { %p11355_p0 = pmov %p11351_p1 }
  0xb0   : > { %6939 = vsyncadd (%p11354_p8), [#allocation11], 4294964992 }
  0xb1   : > { %6941 = dma.done.wait (%p11355_p0), [#allocation14], 10240   ;;  %p11356_p2 = pmov %p11355_p0 }
  0xb2   : > { %p11357_p6 = pmov %p11355_p0 }
  0xb3   : > { %6943 = vsyncadd (%p11356_p2), [#allocation14], 4294957056 }
  0xb4   : > { %6945 = dma.done.wait (%p11357_p6), [#allocation17], 16384   ;;  %p11358_p9 = pmov %p11355_p0 }
  0xb5   : > { %s7290_s4 = scalar_lea.vmem [#allocation19], %s5506_s17  ;;  %p11359_p5 = scmp.ne.s32.totalorder %s7083_s14, 0 }
  0xb6   : > { %6947 = vsyncadd (%p11358_p9), [#allocation17], 4294950912 }
  0xb7   : > { %574 = sbr.rel (%p11359_p5) target bundleno = 396 (0x18c), region = 104 }
  0xbc   : > { %v589_v0 = vld [vmem:[#allocation13 + $0x68] sm:$0xff]  ;;  %v591_v1 = vld [vmem:[#allocation13 + $0x78] sm:$0xff]  ;;  %v588_v2 = vld [vmem:[#allocation13 + $0x60] sm:$0xff]  ;;  %vm614_vm0 = vcmask 261120   ;;  %v6985_v17 = vmov 0.0   ;;  %v594_v22 = vlaneseq }
  0xbd   : > { %642 = vmatprep.subr.mxu0 %v589_v0  ;;  %713 = vmatprep.subr.mxu1 %v591_v1  ;;  %v590_v3 = vld [vmem:[#allocation13 + $0x70] sm:$0xff]  ;;  %v585_v4 = vld [vmem:[#allocation13 + $0x48] sm:$0xff]  ;;  %v587_v5 = vld [vmem:[#allocation13 + $0x58] sm:$0xff] }
  0xbe   : > { %643 = vmatpush1.msra.mxu0 %v588_v2  ;;  %714 = vmatpush1.msra.mxu1 %v590_v3  ;;  %v584_v6 = vld [vmem:[#allocation13 + $0x40] sm:$0xff]  ;;  %v586_v7 = vld [vmem:[#allocation13 + $0x50] sm:$0xff]  ;;  %v581_v8 = vld [vmem:[#allocation13 + $0x28] sm:$0xff]  ;;  %v595_v23 = vshrl.u32 %v594_v22, 7 }
  0xbf   : > { %644 = vmatprep.subr.mxu0 %v585_v4  ;;  %715 = vmatprep.subr.mxu1 %v587_v5  ;;  %v583_v9 = vld [vmem:[#allocation13 + $0x38] sm:$0xff]  ;;  %v580_v10 = vld [vmem:[#allocation13 + $0x20] sm:$0xff]  ;;  %v582_v11 = vld [vmem:[#allocation13 + $0x30] sm:$0xff] }
  0xc0   : > { %645 = vmatpush1.msra.mxu0 %v584_v6  ;;  %716 = vmatpush1.msra.mxu1 %v586_v7  ;;  %v577_v12 = vld [vmem:[#allocation13 + $0x8] sm:$0xff]  ;;  %v579_v13 = vld [vmem:[#allocation13 + $0x18] sm:$0xff]  ;;  %v576_v14 = vld [vmem:[#allocation13] sm:$0xff]  ;;  %v596_v24 = vsub.s32 0, %v595_v23  ;;  %v604_v25 = vsub.s32 2, %v595_v23  ;;  %v600_v27 = vsub.s32 1, %v595_v23 }
  0xc1   : > { %646 = vmatprep.subr.mxu0 %v581_v8  ;;  %717 = vmatprep.subr.mxu1 %v583_v9  ;;  %v578_v15 = vld [vmem:[#allocation13 + $0x10] sm:$0xff]  ;;  %v575_v16 = vld [vmem:[#allocation7] sm:$0xff]  ;;  %v764_v18 = vld [vmem:[#allocation9] sm:$0xff]  ;;  %v608_v28 = vsub.s32 3, %v595_v23 }
  0xc2   : > { %647 = vmatpush1.msra.mxu0 %v580_v10  ;;  %718 = vmatpush1.msra.mxu1 %v582_v11  ;;  %v765_v19 = vld [vmem:[#allocation9 + $0x8] sm:$0xff]  ;;  %v768_v20 = vld [vmem:[#allocation10] sm:$0xff]  ;;  %766 = vst [vmem:[#allocation20] sm:$0xff] %v764_v18  ;;  %v769_v21 = vld [vmem:[#allocation10 + $0x8] sm:$0xff] }
  0xc3   : > { %648 = vmatprep.subr.mxu0 %v577_v12  ;;  %719 = vmatprep.subr.mxu1 %v579_v13  ;;  %767 = vst [vmem:[#allocation20 + $0x8] sm:$0xff] %v765_v19  ;;  %770 = vst [vmem:[#allocation22] sm:$0xff] %v768_v20  ;;  %v592_v26 = vld [vmem:[%s10766_s7] sm:$0xf] }
  0xc4   : > { %649 = vmatpush1.msra.mxu0 %v576_v14  ;;  %682 = vmatprep.mubr.f32.mxu0 %v6985_v17  ;;  %771 = vst [vmem:[#allocation22 + $0x8] sm:$0xff] %v769_v21  ;;  %v597_v29 = vrot.slane %v592_v26, %v596_v24  ;;  %v605_v30 = vrot.slane %v592_v26, %v604_v25 }
  0xc5   : > { %720 = vmatpush1.msra.mxu1 %v578_v15  ;;  %753 = vmatprep.mubr.f32.mxu1 %v6985_v17  ;;  %v601_v31 = vrot.slane %v592_v26, %v600_v27  ;;  %v609_v32 = vrot.slane %v592_v26, %v608_v28 }
  0xc6   : > { %5517 = vmatmul.mubr.msk.f32.vlgmr.msra.gmra.mxu0 %vm614_vm0, %v575_v16  ;;  %5518 = vmatmul.mubr.msk.f32.vlgmr.msra.gmra.mxu1 %vm614_vm0, %v575_v16 }
 0x186   : > { %v684_v33 = vpop.f32.mrf.mxu0  ;;  %v755_v34 = vpop.f32.mrf.mxu1 }
 0x187   : > { %v685_v35 = vadd.f32 %v684_v33, %v597_v29  ;;  %v756_v36 = vadd.f32 %v755_v34, %v605_v30 }
 0x188   : > { %v686_v37 = vpop.f32.mrf.mxu0  ;;  %v757_v38 = vpop.f32.mrf.mxu1 }
 0x189   : > { %760 = vst [vmem:[#allocation3 + $0x10] sm:$0xff] %v685_v35  ;;  %762 = vst [vmem:[#allocation3 + $0x18] sm:$0xff] %v756_v36  ;;  %v687_v39 = vadd.f32 %v686_v37, %v601_v31  ;;  %v758_v40 = vadd.f32 %v757_v38, %v609_v32 }
 0x18b   : > { %761 = vst [vmem:[#allocation3] sm:$0xff] %v687_v39  ;;  %763 = vst [vmem:[#allocation3 + $0x8] sm:$0xff] %v758_v40 }
 0x18c PF: > { %v793_v41 = vld [vmem:[#allocation12 + $0x68] sm:$0xff]  ;;  %v795_v42 = vld [vmem:[#allocation12 + $0x78] sm:$0xff]  ;;  %v792_v43 = vld [vmem:[#allocation12 + $0x60] sm:$0xff]  ;;  %vm796_vm1 = vcmask 261120   ;;  %v10786_v58 = vmov 0.0   ;;  %s6987_s1 = smov [#allocation20]  }
 0x18d   : > { %845 = vmatprep.subr.mxu0 %v793_v41  ;;  %958 = vmatprep.subr.mxu1 %v795_v42  ;;  %v794_v44 = vld [vmem:[#allocation12 + $0x70] sm:$0xff]  ;;  %v789_v45 = vld [vmem:[#allocation12 + $0x48] sm:$0xff]  ;;  %v791_v46 = vld [vmem:[#allocation12 + $0x58] sm:$0xff]  ;;  %s5308_s22 = sshll.u32 %s6987_s1, 4  ;;  %s5600_s19 = sshll.u32 %s7083_s14, 10  ;;  %s5309_s22 = int_to_ptr.vmem [resolvable:$true] %s5308_s22 }
 0x18e   : > { %846 = vmatpush1.msra.mxu0 %v792_v43  ;;  %959 = vmatpush1.msra.mxu1 %v794_v44  ;;  %v788_v47 = vld [vmem:[#allocation12 + $0x40] sm:$0xff]  ;;  %v790_v48 = vld [vmem:[#allocation12 + $0x50] sm:$0xff]  ;;  %v785_v49 = vld [vmem:[#allocation12 + $0x28] sm:$0xff]  ;;  %s5295_s16 = sshll.u32 %s7290_s4, 4  ;;  %s6988_s18 = smov [#allocation22]   ;;  %s10683_s16 = int_to_ptr.vmem [resolvable:$true] %s5295_s16 }
 0x18f   : > { %847 = vmatprep.subr.mxu0 %v789_v45  ;;  %960 = vmatprep.subr.mxu1 %v791_v46  ;;  %v787_v50 = vld [vmem:[#allocation12 + $0x38] sm:$0xff]  ;;  %v784_v51 = vld [vmem:[#allocation12 + $0x20] sm:$0xff]  ;;  %v786_v52 = vld [vmem:[#allocation12 + $0x30] sm:$0xff]  ;;  %s5321_s20 = sshll.u32 %s6988_s18, 4  ;;  %s10681_s17 = scalar_lea.hbm %s10770_s11, %s5600_s19  ;;  %s10686_s20 = int_to_ptr.vmem [resolvable:$true] %s5321_s20 }
 0x190   : > { %848 = vmatpush1.msra.mxu0 %v788_v47  ;;  %961 = vmatpush1.msra.mxu1 %v790_v48  ;;  %v781_v53 = vld [vmem:[#allocation12 + $0x8] sm:$0xff]  ;;  %v783_v54 = vld [vmem:[#allocation12 + $0x18] sm:$0xff]  ;;  %v780_v55 = vld [vmem:[#allocation12] sm:$0xff]  ;;  %s6838_s3 = scalar_lea.vmem %s5309_s22, 256  ;;  %p12475_p12 = scmp.eq.s32.totalorder %s7083_s14, 1 }
 0x191   : > { %849 = vmatprep.subr.mxu0 %v785_v49  ;;  %962 = vmatprep.subr.mxu1 %v787_v50  ;;  %v782_v56 = vld [vmem:[#allocation12 + $0x10] sm:$0xff]  ;;  %v772_v57 = vld [vmem:[%s7268_s29] sm:$0xff]  ;;  %v1140_v59 = vld [vmem:[#allocation15 + $0x1e8] sm:$0xff]  ;;  %p6839_p11 = scmp.ne.s32.totalorder %s5309_s22, %s6838_s3  ;;  %p6845_p7 = scmp.lt.s32.totalorder %s5309_s22, %s5309_s22 }
 0x192   : > { %850 = vmatpush1.msra.mxu0 %v784_v51  ;;  %963 = vmatpush1.msra.mxu1 %v786_v52  ;;  %v1142_v60 = vld [vmem:[#allocation15 + $0x1f8] sm:$0xff]  ;;  %v1139_v61 = vld [vmem:[#allocation15 + $0x1e0] sm:$0xff]  ;;  %v1141_v62 = vld [vmem:[#allocation15 + $0x1f0] sm:$0xff]  ;;  %p6846_p1 = scmp.lt.s32.totalorder %s6838_s3, %s6838_s3 }
 0x193   : > { %851 = vmatprep.subr.mxu0 %v781_v53  ;;  %964 = vmatprep.subr.mxu1 %v783_v54  ;;  %v1136_v63 = vld [vmem:[#allocation15 + $0x1c8] sm:$0xff]  ;;  %v1138_v0 = vld [vmem:[#allocation15 + $0x1d8] sm:$0xff]  ;;  %v1135_v1 = vld [vmem:[#allocation15 + $0x1c0] sm:$0xff]  ;;  %p6840_p13 = pnand %p6839_p11, %p12475_p12 }
 0x194   : > { %852 = vmatpush1.msra.mxu0 %v780_v55  ;;  %885 = vmatprep.mubr.f32.mxu0 %v10786_v58  ;;  %v1137_v2 = vld [vmem:[#allocation15 + $0x1d0] sm:$0xff]  ;;  %v773_v3 = vld [vmem:[%s7268_s29 + $0x8] sm:$0xff]  ;;  %v1132_v4 = vld [vmem:[#allocation15 + $0x1a8] sm:$0xff]  ;;  %p6847_p3 = por %p6846_p1, %p6845_p7 }
 0x195   : > { %965 = vmatpush1.msra.mxu1 %v782_v56  ;;  %998 = vmatprep.mubr.f32.mxu1 %v10786_v58  ;;  %v1134_v5 = vld [vmem:[#allocation15 + $0x1b8] sm:$0xff]  ;;  %v1131_v6 = vld [vmem:[#allocation15 + $0x1a0] sm:$0xff]  ;;  %v1133_v7 = vld [vmem:[#allocation15 + $0x1b0] sm:$0xff]  ;;  %p6841_p10 = pneg %p6840_p13 }
 0x196   : > { %5519 = vmatmul.mubr.msk.f32.vlgmr.msra.gmra.mxu0 %vm796_vm1, %v772_v57  ;;  %5527 = vmatmul.mubr.msk.f32.vlgmr.msra.gmra.mxu1 %vm796_vm1, %v772_v57  ;;  %v1128_v8 = vld [vmem:[#allocation15 + $0x188] sm:$0xff]  ;;  %v1130_v9 = vld [vmem:[#allocation15 + $0x198] sm:$0xff]  ;;  %v1127_v10 = vld [vmem:[#allocation15 + $0x180] sm:$0xff] }
 0x197   : > { %1290 = vmatprep.subr.mxu0 %v1140_v59  ;;  %1361 = vmatprep.subr.mxu1 %v1142_v60  ;;  %v1129_v11 = vld [vmem:[#allocation15 + $0x190] sm:$0xff]  ;;  %v774_v12 = vld [vmem:[%s7268_s29 + $0x10] sm:$0xff]  ;;  %v1126_v14 = vld [vmem:[#allocation15 + $0x178] sm:$0xff]  ;;  %p6848_p4 = pnand %p6847_p3, %p6841_p10 }
 0x198   : > { %1291 = vmatpush1.msra.mxu0 %v1139_v61  ;;  %1362 = vmatpush1.msra.mxu1 %v1141_v62  ;;  %v1124_v13 = vld [vmem:[#allocation15 + $0x168] sm:$0xff]  ;;  %v1123_v15 = vld [vmem:[#allocation15 + $0x160] sm:$0xff]  ;;  %v1125_v16 = vld [vmem:[#allocation15 + $0x170] sm:$0xff] }
 0x199   : > { %1292 = vmatprep.subr.mxu0 %v1136_v63  ;;  %1363 = vmatprep.subr.mxu1 %v1138_v0  ;;  %v7312_v17 = vld [vmem:[#allocation15 + $0x148] sm:$0xff]  ;;  %v7314_v18 = vld [vmem:[#allocation15 + $0x158] sm:$0xff]  ;;  %v7316_v19 = vld [vmem:[#allocation15 + $0x140] sm:$0xff] }
 0x19a   : > { %891 = vmatprep.mubr.f32.mxu0 %v10786_v58  ;;  %1004 = vmatprep.mubr.f32.mxu1 %v10786_v58  ;;  %v7318_v20 = vld [vmem:[#allocation15 + $0x150] sm:$0xff]  ;;  %v7325_v22 = vld [vmem:[#allocation15 + $0x128] sm:$0xff]  ;;  %v7327_v23 = vld [vmem:[#allocation15 + $0x138] sm:$0xff] }
 0x19b   : > { %1293 = vmatpush1.msra.mxu0 %v1135_v1  ;;  %1364 = vmatpush1.msra.mxu1 %v1137_v2  ;;  %v775_v21 = vld [vmem:[%s7268_s29 + $0x18] sm:$0xff]  ;;  %v7331_v24 = vld [vmem:[#allocation15 + $0x120] sm:$0xff]  ;;  %v7337_v26 = vld [vmem:[#allocation15 + $0x108] sm:$0xff] }
 0x19c   : > { %5520 = vmatmul.mubr.msk.f32.gmra.mxu0 %vm796_vm1, %v773_v3  ;;  %5528 = vmatmul.mubr.msk.f32.gmra.mxu1 %vm796_vm1, %v773_v3  ;;  %v7333_v25 = vld [vmem:[#allocation15 + $0x130] sm:$0xff]  ;;  %v7339_v27 = vld [vmem:[#allocation15 + $0x118] sm:$0xff]  ;;  %v7345_v28 = vld [vmem:[#allocation15 + $0x100] sm:$0xff] }
 0x19d   : > { %1294 = vmatprep.subr.mxu0 %v1132_v4  ;;  %1365 = vmatprep.subr.mxu1 %v1134_v5  ;;  %v7347_v29 = vld [vmem:[#allocation15 + $0x110] sm:$0xff]  ;;  %v776_v30 = vld [vmem:[%s7268_s29 + $0x20] sm:$0xff]  ;;  %v7354_v31 = vld [vmem:[#allocation15 + $0xe8] sm:$0xff] }
 0x19e   : > { %1295 = vmatpush1.msra.mxu0 %v1131_v6  ;;  %1366 = vmatpush1.msra.mxu1 %v1133_v7  ;;  %v7356_v32 = vld [vmem:[#allocation15 + $0xf8] sm:$0xff]  ;;  %v7360_v33 = vld [vmem:[#allocation15 + $0xe0] sm:$0xff]  ;;  %v7362_v34 = vld [vmem:[#allocation15 + $0xf0] sm:$0xff] }
 0x19f   : > { %1296 = vmatprep.subr.mxu0 %v1128_v8  ;;  %1367 = vmatprep.subr.mxu1 %v1130_v9  ;;  %v7366_v35 = vld [vmem:[#allocation15 + $0xc8] sm:$0xff]  ;;  %v7368_v36 = vld [vmem:[#allocation15 + $0xd8] sm:$0xff]  ;;  %v7374_v37 = vld [vmem:[#allocation15 + $0xc0] sm:$0xff] }
 0x1a0   : > { %897 = vmatprep.mubr.f32.mxu0 %v10786_v58  ;;  %1010 = vmatprep.mubr.f32.mxu1 %v10786_v58  ;;  %v7376_v38 = vld [vmem:[#allocation15 + $0xd0] sm:$0xff]  ;;  %v777_v39 = vld [vmem:[%s7268_s29 + $0x28] sm:$0xff]  ;;  %v7383_v40 = vld [vmem:[#allocation15 + $0xa8] sm:$0xff] }
 0x1a1   : > { %1297 = vmatpush1.msra.mxu0 %v1127_v10  ;;  %1368 = vmatpush1.msra.mxu1 %v1129_v11  ;;  %v7385_v41 = vld [vmem:[#allocation15 + $0xb8] sm:$0xff]  ;;  %v7389_v42 = vld [vmem:[#allocation15 + $0xa0] sm:$0xff]  ;;  %v7391_v43 = vld [vmem:[#allocation15 + $0xb0] sm:$0xff] }
 0x1a2   : > { %5521 = vmatmul.mubr.msk.f32.gmra.mxu0 %vm796_vm1, %v774_v12  ;;  %5529 = vmatmul.mubr.msk.f32.gmra.mxu1 %vm796_vm1, %v774_v12  ;;  %v7395_v44 = vld [vmem:[#allocation15 + $0x88] sm:$0xff]  ;;  %v7397_v45 = vld [vmem:[#allocation15 + $0x98] sm:$0xff]  ;;  %v7403_v46 = vld [vmem:[#allocation15 + $0x80] sm:$0xff] }
 0x1a3   : > { %1298 = vmatprep.subr.mxu0 %v1124_v13  ;;  %1369 = vmatprep.subr.mxu1 %v1126_v14  ;;  %v7405_v47 = vld [vmem:[#allocation15 + $0x90] sm:$0xff]  ;;  %v778_v48 = vld [vmem:[%s7268_s29 + $0x30] sm:$0xff]  ;;  %v7414_v50 = vld [vmem:[#allocation15 + $0x78] sm:$0xff] }
 0x1a4   : > { %1299 = vmatpush1.msra.mxu0 %v1123_v15  ;;  %1370 = vmatpush1.msra.mxu1 %v1125_v16  ;;  %v7412_v49 = vld [vmem:[#allocation15 + $0x68] sm:$0xff]  ;;  %v7418_v51 = vld [vmem:[#allocation15 + $0x60] sm:$0xff]  ;;  %v7420_v52 = vld [vmem:[#allocation15 + $0x70] sm:$0xff] }
 0x1a5   : > { %1300 = vmatprep.subr.mxu0 %v7312_v17  ;;  %1371 = vmatprep.subr.mxu1 %v7314_v18  ;;  %v7424_v53 = vld [vmem:[#allocation15 + $0x48] sm:$0xff]  ;;  %v7426_v54 = vld [vmem:[#allocation15 + $0x58] sm:$0xff]  ;;  %v7432_v55 = vld [vmem:[#allocation15 + $0x40] sm:$0xff] }
 0x1a6   : > { %903 = vmatprep.mubr.f32.mxu0 %v10786_v58  ;;  %1016 = vmatprep.mubr.f32.mxu1 %v10786_v58  ;;  %v7434_v56 = vld [vmem:[#allocation15 + $0x50] sm:$0xff]  ;;  %v7441_v59 = vld [vmem:[#allocation15 + $0x28] sm:$0xff]  ;;  %v7443_v60 = vld [vmem:[#allocation15 + $0x38] sm:$0xff] }
 0x1a7   : > { %1301 = vmatpush1.msra.mxu0 %v7316_v19  ;;  %1372 = vmatpush1.msra.mxu1 %v7318_v20  ;;  %v779_v57 = vld [vmem:[%s7268_s29 + $0x38] sm:$0xff]  ;;  %v7447_v61 = vld [vmem:[#allocation15 + $0x20] sm:$0xff]  ;;  %v7453_v63 = vld [vmem:[#allocation15 + $0x8] sm:$0xff] }
 0x1a8   : > { %5522 = vmatmul.mubr.msk.f32.gmra.mxu0 %vm796_vm1, %v775_v21  ;;  %5530 = vmatmul.mubr.msk.f32.gmra.mxu1 %vm796_vm1, %v775_v21  ;;  %v7449_v62 = vld [vmem:[#allocation15 + $0x30] sm:$0xff]  ;;  %v7455_v0 = vld [vmem:[#allocation15 + $0x18] sm:$0xff]  ;;  %v7459_v1 = vld [vmem:[#allocation15] sm:$0xff] }
 0x1a9   : > { %1302 = vmatprep.subr.mxu0 %v7325_v22  ;;  %1373 = vmatprep.subr.mxu1 %v7327_v23  ;;  %11360 = vst [vmem:[#allocation31_spill] sm:$0xff] %v7459_v1  ;;  %v7463_v2 = vld [vmem:[#allocation15 + $0x10] sm:$0xff]  ;;  %v1276_v3 = vld [vmem:[#allocation20] sm:$0xff]  ;;  %v7473_v4 = vld [vmem:[#allocation16 + $0x1e8] sm:$0xff] }
 0x1aa   : > { %1303 = vmatpush1.msra.mxu0 %v7331_v24  ;;  %1374 = vmatpush1.msra.mxu1 %v7333_v25  ;;  %11361 = vst [vmem:[#allocation32_spill] sm:$0xff] %v7463_v2  ;;  %11362 = vst [vmem:[#allocation33_spill] sm:$0xff] %v7473_v4  ;;  %v7475_v5 = vld [vmem:[#allocation16 + $0x1f8] sm:$0xff]  ;;  %v7479_v6 = vld [vmem:[#allocation16 + $0x1e0] sm:$0xff] }
 0x1ab   : > { %1304 = vmatprep.subr.mxu0 %v7337_v26  ;;  %1375 = vmatprep.subr.mxu1 %v7339_v27  ;;  %11363 = vst [vmem:[#allocation34_spill] sm:$0xff] %v7475_v5  ;;  %11364 = vst [vmem:[#allocation35_spill] sm:$0xff] %v7479_v6  ;;  %v7481_v7 = vld [vmem:[#allocation16 + $0x1f0] sm:$0xff]  ;;  %v7485_v8 = vld [vmem:[#allocation16 + $0x1c8] sm:$0xff] }
 0x1ac   : > { %909 = vmatprep.mubr.f32.mxu0 %v10786_v58  ;;  %1022 = vmatprep.mubr.f32.mxu1 %v10786_v58  ;;  %11365 = vst [vmem:[#allocation36_spill] sm:$0xff] %v7481_v7  ;;  %11366 = vst [vmem:[#allocation37_spill] sm:$0xff] %v7485_v8  ;;  %v7487_v9 = vld [vmem:[#allocation16 + $0x1d8] sm:$0xff]  ;;  %v7491_v10 = vld [vmem:[#allocation16 + $0x1c0] sm:$0xff] }
 0x1ad   : > { %1305 = vmatpush1.msra.mxu0 %v7345_v28  ;;  %1376 = vmatpush1.msra.mxu1 %v7347_v29  ;;  %11367 = vst [vmem:[#allocation38_spill] sm:$0xff] %v7487_v9  ;;  %11368 = vst [vmem:[#allocation39_spill] sm:$0xff] %v7491_v10  ;;  %v7493_v11 = vld [vmem:[#allocation16 + $0x1d0] sm:$0xff]  ;;  %v7497_v12 = vld [vmem:[#allocation16 + $0x1a8] sm:$0xff] }
 0x1ae   : > { %5523 = vmatmul.mubr.msk.f32.gmra.mxu0 %vm796_vm1, %v776_v30  ;;  %5531 = vmatmul.mubr.msk.f32.gmra.mxu1 %vm796_vm1, %v776_v30  ;;  %11369 = vst [vmem:[#allocation40_spill] sm:$0xff] %v7493_v11  ;;  %11370 = vst [vmem:[#allocation41_spill] sm:$0xff] %v7497_v12  ;;  %v7499_v13 = vld [vmem:[#allocation16 + $0x1b8] sm:$0xff]  ;;  %v7503_v14 = vld [vmem:[#allocation16 + $0x1a0] sm:$0xff] }
 0x1af   : > { %1306 = vmatprep.subr.mxu0 %v7354_v31  ;;  %1377 = vmatprep.subr.mxu1 %v7356_v32  ;;  %11371 = vst [vmem:[#allocation42_spill] sm:$0xff] %v7499_v13  ;;  %11372 = vst [vmem:[#allocation43_spill] sm:$0xff] %v7503_v14  ;;  %v7505_v15 = vld [vmem:[#allocation16 + $0x1b0] sm:$0xff]  ;;  %v7509_v16 = vld [vmem:[#allocation16 + $0x188] sm:$0xff] }
 0x1b0   : > { %1307 = vmatpush1.msra.mxu0 %v7360_v33  ;;  %1378 = vmatpush1.msra.mxu1 %v7362_v34  ;;  %11373 = vst [vmem:[#allocation44_spill] sm:$0xff] %v7505_v15  ;;  %11374 = vst [vmem:[#allocation45_spill] sm:$0xff] %v7509_v16  ;;  %v7511_v21 = vld [vmem:[#allocation16 + $0x198] sm:$0xff]  ;;  %v7515_v30 = vld [vmem:[#allocation16 + $0x180] sm:$0xff] }
 0x1b1   : > { %1308 = vmatprep.subr.mxu0 %v7366_v35  ;;  %1379 = vmatprep.subr.mxu1 %v7368_v36  ;;  %11375 = vst [vmem:[#allocation46_spill] sm:$0xff] %v7511_v21  ;;  %11376 = vst [vmem:[#allocation47_spill] sm:$0xff] %v7515_v30 }
 0x1b2   : > { %915 = vmatprep.mubr.f32.mxu0 %v10786_v58  ;;  %1028 = vmatprep.mubr.f32.mxu1 %v10786_v58 }
 0x1b3   : > { %1309 = vmatpush1.msra.mxu0 %v7374_v37  ;;  %1380 = vmatpush1.msra.mxu1 %v7376_v38 }
 0x1b4   : > { %5524 = vmatmul.mubr.msk.f32.gmra.mxu0 %vm796_vm1, %v777_v39  ;;  %5532 = vmatmul.mubr.msk.f32.gmra.mxu1 %vm796_vm1, %v777_v39  ;;  %v7517_v39 = vld [vmem:[#allocation16 + $0x190] sm:$0xff] }
 0x1b5   : > { %1310 = vmatprep.subr.mxu0 %v7383_v40  ;;  %1381 = vmatprep.subr.mxu1 %v7385_v41  ;;  %11377 = vst [vmem:[#allocation48_spill] sm:$0xff] %v7517_v39 }
 0x1b6   : > { %1311 = vmatpush1.msra.mxu0 %v7389_v42  ;;  %1382 = vmatpush1.msra.mxu1 %v7391_v43 }
 0x1b7   : > { %1312 = vmatprep.subr.mxu0 %v7395_v44  ;;  %1383 = vmatprep.subr.mxu1 %v7397_v45 }
 0x1b8   : > { %921 = vmatprep.mubr.f32.mxu0 %v10786_v58  ;;  %1034 = vmatprep.mubr.f32.mxu1 %v10786_v58 }
 0x1b9   : > { %1313 = vmatpush1.msra.mxu0 %v7403_v46  ;;  %1384 = vmatpush1.msra.mxu1 %v7405_v47 }
 0x1ba   : > { %5525 = vmatmul.mubr.msk.f32.gmra.mxu0 %vm796_vm1, %v778_v48  ;;  %5533 = vmatmul.mubr.msk.f32.gmra.mxu1 %vm796_vm1, %v778_v48  ;;  %v7521_v48 = vld [vmem:[#allocation16 + $0x168] sm:$0xff] }
 0x1bb   : > { %1314 = vmatprep.subr.mxu0 %v7412_v49  ;;  %1385 = vmatprep.subr.mxu1 %v7414_v50  ;;  %11378 = vst [vmem:[#allocation49_spill] sm:$0xff] %v7521_v48 }
 0x1bc   : > { %1315 = vmatpush1.msra.mxu0 %v7418_v51  ;;  %1386 = vmatpush1.msra.mxu1 %v7420_v52 }
 0x1bd   : > { %1316 = vmatprep.subr.mxu0 %v7424_v53  ;;  %1387 = vmatprep.subr.mxu1 %v7426_v54 }
 0x1be   : > { %927 = vmatprep.mubr.f32.mxu0 %v10786_v58  ;;  %1040 = vmatprep.mubr.f32.mxu1 %v10786_v58 }
 0x1bf   : > { %1317 = vmatpush1.msra.mxu0 %v7432_v55  ;;  %1388 = vmatpush1.msra.mxu1 %v7434_v56 }
 0x1c0   : > { %5526 = vmatmul.mubr.msk.f32.gmra.mxu0 %vm796_vm1, %v779_v57  ;;  %5534 = vmatmul.mubr.msk.f32.gmra.mxu1 %vm796_vm1, %v779_v57  ;;  %v7523_v57 = vld [vmem:[#allocation16 + $0x178] sm:$0xff] }
 0x1c1   : > { %1318 = vmatprep.subr.mxu0 %v7441_v59  ;;  %1389 = vmatprep.subr.mxu1 %v7443_v60  ;;  %11379 = vst [vmem:[#allocation50_spill] sm:$0xff] %v7523_v57 }
 0x1c2   : > { %1319 = vmatpush1.msra.mxu0 %v7447_v61  ;;  %1390 = vmatpush1.msra.mxu1 %v7449_v62 }
 0x1c3   : > { %1320 = vmatprep.subr.mxu0 %v7453_v63  ;;  %1391 = vmatprep.subr.mxu1 %v7455_v0 }
 0x1c4   : > { %1321 = vmatpush1.msra.mxu0 %v7459_v1  ;;  %1354 = vmatprep.mubr.f32.mxu0 %v10786_v58 }
 0x1c5   : > { %1392 = vmatpush1.msra.mxu1 %v7463_v2  ;;  %1425 = vmatprep.mubr.f32.mxu1 %v10786_v58 }
 0x1c6   : > { %1355 = vmatmul.mubr.f32.vlgmr.msra.gmra.mxu0 %v1276_v3  ;;  %1426 = vmatmul.mubr.f32.vlgmr.msra.gmra.mxu1 %v1276_v3  ;;  %v7527_v3 = vld [vmem:[#allocation16 + $0x160] sm:$0xff] }
 0x1c7   : > { %1524 = vmatprep.mubr.f32.mxu0 %v10786_v58  ;;  %1595 = vmatprep.mubr.f32.mxu1 %v10786_v58  ;;  %11380 = vst [vmem:[#allocation51_spill] sm:$0xff] %v7527_v3  ;;  %v7529_v58 = vld [vmem:[#allocation16 + $0x170] sm:$0xff] }
 0x1c8   : > { %1460 = vmatprep.subr.mxu0 %v7473_v4  ;;  %1531 = vmatprep.subr.mxu1 %v7475_v5  ;;  %11381 = vst [vmem:[#allocation52_spill] sm:$0xff] %v7529_v58 }
 0x1c9   : > { %1461 = vmatpush1.msra.mxu0 %v7479_v6  ;;  %1532 = vmatpush1.msra.mxu1 %v7481_v7 }
 0x1ca   : > { %1462 = vmatprep.subr.mxu0 %v7485_v8  ;;  %1533 = vmatprep.subr.mxu1 %v7487_v9 }
 0x1cb   : > { %1463 = vmatpush1.msra.mxu0 %v7491_v10  ;;  %1534 = vmatpush1.msra.mxu1 %v7493_v11 }
 0x1cc   : > { %1464 = vmatprep.subr.mxu0 %v7497_v12  ;;  %1535 = vmatprep.subr.mxu1 %v7499_v13  ;;  %v7607_v13 = vld [vmem:[#allocation16 + $0x80] sm:$0xff] }
 0x1cd   : > { %1465 = vmatpush1.msra.mxu0 %v7503_v14  ;;  %1536 = vmatpush1.msra.mxu1 %v7505_v15  ;;  %v7583_v15 = vld [vmem:[#allocation16 + $0xc0] sm:$0xff]  ;;  %v7591_v14 = vld [vmem:[#allocation16 + $0xb8] sm:$0xff]  ;;  %11408 = vst [vmem:[#allocation79_spill] sm:$0xff] %v7607_v13 }
 0x1ce   : > { %1466 = vmatprep.subr.mxu0 %v7509_v16  ;;  %1537 = vmatprep.subr.mxu1 %v7511_v21  ;;  %v7533_v21 = vld [vmem:[#allocation16 + $0x148] sm:$0xff]  ;;  %v7575_v16 = vld [vmem:[#allocation16 + $0xf0] sm:$0xff]  ;;  %11400 = vst [vmem:[#allocation71_spill] sm:$0xff] %v7583_v15  ;;  %11403 = vst [vmem:[#allocation74_spill] sm:$0xff] %v7591_v14 }
 0x1cf   : > { %1467 = vmatpush1.msra.mxu0 %v7515_v30  ;;  %1538 = vmatpush1.msra.mxu1 %v7517_v39  ;;  %11382 = vst [vmem:[#allocation53_spill] sm:$0xff] %v7533_v21  ;;  %v7535_v30 = vld [vmem:[#allocation16 + $0x158] sm:$0xff]  ;;  %v7539_v39 = vld [vmem:[#allocation16 + $0x140] sm:$0xff]  ;;  %11397 = vst [vmem:[#allocation68_spill] sm:$0xff] %v7575_v16 }
 0x1d0   : > { %1468 = vmatprep.subr.mxu0 %v7521_v48  ;;  %1539 = vmatprep.subr.mxu1 %v7523_v57  ;;  %11383 = vst [vmem:[#allocation54_spill] sm:$0xff] %v7535_v30  ;;  %11384 = vst [vmem:[#allocation55_spill] sm:$0xff] %v7539_v39  ;;  %v7541_v48 = vld [vmem:[#allocation16 + $0x150] sm:$0xff]  ;;  %v7545_v57 = vld [vmem:[#allocation16 + $0x128] sm:$0xff] }
 0x1d1   : > { %1469 = vmatpush1.msra.mxu0 %v7527_v3  ;;  %1540 = vmatpush1.msra.mxu1 %v7529_v58  ;;  %11385 = vst [vmem:[#allocation56_spill] sm:$0xff] %v7541_v48  ;;  %11386 = vst [vmem:[#allocation57_spill] sm:$0xff] %v7545_v57  ;;  %v7547_v3 = vld [vmem:[#allocation16 + $0x138] sm:$0xff]  ;;  %v7551_v58 = vld [vmem:[#allocation16 + $0x120] sm:$0xff] }
 0x1d2   : > { %1470 = vmatprep.subr.mxu0 %v7533_v21  ;;  %1541 = vmatprep.subr.mxu1 %v7535_v30  ;;  %11387 = vst [vmem:[#allocation58_spill] sm:$0xff] %v7547_v3  ;;  %11388 = vst [vmem:[#allocation59_spill] sm:$0xff] %v7551_v58  ;;  %v7553_v21 = vld [vmem:[#allocation16 + $0x130] sm:$0xff]  ;;  %v7557_v30 = vld [vmem:[#allocation16 + $0x108] sm:$0xff] }
 0x1d3   : > { %1471 = vmatpush1.msra.mxu0 %v7539_v39  ;;  %1542 = vmatpush1.msra.mxu1 %v7541_v48  ;;  %11389 = vst [vmem:[#allocation60_spill] sm:$0xff] %v7553_v21  ;;  %11390 = vst [vmem:[#allocation61_spill] sm:$0xff] %v7557_v30  ;;  %v7559_v39 = vld [vmem:[#allocation16 + $0x118] sm:$0xff]  ;;  %v7563_v48 = vld [vmem:[#allocation16 + $0x100] sm:$0xff] }
 0x1d4   : > { %1472 = vmatprep.subr.mxu0 %v7545_v57  ;;  %1543 = vmatprep.subr.mxu1 %v7547_v3  ;;  %11391 = vst [vmem:[#allocation62_spill] sm:$0xff] %v7559_v39  ;;  %11392 = vst [vmem:[#allocation63_spill] sm:$0xff] %v7563_v48  ;;  %v7565_v57 = vld [vmem:[#allocation16 + $0x110] sm:$0xff]  ;;  %v7567_v3 = vld [vmem:[#allocation16 + $0xe8] sm:$0xff] }
 0x1d5   : > { %1473 = vmatpush1.msra.mxu0 %v7551_v58  ;;  %1544 = vmatpush1.msra.mxu1 %v7553_v21  ;;  %11393 = vst [vmem:[#allocation64_spill] sm:$0xff] %v7565_v57  ;;  %11394 = vst [vmem:[#allocation65_spill] sm:$0xff] %v7567_v3  ;;  %v7571_v58 = vld [vmem:[#allocation16 + $0xf8] sm:$0xff]  ;;  %v7573_v21 = vld [vmem:[#allocation16 + $0xe0] sm:$0xff] }
 0x1d6   : > { %1474 = vmatprep.subr.mxu0 %v7557_v30  ;;  %1545 = vmatprep.subr.mxu1 %v7559_v39  ;;  %11395 = vst [vmem:[#allocation66_spill] sm:$0xff] %v7571_v58  ;;  %11396 = vst [vmem:[#allocation67_spill] sm:$0xff] %v7573_v21  ;;  %v7579_v39 = vld [vmem:[#allocation16 + $0xc8] sm:$0xff]  ;;  %v7581_v30 = vld [vmem:[#allocation16 + $0xd8] sm:$0xff] }
 0x1d7   : > { %1475 = vmatpush1.msra.mxu0 %v7563_v48  ;;  %1546 = vmatpush1.msra.mxu1 %v7565_v57  ;;  %11398 = vst [vmem:[#allocation69_spill] sm:$0xff] %v7579_v39  ;;  %11399 = vst [vmem:[#allocation70_spill] sm:$0xff] %v7581_v30  ;;  %v7587_v57 = vld [vmem:[#allocation16 + $0xd0] sm:$0xff]  ;;  %v7589_v48 = vld [vmem:[#allocation16 + $0xa8] sm:$0xff] }
 0x1d8   : > { %1476 = vmatprep.subr.mxu0 %v7567_v3  ;;  %1547 = vmatprep.subr.mxu1 %v7571_v58  ;;  %11401 = vst [vmem:[#allocation72_spill] sm:$0xff] %v7587_v57  ;;  %11402 = vst [vmem:[#allocation73_spill] sm:$0xff] %v7589_v48  ;;  %v7595_v58 = vld [vmem:[#allocation16 + $0xa0] sm:$0xff]  ;;  %v7597_v3 = vld [vmem:[#allocation16 + $0xb0] sm:$0xff] }
 0x1d9   : > { %1477 = vmatpush1.msra.mxu0 %v7573_v21  ;;  %1548 = vmatpush1.msra.mxu1 %v7575_v16  ;;  %11404 = vst [vmem:[#allocation75_spill] sm:$0xff] %v7595_v58  ;;  %11405 = vst [vmem:[#allocation76_spill] sm:$0xff] %v7597_v3  ;;  %v7601_v21 = vld [vmem:[#allocation16 + $0x88] sm:$0xff]  ;;  %v7603_v16 = vld [vmem:[#allocation16 + $0x98] sm:$0xff] }
 0x1da   : > { %1478 = vmatprep.subr.mxu0 %v7579_v39  ;;  %1549 = vmatprep.subr.mxu1 %v7581_v30  ;;  %11406 = vst [vmem:[#allocation77_spill] sm:$0xff] %v7601_v21  ;;  %11407 = vst [vmem:[#allocation78_spill] sm:$0xff] %v7603_v16  ;;  %v7609_v39 = vld [vmem:[#allocation16 + $0x90] sm:$0xff]  ;;  %v7613_v30 = vld [vmem:[#allocation16 + $0x68] sm:$0xff] }
 0x1db   : > { %1479 = vmatpush1.msra.mxu0 %v7583_v15  ;;  %1550 = vmatpush1.msra.mxu1 %v7587_v57  ;;  %11409 = vst [vmem:[#allocation80_spill] sm:$0xff] %v7609_v39  ;;  %11410 = vst [vmem:[#allocation81_spill] sm:$0xff] %v7613_v30  ;;  %v7615_v15 = vld [vmem:[#allocation16 + $0x78] sm:$0xff]  ;;  %v7619_v57 = vld [vmem:[#allocation16 + $0x60] sm:$0xff] }
 0x1dc   : > { %1480 = vmatprep.subr.mxu0 %v7589_v48  ;;  %1551 = vmatprep.subr.mxu1 %v7591_v14  ;;  %11411 = vst [vmem:[#allocation82_spill] sm:$0xff] %v7615_v15  ;;  %11412 = vst [vmem:[#allocation83_spill] sm:$0xff] %v7619_v57  ;;  %v7621_v48 = vld [vmem:[#allocation16 + $0x70] sm:$0xff]  ;;  %v7625_v14 = vld [vmem:[#allocation16 + $0x48] sm:$0xff] }
 0x1dd   : > { %1481 = vmatpush1.msra.mxu0 %v7595_v58  ;;  %1552 = vmatpush1.msra.mxu1 %v7597_v3  ;;  %11413 = vst [vmem:[#allocation84_spill] sm:$0xff] %v7621_v48  ;;  %11414 = vst [vmem:[#allocation85_spill] sm:$0xff] %v7625_v14  ;;  %v7627_v58 = vld [vmem:[#allocation16 + $0x58] sm:$0xff]  ;;  %v7631_v3 = vld [vmem:[#allocation16 + $0x40] sm:$0xff] }
 0x1de   : > { %1482 = vmatprep.subr.mxu0 %v7601_v21  ;;  %1553 = vmatprep.subr.mxu1 %v7603_v16  ;;  %11415 = vst [vmem:[#allocation86_spill] sm:$0xff] %v7627_v58  ;;  %11416 = vst [vmem:[#allocation87_spill] sm:$0xff] %v7631_v3  ;;  %v7633_v21 = vld [vmem:[#allocation16 + $0x50] sm:$0xff]  ;;  %v7637_v16 = vld [vmem:[#allocation16 + $0x28] sm:$0xff] }
 0x1df   : > { %1483 = vmatpush1.msra.mxu0 %v7607_v13  ;;  %1554 = vmatpush1.msra.mxu1 %v7609_v39  ;;  %11417 = vst [vmem:[#allocation88_spill] sm:$0xff] %v7633_v21  ;;  %11418 = vst [vmem:[#allocation89_spill] sm:$0xff] %v7637_v16  ;;  %v7639_v13 = vld [vmem:[#allocation16 + $0x38] sm:$0xff]  ;;  %v7643_v39 = vld [vmem:[#allocation16 + $0x20] sm:$0xff] }
 0x1e0   : > { %1484 = vmatprep.subr.mxu0 %v7613_v30  ;;  %1555 = vmatprep.subr.mxu1 %v7615_v15  ;;  %11419 = vst [vmem:[#allocation90_spill] sm:$0xff] %v7639_v13  ;;  %11420 = vst [vmem:[#allocation91_spill] sm:$0xff] %v7643_v39  ;;  %v7645_v30 = vld [vmem:[#allocation16 + $0x30] sm:$0xff]  ;;  %v7649_v15 = vld [vmem:[#allocation16 + $0x8] sm:$0xff] }
 0x1e1   : > { %1485 = vmatpush1.msra.mxu0 %v7619_v57  ;;  %1556 = vmatpush1.msra.mxu1 %v7621_v48  ;;  %11421 = vst [vmem:[#allocation92_spill] sm:$0xff] %v7645_v30  ;;  %11422 = vst [vmem:[#allocation93_spill] sm:$0xff] %v7649_v15  ;;  %v7651_v57 = vld [vmem:[#allocation16 + $0x18] sm:$0xff]  ;;  %v7655_v48 = vld [vmem:[#allocation16] sm:$0xff] }
 0x1e2   : > { %1486 = vmatprep.subr.mxu0 %v7625_v14  ;;  %1557 = vmatprep.subr.mxu1 %v7627_v58  ;;  %11423 = vst [vmem:[#allocation94_spill] sm:$0xff] %v7651_v57  ;;  %11424 = vst [vmem:[#allocation95_spill] sm:$0xff] %v7655_v48  ;;  %v7657_v14 = vld [vmem:[#allocation16 + $0x10] sm:$0xff]  ;;  %v7661_v58 = vld [vmem:[#allocation18 + $0x1e8] sm:$0xff] }
 0x1e3   : > { %1487 = vmatpush1.msra.mxu0 %v7631_v3  ;;  %1558 = vmatpush1.msra.mxu1 %v7633_v21  ;;  %11425 = vst [vmem:[#allocation96_spill] sm:$0xff] %v7657_v14  ;;  %11426 = vst [vmem:[#allocation97_spill] sm:$0xff] %v7661_v58  ;;  %v7663_v3 = vld [vmem:[#allocation18 + $0x1f8] sm:$0xff]  ;;  %v1272_v21 = vld [vmem:[#allocation3 + $0x10] sm:$0xff] }
 0x1e4   : > { %1488 = vmatprep.subr.mxu0 %v7637_v16  ;;  %1559 = vmatprep.subr.mxu1 %v7639_v13  ;;  %11427 = vst [vmem:[#allocation98_spill] sm:$0xff] %v7663_v3 }
 0x1e5   : > { %1489 = vmatpush1.msra.mxu0 %v7643_v39  ;;  %1560 = vmatpush1.msra.mxu1 %v7645_v30 }
 0x1e6   : > { %1490 = vmatprep.subr.mxu0 %v7649_v15  ;;  %1561 = vmatprep.subr.mxu1 %v7651_v57  ;;  %v7679_v15 = vld [vmem:[#allocation3 + $0x18] sm:$0xff] }
 0x1e7   : > { %1491 = vmatpush1.msra.mxu0 %v7655_v48  ;;  %1562 = vmatpush1.msra.mxu1 %v7657_v14 }
 0x1e8   : > { %1627 = vmatprep.subr.mxu0 %v7661_v58  ;;  %1698 = vmatprep.subr.mxu1 %v7663_v3  ;;  %v1273_v58 = vld [vmem:[#allocation3] sm:$0xff]  ;;  %v7686_v3 = vld [vmem:[#allocation3 + $0x8] sm:$0xff] }
 0x256   : > { %v7671_v13 = vpop.f32.mrf.mxu0  ;;  %v7673_v39 = vpop.f32.mrf.mxu1 }
 0x258   : > { %v7675_v30 = vpop.f32.mrf.mxu0  ;;  %v7677_v16 = vpop.f32.mrf.mxu1 }
 0x25c   : > { %v893_v57 = vpop.f32.mrf.mxu0  ;;  %v1006_v12 = vpop.f32.mrf.mxu1 }
 0x25d   : > { %v7681_v48 = vadd.f32 %v1272_v21, %v893_v57  ;;  %v7684_v14 = vadd.f32 %v7679_v15, %v1006_v12 }
 0x25e   : > { %v895_v11 = vpop.f32.mrf.mxu0  ;;  %v1008_v10 = vpop.f32.mrf.mxu1 }
 0x25f   : > { %11428 = vst [vmem:[#allocation99_spill] sm:$0xff] %v7681_v48  ;;  %11429 = vst [vmem:[#allocation100_spill] sm:$0xff] %v7684_v14  ;;  %v7688_v9 = vadd.f32 %v1273_v58, %v895_v11  ;;  %v7691_v8 = vadd.f32 %v7686_v3, %v1008_v10 }
 0x261   : > { %11430 = vst [vmem:[#allocation101_spill] sm:$0xff] %v7688_v9  ;;  %11431 = vst [vmem:[#allocation102_spill] sm:$0xff] %v7691_v8 }
 0x262   : > { %v899_v7 = vpop.f32.mrf.mxu0  ;;  %v1012_v6 = vpop.f32.mrf.mxu1 }
 0x263   : > { %v7693_v5 = vadd.f32 %v1272_v21, %v899_v7  ;;  %v7696_v57 = vadd.f32 %v7679_v15, %v1012_v6 }
 0x264   : > { %v901_v48 = vpop.f32.mrf.mxu0  ;;  %v1014_v12 = vpop.f32.mrf.mxu1 }
 0x265   : > { %11432 = vst [vmem:[#allocation103_spill] sm:$0xff] %v7693_v5  ;;  %11433 = vst [vmem:[#allocation104_spill] sm:$0xff] %v7696_v57  ;;  %v7698_v14 = vadd.f32 %v1273_v58, %v901_v48  ;;  %v7701_v4 = vadd.f32 %v7686_v3, %v1014_v12 }
 0x267   : > { %11434 = vst [vmem:[#allocation105_spill] sm:$0xff] %v7698_v14  ;;  %11435 = vst [vmem:[#allocation106_spill] sm:$0xff] %v7701_v4 }
 0x268   : > { %v905_v2 = vpop.f32.mrf.mxu0  ;;  %v1018_v11 = vpop.f32.mrf.mxu1 }
 0x269   : > { %v7703_v9 = vadd.f32 %v1272_v21, %v905_v2  ;;  %v7706_v10 = vadd.f32 %v7679_v15, %v1018_v11 }
 0x26a   : > { %v907_v8 = vpop.f32.mrf.mxu0  ;;  %v1020_v7 = vpop.f32.mrf.mxu1 }
 0x26b   : > { %11436 = vst [vmem:[#allocation107_spill] sm:$0xff] %v7703_v9  ;;  %11437 = vst [vmem:[#allocation108_spill] sm:$0xff] %v7706_v10  ;;  %v7708_v5 = vadd.f32 %v1273_v58, %v907_v8  ;;  %v7711_v6 = vadd.f32 %v7686_v3, %v1020_v7 }
 0x26d   : > { %11438 = vst [vmem:[#allocation109_spill] sm:$0xff] %v7708_v5  ;;  %11439 = vst [vmem:[#allocation110_spill] sm:$0xff] %v7711_v6 }
 0x26e   : > { %v911_v57 = vpop.f32.mrf.mxu0  ;;  %v1024_v48 = vpop.f32.mrf.mxu1 }
 0x26f   : > { %v7713_v14 = vadd.f32 %v1272_v21, %v911_v57  ;;  %v7716_v12 = vadd.f32 %v7679_v15, %v1024_v48 }
 0x270   : > { %v913_v4 = vpop.f32.mrf.mxu0  ;;  %v1026_v2 = vpop.f32.mrf.mxu1 }
 0x271   : > { %11440 = vst [vmem:[#allocation111_spill] sm:$0xff] %v7713_v14  ;;  %11441 = vst [vmem:[#allocation112_spill] sm:$0xff] %v7716_v12  ;;  %v7718_v9 = vadd.f32 %v1273_v58, %v913_v4  ;;  %v7721_v11 = vadd.f32 %v7686_v3, %v1026_v2 }
 0x273   : > { %11442 = vst [vmem:[#allocation113_spill] sm:$0xff] %v7718_v9  ;;  %11443 = vst [vmem:[#allocation114_spill] sm:$0xff] %v7721_v11 }
 0x274   : > { %v917_v10 = vpop.f32.mrf.mxu0  ;;  %v1030_v8 = vpop.f32.mrf.mxu1 }
 0x275   : > { %v7723_v5 = vadd.f32 %v1272_v21, %v917_v10  ;;  %v7726_v7 = vadd.f32 %v7679_v15, %v1030_v8 }
 0x276   : > { %v919_v6 = vpop.f32.mrf.mxu0  ;;  %v1032_v57 = vpop.f32.mrf.mxu1 }
 0x277   : > { %11444 = vst [vmem:[#allocation115_spill] sm:$0xff] %v7723_v5  ;;  %11445 = vst [vmem:[#allocation116_spill] sm:$0xff] %v7726_v7  ;;  %v7728_v14 = vadd.f32 %v1273_v58, %v919_v6  ;;  %v7731_v48 = vadd.f32 %v7686_v3, %v1032_v57 }
 0x279   : > { %11446 = vst [vmem:[#allocation117_spill] sm:$0xff] %v7728_v14  ;;  %11447 = vst [vmem:[#allocation118_spill] sm:$0xff] %v7731_v48 }
 0x27a   : > { %v923_v12 = vpop.f32.mrf.mxu0  ;;  %v1036_v4 = vpop.f32.mrf.mxu1 }
 0x27b   : > { %v7733_v9 = vadd.f32 %v1272_v21, %v923_v12  ;;  %v7736_v2 = vadd.f32 %v7679_v15, %v1036_v4 }
 0x27c   : > { %v925_v11 = vpop.f32.mrf.mxu0  ;;  %v1038_v10 = vpop.f32.mrf.mxu1 }
 0x27d   : > { %11448 = vst [vmem:[#allocation119_spill] sm:$0xff] %v7733_v9  ;;  %11449 = vst [vmem:[#allocation120_spill] sm:$0xff] %v7736_v2  ;;  %v7738_v5 = vadd.f32 %v1273_v58, %v925_v11  ;;  %v7741_v8 = vadd.f32 %v7686_v3, %v1038_v10  ;;  %v1286_v11 = vadd.f32 %v1272_v21, %v7671_v13 }
 0x27e   : > { %v1287_v10 = vadd.f32 %v1273_v58, %v7675_v30 }
 0x27f   : > { %11450 = vst [vmem:[#allocation121_spill] sm:$0xff] %v7738_v5  ;;  %11451 = vst [vmem:[#allocation122_spill] sm:$0xff] %v7741_v8 }
 0x280   : > { %v929_v7 = vpop.f32.mrf.mxu0  ;;  %v1042_v6 = vpop.f32.mrf.mxu1 }
 0x281   : > { %v7743_v14 = vadd.f32 %v1272_v21, %v929_v7  ;;  %v7746_v57 = vadd.f32 %v7679_v15, %v1042_v6 }
 0x282   : > { %v931_v48 = vpop.f32.mrf.mxu0  ;;  %v1044_v12 = vpop.f32.mrf.mxu1 }
 0x283   : > { %11452 = vst [vmem:[#allocation123_spill] sm:$0xff] %v7743_v14  ;;  %11453 = vst [vmem:[#allocation124_spill] sm:$0xff] %v7746_v57  ;;  %v7748_v9 = vadd.f32 %v1273_v58, %v931_v48  ;;  %v7751_v4 = vadd.f32 %v7686_v3, %v1044_v12  ;;  %v1289_v48 = vadd.f32 %v7686_v3, %v7677_v16 }
 0x284   : > { %v1288_v12 = vadd.f32 %v7679_v15, %v7673_v39  ;;  %v7764_v39 = vld [vmem:[#allocation18 + $0x1e0] sm:$0xff] }
 0x285   : > { %11454 = vst [vmem:[#allocation125_spill] sm:$0xff] %v7748_v9  ;;  %11455 = vst [vmem:[#allocation126_spill] sm:$0xff] %v7751_v4 }
 0x286   : > { %v1356_v2 = vpop.f32.mrf.mxu0  ;;  %v1427_v14 = vpop.f32.mrf.mxu1 }
 0x287   : > { %v1432_v8 = vadd.f32 %v1356_v2, %v1286_v11  ;;  %v1434_v4 = vadd.f32 %v1427_v14, %v1288_v12  ;;  %v7774_v12 = vld [vmem:[#allocation18 + $0x1c0] sm:$0xff] }
 0x288   : > { %v1358_v5 = vpop.f32.mrf.mxu0  ;;  %v1429_v57 = vpop.f32.mrf.mxu1 }
 0x289   : > { %v5535_v1 = vmul.f32 -1.442695, %v1432_v8  ;;  %v1433_v7 = vadd.f32 %v1358_v5, %v1287_v10  ;;  %v1435_v9 = vadd.f32 %v1429_v57, %v1289_v48  ;;  %v1277_v8 = vld [vmem:[#allocation22] sm:$0xff]  ;;  %v7770_v48 = vld [vmem:[#allocation18 + $0x1d8] sm:$0xff] }
 0x28b   : > { %5750 = vpow2.f32 %v5535_v1  ;;  %v5536_v6 = vmul.f32 -1.442695, %v1433_v7  ;;  %v5537_v13 = vmul.f32 -1.442695, %v1435_v9 }
 0x28d   : > { %5752 = vpow2.f32 %v5536_v6  ;;  %v7768_v6 = vld [vmem:[#allocation18 + $0x1c8] sm:$0xff] }
 0x28e   : > { %5754 = vpow2.f32 %v5537_v13  ;;  %v7776_v13 = vld [vmem:[#allocation18 + $0x1d0] sm:$0xff] }
 0x298   : > { %v5751_v21 = vpop.eup %5750 }
 0x299   : > { %v1439_v58 = vadd.f32 1.0, %v5751_v21  ;;  %v7780_v21 = vld [vmem:[#allocation18 + $0x1a8] sm:$0xff] }
 0x29a   : > { %v5753_v30 = vpop.eup %5752 }
 0x29b   : > { %5756 = vrcp.f32 %v1439_v58  ;;  %v1445_v5 = vadd.f32 1.0, %v5753_v30  ;;  %v5755_v1 = vpop.eup %5754  ;;  %v7782_v58 = vld [vmem:[#allocation18 + $0x1b8] sm:$0xff]  ;;  %v7786_v30 = vld [vmem:[#allocation18 + $0x1a0] sm:$0xff] }
 0x29c   : > { %5758 = vtanh.f32 %v1434_v4  ;;  %v1452_v16 = vadd.f32 1.0, %v5755_v1  ;;  %v7766_v4 = vld [vmem:[#allocation18 + $0x1f0] sm:$0xff]  ;;  %v7792_v1 = vld [vmem:[#allocation18 + $0x188] sm:$0xff] }
 0x29d   : > { %5760 = vrcp.f32 %v1445_v5  ;;  %v7788_v5 = vld [vmem:[#allocation18 + $0x1b0] sm:$0xff]  ;;  %11457 = vst [vmem:[#allocation128_spill] sm:$0xff] %v7792_v1 }
 0x29e   : > { %5762 = vrcp.f32 %v1452_v16  ;;  %11456 = vst [vmem:[#allocation127_spill] sm:$0xff] %v7788_v5  ;;  %v7806_v16 = vld [vmem:[#allocation18 + $0x178] sm:$0xff] }
 0x29f   : > { %11462 = vst [vmem:[#allocation133_spill] sm:$0xff] %v7806_v16 }
 0x2a8   : > { %v5757_v2 = vpop.eup %5756 }
 0x2a9   : > { %v5759_v11 = vpop.eup %5758 }
 0x2aa   : > { %v5761_v10 = vpop.eup %5760  ;;  %v1456_v3 = vmul.f32 %v5759_v11, %v5757_v2  ;;  %v7794_v2 = vld [vmem:[#allocation18 + $0x198] sm:$0xff]  ;;  %v7800_v11 = vld [vmem:[#allocation18 + $0x190] sm:$0xff] }
 0x2ab   : > { %v1455_v57 = vmul.f32 %v5761_v10, %v1277_v8  ;;  %v5763_v9 = vpop.eup %5762  ;;  %11458 = vst [vmem:[#allocation129_spill] sm:$0xff] %v7794_v2  ;;  %v7798_v8 = vld [vmem:[#allocation18 + $0x180] sm:$0xff]  ;;  %11460 = vst [vmem:[#allocation131_spill] sm:$0xff] %v7800_v11  ;;  %v7804_v10 = vld [vmem:[#allocation18 + $0x168] sm:$0xff] }
 0x2ac   : > { %11459 = vst [vmem:[#allocation130_spill] sm:$0xff] %v7798_v8  ;;  %11461 = vst [vmem:[#allocation132_spill] sm:$0xff] %v7804_v10 }
 0x2ad   : > { %v7759_v7 = vadd.f32 %v1456_v3, %v1455_v57  ;;  %v7810_v3 = vld [vmem:[#allocation18 + $0x160] sm:$0xff]  ;;  %v7812_v57 = vld [vmem:[#allocation18 + $0x170] sm:$0xff] }
 0x2ae   : > { %11463 = vst [vmem:[#allocation134_spill] sm:$0xff] %v7810_v3  ;;  %11464 = vst [vmem:[#allocation135_spill] sm:$0xff] %v7812_v57 }
 0x2af   : > { %5764 = vtanh.f32 %v7759_v7 }
 0x2bc   : > { %v5765_v14 = vpop.eup %5764 }
 0x2bd   : > { %v7762_v15 = vmul.f32 %v5765_v14, %v5763_v9  ;;  %v7816_v9 = vld [vmem:[#allocation18 + $0x148] sm:$0xff]  ;;  %v7818_v14 = vld [vmem:[#allocation18 + $0x158] sm:$0xff] }
 0x2be   : > { %11465 = vst [vmem:[#allocation136_spill] sm:$0xff] %v7816_v9  ;;  %11466 = vst [vmem:[#allocation137_spill] sm:$0xff] %v7818_v14 }
 0x2bf   : > { %1525 = vmatmul.mubr.f32.vlgmr.msra.gmra.mxu0 %v7762_v15  ;;  %1596 = vmatmul.mubr.f32.vlgmr.msra.gmra.mxu1 %v7762_v15 }
 0x2c0   : > { %1628 = vmatpush1.msra.mxu0 %v7764_v39  ;;  %1699 = vmatpush1.msra.mxu1 %v7766_v4 }
 0x2c1   : > { %1629 = vmatprep.subr.mxu0 %v7768_v6  ;;  %1700 = vmatprep.subr.mxu1 %v7770_v48 }
 0x2c2   : > { %1630 = vmatpush1.msra.mxu0 %v7774_v12  ;;  %1701 = vmatpush1.msra.mxu1 %v7776_v13 }
 0x2c3   : > { %1631 = vmatprep.subr.mxu0 %v7780_v21  ;;  %1702 = vmatprep.subr.mxu1 %v7782_v58 }
 0x2c4   : > { %1632 = vmatpush1.msra.mxu0 %v7786_v30  ;;  %1703 = vmatpush1.msra.mxu1 %v7788_v5  ;;  %v7822_v5 = vld [vmem:[#allocation18 + $0x140] sm:$0xff] }
 0x2c5   : > { %1633 = vmatprep.subr.mxu0 %v7792_v1  ;;  %1704 = vmatprep.subr.mxu1 %v7794_v2  ;;  %11467 = vst [vmem:[#allocation138_spill] sm:$0xff] %v7822_v5  ;;  %v7824_v1 = vld [vmem:[#allocation18 + $0x150] sm:$0xff]  ;;  %v7828_v2 = vld [vmem:[#allocation18 + $0x128] sm:$0xff] }
 0x2c6   : > { %1634 = vmatpush1.msra.mxu0 %v7798_v8  ;;  %1705 = vmatpush1.msra.mxu1 %v7800_v11  ;;  %11468 = vst [vmem:[#allocation139_spill] sm:$0xff] %v7824_v1  ;;  %11469 = vst [vmem:[#allocation140_spill] sm:$0xff] %v7828_v2  ;;  %v7830_v8 = vld [vmem:[#allocation18 + $0x138] sm:$0xff]  ;;  %v7834_v11 = vld [vmem:[#allocation18 + $0x120] sm:$0xff] }
 0x2c7   : > { %1635 = vmatprep.subr.mxu0 %v7804_v10  ;;  %1706 = vmatprep.subr.mxu1 %v7806_v16  ;;  %11470 = vst [vmem:[#allocation141_spill] sm:$0xff] %v7830_v8  ;;  %11471 = vst [vmem:[#allocation142_spill] sm:$0xff] %v7834_v11  ;;  %v7836_v10 = vld [vmem:[#allocation18 + $0x130] sm:$0xff]  ;;  %v7840_v16 = vld [vmem:[#allocation18 + $0x108] sm:$0xff] }
 0x2c8   : > { %1636 = vmatpush1.msra.mxu0 %v7810_v3  ;;  %1707 = vmatpush1.msra.mxu1 %v7812_v57  ;;  %11472 = vst [vmem:[#allocation143_spill] sm:$0xff] %v7836_v10  ;;  %11473 = vst [vmem:[#allocation144_spill] sm:$0xff] %v7840_v16  ;;  %v7842_v3 = vld [vmem:[#allocation18 + $0x118] sm:$0xff]  ;;  %v7846_v57 = vld [vmem:[#allocation18 + $0x100] sm:$0xff] }
 0x2c9   : > { %1637 = vmatprep.subr.mxu0 %v7816_v9  ;;  %1708 = vmatprep.subr.mxu1 %v7818_v14  ;;  %11474 = vst [vmem:[#allocation145_spill] sm:$0xff] %v7842_v3  ;;  %11475 = vst [vmem:[#allocation146_spill] sm:$0xff] %v7846_v57  ;;  %v7848_v9 = vld [vmem:[#allocation18 + $0x110] sm:$0xff]  ;;  %v7852_v14 = vld [vmem:[#allocation18 + $0xe8] sm:$0xff] }
 0x2ca   : > { %1638 = vmatpush1.msra.mxu0 %v7822_v5  ;;  %1709 = vmatpush1.msra.mxu1 %v7824_v1  ;;  %11476 = vst [vmem:[#allocation147_spill] sm:$0xff] %v7848_v9  ;;  %11477 = vst [vmem:[#allocation148_spill] sm:$0xff] %v7852_v14  ;;  %v7854_v5 = vld [vmem:[#allocation18 + $0xf8] sm:$0xff]  ;;  %v7858_v1 = vld [vmem:[#allocation18 + $0xe0] sm:$0xff] }
 0x2cb   : > { %1639 = vmatprep.subr.mxu0 %v7828_v2  ;;  %1710 = vmatprep.subr.mxu1 %v7830_v8  ;;  %11478 = vst [vmem:[#allocation149_spill] sm:$0xff] %v7854_v5  ;;  %11479 = vst [vmem:[#allocation150_spill] sm:$0xff] %v7858_v1  ;;  %v7860_v2 = vld [vmem:[#allocation18 + $0xf0] sm:$0xff]  ;;  %v7864_v8 = vld [vmem:[#allocation18 + $0xc8] sm:$0xff] }
 0x2cc   : > { %1640 = vmatpush1.msra.mxu0 %v7834_v11  ;;  %1711 = vmatpush1.msra.mxu1 %v7836_v10  ;;  %11480 = vst [vmem:[#allocation151_spill] sm:$0xff] %v7860_v2  ;;  %11481 = vst [vmem:[#allocation152_spill] sm:$0xff] %v7864_v8  ;;  %v7866_v11 = vld [vmem:[#allocation18 + $0xd8] sm:$0xff]  ;;  %v7870_v10 = vld [vmem:[#allocation18 + $0xc0] sm:$0xff] }
 0x2cd   : > { %1641 = vmatprep.subr.mxu0 %v7840_v16  ;;  %1712 = vmatprep.subr.mxu1 %v7842_v3  ;;  %11482 = vst [vmem:[#allocation153_spill] sm:$0xff] %v7866_v11  ;;  %11483 = vst [vmem:[#allocation154_spill] sm:$0xff] %v7870_v10  ;;  %v7872_v16 = vld [vmem:[#allocation18 + $0xd0] sm:$0xff]  ;;  %v7876_v3 = vld [vmem:[#allocation18 + $0xa8] sm:$0xff] }
 0x2ce   : > { %1642 = vmatpush1.msra.mxu0 %v7846_v57  ;;  %1713 = vmatpush1.msra.mxu1 %v7848_v9  ;;  %11484 = vst [vmem:[#allocation155_spill] sm:$0xff] %v7872_v16  ;;  %11485 = vst [vmem:[#allocation156_spill] sm:$0xff] %v7876_v3  ;;  %v7878_v57 = vld [vmem:[#allocation18 + $0xb8] sm:$0xff]  ;;  %v7882_v9 = vld [vmem:[#allocation18 + $0xa0] sm:$0xff] }
 0x2cf   : > { %1643 = vmatprep.subr.mxu0 %v7852_v14  ;;  %1714 = vmatprep.subr.mxu1 %v7854_v5  ;;  %11486 = vst [vmem:[#allocation157_spill] sm:$0xff] %v7878_v57  ;;  %11487 = vst [vmem:[#allocation158_spill] sm:$0xff] %v7882_v9  ;;  %v7884_v14 = vld [vmem:[#allocation18 + $0xb0] sm:$0xff]  ;;  %v7888_v5 = vld [vmem:[#allocation18 + $0x88] sm:$0xff] }
 0x2d0   : > { %1644 = vmatpush1.msra.mxu0 %v7858_v1  ;;  %1715 = vmatpush1.msra.mxu1 %v7860_v2  ;;  %11488 = vst [vmem:[#allocation159_spill] sm:$0xff] %v7884_v14  ;;  %11489 = vst [vmem:[#allocation160_spill] sm:$0xff] %v7888_v5  ;;  %v7890_v1 = vld [vmem:[#allocation18 + $0x98] sm:$0xff]  ;;  %v7894_v2 = vld [vmem:[#allocation18 + $0x80] sm:$0xff] }
 0x2d1   : > { %1645 = vmatprep.subr.mxu0 %v7864_v8  ;;  %1716 = vmatprep.subr.mxu1 %v7866_v11  ;;  %11490 = vst [vmem:[#allocation161_spill] sm:$0xff] %v7890_v1  ;;  %11491 = vst [vmem:[#allocation162_spill] sm:$0xff] %v7894_v2  ;;  %v7896_v8 = vld [vmem:[#allocation18 + $0x90] sm:$0xff]  ;;  %v7900_v11 = vld [vmem:[#allocation18 + $0x68] sm:$0xff] }
 0x2d2   : > { %1646 = vmatpush1.msra.mxu0 %v7870_v10  ;;  %1717 = vmatpush1.msra.mxu1 %v7872_v16  ;;  %11492 = vst [vmem:[#allocation163_spill] sm:$0xff] %v7896_v8  ;;  %11493 = vst [vmem:[#allocation164_spill] sm:$0xff] %v7900_v11  ;;  %v7902_v10 = vld [vmem:[#allocation18 + $0x78] sm:$0xff]  ;;  %v7906_v16 = vld [vmem:[#allocation18 + $0x60] sm:$0xff] }
 0x2d3   : > { %1647 = vmatprep.subr.mxu0 %v7876_v3  ;;  %1718 = vmatprep.subr.mxu1 %v7878_v57  ;;  %11494 = vst [vmem:[#allocation165_spill] sm:$0xff] %v7902_v10  ;;  %11495 = vst [vmem:[#allocation166_spill] sm:$0xff] %v7906_v16  ;;  %v7908_v3 = vld [vmem:[#allocation18 + $0x70] sm:$0xff]  ;;  %v7912_v57 = vld [vmem:[#allocation18 + $0x48] sm:$0xff] }
 0x2d4   : > { %1648 = vmatpush1.msra.mxu0 %v7882_v9  ;;  %1719 = vmatpush1.msra.mxu1 %v7884_v14  ;;  %11496 = vst [vmem:[#allocation167_spill] sm:$0xff] %v7908_v3  ;;  %v7914_v9 = vld [vmem:[#allocation18 + $0x58] sm:$0xff]  ;;  %v7918_v14 = vld [vmem:[#allocation18 + $0x40] sm:$0xff] }
 0x2d5   : > { %1649 = vmatprep.subr.mxu0 %v7888_v5  ;;  %1720 = vmatprep.subr.mxu1 %v7890_v1  ;;  %11497 = vst [vmem:[#allocation168_spill] sm:$0xff] %v7914_v9  ;;  %11498 = vst [vmem:[#allocation169_spill] sm:$0xff] %v7918_v14  ;;  %v7920_v5 = vld [vmem:[#allocation18 + $0x50] sm:$0xff]  ;;  %v7924_v1 = vld [vmem:[#allocation18 + $0x28] sm:$0xff] }
 0x2d6   : > { %1650 = vmatpush1.msra.mxu0 %v7894_v2  ;;  %1721 = vmatpush1.msra.mxu1 %v7896_v8  ;;  %11499 = vst [vmem:[#allocation170_spill] sm:$0xff] %v7920_v5  ;;  %v7926_v2 = vld [vmem:[#allocation18 + $0x38] sm:$0xff]  ;;  %v7930_v8 = vld [vmem:[#allocation18 + $0x20] sm:$0xff] }
 0x2d7   : > { %1651 = vmatprep.subr.mxu0 %v7900_v11  ;;  %1722 = vmatprep.subr.mxu1 %v7902_v10  ;;  %11500 = vst [vmem:[#allocation171_spill] sm:$0xff] %v7930_v8  ;;  %v7932_v11 = vld [vmem:[#allocation18 + $0x30] sm:$0xff]  ;;  %v7936_v10 = vld [vmem:[#allocation18 + $0x8] sm:$0xff] }
 0x2d8   : > { %1652 = vmatpush1.msra.mxu0 %v7906_v16  ;;  %1723 = vmatpush1.msra.mxu1 %v7908_v3  ;;  %11501 = vst [vmem:[#allocation172_spill] sm:$0xff] %v7932_v11  ;;  %v7938_v16 = vld [vmem:[#allocation18 + $0x18] sm:$0xff]  ;;  %v7942_v3 = vld [vmem:[#allocation18] sm:$0xff] }
 0x2d9   : > { %1653 = vmatprep.subr.mxu0 %v7912_v57  ;;  %1724 = vmatprep.subr.mxu1 %v7914_v9  ;;  %11502 = vst [vmem:[#allocation173_spill] sm:$0xff] %v7938_v16  ;;  %11503 = vst [vmem:[#allocation174_spill] sm:$0xff] %v7942_v3  ;;  %v7946_v9 = vld [vmem:[#allocation18 + $0x10] sm:$0xff] }
 0x2da   : > { %1654 = vmatpush1.msra.mxu0 %v7918_v14  ;;  %1725 = vmatpush1.msra.mxu1 %v7920_v5  ;;  %11504 = vst [vmem:[#allocation175_spill] sm:$0xff] %v7946_v9  ;;  %v1279_v5 = vld [vmem:[#allocation20 + $0x8] sm:$0xff]  ;;  %v11505_v14 = vmov 0.0  }
 0x2db   : > { %1655 = vmatprep.subr.mxu0 %v7924_v1  ;;  %1726 = vmatprep.subr.mxu1 %v7926_v2 }
 0x2dc   : > { %1656 = vmatpush1.msra.mxu0 %v7930_v8  ;;  %1727 = vmatpush1.msra.mxu1 %v7932_v11  ;;  %v7954_v8 = vld [vmem:[#allocation15 + $0x1e8] sm:$0xff]  ;;  %v7957_v11 = vld [vmem:[#allocation15 + $0x1f8] sm:$0xff] }
 0x2dd   : > { %1657 = vmatprep.subr.mxu0 %v7936_v10  ;;  %1728 = vmatprep.subr.mxu1 %v7938_v16  ;;  %11506 = vst [vmem:[#allocation176_spill] sm:$0xff] %v7954_v8  ;;  %11507 = vst [vmem:[#allocation177_spill] sm:$0xff] %v7957_v11  ;;  %v7960_v16 = vld [vmem:[#allocation15 + $0x1e0] sm:$0xff] }
 0x2de   : > { %1658 = vmatpush1.msra.mxu0 %v7942_v3  ;;  %1691 = vmatprep.mubr.f32.mxu0 %v11505_v14  ;;  %11508 = vst [vmem:[#allocation178_spill] sm:$0xff] %v7960_v16  ;;  %v7963_v3 = vld [vmem:[#allocation15 + $0x1f0] sm:$0xff] }
 0x2df   : > { %1729 = vmatpush1.msra.mxu1 %v7946_v9  ;;  %1762 = vmatprep.mubr.f32.mxu1 %v11505_v14  ;;  %11509 = vst [vmem:[#allocation179_spill] sm:$0xff] %v7963_v3  ;;  %v7966_v9 = vld [vmem:[#allocation15 + $0x1c8] sm:$0xff] }
 0x2e0   : > { %1692 = vmatmul.mubr.f32.vlgmr.msra.gmra.mxu0 %v1279_v5  ;;  %1763 = vmatmul.mubr.f32.vlgmr.msra.gmra.mxu1 %v1279_v5  ;;  %11510 = vst [vmem:[#allocation180_spill] sm:$0xff] %v7966_v9  ;;  %v7969_v5 = vld [vmem:[#allocation15 + $0x1d8] sm:$0xff] }
 0x2e1   : > { %1807 = vmatprep.subr.mxu0 %v7954_v8  ;;  %1878 = vmatprep.subr.mxu1 %v7957_v11  ;;  %11511 = vst [vmem:[#allocation181_spill] sm:$0xff] %v7969_v5  ;;  %v7972_v8 = vld [vmem:[#allocation15 + $0x1c0] sm:$0xff]  ;;  %v7975_v11 = vld [vmem:[#allocation15 + $0x1d0] sm:$0xff] }
 0x2e2   : > { %1808 = vmatpush1.msra.mxu0 %v7960_v16  ;;  %1879 = vmatpush1.msra.mxu1 %v7963_v3  ;;  %11512 = vst [vmem:[#allocation182_spill] sm:$0xff] %v7972_v8  ;;  %11513 = vst [vmem:[#allocation183_spill] sm:$0xff] %v7975_v11  ;;  %v7978_v16 = vld [vmem:[#allocation15 + $0x1a8] sm:$0xff]  ;;  %v7981_v3 = vld [vmem:[#allocation15 + $0x1b8] sm:$0xff] }
 0x2e3   : > { %1809 = vmatprep.subr.mxu0 %v7966_v9  ;;  %1880 = vmatprep.subr.mxu1 %v7969_v5  ;;  %11514 = vst [vmem:[#allocation184_spill] sm:$0xff] %v7978_v16  ;;  %11515 = vst [vmem:[#allocation185_spill] sm:$0xff] %v7981_v3  ;;  %v7984_v9 = vld [vmem:[#allocation15 + $0x1a0] sm:$0xff]  ;;  %v7987_v5 = vld [vmem:[#allocation15 + $0x1b0] sm:$0xff] }
 0x2e4   : > { %1810 = vmatpush1.msra.mxu0 %v7972_v8  ;;  %1881 = vmatpush1.msra.mxu1 %v7975_v11  ;;  %11516 = vst [vmem:[#allocation186_spill] sm:$0xff] %v7984_v9  ;;  %11517 = vst [vmem:[#allocation187_spill] sm:$0xff] %v7987_v5  ;;  %v7990_v8 = vld [vmem:[#allocation15 + $0x188] sm:$0xff]  ;;  %v7993_v11 = vld [vmem:[#allocation15 + $0x198] sm:$0xff] }
 0x2e5   : > { %1811 = vmatprep.subr.mxu0 %v7978_v16  ;;  %1882 = vmatprep.subr.mxu1 %v7981_v3  ;;  %11518 = vst [vmem:[#allocation188_spill] sm:$0xff] %v7990_v8  ;;  %11519 = vst [vmem:[#allocation189_spill] sm:$0xff] %v7993_v11  ;;  %v7996_v16 = vld [vmem:[#allocation15 + $0x180] sm:$0xff]  ;;  %v7999_v3 = vld [vmem:[#allocation15 + $0x190] sm:$0xff] }
 0x2e6   : > { %1812 = vmatpush1.msra.mxu0 %v7984_v9  ;;  %1883 = vmatpush1.msra.mxu1 %v7987_v5  ;;  %v8002_v9 = vld [vmem:[#allocation15 + $0x168] sm:$0xff]  ;;  %v8005_v5 = vld [vmem:[#allocation15 + $0x178] sm:$0xff] }
 0x2e7   : > { %1813 = vmatprep.subr.mxu0 %v7990_v8  ;;  %1884 = vmatprep.subr.mxu1 %v7993_v11  ;;  %v8008_v8 = vld [vmem:[#allocation15 + $0x160] sm:$0xff]  ;;  %v8011_v11 = vld [vmem:[#allocation15 + $0x170] sm:$0xff] }
 0x2e8   : > { %1814 = vmatpush1.msra.mxu0 %v7996_v16  ;;  %1885 = vmatpush1.msra.mxu1 %v7999_v3 }
 0x2e9   : > { %1815 = vmatprep.subr.mxu0 %v8002_v9  ;;  %1886 = vmatprep.subr.mxu1 %v8005_v5 }
 0x2ea   : > { %1816 = vmatpush1.msra.mxu0 %v8008_v8  ;;  %1887 = vmatpush1.msra.mxu1 %v8011_v11 }
 0x2eb   : > { %1817 = vmatprep.subr.mxu0 %v7312_v17  ;;  %1888 = vmatprep.subr.mxu1 %v7314_v18  ;;  %v11520_v17 = vld [vmem:[#allocation31_spill] sm:$0xff]  ;;  %v11521_v18 = vld [vmem:[#allocation32_spill] sm:$0xff] }
 0x2ec   : > { %1818 = vmatpush1.msra.mxu0 %v7316_v19  ;;  %1889 = vmatpush1.msra.mxu1 %v7318_v20  ;;  %v11522_v19 = vld [vmem:[#allocation33_spill] sm:$0xff]  ;;  %v11523_v20 = vld [vmem:[#allocation34_spill] sm:$0xff] }
 0x2ed   : > { %1819 = vmatprep.subr.mxu0 %v7325_v22  ;;  %1890 = vmatprep.subr.mxu1 %v7327_v23  ;;  %v11524_v22 = vld [vmem:[#allocation35_spill] sm:$0xff]  ;;  %v11525_v23 = vld [vmem:[#allocation36_spill] sm:$0xff] }
 0x2ee   : > { %1820 = vmatpush1.msra.mxu0 %v7331_v24  ;;  %1891 = vmatpush1.msra.mxu1 %v7333_v25  ;;  %v11526_v24 = vld [vmem:[#allocation37_spill] sm:$0xff]  ;;  %v11527_v25 = vld [vmem:[#allocation38_spill] sm:$0xff] }
 0x2ef   : > { %1821 = vmatprep.subr.mxu0 %v7337_v26  ;;  %1892 = vmatprep.subr.mxu1 %v7339_v27  ;;  %v11528_v26 = vld [vmem:[#allocation39_spill] sm:$0xff]  ;;  %v11529_v27 = vld [vmem:[#allocation40_spill] sm:$0xff] }
 0x2f0   : > { %1822 = vmatpush1.msra.mxu0 %v7345_v28  ;;  %1893 = vmatpush1.msra.mxu1 %v7347_v29  ;;  %v11530_v28 = vld [vmem:[#allocation41_spill] sm:$0xff]  ;;  %v11531_v29 = vld [vmem:[#allocation42_spill] sm:$0xff] }
 0x2f1   : > { %1823 = vmatprep.subr.mxu0 %v7354_v31  ;;  %1894 = vmatprep.subr.mxu1 %v7356_v32  ;;  %v11532_v31 = vld [vmem:[#allocation43_spill] sm:$0xff]  ;;  %v11533_v32 = vld [vmem:[#allocation44_spill] sm:$0xff] }
 0x2f2   : > { %1824 = vmatpush1.msra.mxu0 %v7360_v33  ;;  %1895 = vmatpush1.msra.mxu1 %v7362_v34  ;;  %v11534_v33 = vld [vmem:[#allocation45_spill] sm:$0xff]  ;;  %v11535_v34 = vld [vmem:[#allocation46_spill] sm:$0xff] }
 0x2f3   : > { %1825 = vmatprep.subr.mxu0 %v7366_v35  ;;  %1896 = vmatprep.subr.mxu1 %v7368_v36  ;;  %v11536_v35 = vld [vmem:[#allocation47_spill] sm:$0xff]  ;;  %v11537_v36 = vld [vmem:[#allocation48_spill] sm:$0xff] }
 0x2f4   : > { %1826 = vmatpush1.msra.mxu0 %v7374_v37  ;;  %1897 = vmatpush1.msra.mxu1 %v7376_v38  ;;  %v11538_v37 = vld [vmem:[#allocation49_spill] sm:$0xff]  ;;  %v11539_v38 = vld [vmem:[#allocation50_spill] sm:$0xff] }
 0x2f5   : > { %1827 = vmatprep.subr.mxu0 %v7383_v40  ;;  %1898 = vmatprep.subr.mxu1 %v7385_v41  ;;  %v11540_v40 = vld [vmem:[#allocation51_spill] sm:$0xff]  ;;  %v11541_v41 = vld [vmem:[#allocation52_spill] sm:$0xff] }
 0x2f6   : > { %1828 = vmatpush1.msra.mxu0 %v7389_v42  ;;  %1899 = vmatpush1.msra.mxu1 %v7391_v43  ;;  %v11542_v42 = vld [vmem:[#allocation53_spill] sm:$0xff]  ;;  %v11543_v43 = vld [vmem:[#allocation54_spill] sm:$0xff] }
 0x2f7   : > { %1829 = vmatprep.subr.mxu0 %v7395_v44  ;;  %1900 = vmatprep.subr.mxu1 %v7397_v45  ;;  %v11544_v44 = vld [vmem:[#allocation55_spill] sm:$0xff]  ;;  %v11545_v45 = vld [vmem:[#allocation56_spill] sm:$0xff] }
 0x2f8   : > { %1830 = vmatpush1.msra.mxu0 %v7403_v46  ;;  %1901 = vmatpush1.msra.mxu1 %v7405_v47  ;;  %v11546_v46 = vld [vmem:[#allocation57_spill] sm:$0xff]  ;;  %v11547_v47 = vld [vmem:[#allocation58_spill] sm:$0xff] }
 0x2f9   : > { %1831 = vmatprep.subr.mxu0 %v7412_v49  ;;  %1902 = vmatprep.subr.mxu1 %v7414_v50  ;;  %v11548_v49 = vld [vmem:[#allocation59_spill] sm:$0xff]  ;;  %v11549_v50 = vld [vmem:[#allocation60_spill] sm:$0xff] }
 0x2fa   : > { %1832 = vmatpush1.msra.mxu0 %v7418_v51  ;;  %1903 = vmatpush1.msra.mxu1 %v7420_v52  ;;  %v11550_v51 = vld [vmem:[#allocation61_spill] sm:$0xff]  ;;  %v11551_v52 = vld [vmem:[#allocation62_spill] sm:$0xff] }
 0x2fb   : > { %1833 = vmatprep.subr.mxu0 %v7424_v53  ;;  %1904 = vmatprep.subr.mxu1 %v7426_v54  ;;  %v11552_v53 = vld [vmem:[#allocation63_spill] sm:$0xff]  ;;  %v11553_v54 = vld [vmem:[#allocation64_spill] sm:$0xff] }
 0x2fc   : > { %1834 = vmatpush1.msra.mxu0 %v7432_v55  ;;  %1905 = vmatpush1.msra.mxu1 %v7434_v56  ;;  %v11554_v55 = vld [vmem:[#allocation65_spill] sm:$0xff]  ;;  %v11555_v56 = vld [vmem:[#allocation66_spill] sm:$0xff] }
 0x2fd   : > { %1835 = vmatprep.subr.mxu0 %v7441_v59  ;;  %1906 = vmatprep.subr.mxu1 %v7443_v60  ;;  %v11556_v59 = vld [vmem:[#allocation67_spill] sm:$0xff]  ;;  %v11557_v60 = vld [vmem:[#allocation68_spill] sm:$0xff] }
 0x2fe   : > { %1836 = vmatpush1.msra.mxu0 %v7447_v61  ;;  %1907 = vmatpush1.msra.mxu1 %v7449_v62  ;;  %v11558_v61 = vld [vmem:[#allocation69_spill] sm:$0xff]  ;;  %v11559_v62 = vld [vmem:[#allocation70_spill] sm:$0xff] }
 0x2ff   : > { %1837 = vmatprep.subr.mxu0 %v7453_v63  ;;  %1908 = vmatprep.subr.mxu1 %v7455_v0  ;;  %v11560_v63 = vld [vmem:[#allocation71_spill] sm:$0xff]  ;;  %v11561_v0 = vld [vmem:[#allocation72_spill] sm:$0xff] }
 0x300   : > { %1838 = vmatpush1.msra.mxu0 %v11520_v17  ;;  %1871 = vmatprep.mubr.f32.mxu0 %v11505_v14  ;;  %v11563_v17 = vld [vmem:[#allocation74_spill] sm:$0xff] }
 0x301   : > { %1909 = vmatpush1.msra.mxu1 %v11521_v18  ;;  %1942 = vmatprep.mubr.f32.mxu1 %v11505_v14  ;;  %v11564_v18 = vld [vmem:[#allocation75_spill] sm:$0xff] }
 0x302   : > { %1872 = vmatmul.mubr.f32.vlgmr.msra.gmra.mxu0 %v7762_v15  ;;  %1943 = vmatmul.mubr.f32.vlgmr.msra.gmra.mxu1 %v7762_v15  ;;  %v11562_v15 = vld [vmem:[#allocation73_spill] sm:$0xff] }
 0x303   : > { %1977 = vmatprep.subr.mxu0 %v11522_v19  ;;  %2048 = vmatprep.subr.mxu1 %v11523_v20  ;;  %v11565_v19 = vld [vmem:[#allocation76_spill] sm:$0xff]  ;;  %v11566_v20 = vld [vmem:[#allocation77_spill] sm:$0xff] }
 0x304   : > { %1978 = vmatpush1.msra.mxu0 %v11524_v22  ;;  %2049 = vmatpush1.msra.mxu1 %v11525_v23  ;;  %v11567_v22 = vld [vmem:[#allocation78_spill] sm:$0xff]  ;;  %v11568_v23 = vld [vmem:[#allocation79_spill] sm:$0xff] }
 0x305   : > { %1979 = vmatprep.subr.mxu0 %v11526_v24  ;;  %2050 = vmatprep.subr.mxu1 %v11527_v25  ;;  %v11569_v24 = vld [vmem:[#allocation80_spill] sm:$0xff]  ;;  %v11570_v25 = vld [vmem:[#allocation81_spill] sm:$0xff] }
 0x306   : > { %1980 = vmatpush1.msra.mxu0 %v11528_v26  ;;  %2051 = vmatpush1.msra.mxu1 %v11529_v27  ;;  %v11571_v26 = vld [vmem:[#allocation82_spill] sm:$0xff]  ;;  %v11572_v27 = vld [vmem:[#allocation83_spill] sm:$0xff] }
 0x307   : > { %1981 = vmatprep.subr.mxu0 %v11530_v28  ;;  %2052 = vmatprep.subr.mxu1 %v11531_v29  ;;  %v11573_v28 = vld [vmem:[#allocation84_spill] sm:$0xff]  ;;  %v11574_v29 = vld [vmem:[#allocation85_spill] sm:$0xff] }
 0x308   : > { %1982 = vmatpush1.msra.mxu0 %v11532_v31  ;;  %2053 = vmatpush1.msra.mxu1 %v11533_v32  ;;  %v11575_v31 = vld [vmem:[#allocation86_spill] sm:$0xff]  ;;  %v11576_v32 = vld [vmem:[#allocation87_spill] sm:$0xff] }
 0x309   : > { %1983 = vmatprep.subr.mxu0 %v11534_v33  ;;  %2054 = vmatprep.subr.mxu1 %v11535_v34  ;;  %v11577_v33 = vld [vmem:[#allocation88_spill] sm:$0xff]  ;;  %v11578_v34 = vld [vmem:[#allocation89_spill] sm:$0xff] }
 0x30a   : > { %1984 = vmatpush1.msra.mxu0 %v11536_v35  ;;  %2055 = vmatpush1.msra.mxu1 %v11537_v36  ;;  %v11579_v35 = vld [vmem:[#allocation90_spill] sm:$0xff]  ;;  %v11580_v36 = vld [vmem:[#allocation91_spill] sm:$0xff] }
 0x30b   : > { %1985 = vmatprep.subr.mxu0 %v11538_v37  ;;  %2056 = vmatprep.subr.mxu1 %v11539_v38  ;;  %v11581_v37 = vld [vmem:[#allocation92_spill] sm:$0xff]  ;;  %v11582_v38 = vld [vmem:[#allocation93_spill] sm:$0xff] }
 0x30c   : > { %1986 = vmatpush1.msra.mxu0 %v11540_v40  ;;  %2057 = vmatpush1.msra.mxu1 %v11541_v41  ;;  %v11583_v40 = vld [vmem:[#allocation94_spill] sm:$0xff]  ;;  %v11584_v41 = vld [vmem:[#allocation95_spill] sm:$0xff] }
 0x30d   : > { %1987 = vmatprep.subr.mxu0 %v11542_v42  ;;  %2058 = vmatprep.subr.mxu1 %v11543_v43  ;;  %v11585_v42 = vld [vmem:[#allocation96_spill] sm:$0xff]  ;;  %v11586_v43 = vld [vmem:[#allocation97_spill] sm:$0xff] }
 0x30e   : > { %1988 = vmatpush1.msra.mxu0 %v11544_v44  ;;  %2059 = vmatpush1.msra.mxu1 %v11545_v45  ;;  %v11587_v44 = vld [vmem:[#allocation98_spill] sm:$0xff]  ;;  %v1603_v45 = vlaneseq }
 0x30f   : > { %1989 = vmatprep.subr.mxu0 %v11546_v46  ;;  %2060 = vmatprep.subr.mxu1 %v11547_v47 }
 0x310   : > { %1990 = vmatpush1.msra.mxu0 %v11548_v49  ;;  %2061 = vmatpush1.msra.mxu1 %v11549_v50  ;;  %v1604_v46 = vshrl.u32 %v1603_v45, 7  ;;  %v1271_v49 = vld [vmem:[%s10769_s10] sm:$0xf] }
 0x311   : > { %1991 = vmatprep.subr.mxu0 %v11550_v51  ;;  %2062 = vmatprep.subr.mxu1 %v11551_v52 }
 0x312   : > { %1992 = vmatpush1.msra.mxu0 %v11552_v53  ;;  %2063 = vmatpush1.msra.mxu1 %v11553_v54  ;;  %v1605_v47 = vsub.s32 0, %v1604_v46  ;;  %v1609_v50 = vsub.s32 1, %v1604_v46 }
 0x313   : > { %1993 = vmatprep.subr.mxu0 %v11554_v55  ;;  %2064 = vmatprep.subr.mxu1 %v11555_v56 }
 0x314   : > { %1994 = vmatpush1.msra.mxu0 %v11556_v59  ;;  %2065 = vmatpush1.msra.mxu1 %v11557_v60  ;;  %v8133_v52 = vrot.slane %v1271_v49, %v1605_v47  ;;  %v8135_v53 = vrot.slane %v1271_v49, %v1609_v50 }
 0x315   : > { %1995 = vmatprep.subr.mxu0 %v11558_v61  ;;  %2066 = vmatprep.subr.mxu1 %v11559_v62 }
 0x316   : > { %1996 = vmatpush1.msra.mxu0 %v11560_v63  ;;  %2067 = vmatpush1.msra.mxu1 %v11561_v0  ;;  %11588 = vst [vmem:[#allocation31_spill] sm:$0xff] %v8133_v52 }
 0x317   : > { %1997 = vmatprep.subr.mxu0 %v11562_v15  ;;  %2068 = vmatprep.subr.mxu1 %v11563_v17  ;;  %v1617_v15 = vsub.s32 3, %v1604_v46 }
 0x318   : > { %1998 = vmatpush1.msra.mxu0 %v11564_v18  ;;  %2069 = vmatpush1.msra.mxu1 %v11565_v19  ;;  %v1613_v19 = vsub.s32 2, %v1604_v46 }
 0x319   : > { %1999 = vmatprep.subr.mxu0 %v11566_v20  ;;  %2070 = vmatprep.subr.mxu1 %v11567_v22  ;;  %v8139_v22 = vrot.slane %v1271_v49, %v1617_v15 }
 0x31a   : > { %2000 = vmatpush1.msra.mxu0 %v11568_v23  ;;  %2071 = vmatpush1.msra.mxu1 %v11569_v24  ;;  %v8141_v23 = vrot.slane %v1271_v49, %v1613_v19  ;;  %v11590_v49 = vld [vmem:[#allocation101_spill] sm:$0xff] }
 0x31b   : > { %2001 = vmatprep.subr.mxu0 %v11570_v25  ;;  %2072 = vmatprep.subr.mxu1 %v11571_v26 }
 0x31c   : > { %2002 = vmatpush1.msra.mxu0 %v11572_v27  ;;  %2073 = vmatpush1.msra.mxu1 %v11573_v28 }
 0x31d   : > { %2003 = vmatprep.subr.mxu0 %v11574_v29  ;;  %2074 = vmatprep.subr.mxu1 %v11575_v31 }
 0x31e   : > { %2004 = vmatpush1.msra.mxu0 %v11576_v32  ;;  %2075 = vmatpush1.msra.mxu1 %v11577_v33 }
 0x31f   : > { %2005 = vmatprep.subr.mxu0 %v11578_v34  ;;  %2076 = vmatprep.subr.mxu1 %v11579_v35 }
 0x320   : > { %2006 = vmatpush1.msra.mxu0 %v11580_v36  ;;  %2077 = vmatpush1.msra.mxu1 %v11581_v37  ;;  %v1281_v37 = vld [vmem:[#allocation22 + $0x8] sm:$0xff] }
 0x321   : > { %2007 = vmatprep.subr.mxu0 %v11582_v38  ;;  %2078 = vmatprep.subr.mxu1 %v11583_v40 }
 0x322   : > { %2008 = vmatpush1.msra.mxu0 %v11584_v41  ;;  %2079 = vmatpush1.msra.mxu1 %v11585_v42  ;;  %v11589_v41 = vld [vmem:[#allocation99_spill] sm:$0xff] }
 0x323   : > { %2041 = vmatprep.mubr.f32.mxu0 %v11505_v14  ;;  %2112 = vmatprep.mubr.f32.mxu1 %v11505_v14 }
 0x324   : > { %2123 = vmatprep.subr.mxu0 %v11586_v43  ;;  %2194 = vmatprep.subr.mxu1 %v11587_v44 }
 0x37f   : > { %v1526_v51 = vpop.f32.mrf.mxu0  ;;  %v1597_v59 = vpop.f32.mrf.mxu1 }
 0x380   : > { %v1623_v55 = vadd.f32 %v8133_v52, %v1526_v51  ;;  %v1625_v26 = vadd.f32 %v8141_v23, %v1597_v59 }
 0x381   : > { %v1528_v54 = vpop.f32.mrf.mxu0  ;;  %v1599_v17 = vpop.f32.mrf.mxu1 }
 0x382   : > { %v1624_v60 = vadd.f32 %v8135_v53, %v1528_v54  ;;  %v1626_v25 = vadd.f32 %v8139_v22, %v1599_v17 }
 0x3a0   : > { %v1693_v56 = vpop.f32.mrf.mxu0  ;;  %v1764_v20 = vpop.f32.mrf.mxu1 }
 0x3a1   : > { %v1769_v61 = vadd.f32 %v1693_v56, %v1623_v55  ;;  %v1771_v28 = vadd.f32 %v1764_v20, %v1625_v26 }
 0x3a2   : > { %v1695_v62 = vpop.f32.mrf.mxu0  ;;  %v1766_v24 = vpop.f32.mrf.mxu1 }
 0x3a3   : > { %v5538_v63 = vmul.f32 -1.442695, %v1769_v61  ;;  %v1770_v0 = vadd.f32 %v1695_v62, %v1624_v60  ;;  %v1772_v27 = vadd.f32 %v1766_v24, %v1626_v25  ;;  %v11591_v60 = vld [vmem:[#allocation102_spill] sm:$0xff]  ;;  %v11592_v62 = vld [vmem:[#allocation100_spill] sm:$0xff] }
 0x3a5   : > { %5766 = vpow2.f32 %v5538_v63  ;;  %v5539_v18 = vmul.f32 -1.442695, %v1770_v0  ;;  %v5540_v31 = vmul.f32 -1.442695, %v1772_v27 }
 0x3a7   : > { %5768 = vpow2.f32 %v5539_v18 }
 0x3a8   : > { %5770 = vtanh.f32 %v1771_v28 }
 0x3b2   : > { %v5767_v29 = vpop.eup %5766 }
 0x3b3   : > { %v1776_v32 = vadd.f32 1.0, %v5767_v29 }
 0x3b4   : > { %v5769_v33 = vpop.eup %5768 }
 0x3b5   : > { %5772 = vrcp.f32 %v1776_v32  ;;  %v1782_v34 = vadd.f32 1.0, %v5769_v33  ;;  %v5771_v35 = vpop.eup %5770 }
 0x3b6   : > { %5774 = vpow2.f32 %v5540_v31 }
 0x3b7   : > { %5776 = vrcp.f32 %v1782_v34 }
 0x3c2   : > { %v5773_v36 = vpop.eup %5772  ;;  %v1873_v38 = vpop.f32.mrf.mxu0 }
 0x3c3   : > { %v5775_v40 = vpop.eup %5774  ;;  %v1949_v42 = vadd.f32 %v1873_v38, %v11589_v41  ;;  %v1793_v45 = vmul.f32 %v5773_v36, %v5771_v35  ;;  %v1944_v55 = vpop.f32.mrf.mxu1  ;;  %v11594_v38 = vld [vmem:[#allocation128_spill] sm:$0xff]  ;;  %v11605_v41 = vld [vmem:[#allocation139_spill] sm:$0xff] }
 0x3c4   : > { %v5777_v43 = vpop.eup %5776  ;;  %v1875_v44 = vpop.f32.mrf.mxu0  ;;  %v1789_v51 = vadd.f32 1.0, %v5775_v40  ;;  %v1951_v63 = vadd.f32 %v1944_v55, %v11592_v62  ;;  %v11604_v40 = vld [vmem:[#allocation138_spill] sm:$0xff]  ;;  %v11615_v55 = vld [vmem:[#allocation149_spill] sm:$0xff] }
 0x3c5   : > { %v1792_v46 = vmul.f32 %v5777_v43, %v1281_v37  ;;  %v5541_v47 = vmul.f32 -1.442695, %v1949_v42  ;;  %v1950_v50 = vadd.f32 %v1875_v44, %v11590_v49  ;;  %v1946_v59 = vpop.f32.mrf.mxu1  ;;  %v11606_v42 = vld [vmem:[#allocation140_spill] sm:$0xff]  ;;  %v11607_v43 = vld [vmem:[#allocation141_spill] sm:$0xff]  ;;  %v11608_v44 = vld [vmem:[#allocation142_spill] sm:$0xff] }
 0x3c6   : > { %v1952_v61 = vadd.f32 %v1946_v59, %v11591_v60  ;;  %v11612_v49 = vld [vmem:[#allocation146_spill] sm:$0xff]  ;;  %v11617_v59 = vld [vmem:[#allocation151_spill] sm:$0xff]  ;;  %v11618_v60 = vld [vmem:[#allocation152_spill] sm:$0xff] }
 0x3c7   : > { %v8147_v54 = vadd.f32 %v1793_v45, %v1792_v46  ;;  %5778 = vpow2.f32 %v5541_v47  ;;  %v5542_v56 = vmul.f32 -1.442695, %v1950_v50  ;;  %v11609_v45 = vld [vmem:[#allocation143_spill] sm:$0xff]  ;;  %v11610_v46 = vld [vmem:[#allocation144_spill] sm:$0xff]  ;;  %v11611_v47 = vld [vmem:[#allocation145_spill] sm:$0xff] }
 0x3c8   : > { %v5543_v0 = vmul.f32 -1.442695, %v1952_v61  ;;  %v11613_v50 = vld [vmem:[#allocation147_spill] sm:$0xff]  ;;  %v11619_v61 = vld [vmem:[#allocation153_spill] sm:$0xff]  ;;  %v11620_v62 = vld [vmem:[#allocation154_spill] sm:$0xff] }
 0x3c9   : > { %5780 = vpow2.f32 %v5542_v56  ;;  %v11616_v56 = vld [vmem:[#allocation150_spill] sm:$0xff] }
 0x3ca   : > { %5782 = vrcp.f32 %v1789_v51  ;;  %v11614_v51 = vld [vmem:[#allocation148_spill] sm:$0xff] }
 0x3cb   : > { %5784 = vtanh.f32 %v8147_v54 }
 0x3cc   : > { %5786 = vtanh.f32 %v1951_v63  ;;  %v11621_v63 = vld [vmem:[#allocation155_spill] sm:$0xff] }
 0x3cd   : > { %5788 = vpow2.f32 %v5543_v0  ;;  %v11622_v0 = vld [vmem:[#allocation156_spill] sm:$0xff] }
 0x3d4   : > { %v5779_v15 = vpop.eup %5778 }
 0x3d5   : > { %v1956_v17 = vadd.f32 1.0, %v5779_v15  ;;  %v11623_v15 = vld [vmem:[#allocation157_spill] sm:$0xff] }
 0x3d6   : > { %v5781_v18 = vpop.eup %5780 }
 0x3d7   : > { %v5783_v19 = vpop.eup %5782  ;;  %5790 = vrcp.f32 %v1956_v17  ;;  %v1962_v20 = vadd.f32 1.0, %v5781_v18  ;;  %v11624_v17 = vld [vmem:[#allocation158_spill] sm:$0xff]  ;;  %v11625_v18 = vld [vmem:[#allocation159_spill] sm:$0xff] }
 0x3d8   : > { %v5785_v24 = vpop.eup %5784 }
 0x3d9   : > { %5792 = vrcp.f32 %v1962_v20  ;;  %v8152_v25 = vmul.f32 %v5785_v24, %v5783_v19  ;;  %v5787_v26 = vpop.eup %5786  ;;  %v11626_v19 = vld [vmem:[#allocation160_spill] sm:$0xff]  ;;  %v11627_v20 = vld [vmem:[#allocation161_spill] sm:$0xff]  ;;  %v11628_v24 = vld [vmem:[#allocation162_spill] sm:$0xff] }
 0x3da   : > { %v5789_v27 = vpop.eup %5788 }
 0x3db   : > { %1797 = vst [vmem:[%s7290_s4] sm:$0xff] %v8152_v25  ;;  %v1969_v32 = vadd.f32 1.0, %v5789_v27  ;;  %v11630_v27 = vld [vmem:[#allocation164_spill] sm:$0xff] }
 0x3dd   : > { %5794 = vrcp.f32 %v1969_v32  ;;  %v11634_v32 = vld [vmem:[#allocation168_spill] sm:$0xff] }
 0x3e4   : > { %v5791_v28 = vpop.eup %5790 }
 0x3e5   : > { %v1973_v29 = vmul.f32 %v5791_v28, %v5787_v26  ;;  %v11629_v26 = vld [vmem:[#allocation163_spill] sm:$0xff]  ;;  %v11631_v28 = vld [vmem:[#allocation165_spill] sm:$0xff] }
 0x3e6   : > { %v5793_v31 = vpop.eup %5792 }
 0x3e7   : > { %v1972_v33 = vmul.f32 %v5793_v31, %v7759_v7  ;;  %v11593_v7 = vld [vmem:[#allocation127_spill] sm:$0xff] }
 0x3e8   : > { %v11633_v31 = vld [vmem:[#allocation167_spill] sm:$0xff] }
 0x3e9   : > { %v8157_v34 = vadd.f32 %v1973_v29, %v1972_v33  ;;  %v11632_v29 = vld [vmem:[#allocation166_spill] sm:$0xff]  ;;  %v11635_v33 = vld [vmem:[#allocation169_spill] sm:$0xff] }
 0x3ea   : > { %v5795_v35 = vpop.eup %5794 }
 0x3eb   : > { %5796 = vtanh.f32 %v8157_v34 }
 0x3f8   : > { %v5797_v36 = vpop.eup %5796 }
 0x3f9   : > { %v8160_v37 = vmul.f32 %v5797_v36, %v5795_v35  ;;  %v11636_v35 = vld [vmem:[#allocation170_spill] sm:$0xff]  ;;  %v11637_v36 = vld [vmem:[#allocation171_spill] sm:$0xff] }
 0x3fb   : > { %2042 = vmatmul.mubr.f32.vlgmr.msra.gmra.mxu0 %v8160_v37  ;;  %2113 = vmatmul.mubr.f32.vlgmr.msra.gmra.mxu1 %v8160_v37 }
 0x3fc   : > { %2124 = vmatpush1.msra.mxu0 %v7764_v39  ;;  %2195 = vmatpush1.msra.mxu1 %v7766_v4  ;;  %v11595_v39 = vld [vmem:[#allocation129_spill] sm:$0xff]  ;;  %v11596_v4 = vld [vmem:[#allocation130_spill] sm:$0xff] }
 0x3fd   : > { %2125 = vmatprep.subr.mxu0 %v7768_v6  ;;  %2196 = vmatprep.subr.mxu1 %v7770_v48  ;;  %v11597_v6 = vld [vmem:[#allocation131_spill] sm:$0xff]  ;;  %v11598_v48 = vld [vmem:[#allocation132_spill] sm:$0xff] }
 0x3fe   : > { %2126 = vmatpush1.msra.mxu0 %v7774_v12  ;;  %2197 = vmatpush1.msra.mxu1 %v7776_v13  ;;  %v11599_v12 = vld [vmem:[#allocation133_spill] sm:$0xff]  ;;  %v11600_v13 = vld [vmem:[#allocation134_spill] sm:$0xff] }
 0x3ff   : > { %2127 = vmatprep.subr.mxu0 %v7780_v21  ;;  %2198 = vmatprep.subr.mxu1 %v7782_v58  ;;  %v11601_v21 = vld [vmem:[#allocation135_spill] sm:$0xff]  ;;  %v11602_v58 = vld [vmem:[#allocation136_spill] sm:$0xff] }
 0x400   : > { %2128 = vmatpush1.msra.mxu0 %v7786_v30  ;;  %2199 = vmatpush1.msra.mxu1 %v11593_v7  ;;  %v11603_v30 = vld [vmem:[#allocation137_spill] sm:$0xff]  ;;  %v11638_v7 = vld [vmem:[#allocation172_spill] sm:$0xff] }
 0x401   : > { %2129 = vmatprep.subr.mxu0 %v11594_v38  ;;  %2200 = vmatprep.subr.mxu1 %v11595_v39  ;;  %v11639_v38 = vld [vmem:[#allocation173_spill] sm:$0xff]  ;;  %v11640_v39 = vld [vmem:[#allocation174_spill] sm:$0xff] }
 0x402   : > { %2130 = vmatpush1.msra.mxu0 %v11596_v4  ;;  %2201 = vmatpush1.msra.mxu1 %v11597_v6  ;;  %v11644_v4 = vld [vmem:[#allocation178_spill] sm:$0xff]  ;;  %v11646_v6 = vld [vmem:[#allocation180_spill] sm:$0xff] }
 0x403   : > { %2131 = vmatprep.subr.mxu0 %v11598_v48  ;;  %2202 = vmatprep.subr.mxu1 %v11599_v12  ;;  %v11647_v48 = vld [vmem:[#allocation181_spill] sm:$0xff]  ;;  %v11648_v12 = vld [vmem:[#allocation182_spill] sm:$0xff] }
 0x404   : > { %2132 = vmatpush1.msra.mxu0 %v11600_v13  ;;  %2203 = vmatpush1.msra.mxu1 %v11601_v21  ;;  %v11649_v13 = vld [vmem:[#allocation183_spill] sm:$0xff]  ;;  %v11650_v21 = vld [vmem:[#allocation184_spill] sm:$0xff] }
 0x405   : > { %2133 = vmatprep.subr.mxu0 %v11602_v58  ;;  %2204 = vmatprep.subr.mxu1 %v11603_v30  ;;  %v11651_v58 = vld [vmem:[#allocation185_spill] sm:$0xff]  ;;  %v11653_v30 = vld [vmem:[#allocation187_spill] sm:$0xff] }
 0x406   : > { %2134 = vmatpush1.msra.mxu0 %v11604_v40  ;;  %2205 = vmatpush1.msra.mxu1 %v11605_v41  ;;  %v11654_v40 = vld [vmem:[#allocation188_spill] sm:$0xff]  ;;  %v11655_v41 = vld [vmem:[#allocation189_spill] sm:$0xff] }
 0x407   : > { %2135 = vmatprep.subr.mxu0 %v11606_v42  ;;  %2206 = vmatprep.subr.mxu1 %v11607_v43  ;;  %v8250_v42 = vld [vmem:[#allocation15 + $0x148] sm:$0xff]  ;;  %v8253_v43 = vld [vmem:[#allocation15 + $0x158] sm:$0xff] }
 0x408   : > { %2136 = vmatpush1.msra.mxu0 %v11608_v44  ;;  %2207 = vmatpush1.msra.mxu1 %v11609_v45  ;;  %v8256_v44 = vld [vmem:[#allocation15 + $0x140] sm:$0xff]  ;;  %v8277_v45 = vld [vmem:[#allocation15 + $0x118] sm:$0xff] }
 0x409   : > { %2137 = vmatprep.subr.mxu0 %v11610_v46  ;;  %2208 = vmatprep.subr.mxu1 %v11611_v47  ;;  %v8280_v46 = vld [vmem:[#allocation15 + $0x100] sm:$0xff]  ;;  %v8283_v47 = vld [vmem:[#allocation15 + $0x110] sm:$0xff] }
 0x40a   : > { %2138 = vmatpush1.msra.mxu0 %v11612_v49  ;;  %2209 = vmatpush1.msra.mxu1 %v11613_v50  ;;  %v8286_v49 = vld [vmem:[#allocation15 + $0xe8] sm:$0xff]  ;;  %v8289_v50 = vld [vmem:[#allocation15 + $0xf8] sm:$0xff] }
 0x40b   : > { %2139 = vmatprep.subr.mxu0 %v11614_v51  ;;  %2210 = vmatprep.subr.mxu1 %v11615_v55  ;;  %v8292_v51 = vld [vmem:[#allocation15 + $0xe0] sm:$0xff]  ;;  %v8295_v55 = vld [vmem:[#allocation15 + $0xf0] sm:$0xff] }
 0x40c   : > { %2140 = vmatpush1.msra.mxu0 %v11616_v56  ;;  %2211 = vmatpush1.msra.mxu1 %v11617_v59  ;;  %v8298_v56 = vld [vmem:[#allocation15 + $0xc8] sm:$0xff]  ;;  %v8301_v59 = vld [vmem:[#allocation15 + $0xd8] sm:$0xff] }
 0x40d   : > { %2141 = vmatprep.subr.mxu0 %v11618_v60  ;;  %2212 = vmatprep.subr.mxu1 %v11619_v61  ;;  %v8304_v60 = vld [vmem:[#allocation15 + $0xc0] sm:$0xff]  ;;  %v8307_v61 = vld [vmem:[#allocation15 + $0xd0] sm:$0xff] }
 0x40e   : > { %2142 = vmatpush1.msra.mxu0 %v11620_v62  ;;  %2213 = vmatpush1.msra.mxu1 %v11621_v63  ;;  %v8310_v62 = vld [vmem:[#allocation15 + $0xa8] sm:$0xff]  ;;  %v8313_v63 = vld [vmem:[#allocation15 + $0xb8] sm:$0xff] }
 0x40f   : > { %2143 = vmatprep.subr.mxu0 %v11622_v0  ;;  %2214 = vmatprep.subr.mxu1 %v11623_v15  ;;  %v8316_v0 = vld [vmem:[#allocation15 + $0xa0] sm:$0xff]  ;;  %v8319_v15 = vld [vmem:[#allocation15 + $0xb0] sm:$0xff] }
 0x410   : > { %2144 = vmatpush1.msra.mxu0 %v11624_v17  ;;  %2215 = vmatpush1.msra.mxu1 %v11625_v18  ;;  %v8322_v17 = vld [vmem:[#allocation15 + $0x88] sm:$0xff]  ;;  %v8325_v18 = vld [vmem:[#allocation15 + $0x98] sm:$0xff] }
 0x411   : > { %2145 = vmatprep.subr.mxu0 %v11626_v19  ;;  %2216 = vmatprep.subr.mxu1 %v11627_v20  ;;  %v8328_v19 = vld [vmem:[#allocation15 + $0x80] sm:$0xff]  ;;  %v8331_v20 = vld [vmem:[#allocation15 + $0x90] sm:$0xff] }
 0x412   : > { %2146 = vmatpush1.msra.mxu0 %v11628_v24  ;;  %2217 = vmatpush1.msra.mxu1 %v11629_v26  ;;  %v8334_v24 = vld [vmem:[#allocation15 + $0x68] sm:$0xff]  ;;  %v8337_v26 = vld [vmem:[#allocation15 + $0x78] sm:$0xff] }
 0x413   : > { %2147 = vmatprep.subr.mxu0 %v11630_v27  ;;  %2218 = vmatprep.subr.mxu1 %v11631_v28  ;;  %v8340_v27 = vld [vmem:[#allocation15 + $0x60] sm:$0xff]  ;;  %v8343_v28 = vld [vmem:[#allocation15 + $0x70] sm:$0xff] }
 0x414   : > { %2148 = vmatpush1.msra.mxu0 %v11632_v29  ;;  %2219 = vmatpush1.msra.mxu1 %v11633_v31  ;;  %v8346_v29 = vld [vmem:[#allocation15 + $0x48] sm:$0xff]  ;;  %v8349_v31 = vld [vmem:[#allocation15 + $0x58] sm:$0xff] }
 0x415   : > { %2149 = vmatprep.subr.mxu0 %v7912_v57  ;;  %2220 = vmatprep.subr.mxu1 %v11634_v32  ;;  %v11641_v57 = vld [vmem:[#allocation175_spill] sm:$0xff] }
 0x416   : > { %2150 = vmatpush1.msra.mxu0 %v11635_v33  ;;  %2221 = vmatpush1.msra.mxu1 %v11636_v35  ;;  %v8352_v32 = vld [vmem:[#allocation15 + $0x40] sm:$0xff]  ;;  %v8355_v33 = vld [vmem:[#allocation15 + $0x50] sm:$0xff]  ;;  %v8358_v35 = vld [vmem:[#allocation15 + $0x28] sm:$0xff] }
 0x417   : > { %2151 = vmatprep.subr.mxu0 %v7924_v1  ;;  %2222 = vmatprep.subr.mxu1 %v7926_v2  ;;  %v11642_v1 = vld [vmem:[#allocation176_spill] sm:$0xff]  ;;  %v11643_v2 = vld [vmem:[#allocation177_spill] sm:$0xff] }
 0x418   : > { %2152 = vmatpush1.msra.mxu0 %v11637_v36  ;;  %2223 = vmatpush1.msra.mxu1 %v11638_v7  ;;  %v8361_v36 = vld [vmem:[#allocation15 + $0x38] sm:$0xff]  ;;  %v8364_v7 = vld [vmem:[#allocation15 + $0x20] sm:$0xff] }
 0x419   : > { %2153 = vmatprep.subr.mxu0 %v7936_v10  ;;  %2224 = vmatprep.subr.mxu1 %v11639_v38  ;;  %v11645_v10 = vld [vmem:[#allocation179_spill] sm:$0xff]  ;;  %11656 = vst [vmem:[#allocation32_spill] sm:$0xff] %v8364_v7  ;;  %v8367_v38 = vld [vmem:[#allocation15 + $0x30] sm:$0xff] }
 0x41a   : > { %2154 = vmatpush1.msra.mxu0 %v11640_v39  ;;  %2187 = vmatprep.mubr.f32.mxu0 %v11505_v14  ;;  %11657 = vst [vmem:[#allocation33_spill] sm:$0xff] %v8367_v38  ;;  %v8370_v39 = vld [vmem:[#allocation15 + $0x8] sm:$0xff] }
 0x41b   : > { %2225 = vmatpush1.msra.mxu1 %v11641_v57  ;;  %2258 = vmatprep.mubr.f32.mxu1 %v11505_v14  ;;  %11658 = vst [vmem:[#allocation34_spill] sm:$0xff] %v8370_v39  ;;  %v8373_v57 = vld [vmem:[#allocation15 + $0x18] sm:$0xff] }
 0x41c   : > { %2188 = vmatmul.mubr.f32.vlgmr.msra.gmra.mxu0 %v8152_v25  ;;  %2259 = vmatmul.mubr.f32.vlgmr.msra.gmra.mxu1 %v8152_v25  ;;  %v11652_v25 = vld [vmem:[#allocation186_spill] sm:$0xff]  ;;  %11659 = vst [vmem:[#allocation35_spill] sm:$0xff] %v8373_v57 }
 0x41d   : > { %2304 = vmatprep.subr.mxu0 %v11642_v1  ;;  %2375 = vmatprep.subr.mxu1 %v11643_v2  ;;  %v8376_v1 = vld [vmem:[#allocation15] sm:$0xff]  ;;  %v8380_v2 = vld [vmem:[#allocation15 + $0x10] sm:$0xff] }
 0x41e   : > { %2305 = vmatpush1.msra.mxu0 %v11644_v4  ;;  %2376 = vmatpush1.msra.mxu1 %v11645_v10  ;;  %11660 = vst [vmem:[#allocation36_spill] sm:$0xff] %v8376_v1  ;;  %11661 = vst [vmem:[#allocation37_spill] sm:$0xff] %v8380_v2  ;;  %v8386_v4 = vld [vmem:[#allocation16 + $0x1e8] sm:$0xff]  ;;  %v8389_v10 = vld [vmem:[#allocation16 + $0x1f8] sm:$0xff] }
 0x41f   : > { %2306 = vmatprep.subr.mxu0 %v11646_v6  ;;  %2377 = vmatprep.subr.mxu1 %v11647_v48  ;;  %11662 = vst [vmem:[#allocation38_spill] sm:$0xff] %v8386_v4  ;;  %11663 = vst [vmem:[#allocation39_spill] sm:$0xff] %v8389_v10  ;;  %v8392_v6 = vld [vmem:[#allocation16 + $0x1e0] sm:$0xff]  ;;  %v8395_v48 = vld [vmem:[#allocation16 + $0x1f0] sm:$0xff] }
 0x420   : > { %2307 = vmatpush1.msra.mxu0 %v11648_v12  ;;  %2378 = vmatpush1.msra.mxu1 %v11649_v13  ;;  %11664 = vst [vmem:[#allocation40_spill] sm:$0xff] %v8392_v6  ;;  %11665 = vst [vmem:[#allocation41_spill] sm:$0xff] %v8395_v48  ;;  %v8398_v12 = vld [vmem:[#allocation16 + $0x1c8] sm:$0xff]  ;;  %v8404_v13 = vld [vmem:[#allocation16 + $0x1c0] sm:$0xff] }
 0x421   : > { %2308 = vmatprep.subr.mxu0 %v11650_v21  ;;  %2379 = vmatprep.subr.mxu1 %v11651_v58  ;;  %11666 = vst [vmem:[#allocation42_spill] sm:$0xff] %v8398_v12  ;;  %11668 = vst [vmem:[#allocation44_spill] sm:$0xff] %v8404_v13  ;;  %v8407_v21 = vld [vmem:[#allocation16 + $0x1d0] sm:$0xff]  ;;  %v8410_v58 = vld [vmem:[#allocation16 + $0x1a8] sm:$0xff] }
 0x422   : > { %2309 = vmatpush1.msra.mxu0 %v11652_v25  ;;  %2380 = vmatpush1.msra.mxu1 %v11653_v30  ;;  %11669 = vst [vmem:[#allocation45_spill] sm:$0xff] %v8407_v21  ;;  %11670 = vst [vmem:[#allocation46_spill] sm:$0xff] %v8410_v58  ;;  %v8413_v25 = vld [vmem:[#allocation16 + $0x1b8] sm:$0xff]  ;;  %v8416_v30 = vld [vmem:[#allocation16 + $0x1a0] sm:$0xff] }
 0x423   : > { %2310 = vmatprep.subr.mxu0 %v11654_v40  ;;  %2381 = vmatprep.subr.mxu1 %v11655_v41  ;;  %11671 = vst [vmem:[#allocation47_spill] sm:$0xff] %v8413_v25  ;;  %11672 = vst [vmem:[#allocation48_spill] sm:$0xff] %v8416_v30  ;;  %v8419_v40 = vld [vmem:[#allocation16 + $0x1b0] sm:$0xff]  ;;  %v8422_v41 = vld [vmem:[#allocation16 + $0x188] sm:$0xff] }
 0x424   : > { %2311 = vmatpush1.msra.mxu0 %v7996_v16  ;;  %2382 = vmatpush1.msra.mxu1 %v7999_v3  ;;  %v8259_v16 = vld [vmem:[#allocation15 + $0x150] sm:$0xff]  ;;  %v8262_v3 = vld [vmem:[#allocation15 + $0x128] sm:$0xff]  ;;  %11673 = vst [vmem:[#allocation49_spill] sm:$0xff] %v8419_v40  ;;  %11674 = vst [vmem:[#allocation50_spill] sm:$0xff] %v8422_v41 }
 0x425   : > { %2312 = vmatprep.subr.mxu0 %v8002_v9  ;;  %2383 = vmatprep.subr.mxu1 %v8005_v5  ;;  %v8271_v9 = vld [vmem:[#allocation15 + $0x130] sm:$0xff]  ;;  %v8274_v5 = vld [vmem:[#allocation15 + $0x108] sm:$0xff] }
 0x426   : > { %2313 = vmatpush1.msra.mxu0 %v8008_v8  ;;  %2384 = vmatpush1.msra.mxu1 %v8011_v11  ;;  %v8265_v8 = vld [vmem:[#allocation15 + $0x138] sm:$0xff]  ;;  %v8268_v11 = vld [vmem:[#allocation15 + $0x120] sm:$0xff] }
 0x427   : > { %2314 = vmatprep.subr.mxu0 %v8250_v42  ;;  %2385 = vmatprep.subr.mxu1 %v8253_v43 }
 0x428   : > { %2315 = vmatpush1.msra.mxu0 %v8256_v44  ;;  %2386 = vmatpush1.msra.mxu1 %v8259_v16 }
 0x429   : > { %2316 = vmatprep.subr.mxu0 %v8262_v3  ;;  %2387 = vmatprep.subr.mxu1 %v8265_v8 }
 0x42a   : > { %2317 = vmatpush1.msra.mxu0 %v8268_v11  ;;  %2388 = vmatpush1.msra.mxu1 %v8271_v9 }
 0x42b   : > { %2318 = vmatprep.subr.mxu0 %v8274_v5  ;;  %2389 = vmatprep.subr.mxu1 %v8277_v45 }
 0x42c   : > { %2319 = vmatpush1.msra.mxu0 %v8280_v46  ;;  %2390 = vmatpush1.msra.mxu1 %v8283_v47 }
 0x42d   : > { %2320 = vmatprep.subr.mxu0 %v8286_v49  ;;  %2391 = vmatprep.subr.mxu1 %v8289_v50 }
 0x42e   : > { %2321 = vmatpush1.msra.mxu0 %v8292_v51  ;;  %2392 = vmatpush1.msra.mxu1 %v8295_v55 }
 0x42f   : > { %2322 = vmatprep.subr.mxu0 %v8298_v56  ;;  %2393 = vmatprep.subr.mxu1 %v8301_v59 }
 0x430   : > { %2323 = vmatpush1.msra.mxu0 %v8304_v60  ;;  %2394 = vmatpush1.msra.mxu1 %v8307_v61 }
 0x431   : > { %2324 = vmatprep.subr.mxu0 %v8310_v62  ;;  %2395 = vmatprep.subr.mxu1 %v8313_v63 }
 0x432   : > { %2325 = vmatpush1.msra.mxu0 %v8316_v0  ;;  %2396 = vmatpush1.msra.mxu1 %v8319_v15 }
 0x433   : > { %2326 = vmatprep.subr.mxu0 %v8322_v17  ;;  %2397 = vmatprep.subr.mxu1 %v8325_v18 }
 0x434   : > { %2327 = vmatpush1.msra.mxu0 %v8328_v19  ;;  %2398 = vmatpush1.msra.mxu1 %v8331_v20 }
 0x435   : > { %2328 = vmatprep.subr.mxu0 %v8334_v24  ;;  %2399 = vmatprep.subr.mxu1 %v8337_v26 }
 0x436   : > { %2329 = vmatpush1.msra.mxu0 %v8340_v27  ;;  %2400 = vmatpush1.msra.mxu1 %v8343_v28 }
 0x437   : > { %2330 = vmatprep.subr.mxu0 %v8346_v29  ;;  %2401 = vmatprep.subr.mxu1 %v8349_v31 }
 0x438   : > { %2331 = vmatpush1.msra.mxu0 %v8352_v32  ;;  %2402 = vmatpush1.msra.mxu1 %v8355_v33 }
 0x439   : > { %2332 = vmatprep.subr.mxu0 %v8358_v35  ;;  %2403 = vmatprep.subr.mxu1 %v8361_v36 }
 0x43a   : > { %2333 = vmatpush1.msra.mxu0 %v8364_v7  ;;  %2404 = vmatpush1.msra.mxu1 %v8367_v38 }
 0x43b   : > { %2334 = vmatprep.subr.mxu0 %v8370_v39  ;;  %2405 = vmatprep.subr.mxu1 %v8373_v57 }
 0x43c   : > { %2335 = vmatpush1.msra.mxu0 %v8376_v1  ;;  %2368 = vmatprep.mubr.f32.mxu0 %v11505_v14 }
 0x43d   : > { %2406 = vmatpush1.msra.mxu1 %v8380_v2  ;;  %2439 = vmatprep.mubr.f32.mxu1 %v11505_v14 }
 0x43e   : > { %2369 = vmatmul.mubr.f32.vlgmr.msra.gmra.mxu0 %v8160_v37  ;;  %2440 = vmatmul.mubr.f32.vlgmr.msra.gmra.mxu1 %v8160_v37  ;;  %v8401_v37 = vld [vmem:[#allocation16 + $0x1d8] sm:$0xff] }
 0x43f   : > { %2474 = vmatprep.subr.mxu0 %v8386_v4  ;;  %2545 = vmatprep.subr.mxu1 %v8389_v10  ;;  %11667 = vst [vmem:[#allocation43_spill] sm:$0xff] %v8401_v37 }
 0x440   : > { %2475 = vmatpush1.msra.mxu0 %v8392_v6  ;;  %2546 = vmatpush1.msra.mxu1 %v8395_v48 }
 0x441   : > { %2476 = vmatprep.subr.mxu0 %v8398_v12  ;;  %2547 = vmatprep.subr.mxu1 %v8401_v37 }
 0x442   : > { %2477 = vmatpush1.msra.mxu0 %v8404_v13  ;;  %2548 = vmatpush1.msra.mxu1 %v8407_v21  ;;  %v8425_v21 = vld [vmem:[#allocation16 + $0x198] sm:$0xff] }
 0x443   : > { %2478 = vmatprep.subr.mxu0 %v8410_v58  ;;  %2549 = vmatprep.subr.mxu1 %v8413_v25  ;;  %11675 = vst [vmem:[#allocation51_spill] sm:$0xff] %v8425_v21  ;;  %v8428_v58 = vld [vmem:[#allocation16 + $0x180] sm:$0xff]  ;;  %v8431_v25 = vld [vmem:[#allocation16 + $0x190] sm:$0xff] }
 0x444   : > { %2479 = vmatpush1.msra.mxu0 %v8416_v30  ;;  %2550 = vmatpush1.msra.mxu1 %v8419_v40  ;;  %11676 = vst [vmem:[#allocation52_spill] sm:$0xff] %v8428_v58  ;;  %11677 = vst [vmem:[#allocation53_spill] sm:$0xff] %v8431_v25  ;;  %v8434_v30 = vld [vmem:[#allocation16 + $0x168] sm:$0xff]  ;;  %v8437_v40 = vld [vmem:[#allocation16 + $0x178] sm:$0xff] }
 0x445   : > { %2480 = vmatprep.subr.mxu0 %v8422_v41  ;;  %2551 = vmatprep.subr.mxu1 %v8425_v21  ;;  %11678 = vst [vmem:[#allocation54_spill] sm:$0xff] %v8434_v30  ;;  %11679 = vst [vmem:[#allocation55_spill] sm:$0xff] %v8437_v40  ;;  %v8440_v41 = vld [vmem:[#allocation16 + $0x160] sm:$0xff]  ;;  %v8443_v21 = vld [vmem:[#allocation16 + $0x170] sm:$0xff] }
 0x446   : > { %2481 = vmatpush1.msra.mxu0 %v8428_v58  ;;  %2552 = vmatpush1.msra.mxu1 %v8431_v25  ;;  %11680 = vst [vmem:[#allocation56_spill] sm:$0xff] %v8440_v41  ;;  %11681 = vst [vmem:[#allocation57_spill] sm:$0xff] %v8443_v21  ;;  %v8446_v58 = vld [vmem:[#allocation16 + $0x148] sm:$0xff]  ;;  %v8449_v25 = vld [vmem:[#allocation16 + $0x158] sm:$0xff] }
 0x447   : > { %2482 = vmatprep.subr.mxu0 %v8434_v30  ;;  %2553 = vmatprep.subr.mxu1 %v8437_v40  ;;  %11682 = vst [vmem:[#allocation58_spill] sm:$0xff] %v8446_v58  ;;  %11683 = vst [vmem:[#allocation59_spill] sm:$0xff] %v8449_v25  ;;  %v8452_v30 = vld [vmem:[#allocation16 + $0x140] sm:$0xff]  ;;  %v8455_v40 = vld [vmem:[#allocation16 + $0x150] sm:$0xff] }
 0x448   : > { %2483 = vmatpush1.msra.mxu0 %v8440_v41  ;;  %2554 = vmatpush1.msra.mxu1 %v8443_v21  ;;  %11684 = vst [vmem:[#allocation60_spill] sm:$0xff] %v8452_v30  ;;  %11685 = vst [vmem:[#allocation61_spill] sm:$0xff] %v8455_v40  ;;  %v8458_v41 = vld [vmem:[#allocation16 + $0x128] sm:$0xff]  ;;  %v8461_v21 = vld [vmem:[#allocation16 + $0x138] sm:$0xff] }
 0x449   : > { %2484 = vmatprep.subr.mxu0 %v8446_v58  ;;  %2555 = vmatprep.subr.mxu1 %v8449_v25  ;;  %11686 = vst [vmem:[#allocation62_spill] sm:$0xff] %v8458_v41  ;;  %11687 = vst [vmem:[#allocation63_spill] sm:$0xff] %v8461_v21  ;;  %v8464_v58 = vld [vmem:[#allocation16 + $0x120] sm:$0xff]  ;;  %v8467_v25 = vld [vmem:[#allocation16 + $0x130] sm:$0xff] }
 0x44a   : > { %2485 = vmatpush1.msra.mxu0 %v8452_v30  ;;  %2556 = vmatpush1.msra.mxu1 %v8455_v40  ;;  %11688 = vst [vmem:[#allocation64_spill] sm:$0xff] %v8464_v58  ;;  %11689 = vst [vmem:[#allocation65_spill] sm:$0xff] %v8467_v25  ;;  %v8470_v30 = vld [vmem:[#allocation16 + $0x108] sm:$0xff]  ;;  %v8473_v40 = vld [vmem:[#allocation16 + $0x118] sm:$0xff] }
 0x44b   : > { %2486 = vmatprep.subr.mxu0 %v8458_v41  ;;  %2557 = vmatprep.subr.mxu1 %v8461_v21  ;;  %11690 = vst [vmem:[#allocation66_spill] sm:$0xff] %v8470_v30  ;;  %11691 = vst [vmem:[#allocation67_spill] sm:$0xff] %v8473_v40  ;;  %v8476_v41 = vld [vmem:[#allocation16 + $0x100] sm:$0xff]  ;;  %v8479_v21 = vld [vmem:[#allocation16 + $0x110] sm:$0xff] }
 0x44c   : > { %2487 = vmatpush1.msra.mxu0 %v8464_v58  ;;  %2558 = vmatpush1.msra.mxu1 %v8467_v25  ;;  %11692 = vst [vmem:[#allocation68_spill] sm:$0xff] %v8476_v41  ;;  %11693 = vst [vmem:[#allocation69_spill] sm:$0xff] %v8479_v21  ;;  %v8482_v58 = vld [vmem:[#allocation16 + $0xe8] sm:$0xff]  ;;  %v8485_v25 = vld [vmem:[#allocation16 + $0xf8] sm:$0xff] }
 0x44d   : > { %2488 = vmatprep.subr.mxu0 %v8470_v30  ;;  %2559 = vmatprep.subr.mxu1 %v8473_v40  ;;  %11694 = vst [vmem:[#allocation70_spill] sm:$0xff] %v8482_v58  ;;  %11695 = vst [vmem:[#allocation71_spill] sm:$0xff] %v8485_v25  ;;  %v8488_v30 = vld [vmem:[#allocation16 + $0xe0] sm:$0xff]  ;;  %v8491_v40 = vld [vmem:[#allocation16 + $0xf0] sm:$0xff] }
 0x44e   : > { %2489 = vmatpush1.msra.mxu0 %v8476_v41  ;;  %2560 = vmatpush1.msra.mxu1 %v8479_v21  ;;  %11696 = vst [vmem:[#allocation72_spill] sm:$0xff] %v8488_v30  ;;  %11697 = vst [vmem:[#allocation73_spill] sm:$0xff] %v8491_v40  ;;  %v8494_v41 = vld [vmem:[#allocation16 + $0xc8] sm:$0xff]  ;;  %v8497_v21 = vld [vmem:[#allocation16 + $0xd8] sm:$0xff] }
 0x44f   : > { %2490 = vmatprep.subr.mxu0 %v8482_v58  ;;  %2561 = vmatprep.subr.mxu1 %v8485_v25  ;;  %11698 = vst [vmem:[#allocation74_spill] sm:$0xff] %v8494_v41  ;;  %11699 = vst [vmem:[#allocation75_spill] sm:$0xff] %v8497_v21  ;;  %v8500_v58 = vld [vmem:[#allocation16 + $0xc0] sm:$0xff]  ;;  %v8503_v25 = vld [vmem:[#allocation16 + $0xd0] sm:$0xff] }
 0x450   : > { %2491 = vmatpush1.msra.mxu0 %v8488_v30  ;;  %2562 = vmatpush1.msra.mxu1 %v8491_v40  ;;  %11700 = vst [vmem:[#allocation76_spill] sm:$0xff] %v8500_v58  ;;  %11701 = vst [vmem:[#allocation77_spill] sm:$0xff] %v8503_v25  ;;  %v8506_v30 = vld [vmem:[#allocation16 + $0xa8] sm:$0xff]  ;;  %v8509_v40 = vld [vmem:[#allocation16 + $0xb8] sm:$0xff] }
 0x451   : > { %2492 = vmatprep.subr.mxu0 %v8494_v41  ;;  %2563 = vmatprep.subr.mxu1 %v8497_v21  ;;  %11702 = vst [vmem:[#allocation78_spill] sm:$0xff] %v8506_v30  ;;  %11703 = vst [vmem:[#allocation79_spill] sm:$0xff] %v8509_v40  ;;  %v8512_v41 = vld [vmem:[#allocation16 + $0xa0] sm:$0xff]  ;;  %v8515_v21 = vld [vmem:[#allocation16 + $0xb0] sm:$0xff] }
 0x452   : > { %2493 = vmatpush1.msra.mxu0 %v8500_v58  ;;  %2564 = vmatpush1.msra.mxu1 %v8503_v25  ;;  %11704 = vst [vmem:[#allocation80_spill] sm:$0xff] %v8512_v41  ;;  %11705 = vst [vmem:[#allocation81_spill] sm:$0xff] %v8515_v21  ;;  %v8518_v58 = vld [vmem:[#allocation16 + $0x88] sm:$0xff]  ;;  %v8521_v25 = vld [vmem:[#allocation16 + $0x98] sm:$0xff] }
 0x453   : > { %2494 = vmatprep.subr.mxu0 %v8506_v30  ;;  %2565 = vmatprep.subr.mxu1 %v8509_v40  ;;  %11706 = vst [vmem:[#allocation82_spill] sm:$0xff] %v8518_v58  ;;  %11707 = vst [vmem:[#allocation83_spill] sm:$0xff] %v8521_v25  ;;  %v8524_v30 = vld [vmem:[#allocation16 + $0x80] sm:$0xff]  ;;  %v8527_v40 = vld [vmem:[#allocation16 + $0x90] sm:$0xff] }
 0x454   : > { %2495 = vmatpush1.msra.mxu0 %v8512_v41  ;;  %2566 = vmatpush1.msra.mxu1 %v8515_v21  ;;  %11708 = vst [vmem:[#allocation84_spill] sm:$0xff] %v8524_v30  ;;  %11709 = vst [vmem:[#allocation85_spill] sm:$0xff] %v8527_v40  ;;  %v8530_v41 = vld [vmem:[#allocation16 + $0x68] sm:$0xff]  ;;  %v8533_v21 = vld [vmem:[#allocation16 + $0x78] sm:$0xff] }
 0x455   : > { %2496 = vmatprep.subr.mxu0 %v8518_v58  ;;  %2567 = vmatprep.subr.mxu1 %v8521_v25  ;;  %11710 = vst [vmem:[#allocation86_spill] sm:$0xff] %v8530_v41  ;;  %11711 = vst [vmem:[#allocation87_spill] sm:$0xff] %v8533_v21  ;;  %v8536_v58 = vld [vmem:[#allocation16 + $0x60] sm:$0xff]  ;;  %v8539_v25 = vld [vmem:[#allocation16 + $0x70] sm:$0xff] }
 0x456   : > { %2497 = vmatpush1.msra.mxu0 %v8524_v30  ;;  %2568 = vmatpush1.msra.mxu1 %v8527_v40  ;;  %11712 = vst [vmem:[#allocation88_spill] sm:$0xff] %v8536_v58  ;;  %11713 = vst [vmem:[#allocation89_spill] sm:$0xff] %v8539_v25  ;;  %v8542_v30 = vld [vmem:[#allocation16 + $0x48] sm:$0xff]  ;;  %v8545_v40 = vld [vmem:[#allocation16 + $0x58] sm:$0xff] }
 0x457   : > { %2498 = vmatprep.subr.mxu0 %v8530_v41  ;;  %2569 = vmatprep.subr.mxu1 %v8533_v21  ;;  %11714 = vst [vmem:[#allocation90_spill] sm:$0xff] %v8542_v30  ;;  %11715 = vst [vmem:[#allocation91_spill] sm:$0xff] %v8545_v40  ;;  %v8548_v41 = vld [vmem:[#allocation16 + $0x40] sm:$0xff]  ;;  %v8551_v21 = vld [vmem:[#allocation16 + $0x50] sm:$0xff] }
 0x458   : > { %2499 = vmatpush1.msra.mxu0 %v8536_v58  ;;  %2570 = vmatpush1.msra.mxu1 %v8539_v25  ;;  %11716 = vst [vmem:[#allocation92_spill] sm:$0xff] %v8548_v41  ;;  %11717 = vst [vmem:[#allocation93_spill] sm:$0xff] %v8551_v21  ;;  %v8554_v58 = vld [vmem:[#allocation16 + $0x28] sm:$0xff]  ;;  %v8557_v25 = vld [vmem:[#allocation16 + $0x38] sm:$0xff] }
 0x459   : > { %2500 = vmatprep.subr.mxu0 %v8542_v30  ;;  %2571 = vmatprep.subr.mxu1 %v8545_v40  ;;  %11718 = vst [vmem:[#allocation94_spill] sm:$0xff] %v8554_v58  ;;  %11719 = vst [vmem:[#allocation95_spill] sm:$0xff] %v8557_v25  ;;  %v8560_v30 = vld [vmem:[#allocation16 + $0x20] sm:$0xff]  ;;  %v8563_v40 = vld [vmem:[#allocation16 + $0x30] sm:$0xff] }
 0x45a   : > { %2501 = vmatpush1.msra.mxu0 %v8548_v41  ;;  %2572 = vmatpush1.msra.mxu1 %v8551_v21  ;;  %11720 = vst [vmem:[#allocation96_spill] sm:$0xff] %v8560_v30  ;;  %11721 = vst [vmem:[#allocation97_spill] sm:$0xff] %v8563_v40  ;;  %v8566_v41 = vld [vmem:[#allocation16 + $0x8] sm:$0xff]  ;;  %v8569_v21 = vld [vmem:[#allocation16 + $0x18] sm:$0xff] }
 0x45b   : > { %2502 = vmatprep.subr.mxu0 %v8554_v58  ;;  %2573 = vmatprep.subr.mxu1 %v8557_v25  ;;  %11722 = vst [vmem:[#allocation98_spill] sm:$0xff] %v8566_v41  ;;  %11723 = vst [vmem:[#allocation99_spill] sm:$0xff] %v8569_v21  ;;  %v8572_v58 = vld [vmem:[#allocation16] sm:$0xff]  ;;  %v8575_v25 = vld [vmem:[#allocation16 + $0x10] sm:$0xff] }
 0x45c   : > { %2503 = vmatpush1.msra.mxu0 %v8560_v30  ;;  %2574 = vmatpush1.msra.mxu1 %v8563_v40  ;;  %11724 = vst [vmem:[#allocation101_spill] sm:$0xff] %v8572_v58  ;;  %11725 = vst [vmem:[#allocation102_spill] sm:$0xff] %v8575_v25  ;;  %v8580_v40 = vld [vmem:[#allocation18 + $0x1e8] sm:$0xff] }
 0x45d   : > { %2504 = vmatprep.subr.mxu0 %v8566_v41  ;;  %2575 = vmatprep.subr.mxu1 %v8569_v21  ;;  %11726 = vst [vmem:[#allocation100_spill] sm:$0xff] %v8580_v40  ;;  %v8583_v41 = vld [vmem:[#allocation18 + $0x1f8] sm:$0xff] }
 0x45e   : > { %2505 = vmatpush1.msra.mxu0 %v8572_v58  ;;  %2576 = vmatpush1.msra.mxu1 %v8575_v25  ;;  %11727 = vst [vmem:[#allocation127_spill] sm:$0xff] %v8583_v41 }
 0x45f   : > { %2538 = vmatprep.mubr.f32.mxu0 %v11505_v14  ;;  %2609 = vmatprep.mubr.f32.mxu1 %v11505_v14 }
 0x460   : > { %2620 = vmatprep.subr.mxu0 %v8580_v40  ;;  %2691 = vmatprep.subr.mxu1 %v8583_v41 }
 0x4bb   : > { %v2043_v21 = vpop.f32.mrf.mxu0  ;;  %v2114_v37 = vpop.f32.mrf.mxu1 }
 0x4bc   : > { %v2119_v58 = vadd.f32 %v2043_v21, %v8133_v52  ;;  %v2121_v57 = vadd.f32 %v2114_v37, %v8141_v23 }
 0x4bd   : > { %v2045_v30 = vpop.f32.mrf.mxu0  ;;  %v2116_v4 = vpop.f32.mrf.mxu1 }
 0x4be   : > { %v2120_v25 = vadd.f32 %v2045_v30, %v8135_v53  ;;  %v2122_v41 = vadd.f32 %v2116_v4, %v8139_v22 }
 0x4dc   : > { %v2189_v13 = vpop.f32.mrf.mxu0  ;;  %v2260_v40 = vpop.f32.mrf.mxu1 }
 0x4dd   : > { %v2265_v12 = vadd.f32 %v2189_v13, %v2119_v58  ;;  %v2267_v21 = vadd.f32 %v2260_v40, %v2121_v57  ;;  %v11728_v13 = vld [vmem:[#allocation103_spill] sm:$0xff] }
 0x4de   : > { %v2191_v48 = vpop.f32.mrf.mxu0  ;;  %v2262_v1 = vpop.f32.mrf.mxu1 }
 0x4df   : > { %v5544_v6 = vmul.f32 -1.442695, %v2265_v12  ;;  %v2266_v10 = vadd.f32 %v2191_v48, %v2120_v25  ;;  %v2268_v39 = vadd.f32 %v2262_v1, %v2122_v41 }
 0x4e1   : > { %5798 = vpow2.f32 %v5544_v6  ;;  %v5545_v2 = vmul.f32 -1.442695, %v2266_v10  ;;  %v5546_v38 = vmul.f32 -1.442695, %v2268_v39  ;;  %v11729_v39 = vld [vmem:[#allocation105_spill] sm:$0xff] }
 0x4e3   : > { %5800 = vpow2.f32 %v5545_v2 }
 0x4e4   : > { %5802 = vtanh.f32 %v2267_v21 }
 0x4ee   : > { %v5799_v52 = vpop.eup %5798 }
 0x4ef   : > { %v2272_v7 = vadd.f32 1.0, %v5799_v52 }
 0x4f0   : > { %v5801_v30 = vpop.eup %5800 }
 0x4f1   : > { %5804 = vrcp.f32 %v2272_v7  ;;  %v2278_v12 = vadd.f32 1.0, %v5801_v30  ;;  %v5803_v6 = vpop.eup %5802  ;;  %v11730_v30 = vld [vmem:[#allocation106_spill] sm:$0xff] }
 0x4f2   : > { %5806 = vpow2.f32 %v5546_v38 }
 0x4f3   : > { %5808 = vrcp.f32 %v2278_v12 }
 0x4fe   : > { %v5805_v10 = vpop.eup %5804  ;;  %v2370_v48 = vpop.f32.mrf.mxu0 }
 0x4ff   : > { %v5807_v2 = vpop.eup %5806  ;;  %v2446_v58 = vadd.f32 %v2370_v48, %v11728_v13  ;;  %v2289_v37 = vmul.f32 %v5805_v10, %v5803_v6  ;;  %v2441_v7 = vpop.f32.mrf.mxu1  ;;  %v11731_v6 = vld [vmem:[#allocation104_spill] sm:$0xff] }
 0x500   : > { %v5809_v4 = vpop.eup %5808  ;;  %v2372_v25 = vpop.f32.mrf.mxu0  ;;  %v2285_v40 = vadd.f32 1.0, %v5807_v2  ;;  %v2448_v10 = vadd.f32 %v2441_v7, %v11731_v6 }
 0x501   : > { %v2288_v57 = vmul.f32 %v5809_v4, %v8147_v54  ;;  %v5548_v1 = vmul.f32 -1.442695, %v2446_v58  ;;  %v2447_v52 = vadd.f32 %v2372_v25, %v11729_v39  ;;  %v2443_v21 = vpop.f32.mrf.mxu1 }
 0x502   : > { %v2449_v12 = vadd.f32 %v2443_v21, %v11730_v30 }
 0x503   : > { %v8593_v41 = vadd.f32 %v2289_v37, %v2288_v57  ;;  %5810 = vpow2.f32 %v5548_v1  ;;  %v5549_v38 = vmul.f32 -1.442695, %v2447_v52 }
 0x504   : > { %v5550_v54 = vmul.f32 -1.442695, %v2449_v12 }
 0x505   : > { %5812 = vpow2.f32 %v5549_v38 }
 0x506   : > { %5814 = vrcp.f32 %v2285_v40 }
 0x507   : > { %5816 = vtanh.f32 %v8593_v41 }
 0x508   : > { %5818 = vtanh.f32 %v2448_v10  ;;  %v8610_v10 = vld [vmem:[#allocation18 + $0x1e0] sm:$0xff] }
 0x509   : > { %5820 = vpow2.f32 %v5550_v54  ;;  %v8613_v54 = vld [vmem:[#allocation18 + $0x1f0] sm:$0xff] }
 0x510   : > { %v5811_v48 = vpop.eup %5810 }
 0x511   : > { %v2453_v13 = vadd.f32 1.0, %v5811_v48  ;;  %v8619_v48 = vld [vmem:[#allocation18 + $0x1d8] sm:$0xff] }
 0x512   : > { %v5813_v2 = vpop.eup %5812 }
 0x513   : > { %v5815_v58 = vpop.eup %5814  ;;  %5822 = vrcp.f32 %v2453_v13  ;;  %v2459_v4 = vadd.f32 1.0, %v5813_v2  ;;  %v8622_v13 = vld [vmem:[#allocation18 + $0x1c0] sm:$0xff]  ;;  %v8625_v2 = vld [vmem:[#allocation18 + $0x1d0] sm:$0xff] }
 0x514   : > { %v5817_v25 = vpop.eup %5816 }
 0x515   : > { %5824 = vrcp.f32 %v2459_v4  ;;  %v8598_v37 = vmul.f32 %v5817_v25, %v5815_v58  ;;  %v5819_v57 = vpop.eup %5818  ;;  %v8628_v58 = vld [vmem:[#allocation18 + $0x1a8] sm:$0xff]  ;;  %v8631_v4 = vld [vmem:[#allocation18 + $0x1b8] sm:$0xff]  ;;  %v8634_v25 = vld [vmem:[#allocation18 + $0x1a0] sm:$0xff] }
 0x516   : > { %v5821_v1 = vpop.eup %5820 }
 0x517   : > { %5547 = vst [vmem:[%s7290_s4 + $0x8] sm:$0xff] %v8598_v37  ;;  %v2466_v7 = vadd.f32 1.0, %v5821_v1  ;;  %v8640_v1 = vld [vmem:[#allocation18 + $0x188] sm:$0xff] }
 0x519   : > { %5826 = vrcp.f32 %v2466_v7  ;;  %v8652_v7 = vld [vmem:[#allocation18 + $0x168] sm:$0xff] }
 0x51a   : > { %11734 = vst [vmem:[#allocation130_spill] sm:$0xff] %v8652_v7 }
 0x520   : > { %v5823_v39 = vpop.eup %5822 }
 0x521   : > { %v2470_v52 = vmul.f32 %v5823_v39, %v5819_v57  ;;  %v8637_v57 = vld [vmem:[#allocation18 + $0x1b0] sm:$0xff]  ;;  %v8643_v39 = vld [vmem:[#allocation18 + $0x198] sm:$0xff] }
 0x522   : > { %v5825_v40 = vpop.eup %5824 }
 0x523   : > { %v2469_v38 = vmul.f32 %v5825_v40, %v8157_v34  ;;  %v8616_v34 = vld [vmem:[#allocation18 + $0x1c8] sm:$0xff]  ;;  %v8649_v40 = vld [vmem:[#allocation18 + $0x190] sm:$0xff] }
 0x524   : > { %11733 = vst [vmem:[#allocation129_spill] sm:$0xff] %v8649_v40 }
 0x525   : > { %v8603_v21 = vadd.f32 %v2470_v52, %v2469_v38  ;;  %v8646_v52 = vld [vmem:[#allocation18 + $0x180] sm:$0xff]  ;;  %v8655_v38 = vld [vmem:[#allocation18 + $0x178] sm:$0xff] }
 0x526   : > { %v5827_v30 = vpop.eup %5826  ;;  %11732 = vst [vmem:[#allocation128_spill] sm:$0xff] %v8646_v52  ;;  %11735 = vst [vmem:[#allocation131_spill] sm:$0xff] %v8655_v38 }
 0x527   : > { %5828 = vtanh.f32 %v8603_v21 }
 0x534   : > { %v5829_v12 = vpop.eup %5828 }
 0x535   : > { %v8606_v6 = vmul.f32 %v5829_v12, %v5827_v30  ;;  %v8658_v30 = vld [vmem:[#allocation18 + $0x160] sm:$0xff]  ;;  %v8661_v12 = vld [vmem:[#allocation18 + $0x170] sm:$0xff] }
 0x536   : > { %11736 = vst [vmem:[#allocation132_spill] sm:$0xff] %v8658_v30  ;;  %11737 = vst [vmem:[#allocation133_spill] sm:$0xff] %v8661_v12 }
 0x537   : > { %2539 = vmatmul.mubr.f32.vlgmr.msra.gmra.mxu0 %v8606_v6  ;;  %2610 = vmatmul.mubr.f32.vlgmr.msra.gmra.mxu1 %v8606_v6 }
 0x538   : > { %2621 = vmatpush1.msra.mxu0 %v8610_v10  ;;  %2692 = vmatpush1.msra.mxu1 %v8613_v54 }
 0x539   : > { %2622 = vmatprep.subr.mxu0 %v8616_v34  ;;  %2693 = vmatprep.subr.mxu1 %v8619_v48 }
 0x53a   : > { %2623 = vmatpush1.msra.mxu0 %v8622_v13  ;;  %2694 = vmatpush1.msra.mxu1 %v8625_v2 }
 0x53b   : > { %2624 = vmatprep.subr.mxu0 %v8628_v58  ;;  %2695 = vmatprep.subr.mxu1 %v8631_v4 }
 0x53c   : > { %2625 = vmatpush1.msra.mxu0 %v8634_v25  ;;  %2696 = vmatpush1.msra.mxu1 %v8637_v57 }
 0x53d   : > { %2626 = vmatprep.subr.mxu0 %v8640_v1  ;;  %2697 = vmatprep.subr.mxu1 %v8643_v39 }
 0x53e   : > { %2627 = vmatpush1.msra.mxu0 %v8646_v52  ;;  %2698 = vmatpush1.msra.mxu1 %v8649_v40  ;;  %v8664_v52 = vld [vmem:[#allocation18 + $0x148] sm:$0xff]  ;;  %v8667_v40 = vld [vmem:[#allocation18 + $0x158] sm:$0xff] }
 0x53f   : > { %2628 = vmatprep.subr.mxu0 %v8652_v7  ;;  %2699 = vmatprep.subr.mxu1 %v8655_v38  ;;  %11738 = vst [vmem:[#allocation134_spill] sm:$0xff] %v8664_v52  ;;  %11739 = vst [vmem:[#allocation135_spill] sm:$0xff] %v8667_v40  ;;  %v8670_v7 = vld [vmem:[#allocation18 + $0x140] sm:$0xff]  ;;  %v8673_v38 = vld [vmem:[#allocation18 + $0x150] sm:$0xff] }
 0x540   : > { %2629 = vmatpush1.msra.mxu0 %v8658_v30  ;;  %2700 = vmatpush1.msra.mxu1 %v8661_v12  ;;  %11740 = vst [vmem:[#allocation136_spill] sm:$0xff] %v8670_v7  ;;  %11741 = vst [vmem:[#allocation137_spill] sm:$0xff] %v8673_v38  ;;  %v8676_v30 = vld [vmem:[#allocation18 + $0x128] sm:$0xff]  ;;  %v8679_v12 = vld [vmem:[#allocation18 + $0x138] sm:$0xff] }
 0x541   : > { %2630 = vmatprep.subr.mxu0 %v8664_v52  ;;  %2701 = vmatprep.subr.mxu1 %v8667_v40  ;;  %11742 = vst [vmem:[#allocation138_spill] sm:$0xff] %v8676_v30  ;;  %11743 = vst [vmem:[#allocation139_spill] sm:$0xff] %v8679_v12  ;;  %v8682_v52 = vld [vmem:[#allocation18 + $0x120] sm:$0xff]  ;;  %v8685_v40 = vld [vmem:[#allocation18 + $0x130] sm:$0xff] }
 0x542   : > { %2631 = vmatpush1.msra.mxu0 %v8670_v7  ;;  %2702 = vmatpush1.msra.mxu1 %v8673_v38  ;;  %11744 = vst [vmem:[#allocation140_spill] sm:$0xff] %v8682_v52  ;;  %11745 = vst [vmem:[#allocation141_spill] sm:$0xff] %v8685_v40  ;;  %v8688_v7 = vld [vmem:[#allocation18 + $0x108] sm:$0xff]  ;;  %v8691_v38 = vld [vmem:[#allocation18 + $0x118] sm:$0xff] }
 0x543   : > { %2632 = vmatprep.subr.mxu0 %v8676_v30  ;;  %2703 = vmatprep.subr.mxu1 %v8679_v12  ;;  %11746 = vst [vmem:[#allocation142_spill] sm:$0xff] %v8688_v7  ;;  %11747 = vst [vmem:[#allocation143_spill] sm:$0xff] %v8691_v38  ;;  %v8694_v30 = vld [vmem:[#allocation18 + $0x100] sm:$0xff]  ;;  %v8697_v12 = vld [vmem:[#allocation18 + $0x110] sm:$0xff] }
 0x544   : > { %2633 = vmatpush1.msra.mxu0 %v8682_v52  ;;  %2704 = vmatpush1.msra.mxu1 %v8685_v40  ;;  %11748 = vst [vmem:[#allocation144_spill] sm:$0xff] %v8694_v30  ;;  %11749 = vst [vmem:[#allocation145_spill] sm:$0xff] %v8697_v12  ;;  %v8700_v52 = vld [vmem:[#allocation18 + $0xe8] sm:$0xff]  ;;  %v8703_v40 = vld [vmem:[#allocation18 + $0xf8] sm:$0xff] }
 0x545   : > { %2634 = vmatprep.subr.mxu0 %v8688_v7  ;;  %2705 = vmatprep.subr.mxu1 %v8691_v38  ;;  %11750 = vst [vmem:[#allocation146_spill] sm:$0xff] %v8700_v52  ;;  %11751 = vst [vmem:[#allocation147_spill] sm:$0xff] %v8703_v40  ;;  %v8706_v7 = vld [vmem:[#allocation18 + $0xe0] sm:$0xff]  ;;  %v8709_v38 = vld [vmem:[#allocation18 + $0xf0] sm:$0xff] }
 0x546   : > { %2635 = vmatpush1.msra.mxu0 %v8694_v30  ;;  %2706 = vmatpush1.msra.mxu1 %v8697_v12  ;;  %11752 = vst [vmem:[#allocation148_spill] sm:$0xff] %v8706_v7  ;;  %11753 = vst [vmem:[#allocation149_spill] sm:$0xff] %v8709_v38  ;;  %v8712_v30 = vld [vmem:[#allocation18 + $0xc8] sm:$0xff]  ;;  %v8715_v12 = vld [vmem:[#allocation18 + $0xd8] sm:$0xff] }
 0x547   : > { %2636 = vmatprep.subr.mxu0 %v8700_v52  ;;  %2707 = vmatprep.subr.mxu1 %v8703_v40  ;;  %11754 = vst [vmem:[#allocation150_spill] sm:$0xff] %v8712_v30  ;;  %11755 = vst [vmem:[#allocation151_spill] sm:$0xff] %v8715_v12  ;;  %v8718_v52 = vld [vmem:[#allocation18 + $0xc0] sm:$0xff]  ;;  %v8721_v40 = vld [vmem:[#allocation18 + $0xd0] sm:$0xff] }
 0x548   : > { %2637 = vmatpush1.msra.mxu0 %v8706_v7  ;;  %2708 = vmatpush1.msra.mxu1 %v8709_v38  ;;  %11756 = vst [vmem:[#allocation152_spill] sm:$0xff] %v8718_v52  ;;  %11757 = vst [vmem:[#allocation153_spill] sm:$0xff] %v8721_v40  ;;  %v8724_v7 = vld [vmem:[#allocation18 + $0xa8] sm:$0xff]  ;;  %v8727_v38 = vld [vmem:[#allocation18 + $0xb8] sm:$0xff] }
 0x549   : > { %2638 = vmatprep.subr.mxu0 %v8712_v30  ;;  %2709 = vmatprep.subr.mxu1 %v8715_v12  ;;  %11758 = vst [vmem:[#allocation154_spill] sm:$0xff] %v8724_v7  ;;  %11759 = vst [vmem:[#allocation155_spill] sm:$0xff] %v8727_v38  ;;  %v8730_v30 = vld [vmem:[#allocation18 + $0xa0] sm:$0xff]  ;;  %v8733_v12 = vld [vmem:[#allocation18 + $0xb0] sm:$0xff] }
 0x54a   : > { %2639 = vmatpush1.msra.mxu0 %v8718_v52  ;;  %2710 = vmatpush1.msra.mxu1 %v8721_v40  ;;  %11760 = vst [vmem:[#allocation156_spill] sm:$0xff] %v8730_v30  ;;  %11761 = vst [vmem:[#allocation157_spill] sm:$0xff] %v8733_v12  ;;  %v8736_v52 = vld [vmem:[#allocation18 + $0x88] sm:$0xff]  ;;  %v8739_v40 = vld [vmem:[#allocation18 + $0x98] sm:$0xff] }
 0x54b   : > { %2640 = vmatprep.subr.mxu0 %v8724_v7  ;;  %2711 = vmatprep.subr.mxu1 %v8727_v38  ;;  %11762 = vst [vmem:[#allocation158_spill] sm:$0xff] %v8736_v52  ;;  %11763 = vst [vmem:[#allocation159_spill] sm:$0xff] %v8739_v40  ;;  %v8742_v7 = vld [vmem:[#allocation18 + $0x80] sm:$0xff]  ;;  %v8745_v38 = vld [vmem:[#allocation18 + $0x90] sm:$0xff] }
 0x54c   : > { %2641 = vmatpush1.msra.mxu0 %v8730_v30  ;;  %2712 = vmatpush1.msra.mxu1 %v8733_v12  ;;  %11764 = vst [vmem:[#allocation160_spill] sm:$0xff] %v8742_v7  ;;  %11765 = vst [vmem:[#allocation161_spill] sm:$0xff] %v8745_v38  ;;  %v8748_v30 = vld [vmem:[#allocation18 + $0x68] sm:$0xff]  ;;  %v8751_v12 = vld [vmem:[#allocation18 + $0x78] sm:$0xff] }
 0x54d   : > { %2642 = vmatprep.subr.mxu0 %v8736_v52  ;;  %2713 = vmatprep.subr.mxu1 %v8739_v40  ;;  %11766 = vst [vmem:[#allocation162_spill] sm:$0xff] %v8748_v30  ;;  %11767 = vst [vmem:[#allocation163_spill] sm:$0xff] %v8751_v12  ;;  %v8754_v52 = vld [vmem:[#allocation18 + $0x60] sm:$0xff]  ;;  %v8757_v40 = vld [vmem:[#allocation18 + $0x70] sm:$0xff] }
 0x54e   : > { %2643 = vmatpush1.msra.mxu0 %v8742_v7  ;;  %2714 = vmatpush1.msra.mxu1 %v8745_v38  ;;  %11768 = vst [vmem:[#allocation164_spill] sm:$0xff] %v8754_v52  ;;  %11769 = vst [vmem:[#allocation165_spill] sm:$0xff] %v8757_v40  ;;  %v8760_v7 = vld [vmem:[#allocation18 + $0x48] sm:$0xff]  ;;  %v8763_v38 = vld [vmem:[#allocation18 + $0x58] sm:$0xff] }
 0x54f   : > { %2644 = vmatprep.subr.mxu0 %v8748_v30  ;;  %2715 = vmatprep.subr.mxu1 %v8751_v12  ;;  %11770 = vst [vmem:[#allocation166_spill] sm:$0xff] %v8760_v7  ;;  %11771 = vst [vmem:[#allocation167_spill] sm:$0xff] %v8763_v38  ;;  %v8766_v30 = vld [vmem:[#allocation18 + $0x40] sm:$0xff]  ;;  %v8769_v12 = vld [vmem:[#allocation18 + $0x50] sm:$0xff] }
 0x550   : > { %2645 = vmatpush1.msra.mxu0 %v8754_v52  ;;  %2716 = vmatpush1.msra.mxu1 %v8757_v40  ;;  %11772 = vst [vmem:[#allocation168_spill] sm:$0xff] %v8766_v30  ;;  %11773 = vst [vmem:[#allocation169_spill] sm:$0xff] %v8769_v12  ;;  %v8772_v52 = vld [vmem:[#allocation18 + $0x28] sm:$0xff]  ;;  %v8775_v40 = vld [vmem:[#allocation18 + $0x38] sm:$0xff] }
 0x551   : > { %2646 = vmatprep.subr.mxu0 %v8760_v7  ;;  %2717 = vmatprep.subr.mxu1 %v8763_v38  ;;  %11774 = vst [vmem:[#allocation170_spill] sm:$0xff] %v8772_v52  ;;  %11775 = vst [vmem:[#allocation171_spill] sm:$0xff] %v8775_v40  ;;  %v8778_v7 = vld [vmem:[#allocation18 + $0x20] sm:$0xff]  ;;  %v8781_v38 = vld [vmem:[#allocation18 + $0x30] sm:$0xff] }
 0x552   : > { %2647 = vmatpush1.msra.mxu0 %v8766_v30  ;;  %2718 = vmatpush1.msra.mxu1 %v8769_v12  ;;  %11776 = vst [vmem:[#allocation172_spill] sm:$0xff] %v8781_v38  ;;  %v8784_v30 = vld [vmem:[#allocation18 + $0x8] sm:$0xff]  ;;  %v8787_v12 = vld [vmem:[#allocation18 + $0x18] sm:$0xff] }
 0x553   : > { %2648 = vmatprep.subr.mxu0 %v8772_v52  ;;  %2719 = vmatprep.subr.mxu1 %v8775_v40  ;;  %11777 = vst [vmem:[#allocation173_spill] sm:$0xff] %v8784_v30  ;;  %11778 = vst [vmem:[#allocation174_spill] sm:$0xff] %v8787_v12  ;;  %v8790_v52 = vld [vmem:[#allocation18] sm:$0xff]  ;;  %v8794_v40 = vld [vmem:[#allocation18 + $0x10] sm:$0xff] }
 0x554   : > { %2649 = vmatpush1.msra.mxu0 %v8778_v7  ;;  %2720 = vmatpush1.msra.mxu1 %v8781_v38  ;;  %11779 = vst [vmem:[#allocation175_spill] sm:$0xff] %v8790_v52  ;;  %11780 = vst [vmem:[#allocation176_spill] sm:$0xff] %v8794_v40  ;;  %v8809_v38 = vld [vmem:[#allocation15 + $0x1f0] sm:$0xff] }
 0x555   : > { %2650 = vmatprep.subr.mxu0 %v8784_v30  ;;  %2721 = vmatprep.subr.mxu1 %v8787_v12  ;;  %v8800_v30 = vld [vmem:[#allocation15 + $0x1e8] sm:$0xff]  ;;  %v8803_v12 = vld [vmem:[#allocation15 + $0x1f8] sm:$0xff]  ;;  %11784 = vst [vmem:[#allocation180_spill] sm:$0xff] %v8809_v38 }
 0x556   : > { %2651 = vmatpush1.msra.mxu0 %v8790_v52  ;;  %2684 = vmatprep.mubr.f32.mxu0 %v11505_v14  ;;  %11781 = vst [vmem:[#allocation177_spill] sm:$0xff] %v8800_v30  ;;  %11782 = vst [vmem:[#allocation178_spill] sm:$0xff] %v8803_v12  ;;  %v8806_v52 = vld [vmem:[#allocation15 + $0x1e0] sm:$0xff] }
 0x557   : > { %2722 = vmatpush1.msra.mxu1 %v8794_v40  ;;  %2755 = vmatprep.mubr.f32.mxu1 %v11505_v14  ;;  %11783 = vst [vmem:[#allocation179_spill] sm:$0xff] %v8806_v52  ;;  %v8812_v40 = vld [vmem:[#allocation15 + $0x1c8] sm:$0xff] }
 0x558   : > { %2685 = vmatmul.mubr.f32.vlgmr.msra.gmra.mxu0 %v8598_v37  ;;  %2756 = vmatmul.mubr.f32.vlgmr.msra.gmra.mxu1 %v8598_v37  ;;  %11785 = vst [vmem:[#allocation181_spill] sm:$0xff] %v8812_v40  ;;  %v8815_v37 = vld [vmem:[#allocation15 + $0x1d8] sm:$0xff] }
 0x559   : > { %2801 = vmatprep.subr.mxu0 %v8800_v30  ;;  %2872 = vmatprep.subr.mxu1 %v8803_v12  ;;  %11786 = vst [vmem:[#allocation182_spill] sm:$0xff] %v8815_v37  ;;  %v8818_v30 = vld [vmem:[#allocation15 + $0x1c0] sm:$0xff]  ;;  %v8821_v12 = vld [vmem:[#allocation15 + $0x1d0] sm:$0xff] }
 0x55a   : > { %2802 = vmatpush1.msra.mxu0 %v8806_v52  ;;  %2873 = vmatpush1.msra.mxu1 %v8809_v38  ;;  %11787 = vst [vmem:[#allocation183_spill] sm:$0xff] %v8818_v30  ;;  %11788 = vst [vmem:[#allocation184_spill] sm:$0xff] %v8821_v12  ;;  %v8824_v52 = vld [vmem:[#allocation15 + $0x1a8] sm:$0xff]  ;;  %v8827_v38 = vld [vmem:[#allocation15 + $0x1b8] sm:$0xff] }
 0x55b   : > { %2803 = vmatprep.subr.mxu0 %v8812_v40  ;;  %2874 = vmatprep.subr.mxu1 %v8815_v37  ;;  %11789 = vst [vmem:[#allocation185_spill] sm:$0xff] %v8824_v52  ;;  %11790 = vst [vmem:[#allocation186_spill] sm:$0xff] %v8827_v38  ;;  %v8830_v40 = vld [vmem:[#allocation15 + $0x1a0] sm:$0xff]  ;;  %v8833_v37 = vld [vmem:[#allocation15 + $0x1b0] sm:$0xff] }
 0x55c   : > { %2804 = vmatpush1.msra.mxu0 %v8818_v30  ;;  %2875 = vmatpush1.msra.mxu1 %v8821_v12  ;;  %11791 = vst [vmem:[#allocation187_spill] sm:$0xff] %v8830_v40  ;;  %11792 = vst [vmem:[#allocation188_spill] sm:$0xff] %v8833_v37  ;;  %v8836_v30 = vld [vmem:[#allocation15 + $0x188] sm:$0xff]  ;;  %v8839_v12 = vld [vmem:[#allocation15 + $0x198] sm:$0xff] }
 0x55d   : > { %2805 = vmatprep.subr.mxu0 %v8824_v52  ;;  %2876 = vmatprep.subr.mxu1 %v8827_v38  ;;  %11793 = vst [vmem:[#allocation189_spill] sm:$0xff] %v8836_v30  ;;  %11794 = vst [vmem:[#allocation103_spill] sm:$0xff] %v8839_v12  ;;  %v8842_v52 = vld [vmem:[#allocation15 + $0x180] sm:$0xff]  ;;  %v8845_v38 = vld [vmem:[#allocation15 + $0x190] sm:$0xff] }
 0x55e   : > { %2806 = vmatpush1.msra.mxu0 %v8830_v40  ;;  %2877 = vmatpush1.msra.mxu1 %v8833_v37  ;;  %v8848_v40 = vld [vmem:[#allocation15 + $0x168] sm:$0xff]  ;;  %v8851_v37 = vld [vmem:[#allocation15 + $0x178] sm:$0xff] }
 0x55f   : > { %2807 = vmatprep.subr.mxu0 %v8836_v30  ;;  %2878 = vmatprep.subr.mxu1 %v8839_v12  ;;  %v8854_v30 = vld [vmem:[#allocation15 + $0x160] sm:$0xff]  ;;  %v8857_v12 = vld [vmem:[#allocation15 + $0x170] sm:$0xff] }
 0x560   : > { %2808 = vmatpush1.msra.mxu0 %v8842_v52  ;;  %2879 = vmatpush1.msra.mxu1 %v8845_v38 }
 0x561   : > { %2809 = vmatprep.subr.mxu0 %v8848_v40  ;;  %2880 = vmatprep.subr.mxu1 %v8851_v37 }
 0x562   : > { %2810 = vmatpush1.msra.mxu0 %v8854_v30  ;;  %2881 = vmatpush1.msra.mxu1 %v8857_v12 }
 0x563   : > { %2811 = vmatprep.subr.mxu0 %v8250_v42  ;;  %2882 = vmatprep.subr.mxu1 %v8253_v43  ;;  %v11795_v42 = vld [vmem:[#allocation32_spill] sm:$0xff]  ;;  %v11796_v43 = vld [vmem:[#allocation33_spill] sm:$0xff] }
 0x564   : > { %2812 = vmatpush1.msra.mxu0 %v8256_v44  ;;  %2883 = vmatpush1.msra.mxu1 %v8259_v16  ;;  %v11797_v44 = vld [vmem:[#allocation34_spill] sm:$0xff]  ;;  %v11798_v16 = vld [vmem:[#allocation35_spill] sm:$0xff] }
 0x565   : > { %2813 = vmatprep.subr.mxu0 %v8262_v3  ;;  %2884 = vmatprep.subr.mxu1 %v8265_v8  ;;  %v11799_v3 = vld [vmem:[#allocation36_spill] sm:$0xff]  ;;  %v11800_v8 = vld [vmem:[#allocation37_spill] sm:$0xff] }
 0x566   : > { %2814 = vmatpush1.msra.mxu0 %v8268_v11  ;;  %2885 = vmatpush1.msra.mxu1 %v8271_v9  ;;  %v11801_v11 = vld [vmem:[#allocation38_spill] sm:$0xff]  ;;  %v11802_v9 = vld [vmem:[#allocation39_spill] sm:$0xff] }
 0x567   : > { %2815 = vmatprep.subr.mxu0 %v8274_v5  ;;  %2886 = vmatprep.subr.mxu1 %v8277_v45  ;;  %v11803_v5 = vld [vmem:[#allocation40_spill] sm:$0xff]  ;;  %v11804_v45 = vld [vmem:[#allocation41_spill] sm:$0xff] }
 0x568   : > { %2816 = vmatpush1.msra.mxu0 %v8280_v46  ;;  %2887 = vmatpush1.msra.mxu1 %v8283_v47  ;;  %v11805_v46 = vld [vmem:[#allocation42_spill] sm:$0xff]  ;;  %v11806_v47 = vld [vmem:[#allocation43_spill] sm:$0xff] }
 0x569   : > { %2817 = vmatprep.subr.mxu0 %v8286_v49  ;;  %2888 = vmatprep.subr.mxu1 %v8289_v50  ;;  %v11807_v49 = vld [vmem:[#allocation44_spill] sm:$0xff]  ;;  %v11808_v50 = vld [vmem:[#allocation45_spill] sm:$0xff] }
 0x56a   : > { %2818 = vmatpush1.msra.mxu0 %v8292_v51  ;;  %2889 = vmatpush1.msra.mxu1 %v8295_v55  ;;  %v11809_v51 = vld [vmem:[#allocation46_spill] sm:$0xff]  ;;  %v11810_v55 = vld [vmem:[#allocation47_spill] sm:$0xff] }
 0x56b   : > { %2819 = vmatprep.subr.mxu0 %v8298_v56  ;;  %2890 = vmatprep.subr.mxu1 %v8301_v59  ;;  %v11811_v56 = vld [vmem:[#allocation48_spill] sm:$0xff]  ;;  %v11812_v59 = vld [vmem:[#allocation49_spill] sm:$0xff] }
 0x56c   : > { %2820 = vmatpush1.msra.mxu0 %v8304_v60  ;;  %2891 = vmatpush1.msra.mxu1 %v8307_v61  ;;  %v11813_v60 = vld [vmem:[#allocation50_spill] sm:$0xff]  ;;  %v11814_v61 = vld [vmem:[#allocation51_spill] sm:$0xff] }
 0x56d   : > { %2821 = vmatprep.subr.mxu0 %v8310_v62  ;;  %2892 = vmatprep.subr.mxu1 %v8313_v63  ;;  %v11815_v62 = vld [vmem:[#allocation52_spill] sm:$0xff]  ;;  %v11816_v63 = vld [vmem:[#allocation53_spill] sm:$0xff] }
 0x56e   : > { %2822 = vmatpush1.msra.mxu0 %v8316_v0  ;;  %2893 = vmatpush1.msra.mxu1 %v8319_v15  ;;  %v11817_v0 = vld [vmem:[#allocation54_spill] sm:$0xff]  ;;  %v11818_v15 = vld [vmem:[#allocation55_spill] sm:$0xff] }
 0x56f   : > { %2823 = vmatprep.subr.mxu0 %v8322_v17  ;;  %2894 = vmatprep.subr.mxu1 %v8325_v18  ;;  %v11819_v17 = vld [vmem:[#allocation56_spill] sm:$0xff]  ;;  %v11820_v18 = vld [vmem:[#allocation57_spill] sm:$0xff] }
 0x570   : > { %2824 = vmatpush1.msra.mxu0 %v8328_v19  ;;  %2895 = vmatpush1.msra.mxu1 %v8331_v20  ;;  %v11821_v19 = vld [vmem:[#allocation58_spill] sm:$0xff]  ;;  %v11822_v20 = vld [vmem:[#allocation59_spill] sm:$0xff] }
 0x571   : > { %2825 = vmatprep.subr.mxu0 %v8334_v24  ;;  %2896 = vmatprep.subr.mxu1 %v8337_v26  ;;  %v11823_v24 = vld [vmem:[#allocation60_spill] sm:$0xff]  ;;  %v11824_v26 = vld [vmem:[#allocation61_spill] sm:$0xff] }
 0x572   : > { %2826 = vmatpush1.msra.mxu0 %v8340_v27  ;;  %2897 = vmatpush1.msra.mxu1 %v8343_v28  ;;  %v11825_v27 = vld [vmem:[#allocation62_spill] sm:$0xff]  ;;  %v11826_v28 = vld [vmem:[#allocation63_spill] sm:$0xff] }
 0x573   : > { %2827 = vmatprep.subr.mxu0 %v8346_v29  ;;  %2898 = vmatprep.subr.mxu1 %v8349_v31  ;;  %v11827_v29 = vld [vmem:[#allocation64_spill] sm:$0xff]  ;;  %v11828_v31 = vld [vmem:[#allocation65_spill] sm:$0xff] }
 0x574   : > { %2828 = vmatpush1.msra.mxu0 %v8352_v32  ;;  %2899 = vmatpush1.msra.mxu1 %v8355_v33  ;;  %v11829_v32 = vld [vmem:[#allocation66_spill] sm:$0xff]  ;;  %v11830_v33 = vld [vmem:[#allocation67_spill] sm:$0xff] }
 0x575   : > { %2829 = vmatprep.subr.mxu0 %v8358_v35  ;;  %2900 = vmatprep.subr.mxu1 %v8361_v36  ;;  %v11831_v35 = vld [vmem:[#allocation68_spill] sm:$0xff]  ;;  %v11832_v36 = vld [vmem:[#allocation69_spill] sm:$0xff] }
 0x576   : > { %2830 = vmatpush1.msra.mxu0 %v11795_v42  ;;  %2901 = vmatpush1.msra.mxu1 %v11796_v43  ;;  %v11834_v42 = vld [vmem:[#allocation71_spill] sm:$0xff]  ;;  %v11835_v43 = vld [vmem:[#allocation72_spill] sm:$0xff] }
 0x577   : > { %2831 = vmatprep.subr.mxu0 %v11797_v44  ;;  %2902 = vmatprep.subr.mxu1 %v11798_v16  ;;  %v11836_v44 = vld [vmem:[#allocation73_spill] sm:$0xff]  ;;  %v11837_v16 = vld [vmem:[#allocation74_spill] sm:$0xff] }
 0x578   : > { %2832 = vmatpush1.msra.mxu0 %v11799_v3  ;;  %2865 = vmatprep.mubr.f32.mxu0 %v11505_v14  ;;  %v11838_v3 = vld [vmem:[#allocation75_spill] sm:$0xff] }
 0x579   : > { %2903 = vmatpush1.msra.mxu1 %v11800_v8  ;;  %2936 = vmatprep.mubr.f32.mxu1 %v11505_v14  ;;  %v11839_v8 = vld [vmem:[#allocation76_spill] sm:$0xff] }
 0x57a   : > { %2866 = vmatmul.mubr.f32.vlgmr.msra.gmra.mxu0 %v8606_v6  ;;  %2937 = vmatmul.mubr.f32.vlgmr.msra.gmra.mxu1 %v8606_v6  ;;  %v11833_v6 = vld [vmem:[#allocation70_spill] sm:$0xff] }
 0x57b   : > { %2971 = vmatprep.subr.mxu0 %v11801_v11  ;;  %3042 = vmatprep.subr.mxu1 %v11802_v9  ;;  %v11840_v11 = vld [vmem:[#allocation77_spill] sm:$0xff]  ;;  %v11841_v9 = vld [vmem:[#allocation78_spill] sm:$0xff] }
 0x57c   : > { %2972 = vmatpush1.msra.mxu0 %v11803_v5  ;;  %3043 = vmatpush1.msra.mxu1 %v11804_v45  ;;  %v11842_v5 = vld [vmem:[#allocation79_spill] sm:$0xff]  ;;  %v11843_v45 = vld [vmem:[#allocation80_spill] sm:$0xff] }
 0x57d   : > { %2973 = vmatprep.subr.mxu0 %v11805_v46  ;;  %3044 = vmatprep.subr.mxu1 %v11806_v47  ;;  %v11844_v46 = vld [vmem:[#allocation81_spill] sm:$0xff]  ;;  %v11845_v47 = vld [vmem:[#allocation82_spill] sm:$0xff] }
 0x57e   : > { %2974 = vmatpush1.msra.mxu0 %v11807_v49  ;;  %3045 = vmatpush1.msra.mxu1 %v11808_v50  ;;  %v11846_v49 = vld [vmem:[#allocation83_spill] sm:$0xff]  ;;  %v11847_v50 = vld [vmem:[#allocation84_spill] sm:$0xff] }
 0x57f   : > { %2975 = vmatprep.subr.mxu0 %v11809_v51  ;;  %3046 = vmatprep.subr.mxu1 %v11810_v55  ;;  %v11848_v51 = vld [vmem:[#allocation85_spill] sm:$0xff]  ;;  %v11849_v55 = vld [vmem:[#allocation86_spill] sm:$0xff] }
 0x580   : > { %2976 = vmatpush1.msra.mxu0 %v11811_v56  ;;  %3047 = vmatpush1.msra.mxu1 %v11812_v59  ;;  %v11850_v56 = vld [vmem:[#allocation87_spill] sm:$0xff]  ;;  %v11851_v59 = vld [vmem:[#allocation88_spill] sm:$0xff] }
 0x581   : > { %2977 = vmatprep.subr.mxu0 %v11813_v60  ;;  %3048 = vmatprep.subr.mxu1 %v11814_v61  ;;  %v11852_v60 = vld [vmem:[#allocation89_spill] sm:$0xff]  ;;  %v11853_v61 = vld [vmem:[#allocation90_spill] sm:$0xff] }
 0x582   : > { %2978 = vmatpush1.msra.mxu0 %v11815_v62  ;;  %3049 = vmatpush1.msra.mxu1 %v11816_v63  ;;  %v11854_v62 = vld [vmem:[#allocation91_spill] sm:$0xff]  ;;  %v11855_v63 = vld [vmem:[#allocation92_spill] sm:$0xff] }
 0x583   : > { %2979 = vmatprep.subr.mxu0 %v11817_v0  ;;  %3050 = vmatprep.subr.mxu1 %v11818_v15  ;;  %v11856_v0 = vld [vmem:[#allocation93_spill] sm:$0xff]  ;;  %v11857_v15 = vld [vmem:[#allocation94_spill] sm:$0xff] }
 0x584   : > { %2980 = vmatpush1.msra.mxu0 %v11819_v17  ;;  %3051 = vmatpush1.msra.mxu1 %v11820_v18  ;;  %v11858_v17 = vld [vmem:[#allocation95_spill] sm:$0xff]  ;;  %v11859_v18 = vld [vmem:[#allocation96_spill] sm:$0xff] }
 0x585   : > { %2981 = vmatprep.subr.mxu0 %v11821_v19  ;;  %3052 = vmatprep.subr.mxu1 %v11822_v20  ;;  %v11860_v19 = vld [vmem:[#allocation97_spill] sm:$0xff]  ;;  %v11861_v20 = vld [vmem:[#allocation98_spill] sm:$0xff] }
 0x586   : > { %2982 = vmatpush1.msra.mxu0 %v11823_v24  ;;  %3053 = vmatpush1.msra.mxu1 %v11824_v26  ;;  %v11862_v24 = vld [vmem:[#allocation99_spill] sm:$0xff]  ;;  %v11863_v26 = vld [vmem:[#allocation101_spill] sm:$0xff] }
 0x587   : > { %2983 = vmatprep.subr.mxu0 %v11825_v27  ;;  %3054 = vmatprep.subr.mxu1 %v11826_v28  ;;  %v11864_v27 = vld [vmem:[#allocation102_spill] sm:$0xff]  ;;  %v11865_v28 = vld [vmem:[#allocation100_spill] sm:$0xff] }
 0x588   : > { %2984 = vmatpush1.msra.mxu0 %v11827_v29  ;;  %3055 = vmatpush1.msra.mxu1 %v11828_v31  ;;  %v11866_v29 = vld [vmem:[#allocation127_spill] sm:$0xff] }
 0x589   : > { %2985 = vmatprep.subr.mxu0 %v11829_v32  ;;  %3056 = vmatprep.subr.mxu1 %v11830_v33  ;;  %v11867_v33 = vld [vmem:[#allocation31_spill] sm:$0xff] }
 0x58a   : > { %2986 = vmatpush1.msra.mxu0 %v11831_v35  ;;  %3057 = vmatpush1.msra.mxu1 %v11832_v36 }
 0x58b   : > { %2987 = vmatprep.subr.mxu0 %v11833_v6  ;;  %3058 = vmatprep.subr.mxu1 %v11834_v42 }
 0x58c   : > { %2988 = vmatpush1.msra.mxu0 %v11835_v43  ;;  %3059 = vmatpush1.msra.mxu1 %v11836_v44 }
 0x58d   : > { %2989 = vmatprep.subr.mxu0 %v11837_v16  ;;  %3060 = vmatprep.subr.mxu1 %v11838_v3 }
 0x58e   : > { %2990 = vmatpush1.msra.mxu0 %v11839_v8  ;;  %3061 = vmatpush1.msra.mxu1 %v11840_v11 }
 0x58f   : > { %2991 = vmatprep.subr.mxu0 %v11841_v9  ;;  %3062 = vmatprep.subr.mxu1 %v11842_v5 }
 0x590   : > { %2992 = vmatpush1.msra.mxu0 %v11843_v45  ;;  %3063 = vmatpush1.msra.mxu1 %v11844_v46 }
 0x591   : > { %2993 = vmatprep.subr.mxu0 %v11845_v47  ;;  %3064 = vmatprep.subr.mxu1 %v11846_v49 }
 0x592   : > { %2994 = vmatpush1.msra.mxu0 %v11847_v50  ;;  %3065 = vmatpush1.msra.mxu1 %v11848_v51 }
 0x593   : > { %2995 = vmatprep.subr.mxu0 %v11849_v55  ;;  %3066 = vmatprep.subr.mxu1 %v11850_v56 }
 0x594   : > { %2996 = vmatpush1.msra.mxu0 %v11851_v59  ;;  %3067 = vmatpush1.msra.mxu1 %v11852_v60 }
 0x595   : > { %2997 = vmatprep.subr.mxu0 %v11853_v61  ;;  %3068 = vmatprep.subr.mxu1 %v11854_v62 }
 0x596   : > { %2998 = vmatpush1.msra.mxu0 %v11855_v63  ;;  %3069 = vmatpush1.msra.mxu1 %v11856_v0  ;;  %v11868_v0 = vld [vmem:[#allocation107_spill] sm:$0xff] }
 0x597   : > { %2999 = vmatprep.subr.mxu0 %v11857_v15  ;;  %3070 = vmatprep.subr.mxu1 %v11858_v17 }
 0x598   : > { %3000 = vmatpush1.msra.mxu0 %v11859_v18  ;;  %3071 = vmatpush1.msra.mxu1 %v11860_v19 }
 0x599   : > { %3001 = vmatprep.subr.mxu0 %v11861_v20  ;;  %3072 = vmatprep.subr.mxu1 %v11862_v24 }
 0x59a   : > { %3002 = vmatpush1.msra.mxu0 %v11863_v26  ;;  %3073 = vmatpush1.msra.mxu1 %v11864_v27  ;;  %v11869_v26 = vld [vmem:[#allocation109_spill] sm:$0xff] }
 0x59b   : > { %3035 = vmatprep.mubr.f32.mxu0 %v11505_v14  ;;  %3106 = vmatprep.mubr.f32.mxu1 %v11505_v14 }
 0x59c   : > { %3117 = vmatprep.subr.mxu0 %v11865_v28  ;;  %3188 = vmatprep.subr.mxu1 %v11866_v29 }
 0x5f7   : > { %v2540_v31 = vpop.f32.mrf.mxu0  ;;  %v2611_v6 = vpop.f32.mrf.mxu1 }
 0x5f8   : > { %v2616_v35 = vadd.f32 %v2540_v31, %v11867_v33  ;;  %v2618_v46 = vadd.f32 %v2611_v6, %v8141_v23 }
 0x5f9   : > { %v2542_v32 = vpop.f32.mrf.mxu0  ;;  %v2613_v8 = vpop.f32.mrf.mxu1 }
 0x5fa   : > { %v2617_v42 = vadd.f32 %v2542_v32, %v8135_v53  ;;  %v2619_v45 = vadd.f32 %v2613_v8, %v8139_v22 }
 0x618   : > { %v2686_v36 = vpop.f32.mrf.mxu0  ;;  %v2757_v9 = vpop.f32.mrf.mxu1 }
 0x619   : > { %v2762_v43 = vadd.f32 %v2686_v36, %v2616_v35  ;;  %v2764_v49 = vadd.f32 %v2757_v9, %v2618_v46  ;;  %v11870_v36 = vld [vmem:[#allocation110_spill] sm:$0xff] }
 0x61a   : > { %v2688_v44 = vpop.f32.mrf.mxu0  ;;  %v2759_v5 = vpop.f32.mrf.mxu1 }
 0x61b   : > { %v5551_v16 = vmul.f32 -1.442695, %v2762_v43  ;;  %v2763_v3 = vadd.f32 %v2688_v44, %v2617_v42  ;;  %v2765_v47 = vadd.f32 %v2759_v5, %v2619_v45  ;;  %v11871_v42 = vld [vmem:[#allocation108_spill] sm:$0xff] }
 0x61d   : > { %5830 = vpow2.f32 %v5551_v16  ;;  %v5552_v11 = vmul.f32 -1.442695, %v2763_v3  ;;  %v5553_v51 = vmul.f32 -1.442695, %v2765_v47 }
 0x61f   : > { %5832 = vpow2.f32 %v5552_v11 }
 0x620   : > { %5834 = vtanh.f32 %v2764_v49 }
 0x62a   : > { %v5831_v50 = vpop.eup %5830 }
 0x62b   : > { %v2769_v55 = vadd.f32 1.0, %v5831_v50 }
 0x62c   : > { %v5833_v56 = vpop.eup %5832 }
 0x62d   : > { %5836 = vrcp.f32 %v2769_v55  ;;  %v2775_v59 = vadd.f32 1.0, %v5833_v56  ;;  %v5835_v60 = vpop.eup %5834 }
 0x62e   : > { %5838 = vpow2.f32 %v5553_v51 }
 0x62f   : > { %5840 = vrcp.f32 %v2775_v59 }
 0x63a   : > { %v5837_v61 = vpop.eup %5836  ;;  %v2867_v62 = vpop.f32.mrf.mxu0 }
 0x63b   : > { %v5839_v63 = vpop.eup %5838  ;;  %v2943_v15 = vadd.f32 %v2867_v62, %v11868_v0  ;;  %v2786_v19 = vmul.f32 %v5837_v61, %v5835_v60  ;;  %v2938_v31 = vpop.f32.mrf.mxu1  ;;  %v11885_v62 = vld [vmem:[#allocation141_spill] sm:$0xff]  ;;  %v11887_v0 = vld [vmem:[#allocation143_spill] sm:$0xff] }
 0x63c   : > { %v5841_v17 = vpop.eup %5840  ;;  %v2869_v18 = vpop.f32.mrf.mxu0  ;;  %v2782_v28 = vadd.f32 1.0, %v5839_v63  ;;  %v2945_v43 = vadd.f32 %v2938_v31, %v11871_v42  ;;  %v11886_v63 = vld [vmem:[#allocation142_spill] sm:$0xff]  ;;  %v11897_v31 = vld [vmem:[#allocation153_spill] sm:$0xff] }
 0x63d   : > { %v2785_v20 = vmul.f32 %v5841_v17, %v8593_v41  ;;  %v5555_v24 = vmul.f32 -1.442695, %v2943_v15  ;;  %v2944_v27 = vadd.f32 %v2869_v18, %v11869_v26  ;;  %v2940_v35 = vpop.f32.mrf.mxu1  ;;  %v11888_v15 = vld [vmem:[#allocation144_spill] sm:$0xff]  ;;  %v11889_v17 = vld [vmem:[#allocation145_spill] sm:$0xff]  ;;  %v11890_v18 = vld [vmem:[#allocation146_spill] sm:$0xff] }
 0x63e   : > { %v2946_v6 = vadd.f32 %v2940_v35, %v11870_v36  ;;  %v11894_v26 = vld [vmem:[#allocation150_spill] sm:$0xff]  ;;  %v11899_v35 = vld [vmem:[#allocation155_spill] sm:$0xff]  ;;  %v11900_v36 = vld [vmem:[#allocation156_spill] sm:$0xff] }
 0x63f   : > { %v8983_v29 = vadd.f32 %v2786_v19, %v2785_v20  ;;  %5842 = vpow2.f32 %v5555_v24  ;;  %v5556_v32 = vmul.f32 -1.442695, %v2944_v27  ;;  %v11891_v19 = vld [vmem:[#allocation147_spill] sm:$0xff]  ;;  %v11892_v20 = vld [vmem:[#allocation148_spill] sm:$0xff]  ;;  %v11893_v24 = vld [vmem:[#allocation149_spill] sm:$0xff] }
 0x640   : > { %v5557_v41 = vmul.f32 -1.442695, %v2946_v6  ;;  %v11895_v27 = vld [vmem:[#allocation151_spill] sm:$0xff]  ;;  %v11901_v6 = vld [vmem:[#allocation157_spill] sm:$0xff]  ;;  %v11902_v42 = vld [vmem:[#allocation158_spill] sm:$0xff] }
 0x641   : > { %5844 = vpow2.f32 %v5556_v32  ;;  %v11898_v32 = vld [vmem:[#allocation154_spill] sm:$0xff] }
 0x642   : > { %5846 = vrcp.f32 %v2782_v28  ;;  %v11896_v28 = vld [vmem:[#allocation152_spill] sm:$0xff] }
 0x643   : > { %5848 = vtanh.f32 %v8983_v29 }
 0x644   : > { %5850 = vtanh.f32 %v2945_v43  ;;  %v11903_v43 = vld [vmem:[#allocation159_spill] sm:$0xff] }
 0x645   : > { %5852 = vpow2.f32 %v5557_v41  ;;  %v11904_v41 = vld [vmem:[#allocation160_spill] sm:$0xff] }
 0x64c   : > { %v5843_v44 = vpop.eup %5842 }
 0x64d   : > { %v2950_v16 = vadd.f32 1.0, %v5843_v44  ;;  %v11905_v44 = vld [vmem:[#allocation161_spill] sm:$0xff] }
 0x64e   : > { %v5845_v3 = vpop.eup %5844 }
 0x64f   : > { %v5847_v8 = vpop.eup %5846  ;;  %5854 = vrcp.f32 %v2950_v16  ;;  %v2956_v11 = vadd.f32 1.0, %v5845_v3  ;;  %v11906_v16 = vld [vmem:[#allocation162_spill] sm:$0xff]  ;;  %v11907_v3 = vld [vmem:[#allocation163_spill] sm:$0xff] }
 0x650   : > { %v5849_v9 = vpop.eup %5848 }
 0x651   : > { %5856 = vrcp.f32 %v2956_v11  ;;  %v8988_v5 = vmul.f32 %v5849_v9, %v5847_v8  ;;  %v5851_v45 = vpop.eup %5850  ;;  %v11908_v8 = vld [vmem:[#allocation164_spill] sm:$0xff]  ;;  %v11909_v11 = vld [vmem:[#allocation165_spill] sm:$0xff]  ;;  %v11910_v9 = vld [vmem:[#allocation166_spill] sm:$0xff] }
 0x652   : > { %v5853_v46 = vpop.eup %5852 }
 0x653   : > { %5554 = vst [vmem:[%s7290_s4 + $0x10] sm:$0xff] %v8988_v5  ;;  %v2963_v51 = vadd.f32 1.0, %v5853_v46  ;;  %v11912_v46 = vld [vmem:[#allocation168_spill] sm:$0xff] }
 0x655   : > { %5858 = vrcp.f32 %v2963_v51  ;;  %v11916_v51 = vld [vmem:[#allocation172_spill] sm:$0xff] }
 0x65c   : > { %v5855_v47 = vpop.eup %5854 }
 0x65d   : > { %v2967_v49 = vmul.f32 %v5855_v47, %v5851_v45  ;;  %v11911_v45 = vld [vmem:[#allocation167_spill] sm:$0xff]  ;;  %v11913_v47 = vld [vmem:[#allocation169_spill] sm:$0xff] }
 0x65e   : > { %v5857_v50 = vpop.eup %5856 }
 0x65f   : > { %v2966_v55 = vmul.f32 %v5857_v50, %v8603_v21  ;;  %v11872_v21 = vld [vmem:[#allocation128_spill] sm:$0xff]  ;;  %v11915_v50 = vld [vmem:[#allocation171_spill] sm:$0xff] }
 0x661   : > { %v8993_v56 = vadd.f32 %v2967_v49, %v2966_v55  ;;  %v11914_v49 = vld [vmem:[#allocation170_spill] sm:$0xff]  ;;  %v11917_v55 = vld [vmem:[#allocation173_spill] sm:$0xff] }
 0x662   : > { %v5859_v59 = vpop.eup %5858 }
 0x663   : > { %5860 = vtanh.f32 %v8993_v56 }
 0x670   : > { %v5861_v60 = vpop.eup %5860 }
 0x671   : > { %v8996_v61 = vmul.f32 %v5861_v60, %v5859_v59  ;;  %v11918_v59 = vld [vmem:[#allocation174_spill] sm:$0xff]  ;;  %v11919_v60 = vld [vmem:[#allocation175_spill] sm:$0xff] }
 0x673   : > { %3036 = vmatmul.mubr.f32.vlgmr.msra.gmra.mxu0 %v8996_v61  ;;  %3107 = vmatmul.mubr.f32.vlgmr.msra.gmra.mxu1 %v8996_v61 }
 0x674   : > { %3118 = vmatpush1.msra.mxu0 %v8610_v10  ;;  %3189 = vmatpush1.msra.mxu1 %v8613_v54  ;;  %v11873_v10 = vld [vmem:[#allocation129_spill] sm:$0xff]  ;;  %v11874_v54 = vld [vmem:[#allocation130_spill] sm:$0xff] }
 0x675   : > { %3119 = vmatprep.subr.mxu0 %v8616_v34  ;;  %3190 = vmatprep.subr.mxu1 %v8619_v48  ;;  %v11875_v34 = vld [vmem:[#allocation131_spill] sm:$0xff]  ;;  %v11876_v48 = vld [vmem:[#allocation132_spill] sm:$0xff] }
 0x676   : > { %3120 = vmatpush1.msra.mxu0 %v8622_v13  ;;  %3191 = vmatpush1.msra.mxu1 %v8625_v2  ;;  %v11877_v13 = vld [vmem:[#allocation133_spill] sm:$0xff]  ;;  %v11878_v2 = vld [vmem:[#allocation134_spill] sm:$0xff] }
 0x677   : > { %3121 = vmatprep.subr.mxu0 %v8628_v58  ;;  %3192 = vmatprep.subr.mxu1 %v8631_v4  ;;  %v11879_v58 = vld [vmem:[#allocation135_spill] sm:$0xff]  ;;  %v11880_v4 = vld [vmem:[#allocation136_spill] sm:$0xff] }
 0x678   : > { %3122 = vmatpush1.msra.mxu0 %v8634_v25  ;;  %3193 = vmatpush1.msra.mxu1 %v8637_v57  ;;  %v11881_v25 = vld [vmem:[#allocation137_spill] sm:$0xff]  ;;  %v11882_v57 = vld [vmem:[#allocation138_spill] sm:$0xff] }
 0x679   : > { %3123 = vmatprep.subr.mxu0 %v8640_v1  ;;  %3194 = vmatprep.subr.mxu1 %v8643_v39  ;;  %v11883_v1 = vld [vmem:[#allocation139_spill] sm:$0xff]  ;;  %v11884_v39 = vld [vmem:[#allocation140_spill] sm:$0xff] }
 0x67a   : > { %3124 = vmatpush1.msra.mxu0 %v11872_v21  ;;  %3195 = vmatpush1.msra.mxu1 %v11873_v10  ;;  %v11920_v21 = vld [vmem:[#allocation176_spill] sm:$0xff]  ;;  %v11921_v10 = vld [vmem:[#allocation177_spill] sm:$0xff] }
 0x67b   : > { %3125 = vmatprep.subr.mxu0 %v11874_v54  ;;  %3196 = vmatprep.subr.mxu1 %v11875_v34  ;;  %v11923_v54 = vld [vmem:[#allocation179_spill] sm:$0xff]  ;;  %v11924_v34 = vld [vmem:[#allocation180_spill] sm:$0xff] }
 0x67c   : > { %3126 = vmatpush1.msra.mxu0 %v11876_v48  ;;  %3197 = vmatpush1.msra.mxu1 %v11877_v13  ;;  %v11925_v48 = vld [vmem:[#allocation181_spill] sm:$0xff]  ;;  %v11926_v13 = vld [vmem:[#allocation182_spill] sm:$0xff] }
 0x67d   : > { %3127 = vmatprep.subr.mxu0 %v11878_v2  ;;  %3198 = vmatprep.subr.mxu1 %v11879_v58  ;;  %v11927_v2 = vld [vmem:[#allocation183_spill] sm:$0xff]  ;;  %v11928_v58 = vld [vmem:[#allocation184_spill] sm:$0xff] }
 0x67e   : > { %3128 = vmatpush1.msra.mxu0 %v11880_v4  ;;  %3199 = vmatpush1.msra.mxu1 %v11881_v25  ;;  %v11929_v4 = vld [vmem:[#allocation185_spill] sm:$0xff]  ;;  %v11930_v25 = vld [vmem:[#allocation186_spill] sm:$0xff] }
 0x67f   : > { %3129 = vmatprep.subr.mxu0 %v11882_v57  ;;  %3200 = vmatprep.subr.mxu1 %v11883_v1  ;;  %v11932_v57 = vld [vmem:[#allocation188_spill] sm:$0xff]  ;;  %v11933_v1 = vld [vmem:[#allocation189_spill] sm:$0xff] }
 0x680   : > { %3130 = vmatpush1.msra.mxu0 %v11884_v39  ;;  %3201 = vmatpush1.msra.mxu1 %v11885_v62  ;;  %v11934_v39 = vld [vmem:[#allocation103_spill] sm:$0xff]  ;;  %v9086_v62 = vld [vmem:[#allocation15 + $0x148] sm:$0xff] }
 0x681   : > { %3131 = vmatprep.subr.mxu0 %v11886_v63  ;;  %3202 = vmatprep.subr.mxu1 %v11887_v0  ;;  %v9089_v63 = vld [vmem:[#allocation15 + $0x158] sm:$0xff]  ;;  %v9092_v0 = vld [vmem:[#allocation15 + $0x140] sm:$0xff] }
 0x682   : > { %3132 = vmatpush1.msra.mxu0 %v11888_v15  ;;  %3203 = vmatpush1.msra.mxu1 %v11889_v17  ;;  %v9113_v15 = vld [vmem:[#allocation15 + $0x118] sm:$0xff]  ;;  %v9116_v17 = vld [vmem:[#allocation15 + $0x100] sm:$0xff] }
 0x683   : > { %3133 = vmatprep.subr.mxu0 %v11890_v18  ;;  %3204 = vmatprep.subr.mxu1 %v11891_v19  ;;  %v9119_v18 = vld [vmem:[#allocation15 + $0x110] sm:$0xff]  ;;  %v9122_v19 = vld [vmem:[#allocation15 + $0xe8] sm:$0xff] }
 0x684   : > { %3134 = vmatpush1.msra.mxu0 %v11892_v20  ;;  %3205 = vmatpush1.msra.mxu1 %v11893_v24  ;;  %v9125_v20 = vld [vmem:[#allocation15 + $0xf8] sm:$0xff]  ;;  %v9128_v24 = vld [vmem:[#allocation15 + $0xe0] sm:$0xff] }
 0x685   : > { %3135 = vmatprep.subr.mxu0 %v11894_v26  ;;  %3206 = vmatprep.subr.mxu1 %v11895_v27  ;;  %v9131_v26 = vld [vmem:[#allocation15 + $0xf0] sm:$0xff]  ;;  %v9134_v27 = vld [vmem:[#allocation15 + $0xc8] sm:$0xff] }
 0x686   : > { %3136 = vmatpush1.msra.mxu0 %v11896_v28  ;;  %3207 = vmatpush1.msra.mxu1 %v11897_v31  ;;  %v9137_v28 = vld [vmem:[#allocation15 + $0xd8] sm:$0xff]  ;;  %v9140_v31 = vld [vmem:[#allocation15 + $0xc0] sm:$0xff] }
 0x687   : > { %3137 = vmatprep.subr.mxu0 %v11898_v32  ;;  %3208 = vmatprep.subr.mxu1 %v11899_v35  ;;  %v9143_v32 = vld [vmem:[#allocation15 + $0xd0] sm:$0xff]  ;;  %v9146_v35 = vld [vmem:[#allocation15 + $0xa8] sm:$0xff] }
 0x688   : > { %3138 = vmatpush1.msra.mxu0 %v11900_v36  ;;  %3209 = vmatpush1.msra.mxu1 %v11901_v6  ;;  %v9149_v36 = vld [vmem:[#allocation15 + $0xb8] sm:$0xff]  ;;  %v9152_v6 = vld [vmem:[#allocation15 + $0xa0] sm:$0xff] }
 0x689   : > { %3139 = vmatprep.subr.mxu0 %v11902_v42  ;;  %3210 = vmatprep.subr.mxu1 %v11903_v43  ;;  %v9155_v42 = vld [vmem:[#allocation15 + $0xb0] sm:$0xff]  ;;  %v9158_v43 = vld [vmem:[#allocation15 + $0x88] sm:$0xff] }
 0x68a   : > { %3140 = vmatpush1.msra.mxu0 %v11904_v41  ;;  %3211 = vmatpush1.msra.mxu1 %v11905_v44  ;;  %v9161_v41 = vld [vmem:[#allocation15 + $0x98] sm:$0xff]  ;;  %v9164_v44 = vld [vmem:[#allocation15 + $0x80] sm:$0xff] }
 0x68b   : > { %3141 = vmatprep.subr.mxu0 %v11906_v16  ;;  %3212 = vmatprep.subr.mxu1 %v11907_v3  ;;  %v9167_v16 = vld [vmem:[#allocation15 + $0x90] sm:$0xff]  ;;  %v9170_v3 = vld [vmem:[#allocation15 + $0x68] sm:$0xff] }
 0x68c   : > { %3142 = vmatpush1.msra.mxu0 %v11908_v8  ;;  %3213 = vmatpush1.msra.mxu1 %v11909_v11  ;;  %v9173_v8 = vld [vmem:[#allocation15 + $0x78] sm:$0xff]  ;;  %v9176_v11 = vld [vmem:[#allocation15 + $0x60] sm:$0xff] }
 0x68d   : > { %3143 = vmatprep.subr.mxu0 %v11910_v9  ;;  %3214 = vmatprep.subr.mxu1 %v11911_v45  ;;  %v9179_v9 = vld [vmem:[#allocation15 + $0x70] sm:$0xff]  ;;  %v9182_v45 = vld [vmem:[#allocation15 + $0x48] sm:$0xff] }
 0x68e   : > { %3144 = vmatpush1.msra.mxu0 %v11912_v46  ;;  %3215 = vmatpush1.msra.mxu1 %v11913_v47  ;;  %v9185_v46 = vld [vmem:[#allocation15 + $0x58] sm:$0xff]  ;;  %v9188_v47 = vld [vmem:[#allocation15 + $0x40] sm:$0xff] }
 0x68f   : > { %3145 = vmatprep.subr.mxu0 %v11914_v49  ;;  %3216 = vmatprep.subr.mxu1 %v11915_v50  ;;  %v9191_v49 = vld [vmem:[#allocation15 + $0x50] sm:$0xff]  ;;  %v9194_v50 = vld [vmem:[#allocation15 + $0x28] sm:$0xff] }
 0x690   : > { %3146 = vmatpush1.msra.mxu0 %v8778_v7  ;;  %3217 = vmatpush1.msra.mxu1 %v11916_v51  ;;  %v11922_v7 = vld [vmem:[#allocation178_spill] sm:$0xff] }
 0x691   : > { %3147 = vmatprep.subr.mxu0 %v11917_v55  ;;  %3218 = vmatprep.subr.mxu1 %v11918_v59  ;;  %v9197_v51 = vld [vmem:[#allocation15 + $0x38] sm:$0xff]  ;;  %v9200_v55 = vld [vmem:[#allocation15 + $0x20] sm:$0xff]  ;;  %v9203_v59 = vld [vmem:[#allocation15 + $0x30] sm:$0xff] }
 0x692   : > { %3148 = vmatpush1.msra.mxu0 %v11919_v60  ;;  %3181 = vmatprep.mubr.f32.mxu0 %v11505_v14  ;;  %11935 = vst [vmem:[#allocation105_spill] sm:$0xff] %v9200_v55  ;;  %11936 = vst [vmem:[#allocation106_spill] sm:$0xff] %v9203_v59  ;;  %v9206_v60 = vld [vmem:[#allocation15 + $0x8] sm:$0xff] }
 0x693   : > { %3219 = vmatpush1.msra.mxu1 %v11920_v21  ;;  %3252 = vmatprep.mubr.f32.mxu1 %v11505_v14  ;;  %11937 = vst [vmem:[#allocation104_spill] sm:$0xff] %v9206_v60  ;;  %v9209_v21 = vld [vmem:[#allocation15 + $0x18] sm:$0xff] }
 0x694   : > { %3182 = vmatmul.mubr.f32.vlgmr.msra.gmra.mxu0 %v8988_v5  ;;  %3253 = vmatmul.mubr.f32.vlgmr.msra.gmra.mxu1 %v8988_v5  ;;  %v11931_v5 = vld [vmem:[#allocation187_spill] sm:$0xff]  ;;  %11938 = vst [vmem:[#allocation32_spill] sm:$0xff] %v9209_v21 }
 0x695   : > { %3298 = vmatprep.subr.mxu0 %v11921_v10  ;;  %3369 = vmatprep.subr.mxu1 %v11922_v7  ;;  %v9212_v10 = vld [vmem:[#allocation15] sm:$0xff]  ;;  %v9216_v7 = vld [vmem:[#allocation15 + $0x10] sm:$0xff] }
 0x696   : > { %3299 = vmatpush1.msra.mxu0 %v11923_v54  ;;  %3370 = vmatpush1.msra.mxu1 %v11924_v34  ;;  %11939 = vst [vmem:[#allocation33_spill] sm:$0xff] %v9212_v10  ;;  %11940 = vst [vmem:[#allocation34_spill] sm:$0xff] %v9216_v7  ;;  %v9222_v54 = vld [vmem:[#allocation16 + $0x1e8] sm:$0xff]  ;;  %v9225_v34 = vld [vmem:[#allocation16 + $0x1f8] sm:$0xff] }
 0x697   : > { %3300 = vmatprep.subr.mxu0 %v11925_v48  ;;  %3371 = vmatprep.subr.mxu1 %v11926_v13  ;;  %11941 = vst [vmem:[#allocation35_spill] sm:$0xff] %v9222_v54  ;;  %11942 = vst [vmem:[#allocation36_spill] sm:$0xff] %v9225_v34  ;;  %v9228_v48 = vld [vmem:[#allocation16 + $0x1e0] sm:$0xff]  ;;  %v9231_v13 = vld [vmem:[#allocation16 + $0x1f0] sm:$0xff] }
 0x698   : > { %3301 = vmatpush1.msra.mxu0 %v11927_v2  ;;  %3372 = vmatpush1.msra.mxu1 %v11928_v58  ;;  %11943 = vst [vmem:[#allocation37_spill] sm:$0xff] %v9228_v48  ;;  %11944 = vst [vmem:[#allocation38_spill] sm:$0xff] %v9231_v13  ;;  %v9234_v2 = vld [vmem:[#allocation16 + $0x1c8] sm:$0xff]  ;;  %v9240_v58 = vld [vmem:[#allocation16 + $0x1c0] sm:$0xff] }
 0x699   : > { %3302 = vmatprep.subr.mxu0 %v11929_v4  ;;  %3373 = vmatprep.subr.mxu1 %v11930_v25  ;;  %11945 = vst [vmem:[#allocation39_spill] sm:$0xff] %v9234_v2  ;;  %11947 = vst [vmem:[#allocation41_spill] sm:$0xff] %v9240_v58  ;;  %v9243_v4 = vld [vmem:[#allocation16 + $0x1d0] sm:$0xff]  ;;  %v9246_v25 = vld [vmem:[#allocation16 + $0x1a8] sm:$0xff] }
 0x69a   : > { %3303 = vmatpush1.msra.mxu0 %v11931_v5  ;;  %3374 = vmatpush1.msra.mxu1 %v11932_v57  ;;  %11948 = vst [vmem:[#allocation42_spill] sm:$0xff] %v9243_v4  ;;  %11949 = vst [vmem:[#allocation43_spill] sm:$0xff] %v9246_v25  ;;  %v9249_v5 = vld [vmem:[#allocation16 + $0x1b8] sm:$0xff]  ;;  %v9252_v57 = vld [vmem:[#allocation16 + $0x1a0] sm:$0xff] }
 0x69b   : > { %3304 = vmatprep.subr.mxu0 %v11933_v1  ;;  %3375 = vmatprep.subr.mxu1 %v11934_v39  ;;  %11950 = vst [vmem:[#allocation44_spill] sm:$0xff] %v9249_v5  ;;  %11951 = vst [vmem:[#allocation45_spill] sm:$0xff] %v9252_v57  ;;  %v9255_v1 = vld [vmem:[#allocation16 + $0x1b0] sm:$0xff]  ;;  %v9258_v39 = vld [vmem:[#allocation16 + $0x188] sm:$0xff] }
 0x69c   : > { %3305 = vmatpush1.msra.mxu0 %v8842_v52  ;;  %3376 = vmatpush1.msra.mxu1 %v8845_v38  ;;  %v9095_v52 = vld [vmem:[#allocation15 + $0x150] sm:$0xff]  ;;  %v9101_v38 = vld [vmem:[#allocation15 + $0x138] sm:$0xff]  ;;  %11952 = vst [vmem:[#allocation46_spill] sm:$0xff] %v9255_v1  ;;  %11953 = vst [vmem:[#allocation47_spill] sm:$0xff] %v9258_v39 }
 0x69d   : > { %3306 = vmatprep.subr.mxu0 %v8848_v40  ;;  %3377 = vmatprep.subr.mxu1 %v8851_v37  ;;  %v9098_v40 = vld [vmem:[#allocation15 + $0x128] sm:$0xff] }
 0x69e   : > { %3307 = vmatpush1.msra.mxu0 %v8854_v30  ;;  %3378 = vmatpush1.msra.mxu1 %v8857_v12  ;;  %v9104_v30 = vld [vmem:[#allocation15 + $0x120] sm:$0xff]  ;;  %v9107_v12 = vld [vmem:[#allocation15 + $0x130] sm:$0xff]  ;;  %v9110_v37 = vld [vmem:[#allocation15 + $0x108] sm:$0xff] }
 0x69f   : > { %3308 = vmatprep.subr.mxu0 %v9086_v62  ;;  %3379 = vmatprep.subr.mxu1 %v9089_v63 }
 0x6a0   : > { %3309 = vmatpush1.msra.mxu0 %v9092_v0  ;;  %3380 = vmatpush1.msra.mxu1 %v9095_v52 }
 0x6a1   : > { %3310 = vmatprep.subr.mxu0 %v9098_v40  ;;  %3381 = vmatprep.subr.mxu1 %v9101_v38 }
 0x6a2   : > { %3311 = vmatpush1.msra.mxu0 %v9104_v30  ;;  %3382 = vmatpush1.msra.mxu1 %v9107_v12 }
 0x6a3   : > { %3312 = vmatprep.subr.mxu0 %v9110_v37  ;;  %3383 = vmatprep.subr.mxu1 %v9113_v15 }
 0x6a4   : > { %3313 = vmatpush1.msra.mxu0 %v9116_v17  ;;  %3384 = vmatpush1.msra.mxu1 %v9119_v18 }
 0x6a5   : > { %3314 = vmatprep.subr.mxu0 %v9122_v19  ;;  %3385 = vmatprep.subr.mxu1 %v9125_v20 }
 0x6a6   : > { %3315 = vmatpush1.msra.mxu0 %v9128_v24  ;;  %3386 = vmatpush1.msra.mxu1 %v9131_v26 }
 0x6a7   : > { %3316 = vmatprep.subr.mxu0 %v9134_v27  ;;  %3387 = vmatprep.subr.mxu1 %v9137_v28 }
 0x6a8   : > { %3317 = vmatpush1.msra.mxu0 %v9140_v31  ;;  %3388 = vmatpush1.msra.mxu1 %v9143_v32 }
 0x6a9   : > { %3318 = vmatprep.subr.mxu0 %v9146_v35  ;;  %3389 = vmatprep.subr.mxu1 %v9149_v36 }
 0x6aa   : > { %3319 = vmatpush1.msra.mxu0 %v9152_v6  ;;  %3390 = vmatpush1.msra.mxu1 %v9155_v42 }
 0x6ab   : > { %3320 = vmatprep.subr.mxu0 %v9158_v43  ;;  %3391 = vmatprep.subr.mxu1 %v9161_v41 }
 0x6ac   : > { %3321 = vmatpush1.msra.mxu0 %v9164_v44  ;;  %3392 = vmatpush1.msra.mxu1 %v9167_v16 }
 0x6ad   : > { %3322 = vmatprep.subr.mxu0 %v9170_v3  ;;  %3393 = vmatprep.subr.mxu1 %v9173_v8 }
 0x6ae   : > { %3323 = vmatpush1.msra.mxu0 %v9176_v11  ;;  %3394 = vmatpush1.msra.mxu1 %v9179_v9 }
 0x6af   : > { %3324 = vmatprep.subr.mxu0 %v9182_v45  ;;  %3395 = vmatprep.subr.mxu1 %v9185_v46 }
 0x6b0   : > { %3325 = vmatpush1.msra.mxu0 %v9188_v47  ;;  %3396 = vmatpush1.msra.mxu1 %v9191_v49 }
 0x6b1   : > { %3326 = vmatprep.subr.mxu0 %v9194_v50  ;;  %3397 = vmatprep.subr.mxu1 %v9197_v51 }
 0x6b2   : > { %3327 = vmatpush1.msra.mxu0 %v9200_v55  ;;  %3398 = vmatpush1.msra.mxu1 %v9203_v59 }
 0x6b3   : > { %3328 = vmatprep.subr.mxu0 %v9206_v60  ;;  %3399 = vmatprep.subr.mxu1 %v9209_v21 }
 0x6b4   : > { %3329 = vmatpush1.msra.mxu0 %v9212_v10  ;;  %3362 = vmatprep.mubr.f32.mxu0 %v11505_v14 }
 0x6b5   : > { %3400 = vmatpush1.msra.mxu1 %v9216_v7  ;;  %3433 = vmatprep.mubr.f32.mxu1 %v11505_v14 }
 0x6b6   : > { %3363 = vmatmul.mubr.f32.vlgmr.msra.gmra.mxu0 %v8996_v61  ;;  %3434 = vmatmul.mubr.f32.vlgmr.msra.gmra.mxu1 %v8996_v61  ;;  %v9237_v61 = vld [vmem:[#allocation16 + $0x1d8] sm:$0xff] }
 0x6b7   : > { %3468 = vmatprep.subr.mxu0 %v9222_v54  ;;  %3539 = vmatprep.subr.mxu1 %v9225_v34  ;;  %11946 = vst [vmem:[#allocation40_spill] sm:$0xff] %v9237_v61 }
 0x6b8   : > { %3469 = vmatpush1.msra.mxu0 %v9228_v48  ;;  %3540 = vmatpush1.msra.mxu1 %v9231_v13 }
 0x6b9   : > { %3470 = vmatprep.subr.mxu0 %v9234_v2  ;;  %3541 = vmatprep.subr.mxu1 %v9237_v61 }
 0x6ba   : > { %3471 = vmatpush1.msra.mxu0 %v9240_v58  ;;  %3542 = vmatpush1.msra.mxu1 %v9243_v4  ;;  %v9261_v4 = vld [vmem:[#allocation16 + $0x198] sm:$0xff] }
 0x6bb   : > { %3472 = vmatprep.subr.mxu0 %v9246_v25  ;;  %3543 = vmatprep.subr.mxu1 %v9249_v5  ;;  %11954 = vst [vmem:[#allocation48_spill] sm:$0xff] %v9261_v4  ;;  %v9264_v25 = vld [vmem:[#allocation16 + $0x180] sm:$0xff]  ;;  %v9267_v5 = vld [vmem:[#allocation16 + $0x190] sm:$0xff] }
 0x6bc   : > { %3473 = vmatpush1.msra.mxu0 %v9252_v57  ;;  %3544 = vmatpush1.msra.mxu1 %v9255_v1  ;;  %11955 = vst [vmem:[#allocation49_spill] sm:$0xff] %v9264_v25  ;;  %11956 = vst [vmem:[#allocation50_spill] sm:$0xff] %v9267_v5  ;;  %v9270_v57 = vld [vmem:[#allocation16 + $0x168] sm:$0xff]  ;;  %v9273_v1 = vld [vmem:[#allocation16 + $0x178] sm:$0xff] }
 0x6bd   : > { %3474 = vmatprep.subr.mxu0 %v9258_v39  ;;  %3545 = vmatprep.subr.mxu1 %v9261_v4  ;;  %11957 = vst [vmem:[#allocation51_spill] sm:$0xff] %v9270_v57  ;;  %11958 = vst [vmem:[#allocation52_spill] sm:$0xff] %v9273_v1  ;;  %v9276_v39 = vld [vmem:[#allocation16 + $0x160] sm:$0xff]  ;;  %v9279_v4 = vld [vmem:[#allocation16 + $0x170] sm:$0xff] }
 0x6be   : > { %3475 = vmatpush1.msra.mxu0 %v9264_v25  ;;  %3546 = vmatpush1.msra.mxu1 %v9267_v5  ;;  %11959 = vst [vmem:[#allocation53_spill] sm:$0xff] %v9276_v39  ;;  %11960 = vst [vmem:[#allocation54_spill] sm:$0xff] %v9279_v4  ;;  %v9282_v25 = vld [vmem:[#allocation16 + $0x148] sm:$0xff]  ;;  %v9285_v5 = vld [vmem:[#allocation16 + $0x158] sm:$0xff] }
 0x6bf   : > { %3476 = vmatprep.subr.mxu0 %v9270_v57  ;;  %3547 = vmatprep.subr.mxu1 %v9273_v1  ;;  %11961 = vst [vmem:[#allocation55_spill] sm:$0xff] %v9282_v25  ;;  %11962 = vst [vmem:[#allocation56_spill] sm:$0xff] %v9285_v5  ;;  %v9288_v57 = vld [vmem:[#allocation16 + $0x140] sm:$0xff]  ;;  %v9291_v1 = vld [vmem:[#allocation16 + $0x150] sm:$0xff] }
 0x6c0   : > { %3477 = vmatpush1.msra.mxu0 %v9276_v39  ;;  %3548 = vmatpush1.msra.mxu1 %v9279_v4  ;;  %11963 = vst [vmem:[#allocation57_spill] sm:$0xff] %v9288_v57  ;;  %11964 = vst [vmem:[#allocation58_spill] sm:$0xff] %v9291_v1  ;;  %v9294_v39 = vld [vmem:[#allocation16 + $0x128] sm:$0xff]  ;;  %v9297_v4 = vld [vmem:[#allocation16 + $0x138] sm:$0xff] }
 0x6c1   : > { %3478 = vmatprep.subr.mxu0 %v9282_v25  ;;  %3549 = vmatprep.subr.mxu1 %v9285_v5  ;;  %11965 = vst [vmem:[#allocation59_spill] sm:$0xff] %v9294_v39  ;;  %11966 = vst [vmem:[#allocation60_spill] sm:$0xff] %v9297_v4  ;;  %v9300_v25 = vld [vmem:[#allocation16 + $0x120] sm:$0xff]  ;;  %v9303_v5 = vld [vmem:[#allocation16 + $0x130] sm:$0xff] }
 0x6c2   : > { %3479 = vmatpush1.msra.mxu0 %v9288_v57  ;;  %3550 = vmatpush1.msra.mxu1 %v9291_v1  ;;  %11967 = vst [vmem:[#allocation61_spill] sm:$0xff] %v9300_v25  ;;  %11968 = vst [vmem:[#allocation62_spill] sm:$0xff] %v9303_v5  ;;  %v9306_v57 = vld [vmem:[#allocation16 + $0x108] sm:$0xff]  ;;  %v9309_v1 = vld [vmem:[#allocation16 + $0x118] sm:$0xff] }
 0x6c3   : > { %3480 = vmatprep.subr.mxu0 %v9294_v39  ;;  %3551 = vmatprep.subr.mxu1 %v9297_v4  ;;  %11969 = vst [vmem:[#allocation63_spill] sm:$0xff] %v9306_v57  ;;  %11970 = vst [vmem:[#allocation64_spill] sm:$0xff] %v9309_v1  ;;  %v9312_v39 = vld [vmem:[#allocation16 + $0x100] sm:$0xff]  ;;  %v9315_v4 = vld [vmem:[#allocation16 + $0x110] sm:$0xff] }
 0x6c4   : > { %3481 = vmatpush1.msra.mxu0 %v9300_v25  ;;  %3552 = vmatpush1.msra.mxu1 %v9303_v5  ;;  %11971 = vst [vmem:[#allocation65_spill] sm:$0xff] %v9312_v39  ;;  %11972 = vst [vmem:[#allocation66_spill] sm:$0xff] %v9315_v4  ;;  %v9318_v25 = vld [vmem:[#allocation16 + $0xe8] sm:$0xff]  ;;  %v9321_v5 = vld [vmem:[#allocation16 + $0xf8] sm:$0xff] }
 0x6c5   : > { %3482 = vmatprep.subr.mxu0 %v9306_v57  ;;  %3553 = vmatprep.subr.mxu1 %v9309_v1  ;;  %11973 = vst [vmem:[#allocation67_spill] sm:$0xff] %v9318_v25  ;;  %11974 = vst [vmem:[#allocation68_spill] sm:$0xff] %v9321_v5  ;;  %v9324_v57 = vld [vmem:[#allocation16 + $0xe0] sm:$0xff]  ;;  %v9327_v1 = vld [vmem:[#allocation16 + $0xf0] sm:$0xff] }
 0x6c6   : > { %3483 = vmatpush1.msra.mxu0 %v9312_v39  ;;  %3554 = vmatpush1.msra.mxu1 %v9315_v4  ;;  %11975 = vst [vmem:[#allocation69_spill] sm:$0xff] %v9324_v57  ;;  %11976 = vst [vmem:[#allocation70_spill] sm:$0xff] %v9327_v1  ;;  %v9330_v39 = vld [vmem:[#allocation16 + $0xc8] sm:$0xff]  ;;  %v9333_v4 = vld [vmem:[#allocation16 + $0xd8] sm:$0xff] }
 0x6c7   : > { %3484 = vmatprep.subr.mxu0 %v9318_v25  ;;  %3555 = vmatprep.subr.mxu1 %v9321_v5  ;;  %11977 = vst [vmem:[#allocation71_spill] sm:$0xff] %v9330_v39  ;;  %11978 = vst [vmem:[#allocation72_spill] sm:$0xff] %v9333_v4  ;;  %v9336_v25 = vld [vmem:[#allocation16 + $0xc0] sm:$0xff]  ;;  %v9339_v5 = vld [vmem:[#allocation16 + $0xd0] sm:$0xff] }
 0x6c8   : > { %3485 = vmatpush1.msra.mxu0 %v9324_v57  ;;  %3556 = vmatpush1.msra.mxu1 %v9327_v1  ;;  %11979 = vst [vmem:[#allocation73_spill] sm:$0xff] %v9336_v25  ;;  %11980 = vst [vmem:[#allocation74_spill] sm:$0xff] %v9339_v5  ;;  %v9342_v57 = vld [vmem:[#allocation16 + $0xa8] sm:$0xff]  ;;  %v9345_v1 = vld [vmem:[#allocation16 + $0xb8] sm:$0xff] }
 0x6c9   : > { %3486 = vmatprep.subr.mxu0 %v9330_v39  ;;  %3557 = vmatprep.subr.mxu1 %v9333_v4  ;;  %11981 = vst [vmem:[#allocation75_spill] sm:$0xff] %v9342_v57  ;;  %11982 = vst [vmem:[#allocation76_spill] sm:$0xff] %v9345_v1  ;;  %v9348_v39 = vld [vmem:[#allocation16 + $0xa0] sm:$0xff]  ;;  %v9351_v4 = vld [vmem:[#allocation16 + $0xb0] sm:$0xff] }
 0x6ca   : > { %3487 = vmatpush1.msra.mxu0 %v9336_v25  ;;  %3558 = vmatpush1.msra.mxu1 %v9339_v5  ;;  %11983 = vst [vmem:[#allocation77_spill] sm:$0xff] %v9348_v39  ;;  %11984 = vst [vmem:[#allocation78_spill] sm:$0xff] %v9351_v4  ;;  %v9354_v25 = vld [vmem:[#allocation16 + $0x88] sm:$0xff]  ;;  %v9357_v5 = vld [vmem:[#allocation16 + $0x98] sm:$0xff] }
 0x6cb   : > { %3488 = vmatprep.subr.mxu0 %v9342_v57  ;;  %3559 = vmatprep.subr.mxu1 %v9345_v1  ;;  %11985 = vst [vmem:[#allocation79_spill] sm:$0xff] %v9354_v25  ;;  %11986 = vst [vmem:[#allocation80_spill] sm:$0xff] %v9357_v5  ;;  %v9360_v57 = vld [vmem:[#allocation16 + $0x80] sm:$0xff]  ;;  %v9363_v1 = vld [vmem:[#allocation16 + $0x90] sm:$0xff] }
 0x6cc   : > { %3489 = vmatpush1.msra.mxu0 %v9348_v39  ;;  %3560 = vmatpush1.msra.mxu1 %v9351_v4  ;;  %11987 = vst [vmem:[#allocation81_spill] sm:$0xff] %v9360_v57  ;;  %11988 = vst [vmem:[#allocation82_spill] sm:$0xff] %v9363_v1  ;;  %v9366_v39 = vld [vmem:[#allocation16 + $0x68] sm:$0xff]  ;;  %v9369_v4 = vld [vmem:[#allocation16 + $0x78] sm:$0xff] }
 0x6cd   : > { %3490 = vmatprep.subr.mxu0 %v9354_v25  ;;  %3561 = vmatprep.subr.mxu1 %v9357_v5  ;;  %11989 = vst [vmem:[#allocation83_spill] sm:$0xff] %v9366_v39  ;;  %11990 = vst [vmem:[#allocation84_spill] sm:$0xff] %v9369_v4  ;;  %v9372_v25 = vld [vmem:[#allocation16 + $0x60] sm:$0xff]  ;;  %v9375_v5 = vld [vmem:[#allocation16 + $0x70] sm:$0xff] }
 0x6ce   : > { %3491 = vmatpush1.msra.mxu0 %v9360_v57  ;;  %3562 = vmatpush1.msra.mxu1 %v9363_v1  ;;  %11991 = vst [vmem:[#allocation85_spill] sm:$0xff] %v9372_v25  ;;  %11992 = vst [vmem:[#allocation86_spill] sm:$0xff] %v9375_v5  ;;  %v9378_v57 = vld [vmem:[#allocation16 + $0x48] sm:$0xff]  ;;  %v9381_v1 = vld [vmem:[#allocation16 + $0x58] sm:$0xff] }
 0x6cf   : > { %3492 = vmatprep.subr.mxu0 %v9366_v39  ;;  %3563 = vmatprep.subr.mxu1 %v9369_v4  ;;  %11993 = vst [vmem:[#allocation87_spill] sm:$0xff] %v9378_v57  ;;  %11994 = vst [vmem:[#allocation88_spill] sm:$0xff] %v9381_v1  ;;  %v9384_v39 = vld [vmem:[#allocation16 + $0x40] sm:$0xff]  ;;  %v9387_v4 = vld [vmem:[#allocation16 + $0x50] sm:$0xff] }
 0x6d0   : > { %3493 = vmatpush1.msra.mxu0 %v9372_v25  ;;  %3564 = vmatpush1.msra.mxu1 %v9375_v5  ;;  %11995 = vst [vmem:[#allocation89_spill] sm:$0xff] %v9384_v39  ;;  %11996 = vst [vmem:[#allocation90_spill] sm:$0xff] %v9387_v4  ;;  %v9390_v25 = vld [vmem:[#allocation16 + $0x28] sm:$0xff]  ;;  %v9393_v5 = vld [vmem:[#allocation16 + $0x38] sm:$0xff] }
 0x6d1   : > { %3494 = vmatprep.subr.mxu0 %v9378_v57  ;;  %3565 = vmatprep.subr.mxu1 %v9381_v1  ;;  %11997 = vst [vmem:[#allocation91_spill] sm:$0xff] %v9390_v25  ;;  %11998 = vst [vmem:[#allocation92_spill] sm:$0xff] %v9393_v5  ;;  %v9396_v57 = vld [vmem:[#allocation16 + $0x20] sm:$0xff]  ;;  %v9399_v1 = vld [vmem:[#allocation16 + $0x30] sm:$0xff] }
 0x6d2   : > { %3495 = vmatpush1.msra.mxu0 %v9384_v39  ;;  %3566 = vmatpush1.msra.mxu1 %v9387_v4  ;;  %11999 = vst [vmem:[#allocation93_spill] sm:$0xff] %v9396_v57  ;;  %12000 = vst [vmem:[#allocation94_spill] sm:$0xff] %v9399_v1  ;;  %v9402_v39 = vld [vmem:[#allocation16 + $0x8] sm:$0xff]  ;;  %v9405_v4 = vld [vmem:[#allocation16 + $0x18] sm:$0xff] }
 0x6d3   : > { %3496 = vmatprep.subr.mxu0 %v9390_v25  ;;  %3567 = vmatprep.subr.mxu1 %v9393_v5  ;;  %12001 = vst [vmem:[#allocation95_spill] sm:$0xff] %v9402_v39  ;;  %12002 = vst [vmem:[#allocation96_spill] sm:$0xff] %v9405_v4  ;;  %v9408_v25 = vld [vmem:[#allocation16] sm:$0xff]  ;;  %v9411_v5 = vld [vmem:[#allocation16 + $0x10] sm:$0xff] }
 0x6d4   : > { %3497 = vmatpush1.msra.mxu0 %v9396_v57  ;;  %3568 = vmatpush1.msra.mxu1 %v9399_v1  ;;  %12003 = vst [vmem:[#allocation97_spill] sm:$0xff] %v9408_v25  ;;  %12004 = vst [vmem:[#allocation98_spill] sm:$0xff] %v9411_v5  ;;  %v9416_v1 = vld [vmem:[#allocation18 + $0x1e8] sm:$0xff] }
 0x6d5   : > { %3498 = vmatprep.subr.mxu0 %v9402_v39  ;;  %3569 = vmatprep.subr.mxu1 %v9405_v4  ;;  %12005 = vst [vmem:[#allocation99_spill] sm:$0xff] %v9416_v1  ;;  %v9419_v39 = vld [vmem:[#allocation18 + $0x1f8] sm:$0xff] }
 0x6d6   : > { %3499 = vmatpush1.msra.mxu0 %v9408_v25  ;;  %3570 = vmatpush1.msra.mxu1 %v9411_v5  ;;  %12006 = vst [vmem:[#allocation101_spill] sm:$0xff] %v9419_v39 }
 0x6d7   : > { %3532 = vmatprep.mubr.f32.mxu0 %v11505_v14  ;;  %3603 = vmatprep.mubr.f32.mxu1 %v11505_v14 }
 0x6d8   : > { %3614 = vmatprep.subr.mxu0 %v9416_v1  ;;  %3685 = vmatprep.subr.mxu1 %v9419_v39 }
 0x733   : > { %v3037_v4 = vpop.f32.mrf.mxu0  ;;  %v3108_v61 = vpop.f32.mrf.mxu1 }
 0x734   : > { %v3113_v25 = vadd.f32 %v3037_v4, %v11867_v33  ;;  %v3115_v21 = vadd.f32 %v3108_v61, %v8141_v23 }
 0x735   : > { %v3039_v57 = vpop.f32.mrf.mxu0  ;;  %v3110_v54 = vpop.f32.mrf.mxu1 }
 0x736   : > { %v3114_v5 = vadd.f32 %v3039_v57, %v8135_v53  ;;  %v3116_v39 = vadd.f32 %v3110_v54, %v8139_v22 }
 0x754   : > { %v3183_v58 = vpop.f32.mrf.mxu0  ;;  %v3254_v1 = vpop.f32.mrf.mxu1 }
 0x755   : > { %v3259_v2 = vadd.f32 %v3183_v58, %v3113_v25  ;;  %v3261_v4 = vadd.f32 %v3254_v1, %v3115_v21  ;;  %v12007_v58 = vld [vmem:[#allocation111_spill] sm:$0xff] }
 0x756   : > { %v3185_v13 = vpop.f32.mrf.mxu0  ;;  %v3256_v10 = vpop.f32.mrf.mxu1 }
 0x757   : > { %v5558_v48 = vmul.f32 -1.442695, %v3259_v2  ;;  %v3260_v34 = vadd.f32 %v3185_v13, %v3114_v5  ;;  %v3262_v60 = vadd.f32 %v3256_v10, %v3116_v39 }
 0x759   : > { %5862 = vpow2.f32 %v5558_v48  ;;  %v5559_v7 = vmul.f32 -1.442695, %v3260_v34  ;;  %v5560_v59 = vmul.f32 -1.442695, %v3262_v60  ;;  %v12008_v60 = vld [vmem:[#allocation113_spill] sm:$0xff] }
 0x75b   : > { %5864 = vpow2.f32 %v5559_v7 }
 0x75c   : > { %5866 = vtanh.f32 %v3261_v4 }
 0x766   : > { %v5863_v33 = vpop.eup %5862 }
 0x767   : > { %v3266_v55 = vadd.f32 1.0, %v5863_v33 }
 0x768   : > { %v5865_v57 = vpop.eup %5864 }
 0x769   : > { %5868 = vrcp.f32 %v3266_v55  ;;  %v3272_v2 = vadd.f32 1.0, %v5865_v57  ;;  %v5867_v48 = vpop.eup %5866  ;;  %v12009_v57 = vld [vmem:[#allocation114_spill] sm:$0xff] }
 0x76a   : > { %5870 = vpow2.f32 %v5560_v59 }
 0x76b   : > { %5872 = vrcp.f32 %v3272_v2 }
 0x776   : > { %v5869_v34 = vpop.eup %5868  ;;  %v3364_v13 = vpop.f32.mrf.mxu0 }
 0x777   : > { %v5871_v7 = vpop.eup %5870  ;;  %v3440_v25 = vadd.f32 %v3364_v13, %v12007_v58  ;;  %v3283_v61 = vmul.f32 %v5869_v34, %v5867_v48  ;;  %v3435_v55 = vpop.f32.mrf.mxu1  ;;  %v12010_v48 = vld [vmem:[#allocation112_spill] sm:$0xff] }
 0x778   : > { %v5873_v54 = vpop.eup %5872  ;;  %v3366_v5 = vpop.f32.mrf.mxu0  ;;  %v3279_v1 = vadd.f32 1.0, %v5871_v7  ;;  %v3442_v34 = vadd.f32 %v3435_v55, %v12010_v48 }
 0x779   : > { %v3282_v21 = vmul.f32 %v5873_v54, %v8983_v29  ;;  %v5562_v10 = vmul.f32 -1.442695, %v3440_v25  ;;  %v3441_v33 = vadd.f32 %v3366_v5, %v12008_v60  ;;  %v3437_v4 = vpop.f32.mrf.mxu1 }
 0x77a   : > { %v3443_v2 = vadd.f32 %v3437_v4, %v12009_v57 }
 0x77b   : > { %v9429_v39 = vadd.f32 %v3283_v61, %v3282_v21  ;;  %5874 = vpow2.f32 %v5562_v10  ;;  %v5563_v59 = vmul.f32 -1.442695, %v3441_v33 }
 0x77c   : > { %v5564_v29 = vmul.f32 -1.442695, %v3443_v2 }
 0x77d   : > { %5876 = vpow2.f32 %v5563_v59 }
 0x77e   : > { %5878 = vrcp.f32 %v3279_v1 }
 0x77f   : > { %5880 = vtanh.f32 %v9429_v39 }
 0x780   : > { %5882 = vtanh.f32 %v3442_v34  ;;  %v9446_v34 = vld [vmem:[#allocation18 + $0x1e0] sm:$0xff] }
 0x781   : > { %5884 = vpow2.f32 %v5564_v29  ;;  %v9449_v29 = vld [vmem:[#allocation18 + $0x1f0] sm:$0xff] }
 0x788   : > { %v5875_v13 = vpop.eup %5874 }
 0x789   : > { %v3447_v58 = vadd.f32 1.0, %v5875_v13  ;;  %v9455_v13 = vld [vmem:[#allocation18 + $0x1d8] sm:$0xff] }
 0x78a   : > { %v5877_v7 = vpop.eup %5876 }
 0x78b   : > { %v5879_v25 = vpop.eup %5878  ;;  %5886 = vrcp.f32 %v3447_v58  ;;  %v3453_v54 = vadd.f32 1.0, %v5877_v7  ;;  %v9458_v58 = vld [vmem:[#allocation18 + $0x1c0] sm:$0xff]  ;;  %v9461_v7 = vld [vmem:[#allocation18 + $0x1d0] sm:$0xff] }
 0x78c   : > { %v5881_v5 = vpop.eup %5880 }
 0x78d   : > { %5888 = vrcp.f32 %v3453_v54  ;;  %v9434_v61 = vmul.f32 %v5881_v5, %v5879_v25  ;;  %v5883_v21 = vpop.eup %5882  ;;  %v9464_v25 = vld [vmem:[#allocation18 + $0x1a8] sm:$0xff]  ;;  %v9467_v54 = vld [vmem:[#allocation18 + $0x1b8] sm:$0xff]  ;;  %v9470_v5 = vld [vmem:[#allocation18 + $0x1a0] sm:$0xff] }
 0x78e   : > { %v5885_v10 = vpop.eup %5884 }
 0x78f   : > { %5561 = vst [vmem:[%s7290_s4 + $0x18] sm:$0xff] %v9434_v61  ;;  %v3460_v55 = vadd.f32 1.0, %v5885_v10  ;;  %v9476_v10 = vld [vmem:[#allocation18 + $0x188] sm:$0xff] }
 0x791   : > { %5890 = vrcp.f32 %v3460_v55  ;;  %v9488_v55 = vld [vmem:[#allocation18 + $0x168] sm:$0xff] }
 0x792   : > { %12013 = vst [vmem:[#allocation127_spill] sm:$0xff] %v9488_v55 }
 0x798   : > { %v5887_v60 = vpop.eup %5886 }
 0x799   : > { %v3464_v33 = vmul.f32 %v5887_v60, %v5883_v21  ;;  %v9473_v21 = vld [vmem:[#allocation18 + $0x1b0] sm:$0xff]  ;;  %v9479_v60 = vld [vmem:[#allocation18 + $0x198] sm:$0xff] }
 0x79a   : > { %v5889_v1 = vpop.eup %5888 }
 0x79b   : > { %v3463_v59 = vmul.f32 %v5889_v1, %v8993_v56  ;;  %v9452_v56 = vld [vmem:[#allocation18 + $0x1c8] sm:$0xff]  ;;  %v9485_v1 = vld [vmem:[#allocation18 + $0x190] sm:$0xff] }
 0x79c   : > { %12012 = vst [vmem:[#allocation100_spill] sm:$0xff] %v9485_v1 }
 0x79d   : > { %v9439_v4 = vadd.f32 %v3464_v33, %v3463_v59  ;;  %v9482_v33 = vld [vmem:[#allocation18 + $0x180] sm:$0xff]  ;;  %v9491_v59 = vld [vmem:[#allocation18 + $0x178] sm:$0xff] }
 0x79e   : > { %v5891_v57 = vpop.eup %5890  ;;  %12011 = vst [vmem:[#allocation102_spill] sm:$0xff] %v9482_v33  ;;  %12014 = vst [vmem:[#allocation107_spill] sm:$0xff] %v9491_v59 }
 0x79f   : > { %5892 = vtanh.f32 %v9439_v4 }
 0x7ac   : > { %v5893_v2 = vpop.eup %5892 }
 0x7ad   : > { %v9442_v48 = vmul.f32 %v5893_v2, %v5891_v57  ;;  %v9494_v57 = vld [vmem:[#allocation18 + $0x160] sm:$0xff]  ;;  %v9497_v2 = vld [vmem:[#allocation18 + $0x170] sm:$0xff] }
 0x7ae   : > { %12015 = vst [vmem:[#allocation109_spill] sm:$0xff] %v9494_v57  ;;  %12016 = vst [vmem:[#allocation110_spill] sm:$0xff] %v9497_v2 }
 0x7af   : > { %3533 = vmatmul.mubr.f32.vlgmr.msra.gmra.mxu0 %v9442_v48  ;;  %3604 = vmatmul.mubr.f32.vlgmr.msra.gmra.mxu1 %v9442_v48 }
 0x7b0   : > { %3615 = vmatpush1.msra.mxu0 %v9446_v34  ;;  %3686 = vmatpush1.msra.mxu1 %v9449_v29 }
 0x7b1   : > { %3616 = vmatprep.subr.mxu0 %v9452_v56  ;;  %3687 = vmatprep.subr.mxu1 %v9455_v13 }
 0x7b2   : > { %3617 = vmatpush1.msra.mxu0 %v9458_v58  ;;  %3688 = vmatpush1.msra.mxu1 %v9461_v7 }
 0x7b3   : > { %3618 = vmatprep.subr.mxu0 %v9464_v25  ;;  %3689 = vmatprep.subr.mxu1 %v9467_v54 }
 0x7b4   : > { %3619 = vmatpush1.msra.mxu0 %v9470_v5  ;;  %3690 = vmatpush1.msra.mxu1 %v9473_v21 }
 0x7b5   : > { %3620 = vmatprep.subr.mxu0 %v9476_v10  ;;  %3691 = vmatprep.subr.mxu1 %v9479_v60 }
 0x7b6   : > { %3621 = vmatpush1.msra.mxu0 %v9482_v33  ;;  %3692 = vmatpush1.msra.mxu1 %v9485_v1  ;;  %v9500_v33 = vld [vmem:[#allocation18 + $0x148] sm:$0xff]  ;;  %v9503_v1 = vld [vmem:[#allocation18 + $0x158] sm:$0xff] }
 0x7b7   : > { %3622 = vmatprep.subr.mxu0 %v9488_v55  ;;  %3693 = vmatprep.subr.mxu1 %v9491_v59  ;;  %12017 = vst [vmem:[#allocation108_spill] sm:$0xff] %v9500_v33  ;;  %12018 = vst [vmem:[#allocation128_spill] sm:$0xff] %v9503_v1  ;;  %v9506_v55 = vld [vmem:[#allocation18 + $0x140] sm:$0xff]  ;;  %v9509_v59 = vld [vmem:[#allocation18 + $0x150] sm:$0xff] }
 0x7b8   : > { %3623 = vmatpush1.msra.mxu0 %v9494_v57  ;;  %3694 = vmatpush1.msra.mxu1 %v9497_v2  ;;  %12019 = vst [vmem:[#allocation129_spill] sm:$0xff] %v9506_v55  ;;  %12020 = vst [vmem:[#allocation130_spill] sm:$0xff] %v9509_v59  ;;  %v9512_v57 = vld [vmem:[#allocation18 + $0x128] sm:$0xff]  ;;  %v9515_v2 = vld [vmem:[#allocation18 + $0x138] sm:$0xff] }
 0x7b9   : > { %3624 = vmatprep.subr.mxu0 %v9500_v33  ;;  %3695 = vmatprep.subr.mxu1 %v9503_v1  ;;  %12021 = vst [vmem:[#allocation131_spill] sm:$0xff] %v9512_v57  ;;  %12022 = vst [vmem:[#allocation132_spill] sm:$0xff] %v9515_v2  ;;  %v9518_v33 = vld [vmem:[#allocation18 + $0x120] sm:$0xff]  ;;  %v9521_v1 = vld [vmem:[#allocation18 + $0x130] sm:$0xff] }
 0x7ba   : > { %3625 = vmatpush1.msra.mxu0 %v9506_v55  ;;  %3696 = vmatpush1.msra.mxu1 %v9509_v59  ;;  %12023 = vst [vmem:[#allocation133_spill] sm:$0xff] %v9518_v33  ;;  %12024 = vst [vmem:[#allocation134_spill] sm:$0xff] %v9521_v1  ;;  %v9524_v55 = vld [vmem:[#allocation18 + $0x108] sm:$0xff]  ;;  %v9527_v59 = vld [vmem:[#allocation18 + $0x118] sm:$0xff] }
 0x7bb   : > { %3626 = vmatprep.subr.mxu0 %v9512_v57  ;;  %3697 = vmatprep.subr.mxu1 %v9515_v2  ;;  %12025 = vst [vmem:[#allocation135_spill] sm:$0xff] %v9524_v55  ;;  %12026 = vst [vmem:[#allocation136_spill] sm:$0xff] %v9527_v59  ;;  %v9530_v57 = vld [vmem:[#allocation18 + $0x100] sm:$0xff]  ;;  %v9533_v2 = vld [vmem:[#allocation18 + $0x110] sm:$0xff] }
 0x7bc   : > { %3627 = vmatpush1.msra.mxu0 %v9518_v33  ;;  %3698 = vmatpush1.msra.mxu1 %v9521_v1  ;;  %12027 = vst [vmem:[#allocation137_spill] sm:$0xff] %v9530_v57  ;;  %12028 = vst [vmem:[#allocation138_spill] sm:$0xff] %v9533_v2  ;;  %v9536_v33 = vld [vmem:[#allocation18 + $0xe8] sm:$0xff]  ;;  %v9539_v1 = vld [vmem:[#allocation18 + $0xf8] sm:$0xff] }
 0x7bd   : > { %3628 = vmatprep.subr.mxu0 %v9524_v55  ;;  %3699 = vmatprep.subr.mxu1 %v9527_v59  ;;  %12029 = vst [vmem:[#allocation139_spill] sm:$0xff] %v9536_v33  ;;  %12030 = vst [vmem:[#allocation140_spill] sm:$0xff] %v9539_v1  ;;  %v9542_v55 = vld [vmem:[#allocation18 + $0xe0] sm:$0xff]  ;;  %v9545_v59 = vld [vmem:[#allocation18 + $0xf0] sm:$0xff] }
 0x7be   : > { %3629 = vmatpush1.msra.mxu0 %v9530_v57  ;;  %3700 = vmatpush1.msra.mxu1 %v9533_v2  ;;  %12031 = vst [vmem:[#allocation141_spill] sm:$0xff] %v9542_v55  ;;  %12032 = vst [vmem:[#allocation142_spill] sm:$0xff] %v9545_v59  ;;  %v9548_v57 = vld [vmem:[#allocation18 + $0xc8] sm:$0xff]  ;;  %v9551_v2 = vld [vmem:[#allocation18 + $0xd8] sm:$0xff] }
 0x7bf   : > { %3630 = vmatprep.subr.mxu0 %v9536_v33  ;;  %3701 = vmatprep.subr.mxu1 %v9539_v1  ;;  %12033 = vst [vmem:[#allocation143_spill] sm:$0xff] %v9548_v57  ;;  %12034 = vst [vmem:[#allocation144_spill] sm:$0xff] %v9551_v2  ;;  %v9554_v33 = vld [vmem:[#allocation18 + $0xc0] sm:$0xff]  ;;  %v9557_v1 = vld [vmem:[#allocation18 + $0xd0] sm:$0xff] }
 0x7c0   : > { %3631 = vmatpush1.msra.mxu0 %v9542_v55  ;;  %3702 = vmatpush1.msra.mxu1 %v9545_v59  ;;  %12035 = vst [vmem:[#allocation145_spill] sm:$0xff] %v9554_v33  ;;  %12036 = vst [vmem:[#allocation146_spill] sm:$0xff] %v9557_v1  ;;  %v9560_v55 = vld [vmem:[#allocation18 + $0xa8] sm:$0xff]  ;;  %v9563_v59 = vld [vmem:[#allocation18 + $0xb8] sm:$0xff] }
 0x7c1   : > { %3632 = vmatprep.subr.mxu0 %v9548_v57  ;;  %3703 = vmatprep.subr.mxu1 %v9551_v2  ;;  %12037 = vst [vmem:[#allocation147_spill] sm:$0xff] %v9560_v55  ;;  %12038 = vst [vmem:[#allocation148_spill] sm:$0xff] %v9563_v59  ;;  %v9566_v57 = vld [vmem:[#allocation18 + $0xa0] sm:$0xff]  ;;  %v9569_v2 = vld [vmem:[#allocation18 + $0xb0] sm:$0xff] }
 0x7c2   : > { %3633 = vmatpush1.msra.mxu0 %v9554_v33  ;;  %3704 = vmatpush1.msra.mxu1 %v9557_v1  ;;  %12039 = vst [vmem:[#allocation149_spill] sm:$0xff] %v9566_v57  ;;  %12040 = vst [vmem:[#allocation150_spill] sm:$0xff] %v9569_v2  ;;  %v9572_v33 = vld [vmem:[#allocation18 + $0x88] sm:$0xff]  ;;  %v9575_v1 = vld [vmem:[#allocation18 + $0x98] sm:$0xff] }
 0x7c3   : > { %3634 = vmatprep.subr.mxu0 %v9560_v55  ;;  %3705 = vmatprep.subr.mxu1 %v9563_v59  ;;  %12041 = vst [vmem:[#allocation151_spill] sm:$0xff] %v9572_v33  ;;  %12042 = vst [vmem:[#allocation152_spill] sm:$0xff] %v9575_v1  ;;  %v9578_v55 = vld [vmem:[#allocation18 + $0x80] sm:$0xff]  ;;  %v9581_v59 = vld [vmem:[#allocation18 + $0x90] sm:$0xff] }
 0x7c4   : > { %3635 = vmatpush1.msra.mxu0 %v9566_v57  ;;  %3706 = vmatpush1.msra.mxu1 %v9569_v2  ;;  %12043 = vst [vmem:[#allocation153_spill] sm:$0xff] %v9578_v55  ;;  %12044 = vst [vmem:[#allocation154_spill] sm:$0xff] %v9581_v59  ;;  %v9584_v57 = vld [vmem:[#allocation18 + $0x68] sm:$0xff]  ;;  %v9587_v2 = vld [vmem:[#allocation18 + $0x78] sm:$0xff] }
 0x7c5   : > { %3636 = vmatprep.subr.mxu0 %v9572_v33  ;;  %3707 = vmatprep.subr.mxu1 %v9575_v1  ;;  %12045 = vst [vmem:[#allocation155_spill] sm:$0xff] %v9584_v57  ;;  %12046 = vst [vmem:[#allocation156_spill] sm:$0xff] %v9587_v2  ;;  %v9590_v33 = vld [vmem:[#allocation18 + $0x60] sm:$0xff]  ;;  %v9593_v1 = vld [vmem:[#allocation18 + $0x70] sm:$0xff] }
 0x7c6   : > { %3637 = vmatpush1.msra.mxu0 %v9578_v55  ;;  %3708 = vmatpush1.msra.mxu1 %v9581_v59  ;;  %12047 = vst [vmem:[#allocation157_spill] sm:$0xff] %v9590_v33  ;;  %12048 = vst [vmem:[#allocation158_spill] sm:$0xff] %v9593_v1  ;;  %v9596_v55 = vld [vmem:[#allocation18 + $0x48] sm:$0xff]  ;;  %v9599_v59 = vld [vmem:[#allocation18 + $0x58] sm:$0xff] }
 0x7c7   : > { %3638 = vmatprep.subr.mxu0 %v9584_v57  ;;  %3709 = vmatprep.subr.mxu1 %v9587_v2  ;;  %12049 = vst [vmem:[#allocation159_spill] sm:$0xff] %v9596_v55  ;;  %12050 = vst [vmem:[#allocation160_spill] sm:$0xff] %v9599_v59  ;;  %v9602_v57 = vld [vmem:[#allocation18 + $0x40] sm:$0xff]  ;;  %v9605_v2 = vld [vmem:[#allocation18 + $0x50] sm:$0xff] }
 0x7c8   : > { %3639 = vmatpush1.msra.mxu0 %v9590_v33  ;;  %3710 = vmatpush1.msra.mxu1 %v9593_v1  ;;  %12051 = vst [vmem:[#allocation161_spill] sm:$0xff] %v9602_v57  ;;  %12052 = vst [vmem:[#allocation162_spill] sm:$0xff] %v9605_v2  ;;  %v9608_v33 = vld [vmem:[#allocation18 + $0x28] sm:$0xff]  ;;  %v9611_v1 = vld [vmem:[#allocation18 + $0x38] sm:$0xff] }
 0x7c9   : > { %3640 = vmatprep.subr.mxu0 %v9596_v55  ;;  %3711 = vmatprep.subr.mxu1 %v9599_v59  ;;  %12053 = vst [vmem:[#allocation163_spill] sm:$0xff] %v9608_v33  ;;  %12054 = vst [vmem:[#allocation164_spill] sm:$0xff] %v9611_v1  ;;  %v9614_v55 = vld [vmem:[#allocation18 + $0x20] sm:$0xff]  ;;  %v9617_v59 = vld [vmem:[#allocation18 + $0x30] sm:$0xff] }
 0x7ca   : > { %3641 = vmatpush1.msra.mxu0 %v9602_v57  ;;  %3712 = vmatpush1.msra.mxu1 %v9605_v2  ;;  %12055 = vst [vmem:[#allocation165_spill] sm:$0xff] %v9617_v59  ;;  %v9620_v57 = vld [vmem:[#allocation18 + $0x8] sm:$0xff]  ;;  %v9623_v2 = vld [vmem:[#allocation18 + $0x18] sm:$0xff] }
 0x7cb   : > { %3642 = vmatprep.subr.mxu0 %v9608_v33  ;;  %3713 = vmatprep.subr.mxu1 %v9611_v1  ;;  %12056 = vst [vmem:[#allocation166_spill] sm:$0xff] %v9620_v57  ;;  %12057 = vst [vmem:[#allocation167_spill] sm:$0xff] %v9623_v2  ;;  %v9626_v33 = vld [vmem:[#allocation18] sm:$0xff]  ;;  %v9630_v1 = vld [vmem:[#allocation18 + $0x10] sm:$0xff] }
 0x7cc   : > { %3643 = vmatpush1.msra.mxu0 %v9614_v55  ;;  %3714 = vmatpush1.msra.mxu1 %v9617_v59  ;;  %12058 = vst [vmem:[#allocation168_spill] sm:$0xff] %v9626_v33  ;;  %12059 = vst [vmem:[#allocation169_spill] sm:$0xff] %v9630_v1  ;;  %v9645_v59 = vld [vmem:[#allocation15 + $0x1f0] sm:$0xff] }
 0x7cd   : > { %3644 = vmatprep.subr.mxu0 %v9620_v57  ;;  %3715 = vmatprep.subr.mxu1 %v9623_v2  ;;  %v9636_v57 = vld [vmem:[#allocation15 + $0x1e8] sm:$0xff]  ;;  %v9639_v2 = vld [vmem:[#allocation15 + $0x1f8] sm:$0xff]  ;;  %12063 = vst [vmem:[#allocation173_spill] sm:$0xff] %v9645_v59 }
 0x7ce   : > { %3645 = vmatpush1.msra.mxu0 %v9626_v33  ;;  %3678 = vmatprep.mubr.f32.mxu0 %v11505_v14  ;;  %12060 = vst [vmem:[#allocation170_spill] sm:$0xff] %v9636_v57  ;;  %12061 = vst [vmem:[#allocation171_spill] sm:$0xff] %v9639_v2  ;;  %v9642_v33 = vld [vmem:[#allocation15 + $0x1e0] sm:$0xff] }
 0x7cf   : > { %3716 = vmatpush1.msra.mxu1 %v9630_v1  ;;  %3749 = vmatprep.mubr.f32.mxu1 %v11505_v14  ;;  %12062 = vst [vmem:[#allocation172_spill] sm:$0xff] %v9642_v33  ;;  %v9648_v1 = vld [vmem:[#allocation15 + $0x1c8] sm:$0xff] }
 0x7d0   : > { %3679 = vmatmul.mubr.f32.vlgmr.msra.gmra.mxu0 %v9434_v61  ;;  %3750 = vmatmul.mubr.f32.vlgmr.msra.gmra.mxu1 %v9434_v61  ;;  %12064 = vst [vmem:[#allocation174_spill] sm:$0xff] %v9648_v1  ;;  %v9651_v61 = vld [vmem:[#allocation15 + $0x1d8] sm:$0xff] }
 0x7d1   : > { %3795 = vmatprep.subr.mxu0 %v9636_v57  ;;  %3866 = vmatprep.subr.mxu1 %v9639_v2  ;;  %12065 = vst [vmem:[#allocation175_spill] sm:$0xff] %v9651_v61  ;;  %v9654_v57 = vld [vmem:[#allocation15 + $0x1c0] sm:$0xff]  ;;  %v9657_v2 = vld [vmem:[#allocation15 + $0x1d0] sm:$0xff] }
 0x7d2   : > { %3796 = vmatpush1.msra.mxu0 %v9642_v33  ;;  %3867 = vmatpush1.msra.mxu1 %v9645_v59  ;;  %12066 = vst [vmem:[#allocation176_spill] sm:$0xff] %v9654_v57  ;;  %12067 = vst [vmem:[#allocation177_spill] sm:$0xff] %v9657_v2  ;;  %v9660_v33 = vld [vmem:[#allocation15 + $0x1a8] sm:$0xff]  ;;  %v9663_v59 = vld [vmem:[#allocation15 + $0x1b8] sm:$0xff] }
 0x7d3   : > { %3797 = vmatprep.subr.mxu0 %v9648_v1  ;;  %3868 = vmatprep.subr.mxu1 %v9651_v61  ;;  %12068 = vst [vmem:[#allocation178_spill] sm:$0xff] %v9660_v33  ;;  %12069 = vst [vmem:[#allocation179_spill] sm:$0xff] %v9663_v59  ;;  %v9666_v1 = vld [vmem:[#allocation15 + $0x1a0] sm:$0xff]  ;;  %v9669_v61 = vld [vmem:[#allocation15 + $0x1b0] sm:$0xff] }
 0x7d4   : > { %3798 = vmatpush1.msra.mxu0 %v9654_v57  ;;  %3869 = vmatpush1.msra.mxu1 %v9657_v2  ;;  %12070 = vst [vmem:[#allocation180_spill] sm:$0xff] %v9666_v1  ;;  %12071 = vst [vmem:[#allocation181_spill] sm:$0xff] %v9669_v61  ;;  %v9672_v57 = vld [vmem:[#allocation15 + $0x188] sm:$0xff]  ;;  %v9675_v2 = vld [vmem:[#allocation15 + $0x198] sm:$0xff] }
 0x7d5   : > { %3799 = vmatprep.subr.mxu0 %v9660_v33  ;;  %3870 = vmatprep.subr.mxu1 %v9663_v59  ;;  %12072 = vst [vmem:[#allocation182_spill] sm:$0xff] %v9672_v57  ;;  %12073 = vst [vmem:[#allocation183_spill] sm:$0xff] %v9675_v2  ;;  %v9678_v33 = vld [vmem:[#allocation15 + $0x180] sm:$0xff]  ;;  %v9681_v59 = vld [vmem:[#allocation15 + $0x190] sm:$0xff] }
 0x7d6   : > { %3800 = vmatpush1.msra.mxu0 %v9666_v1  ;;  %3871 = vmatpush1.msra.mxu1 %v9669_v61  ;;  %v9684_v1 = vld [vmem:[#allocation15 + $0x168] sm:$0xff]  ;;  %v9687_v61 = vld [vmem:[#allocation15 + $0x178] sm:$0xff] }
 0x7d7   : > { %3801 = vmatprep.subr.mxu0 %v9672_v57  ;;  %3872 = vmatprep.subr.mxu1 %v9675_v2  ;;  %v9690_v57 = vld [vmem:[#allocation15 + $0x160] sm:$0xff]  ;;  %v9693_v2 = vld [vmem:[#allocation15 + $0x170] sm:$0xff] }
 0x7d8   : > { %3802 = vmatpush1.msra.mxu0 %v9678_v33  ;;  %3873 = vmatpush1.msra.mxu1 %v9681_v59 }
 0x7d9   : > { %3803 = vmatprep.subr.mxu0 %v9684_v1  ;;  %3874 = vmatprep.subr.mxu1 %v9687_v61 }
 0x7da   : > { %3804 = vmatpush1.msra.mxu0 %v9690_v57  ;;  %3875 = vmatpush1.msra.mxu1 %v9693_v2 }
 0x7db   : > { %3805 = vmatprep.subr.mxu0 %v9086_v62  ;;  %3876 = vmatprep.subr.mxu1 %v9089_v63  ;;  %v12074_v62 = vld [vmem:[#allocation105_spill] sm:$0xff]  ;;  %v12075_v63 = vld [vmem:[#allocation106_spill] sm:$0xff] }
 0x7dc   : > { %3806 = vmatpush1.msra.mxu0 %v9092_v0  ;;  %3877 = vmatpush1.msra.mxu1 %v9095_v52  ;;  %v12076_v0 = vld [vmem:[#allocation104_spill] sm:$0xff] }
 0x7dd   : > { %3807 = vmatprep.subr.mxu0 %v9098_v40  ;;  %3878 = vmatprep.subr.mxu1 %v9101_v38  ;;  %v12077_v52 = vld [vmem:[#allocation32_spill] sm:$0xff]  ;;  %v12078_v40 = vld [vmem:[#allocation33_spill] sm:$0xff]  ;;  %v12079_v38 = vld [vmem:[#allocation34_spill] sm:$0xff] }
 0x7de   : > { %3808 = vmatpush1.msra.mxu0 %v9104_v30  ;;  %3879 = vmatpush1.msra.mxu1 %v9107_v12  ;;  %v12080_v30 = vld [vmem:[#allocation35_spill] sm:$0xff]  ;;  %v12081_v12 = vld [vmem:[#allocation36_spill] sm:$0xff] }
 0x7df   : > { %3809 = vmatprep.subr.mxu0 %v9110_v37  ;;  %3880 = vmatprep.subr.mxu1 %v9113_v15  ;;  %v12082_v37 = vld [vmem:[#allocation37_spill] sm:$0xff]  ;;  %v12083_v15 = vld [vmem:[#allocation38_spill] sm:$0xff] }
 0x7e0   : > { %3810 = vmatpush1.msra.mxu0 %v9116_v17  ;;  %3881 = vmatpush1.msra.mxu1 %v9119_v18  ;;  %v12084_v17 = vld [vmem:[#allocation39_spill] sm:$0xff]  ;;  %v12085_v18 = vld [vmem:[#allocation40_spill] sm:$0xff] }
 0x7e1   : > { %3811 = vmatprep.subr.mxu0 %v9122_v19  ;;  %3882 = vmatprep.subr.mxu1 %v9125_v20  ;;  %v12086_v19 = vld [vmem:[#allocation41_spill] sm:$0xff]  ;;  %v12087_v20 = vld [vmem:[#allocation42_spill] sm:$0xff] }
 0x7e2   : > { %3812 = vmatpush1.msra.mxu0 %v9128_v24  ;;  %3883 = vmatpush1.msra.mxu1 %v9131_v26  ;;  %v12088_v24 = vld [vmem:[#allocation43_spill] sm:$0xff]  ;;  %v12089_v26 = vld [vmem:[#allocation44_spill] sm:$0xff] }
 0x7e3   : > { %3813 = vmatprep.subr.mxu0 %v9134_v27  ;;  %3884 = vmatprep.subr.mxu1 %v9137_v28  ;;  %v12090_v27 = vld [vmem:[#allocation45_spill] sm:$0xff]  ;;  %v12091_v28 = vld [vmem:[#allocation46_spill] sm:$0xff] }
 0x7e4   : > { %3814 = vmatpush1.msra.mxu0 %v9140_v31  ;;  %3885 = vmatpush1.msra.mxu1 %v9143_v32  ;;  %v12092_v31 = vld [vmem:[#allocation47_spill] sm:$0xff]  ;;  %v12093_v32 = vld [vmem:[#allocation48_spill] sm:$0xff] }
 0x7e5   : > { %3815 = vmatprep.subr.mxu0 %v9146_v35  ;;  %3886 = vmatprep.subr.mxu1 %v9149_v36  ;;  %v12094_v35 = vld [vmem:[#allocation49_spill] sm:$0xff]  ;;  %v12095_v36 = vld [vmem:[#allocation50_spill] sm:$0xff] }
 0x7e6   : > { %3816 = vmatpush1.msra.mxu0 %v9152_v6  ;;  %3887 = vmatpush1.msra.mxu1 %v9155_v42  ;;  %v12096_v6 = vld [vmem:[#allocation51_spill] sm:$0xff]  ;;  %v12097_v42 = vld [vmem:[#allocation52_spill] sm:$0xff] }
 0x7e7   : > { %3817 = vmatprep.subr.mxu0 %v9158_v43  ;;  %3888 = vmatprep.subr.mxu1 %v9161_v41  ;;  %v12098_v43 = vld [vmem:[#allocation53_spill] sm:$0xff]  ;;  %v12099_v41 = vld [vmem:[#allocation54_spill] sm:$0xff] }
 0x7e8   : > { %3818 = vmatpush1.msra.mxu0 %v9164_v44  ;;  %3889 = vmatpush1.msra.mxu1 %v9167_v16  ;;  %v12100_v44 = vld [vmem:[#allocation55_spill] sm:$0xff]  ;;  %v12101_v16 = vld [vmem:[#allocation56_spill] sm:$0xff] }
 0x7e9   : > { %3819 = vmatprep.subr.mxu0 %v9170_v3  ;;  %3890 = vmatprep.subr.mxu1 %v9173_v8  ;;  %v12102_v3 = vld [vmem:[#allocation57_spill] sm:$0xff]  ;;  %v12103_v8 = vld [vmem:[#allocation58_spill] sm:$0xff] }
 0x7ea   : > { %3820 = vmatpush1.msra.mxu0 %v9176_v11  ;;  %3891 = vmatpush1.msra.mxu1 %v9179_v9  ;;  %v12104_v11 = vld [vmem:[#allocation59_spill] sm:$0xff]  ;;  %v12105_v9 = vld [vmem:[#allocation60_spill] sm:$0xff] }
 0x7eb   : > { %3821 = vmatprep.subr.mxu0 %v9182_v45  ;;  %3892 = vmatprep.subr.mxu1 %v9185_v46  ;;  %v12106_v45 = vld [vmem:[#allocation61_spill] sm:$0xff]  ;;  %v12107_v46 = vld [vmem:[#allocation62_spill] sm:$0xff] }
 0x7ec   : > { %3822 = vmatpush1.msra.mxu0 %v9188_v47  ;;  %3893 = vmatpush1.msra.mxu1 %v9191_v49  ;;  %v12108_v47 = vld [vmem:[#allocation63_spill] sm:$0xff]  ;;  %v12109_v49 = vld [vmem:[#allocation64_spill] sm:$0xff] }
 0x7ed   : > { %3823 = vmatprep.subr.mxu0 %v9194_v50  ;;  %3894 = vmatprep.subr.mxu1 %v9197_v51  ;;  %v12110_v50 = vld [vmem:[#allocation65_spill] sm:$0xff]  ;;  %v12111_v51 = vld [vmem:[#allocation66_spill] sm:$0xff] }
 0x7ee   : > { %3824 = vmatpush1.msra.mxu0 %v12074_v62  ;;  %3895 = vmatpush1.msra.mxu1 %v12075_v63  ;;  %v12113_v62 = vld [vmem:[#allocation68_spill] sm:$0xff]  ;;  %v12114_v63 = vld [vmem:[#allocation69_spill] sm:$0xff] }
 0x7ef   : > { %3825 = vmatprep.subr.mxu0 %v12076_v0  ;;  %3896 = vmatprep.subr.mxu1 %v12077_v52  ;;  %v12115_v0 = vld [vmem:[#allocation70_spill] sm:$0xff]  ;;  %v12116_v52 = vld [vmem:[#allocation71_spill] sm:$0xff] }
 0x7f0   : > { %3826 = vmatpush1.msra.mxu0 %v12078_v40  ;;  %3859 = vmatprep.mubr.f32.mxu0 %v11505_v14  ;;  %v12117_v40 = vld [vmem:[#allocation72_spill] sm:$0xff] }
 0x7f1   : > { %3897 = vmatpush1.msra.mxu1 %v12079_v38  ;;  %3930 = vmatprep.mubr.f32.mxu1 %v11505_v14  ;;  %v12118_v38 = vld [vmem:[#allocation73_spill] sm:$0xff] }
 0x7f2   : > { %3860 = vmatmul.mubr.f32.vlgmr.msra.gmra.mxu0 %v9442_v48  ;;  %3931 = vmatmul.mubr.f32.vlgmr.msra.gmra.mxu1 %v9442_v48  ;;  %v12112_v48 = vld [vmem:[#allocation67_spill] sm:$0xff] }
 0x7f3   : > { %3965 = vmatprep.subr.mxu0 %v12080_v30  ;;  %4036 = vmatprep.subr.mxu1 %v12081_v12  ;;  %v12119_v30 = vld [vmem:[#allocation74_spill] sm:$0xff]  ;;  %v12120_v12 = vld [vmem:[#allocation75_spill] sm:$0xff] }
 0x7f4   : > { %3966 = vmatpush1.msra.mxu0 %v12082_v37  ;;  %4037 = vmatpush1.msra.mxu1 %v12083_v15  ;;  %v12121_v37 = vld [vmem:[#allocation76_spill] sm:$0xff]  ;;  %v12122_v15 = vld [vmem:[#allocation77_spill] sm:$0xff] }
 0x7f5   : > { %3967 = vmatprep.subr.mxu0 %v12084_v17  ;;  %4038 = vmatprep.subr.mxu1 %v12085_v18  ;;  %v12123_v17 = vld [vmem:[#allocation78_spill] sm:$0xff]  ;;  %v12124_v18 = vld [vmem:[#allocation79_spill] sm:$0xff] }
 0x7f6   : > { %3968 = vmatpush1.msra.mxu0 %v12086_v19  ;;  %4039 = vmatpush1.msra.mxu1 %v12087_v20  ;;  %v12125_v19 = vld [vmem:[#allocation80_spill] sm:$0xff]  ;;  %v12126_v20 = vld [vmem:[#allocation81_spill] sm:$0xff] }
 0x7f7   : > { %3969 = vmatprep.subr.mxu0 %v12088_v24  ;;  %4040 = vmatprep.subr.mxu1 %v12089_v26  ;;  %v12127_v24 = vld [vmem:[#allocation82_spill] sm:$0xff]  ;;  %v12128_v26 = vld [vmem:[#allocation83_spill] sm:$0xff] }
 0x7f8   : > { %3970 = vmatpush1.msra.mxu0 %v12090_v27  ;;  %4041 = vmatpush1.msra.mxu1 %v12091_v28  ;;  %v12129_v27 = vld [vmem:[#allocation84_spill] sm:$0xff]  ;;  %v12130_v28 = vld [vmem:[#allocation85_spill] sm:$0xff] }
 0x7f9   : > { %3971 = vmatprep.subr.mxu0 %v12092_v31  ;;  %4042 = vmatprep.subr.mxu1 %v12093_v32  ;;  %v12131_v31 = vld [vmem:[#allocation86_spill] sm:$0xff]  ;;  %v12132_v32 = vld [vmem:[#allocation87_spill] sm:$0xff] }
 0x7fa   : > { %3972 = vmatpush1.msra.mxu0 %v12094_v35  ;;  %4043 = vmatpush1.msra.mxu1 %v12095_v36  ;;  %v12133_v35 = vld [vmem:[#allocation88_spill] sm:$0xff]  ;;  %v12134_v36 = vld [vmem:[#allocation89_spill] sm:$0xff] }
 0x7fb   : > { %3973 = vmatprep.subr.mxu0 %v12096_v6  ;;  %4044 = vmatprep.subr.mxu1 %v12097_v42  ;;  %v12135_v6 = vld [vmem:[#allocation90_spill] sm:$0xff]  ;;  %v12136_v42 = vld [vmem:[#allocation91_spill] sm:$0xff] }
 0x7fc   : > { %3974 = vmatpush1.msra.mxu0 %v12098_v43  ;;  %4045 = vmatpush1.msra.mxu1 %v12099_v41  ;;  %v12137_v43 = vld [vmem:[#allocation92_spill] sm:$0xff]  ;;  %v12138_v41 = vld [vmem:[#allocation93_spill] sm:$0xff] }
 0x7fd   : > { %3975 = vmatprep.subr.mxu0 %v12100_v44  ;;  %4046 = vmatprep.subr.mxu1 %v12101_v16  ;;  %v12139_v44 = vld [vmem:[#allocation94_spill] sm:$0xff]  ;;  %v12140_v16 = vld [vmem:[#allocation95_spill] sm:$0xff] }
 0x7fe   : > { %3976 = vmatpush1.msra.mxu0 %v12102_v3  ;;  %4047 = vmatpush1.msra.mxu1 %v12103_v8  ;;  %v12141_v3 = vld [vmem:[#allocation96_spill] sm:$0xff]  ;;  %v12142_v8 = vld [vmem:[#allocation97_spill] sm:$0xff] }
 0x7ff   : > { %3977 = vmatprep.subr.mxu0 %v12104_v11  ;;  %4048 = vmatprep.subr.mxu1 %v12105_v9  ;;  %v12143_v11 = vld [vmem:[#allocation98_spill] sm:$0xff]  ;;  %v12144_v9 = vld [vmem:[#allocation99_spill] sm:$0xff] }
 0x800   : > { %3978 = vmatpush1.msra.mxu0 %v12106_v45  ;;  %4049 = vmatpush1.msra.mxu1 %v12107_v46  ;;  %v12145_v45 = vld [vmem:[#allocation101_spill] sm:$0xff] }
 0x801   : > { %3979 = vmatprep.subr.mxu0 %v12108_v47  ;;  %4050 = vmatprep.subr.mxu1 %v12109_v49  ;;  %v12146_v49 = vld [vmem:[#allocation31_spill] sm:$0xff] }
 0x802   : > { %3980 = vmatpush1.msra.mxu0 %v12110_v50  ;;  %4051 = vmatpush1.msra.mxu1 %v12111_v51 }
 0x803   : > { %3981 = vmatprep.subr.mxu0 %v12112_v48  ;;  %4052 = vmatprep.subr.mxu1 %v12113_v62 }
 0x804   : > { %3982 = vmatpush1.msra.mxu0 %v12114_v63  ;;  %4053 = vmatpush1.msra.mxu1 %v12115_v0 }
 0x805   : > { %3983 = vmatprep.subr.mxu0 %v12116_v52  ;;  %4054 = vmatprep.subr.mxu1 %v12117_v40 }
 0x806   : > { %3984 = vmatpush1.msra.mxu0 %v12118_v38  ;;  %4055 = vmatpush1.msra.mxu1 %v12119_v30 }
 0x807   : > { %3985 = vmatprep.subr.mxu0 %v12120_v12  ;;  %4056 = vmatprep.subr.mxu1 %v12121_v37 }
 0x808   : > { %3986 = vmatpush1.msra.mxu0 %v12122_v15  ;;  %4057 = vmatpush1.msra.mxu1 %v12123_v17 }
 0x809   : > { %3987 = vmatprep.subr.mxu0 %v12124_v18  ;;  %4058 = vmatprep.subr.mxu1 %v12125_v19 }
 0x80a   : > { %3988 = vmatpush1.msra.mxu0 %v12126_v20  ;;  %4059 = vmatpush1.msra.mxu1 %v12127_v24 }
 0x80b   : > { %3989 = vmatprep.subr.mxu0 %v12128_v26  ;;  %4060 = vmatprep.subr.mxu1 %v12129_v27 }
 0x80c   : > { %3990 = vmatpush1.msra.mxu0 %v12130_v28  ;;  %4061 = vmatpush1.msra.mxu1 %v12131_v31 }
 0x80d   : > { %3991 = vmatprep.subr.mxu0 %v12132_v32  ;;  %4062 = vmatprep.subr.mxu1 %v12133_v35 }
 0x80e   : > { %3992 = vmatpush1.msra.mxu0 %v12134_v36  ;;  %4063 = vmatpush1.msra.mxu1 %v12135_v6  ;;  %v12147_v6 = vld [vmem:[#allocation115_spill] sm:$0xff] }
 0x80f   : > { %3993 = vmatprep.subr.mxu0 %v12136_v42  ;;  %4064 = vmatprep.subr.mxu1 %v12137_v43 }
 0x810   : > { %3994 = vmatpush1.msra.mxu0 %v12138_v41  ;;  %4065 = vmatpush1.msra.mxu1 %v12139_v44 }
 0x811   : > { %3995 = vmatprep.subr.mxu0 %v12140_v16  ;;  %4066 = vmatprep.subr.mxu1 %v12141_v3 }
 0x812   : > { %3996 = vmatpush1.msra.mxu0 %v12142_v8  ;;  %4067 = vmatpush1.msra.mxu1 %v12143_v11  ;;  %v12148_v8 = vld [vmem:[#allocation117_spill] sm:$0xff] }
 0x813   : > { %4029 = vmatprep.mubr.f32.mxu0 %v11505_v14  ;;  %4100 = vmatprep.mubr.f32.mxu1 %v11505_v14 }
 0x814   : > { %4111 = vmatprep.subr.mxu0 %v12144_v9  ;;  %4182 = vmatprep.subr.mxu1 %v12145_v45 }
 0x86f   : > { %v3534_v46 = vpop.f32.mrf.mxu0  ;;  %v3605_v48 = vpop.f32.mrf.mxu1 }
 0x870   : > { %v3610_v50 = vadd.f32 %v3534_v46, %v12146_v49  ;;  %v3612_v17 = vadd.f32 %v3605_v48, %v8141_v23 }
 0x871   : > { %v3536_v47 = vpop.f32.mrf.mxu0  ;;  %v3607_v38 = vpop.f32.mrf.mxu1 }
 0x872   : > { %v3611_v62 = vadd.f32 %v3536_v47, %v8135_v53  ;;  %v3613_v15 = vadd.f32 %v3607_v38, %v8139_v22 }
 0x890   : > { %v3680_v51 = vpop.f32.mrf.mxu0  ;;  %v3751_v12 = vpop.f32.mrf.mxu1 }
 0x891   : > { %v3756_v63 = vadd.f32 %v3680_v51, %v3610_v50  ;;  %v3758_v19 = vadd.f32 %v3751_v12, %v3612_v17  ;;  %v12149_v51 = vld [vmem:[#allocation118_spill] sm:$0xff] }
 0x892   : > { %v3682_v0 = vpop.f32.mrf.mxu0  ;;  %v3753_v37 = vpop.f32.mrf.mxu1 }
 0x893   : > { %v5565_v52 = vmul.f32 -1.442695, %v3756_v63  ;;  %v3757_v40 = vadd.f32 %v3682_v0, %v3611_v62  ;;  %v3759_v18 = vadd.f32 %v3753_v37, %v3613_v15  ;;  %v12150_v62 = vld [vmem:[#allocation116_spill] sm:$0xff] }
 0x895   : > { %5894 = vpow2.f32 %v5565_v52  ;;  %v5566_v30 = vmul.f32 -1.442695, %v3757_v40  ;;  %v5567_v24 = vmul.f32 -1.442695, %v3759_v18 }
 0x897   : > { %5896 = vpow2.f32 %v5566_v30 }
 0x898   : > { %5898 = vtanh.f32 %v3758_v19 }
 0x8a2   : > { %v5895_v20 = vpop.eup %5894 }
 0x8a3   : > { %v3763_v26 = vadd.f32 1.0, %v5895_v20 }
 0x8a4   : > { %v5897_v27 = vpop.eup %5896 }
 0x8a5   : > { %5900 = vrcp.f32 %v3763_v26  ;;  %v3769_v28 = vadd.f32 1.0, %v5897_v27  ;;  %v5899_v31 = vpop.eup %5898 }
 0x8a6   : > { %5902 = vpow2.f32 %v5567_v24 }
 0x8a7   : > { %5904 = vrcp.f32 %v3769_v28 }
 0x8b2   : > { %v5901_v32 = vpop.eup %5900  ;;  %v3861_v35 = vpop.f32.mrf.mxu0 }
 0x8b3   : > { %v5903_v36 = vpop.eup %5902  ;;  %v3937_v42 = vadd.f32 %v3861_v35, %v12147_v6  ;;  %v3780_v44 = vmul.f32 %v5901_v32, %v5899_v31  ;;  %v3932_v46 = vpop.f32.mrf.mxu1  ;;  %v12164_v35 = vld [vmem:[#allocation134_spill] sm:$0xff]  ;;  %v12166_v6 = vld [vmem:[#allocation136_spill] sm:$0xff] }
 0x8b4   : > { %v5905_v43 = vpop.eup %5904  ;;  %v3863_v41 = vpop.f32.mrf.mxu0  ;;  %v3776_v9 = vadd.f32 1.0, %v5903_v36  ;;  %v3939_v63 = vadd.f32 %v3932_v46, %v12150_v62  ;;  %v12165_v36 = vld [vmem:[#allocation135_spill] sm:$0xff]  ;;  %v12176_v46 = vld [vmem:[#allocation146_spill] sm:$0xff] }
 0x8b5   : > { %v3779_v16 = vmul.f32 %v5905_v43, %v9429_v39  ;;  %v5569_v3 = vmul.f32 -1.442695, %v3937_v42  ;;  %v3938_v11 = vadd.f32 %v3863_v41, %v12148_v8  ;;  %v3934_v50 = vpop.f32.mrf.mxu1  ;;  %v12167_v42 = vld [vmem:[#allocation137_spill] sm:$0xff]  ;;  %v12168_v43 = vld [vmem:[#allocation138_spill] sm:$0xff]  ;;  %v12169_v41 = vld [vmem:[#allocation139_spill] sm:$0xff] }
 0x8b6   : > { %v3940_v48 = vadd.f32 %v3934_v50, %v12149_v51  ;;  %v12173_v8 = vld [vmem:[#allocation143_spill] sm:$0xff]  ;;  %v12178_v50 = vld [vmem:[#allocation148_spill] sm:$0xff]  ;;  %v12179_v51 = vld [vmem:[#allocation149_spill] sm:$0xff] }
 0x8b7   : > { %v9819_v45 = vadd.f32 %v3780_v44, %v3779_v16  ;;  %5906 = vpow2.f32 %v5569_v3  ;;  %v5570_v47 = vmul.f32 -1.442695, %v3938_v11  ;;  %v12170_v44 = vld [vmem:[#allocation140_spill] sm:$0xff]  ;;  %v12171_v16 = vld [vmem:[#allocation141_spill] sm:$0xff]  ;;  %v12172_v3 = vld [vmem:[#allocation142_spill] sm:$0xff] }
 0x8b8   : > { %v5571_v39 = vmul.f32 -1.442695, %v3940_v48  ;;  %v12174_v11 = vld [vmem:[#allocation144_spill] sm:$0xff]  ;;  %v12180_v48 = vld [vmem:[#allocation150_spill] sm:$0xff]  ;;  %v12181_v62 = vld [vmem:[#allocation151_spill] sm:$0xff] }
 0x8b9   : > { %5908 = vpow2.f32 %v5570_v47  ;;  %v12177_v47 = vld [vmem:[#allocation147_spill] sm:$0xff] }
 0x8ba   : > { %5910 = vrcp.f32 %v3776_v9  ;;  %v12175_v9 = vld [vmem:[#allocation145_spill] sm:$0xff] }
 0x8bb   : > { %5912 = vtanh.f32 %v9819_v45 }
 0x8bc   : > { %5914 = vtanh.f32 %v3939_v63  ;;  %v12182_v63 = vld [vmem:[#allocation152_spill] sm:$0xff] }
 0x8bd   : > { %5916 = vpow2.f32 %v5571_v39  ;;  %v12183_v39 = vld [vmem:[#allocation153_spill] sm:$0xff] }
 0x8c4   : > { %v5907_v0 = vpop.eup %5906 }
 0x8c5   : > { %v3944_v52 = vadd.f32 1.0, %v5907_v0  ;;  %v12184_v0 = vld [vmem:[#allocation154_spill] sm:$0xff] }
 0x8c6   : > { %v5909_v40 = vpop.eup %5908 }
 0x8c7   : > { %v5911_v38 = vpop.eup %5910  ;;  %5918 = vrcp.f32 %v3944_v52  ;;  %v3950_v30 = vadd.f32 1.0, %v5909_v40  ;;  %v12185_v52 = vld [vmem:[#allocation155_spill] sm:$0xff]  ;;  %v12186_v40 = vld [vmem:[#allocation156_spill] sm:$0xff] }
 0x8c8   : > { %v5913_v12 = vpop.eup %5912 }
 0x8c9   : > { %5920 = vrcp.f32 %v3950_v30  ;;  %v9824_v37 = vmul.f32 %v5913_v12, %v5911_v38  ;;  %v5915_v15 = vpop.eup %5914  ;;  %v12187_v38 = vld [vmem:[#allocation157_spill] sm:$0xff]  ;;  %v12188_v30 = vld [vmem:[#allocation158_spill] sm:$0xff]  ;;  %v12189_v12 = vld [vmem:[#allocation159_spill] sm:$0xff] }
 0x8ca   : > { %v5917_v17 = vpop.eup %5916 }
 0x8cb   : > { %5568 = vst [vmem:[%s7290_s4 + $0x20] sm:$0xff] %v9824_v37  ;;  %v3957_v24 = vadd.f32 1.0, %v5917_v17  ;;  %v12191_v17 = vld [vmem:[#allocation161_spill] sm:$0xff] }
 0x8cd   : > { %5922 = vrcp.f32 %v3957_v24  ;;  %v12195_v24 = vld [vmem:[#allocation165_spill] sm:$0xff] }
 0x8d4   : > { %v5919_v18 = vpop.eup %5918 }
 0x8d5   : > { %v3961_v19 = vmul.f32 %v5919_v18, %v5915_v15  ;;  %v12190_v15 = vld [vmem:[#allocation160_spill] sm:$0xff]  ;;  %v12192_v18 = vld [vmem:[#allocation162_spill] sm:$0xff] }
 0x8d6   : > { %v5921_v20 = vpop.eup %5920 }
 0x8d7   : > { %v3960_v26 = vmul.f32 %v5921_v20, %v9439_v4  ;;  %v12151_v4 = vld [vmem:[#allocation102_spill] sm:$0xff]  ;;  %v12194_v20 = vld [vmem:[#allocation164_spill] sm:$0xff] }
 0x8d9   : > { %v9829_v27 = vadd.f32 %v3961_v19, %v3960_v26  ;;  %v12193_v19 = vld [vmem:[#allocation163_spill] sm:$0xff]  ;;  %v12196_v26 = vld [vmem:[#allocation166_spill] sm:$0xff] }
 0x8da   : > { %v5923_v28 = vpop.eup %5922 }
 0x8db   : > { %5924 = vtanh.f32 %v9829_v27 }
 0x8e8   : > { %v5925_v31 = vpop.eup %5924 }
 0x8e9   : > { %v9832_v32 = vmul.f32 %v5925_v31, %v5923_v28  ;;  %v12197_v28 = vld [vmem:[#allocation167_spill] sm:$0xff]  ;;  %v12198_v31 = vld [vmem:[#allocation168_spill] sm:$0xff] }
 0x8eb   : > { %4030 = vmatmul.mubr.f32.vlgmr.msra.gmra.mxu0 %v9832_v32  ;;  %4101 = vmatmul.mubr.f32.vlgmr.msra.gmra.mxu1 %v9832_v32 }
 0x8ec   : > { %4112 = vmatpush1.msra.mxu0 %v9446_v34  ;;  %4183 = vmatpush1.msra.mxu1 %v9449_v29  ;;  %v12152_v34 = vld [vmem:[#allocation100_spill] sm:$0xff]  ;;  %v12153_v29 = vld [vmem:[#allocation127_spill] sm:$0xff] }
 0x8ed   : > { %4113 = vmatprep.subr.mxu0 %v9452_v56  ;;  %4184 = vmatprep.subr.mxu1 %v9455_v13  ;;  %v12154_v56 = vld [vmem:[#allocation107_spill] sm:$0xff]  ;;  %v12155_v13 = vld [vmem:[#allocation109_spill] sm:$0xff] }
 0x8ee   : > { %4114 = vmatpush1.msra.mxu0 %v9458_v58  ;;  %4185 = vmatpush1.msra.mxu1 %v9461_v7  ;;  %v12156_v58 = vld [vmem:[#allocation110_spill] sm:$0xff]  ;;  %v12157_v7 = vld [vmem:[#allocation108_spill] sm:$0xff] }
 0x8ef   : > { %4115 = vmatprep.subr.mxu0 %v9464_v25  ;;  %4186 = vmatprep.subr.mxu1 %v9467_v54  ;;  %v12158_v25 = vld [vmem:[#allocation128_spill] sm:$0xff]  ;;  %v12159_v54 = vld [vmem:[#allocation129_spill] sm:$0xff] }
 0x8f0   : > { %4116 = vmatpush1.msra.mxu0 %v9470_v5  ;;  %4187 = vmatpush1.msra.mxu1 %v9473_v21  ;;  %v12160_v5 = vld [vmem:[#allocation130_spill] sm:$0xff]  ;;  %v12161_v21 = vld [vmem:[#allocation131_spill] sm:$0xff] }
 0x8f1   : > { %4117 = vmatprep.subr.mxu0 %v9476_v10  ;;  %4188 = vmatprep.subr.mxu1 %v9479_v60  ;;  %v12162_v10 = vld [vmem:[#allocation132_spill] sm:$0xff]  ;;  %v12163_v60 = vld [vmem:[#allocation133_spill] sm:$0xff] }
 0x8f2   : > { %4118 = vmatpush1.msra.mxu0 %v12151_v4  ;;  %4189 = vmatpush1.msra.mxu1 %v12152_v34  ;;  %v12199_v4 = vld [vmem:[#allocation169_spill] sm:$0xff]  ;;  %v12200_v34 = vld [vmem:[#allocation170_spill] sm:$0xff] }
 0x8f3   : > { %4119 = vmatprep.subr.mxu0 %v12153_v29  ;;  %4190 = vmatprep.subr.mxu1 %v12154_v56  ;;  %v12202_v29 = vld [vmem:[#allocation172_spill] sm:$0xff]  ;;  %v12203_v56 = vld [vmem:[#allocation173_spill] sm:$0xff] }
 0x8f4   : > { %4120 = vmatpush1.msra.mxu0 %v12155_v13  ;;  %4191 = vmatpush1.msra.mxu1 %v12156_v58  ;;  %v12204_v13 = vld [vmem:[#allocation174_spill] sm:$0xff]  ;;  %v12205_v58 = vld [vmem:[#allocation175_spill] sm:$0xff] }
 0x8f5   : > { %4121 = vmatprep.subr.mxu0 %v12157_v7  ;;  %4192 = vmatprep.subr.mxu1 %v12158_v25  ;;  %v12206_v7 = vld [vmem:[#allocation176_spill] sm:$0xff]  ;;  %v12207_v25 = vld [vmem:[#allocation177_spill] sm:$0xff] }
 0x8f6   : > { %4122 = vmatpush1.msra.mxu0 %v12159_v54  ;;  %4193 = vmatpush1.msra.mxu1 %v12160_v5  ;;  %v12208_v54 = vld [vmem:[#allocation178_spill] sm:$0xff]  ;;  %v12209_v5 = vld [vmem:[#allocation179_spill] sm:$0xff] }
 0x8f7   : > { %4123 = vmatprep.subr.mxu0 %v12161_v21  ;;  %4194 = vmatprep.subr.mxu1 %v12162_v10  ;;  %v12211_v21 = vld [vmem:[#allocation181_spill] sm:$0xff]  ;;  %v12212_v10 = vld [vmem:[#allocation182_spill] sm:$0xff] }
 0x8f8   : > { %4124 = vmatpush1.msra.mxu0 %v12163_v60  ;;  %4195 = vmatpush1.msra.mxu1 %v12164_v35  ;;  %v12213_v60 = vld [vmem:[#allocation183_spill] sm:$0xff]  ;;  %v9922_v35 = vld [vmem:[#allocation15 + $0x148] sm:$0xff] }
 0x8f9   : > { %4125 = vmatprep.subr.mxu0 %v12165_v36  ;;  %4196 = vmatprep.subr.mxu1 %v12166_v6  ;;  %v9925_v36 = vld [vmem:[#allocation15 + $0x158] sm:$0xff]  ;;  %v9928_v6 = vld [vmem:[#allocation15 + $0x140] sm:$0xff] }
 0x8fa   : > { %4126 = vmatpush1.msra.mxu0 %v12167_v42  ;;  %4197 = vmatpush1.msra.mxu1 %v12168_v43  ;;  %v9949_v42 = vld [vmem:[#allocation15 + $0x118] sm:$0xff]  ;;  %v9952_v43 = vld [vmem:[#allocation15 + $0x100] sm:$0xff] }
 0x8fb   : > { %4127 = vmatprep.subr.mxu0 %v12169_v41  ;;  %4198 = vmatprep.subr.mxu1 %v12170_v44  ;;  %v9955_v41 = vld [vmem:[#allocation15 + $0x110] sm:$0xff]  ;;  %v9958_v44 = vld [vmem:[#allocation15 + $0xe8] sm:$0xff] }
 0x8fc   : > { %4128 = vmatpush1.msra.mxu0 %v12171_v16  ;;  %4199 = vmatpush1.msra.mxu1 %v12172_v3  ;;  %v9961_v16 = vld [vmem:[#allocation15 + $0xf8] sm:$0xff]  ;;  %v9964_v3 = vld [vmem:[#allocation15 + $0xe0] sm:$0xff] }
 0x8fd   : > { %4129 = vmatprep.subr.mxu0 %v12173_v8  ;;  %4200 = vmatprep.subr.mxu1 %v12174_v11  ;;  %v9967_v8 = vld [vmem:[#allocation15 + $0xf0] sm:$0xff]  ;;  %v9970_v11 = vld [vmem:[#allocation15 + $0xc8] sm:$0xff] }
 0x8fe   : > { %4130 = vmatpush1.msra.mxu0 %v12175_v9  ;;  %4201 = vmatpush1.msra.mxu1 %v12176_v46  ;;  %v9973_v9 = vld [vmem:[#allocation15 + $0xd8] sm:$0xff]  ;;  %v9976_v46 = vld [vmem:[#allocation15 + $0xc0] sm:$0xff] }
 0x8ff   : > { %4131 = vmatprep.subr.mxu0 %v12177_v47  ;;  %4202 = vmatprep.subr.mxu1 %v12178_v50  ;;  %v9979_v47 = vld [vmem:[#allocation15 + $0xd0] sm:$0xff]  ;;  %v9982_v50 = vld [vmem:[#allocation15 + $0xa8] sm:$0xff] }
 0x900   : > { %4132 = vmatpush1.msra.mxu0 %v12179_v51  ;;  %4203 = vmatpush1.msra.mxu1 %v12180_v48  ;;  %v9985_v51 = vld [vmem:[#allocation15 + $0xb8] sm:$0xff]  ;;  %v9988_v48 = vld [vmem:[#allocation15 + $0xa0] sm:$0xff] }
 0x901   : > { %4133 = vmatprep.subr.mxu0 %v12181_v62  ;;  %4204 = vmatprep.subr.mxu1 %v12182_v63  ;;  %v9991_v62 = vld [vmem:[#allocation15 + $0xb0] sm:$0xff]  ;;  %v9994_v63 = vld [vmem:[#allocation15 + $0x88] sm:$0xff] }
 0x902   : > { %4134 = vmatpush1.msra.mxu0 %v12183_v39  ;;  %4205 = vmatpush1.msra.mxu1 %v12184_v0  ;;  %v9997_v39 = vld [vmem:[#allocation15 + $0x98] sm:$0xff]  ;;  %v10000_v0 = vld [vmem:[#allocation15 + $0x80] sm:$0xff] }
 0x903   : > { %4135 = vmatprep.subr.mxu0 %v12185_v52  ;;  %4206 = vmatprep.subr.mxu1 %v12186_v40  ;;  %v10003_v52 = vld [vmem:[#allocation15 + $0x90] sm:$0xff]  ;;  %v10006_v40 = vld [vmem:[#allocation15 + $0x68] sm:$0xff] }
 0x904   : > { %4136 = vmatpush1.msra.mxu0 %v12187_v38  ;;  %4207 = vmatpush1.msra.mxu1 %v12188_v30  ;;  %v10009_v38 = vld [vmem:[#allocation15 + $0x78] sm:$0xff]  ;;  %v10012_v30 = vld [vmem:[#allocation15 + $0x60] sm:$0xff] }
 0x905   : > { %4137 = vmatprep.subr.mxu0 %v12189_v12  ;;  %4208 = vmatprep.subr.mxu1 %v12190_v15  ;;  %v10015_v12 = vld [vmem:[#allocation15 + $0x70] sm:$0xff]  ;;  %v10018_v15 = vld [vmem:[#allocation15 + $0x48] sm:$0xff] }
 0x906   : > { %4138 = vmatpush1.msra.mxu0 %v12191_v17  ;;  %4209 = vmatpush1.msra.mxu1 %v12192_v18  ;;  %v10021_v17 = vld [vmem:[#allocation15 + $0x58] sm:$0xff]  ;;  %v10024_v18 = vld [vmem:[#allocation15 + $0x40] sm:$0xff] }
 0x907   : > { %4139 = vmatprep.subr.mxu0 %v12193_v19  ;;  %4210 = vmatprep.subr.mxu1 %v12194_v20  ;;  %v10027_v19 = vld [vmem:[#allocation15 + $0x50] sm:$0xff]  ;;  %v10030_v20 = vld [vmem:[#allocation15 + $0x28] sm:$0xff] }
 0x908   : > { %4140 = vmatpush1.msra.mxu0 %v9614_v55  ;;  %4211 = vmatpush1.msra.mxu1 %v12195_v24  ;;  %v12201_v55 = vld [vmem:[#allocation171_spill] sm:$0xff]  ;;  %v10033_v24 = vld [vmem:[#allocation15 + $0x38] sm:$0xff] }
 0x909   : > { %4141 = vmatprep.subr.mxu0 %v12196_v26  ;;  %4212 = vmatprep.subr.mxu1 %v12197_v28  ;;  %v10036_v26 = vld [vmem:[#allocation15 + $0x20] sm:$0xff]  ;;  %v10039_v28 = vld [vmem:[#allocation15 + $0x30] sm:$0xff] }
 0x90a   : > { %4142 = vmatpush1.msra.mxu0 %v12198_v31  ;;  %4175 = vmatprep.mubr.f32.mxu0 %v11505_v14  ;;  %12214 = vst [vmem:[#allocation184_spill] sm:$0xff] %v10036_v26  ;;  %12215 = vst [vmem:[#allocation185_spill] sm:$0xff] %v10039_v28  ;;  %v10042_v31 = vld [vmem:[#allocation15 + $0x8] sm:$0xff] }
 0x90b   : > { %4213 = vmatpush1.msra.mxu1 %v12199_v4  ;;  %4246 = vmatprep.mubr.f32.mxu1 %v11505_v14  ;;  %12216 = vst [vmem:[#allocation186_spill] sm:$0xff] %v10042_v31  ;;  %v10045_v4 = vld [vmem:[#allocation15 + $0x18] sm:$0xff] }
 0x90c   : > { %4176 = vmatmul.mubr.f32.vlgmr.msra.gmra.mxu0 %v9824_v37  ;;  %4247 = vmatmul.mubr.f32.vlgmr.msra.gmra.mxu1 %v9824_v37  ;;  %v12210_v37 = vld [vmem:[#allocation180_spill] sm:$0xff]  ;;  %12217 = vst [vmem:[#allocation187_spill] sm:$0xff] %v10045_v4 }
 0x90d   : > { %4292 = vmatprep.subr.mxu0 %v12200_v34  ;;  %4363 = vmatprep.subr.mxu1 %v12201_v55  ;;  %v10048_v34 = vld [vmem:[#allocation15] sm:$0xff]  ;;  %v10052_v55 = vld [vmem:[#allocation15 + $0x10] sm:$0xff] }
 0x90e   : > { %4293 = vmatpush1.msra.mxu0 %v12202_v29  ;;  %4364 = vmatpush1.msra.mxu1 %v12203_v56  ;;  %12218 = vst [vmem:[#allocation188_spill] sm:$0xff] %v10048_v34  ;;  %12219 = vst [vmem:[#allocation189_spill] sm:$0xff] %v10052_v55  ;;  %v10058_v29 = vld [vmem:[#allocation16 + $0x1e8] sm:$0xff]  ;;  %v10061_v56 = vld [vmem:[#allocation16 + $0x1f8] sm:$0xff] }
 0x90f   : > { %4294 = vmatprep.subr.mxu0 %v12204_v13  ;;  %4365 = vmatprep.subr.mxu1 %v12205_v58  ;;  %12220 = vst [vmem:[#allocation103_spill] sm:$0xff] %v10058_v29  ;;  %12221 = vst [vmem:[#allocation111_spill] sm:$0xff] %v10061_v56  ;;  %v10064_v13 = vld [vmem:[#allocation16 + $0x1e0] sm:$0xff]  ;;  %v10067_v58 = vld [vmem:[#allocation16 + $0x1f0] sm:$0xff] }
 0x910   : > { %4295 = vmatpush1.msra.mxu0 %v12206_v7  ;;  %4366 = vmatpush1.msra.mxu1 %v12207_v25  ;;  %12222 = vst [vmem:[#allocation113_spill] sm:$0xff] %v10064_v13  ;;  %12223 = vst [vmem:[#allocation114_spill] sm:$0xff] %v10067_v58  ;;  %v10070_v7 = vld [vmem:[#allocation16 + $0x1c8] sm:$0xff]  ;;  %v10076_v25 = vld [vmem:[#allocation16 + $0x1c0] sm:$0xff] }
 0x911   : > { %4296 = vmatprep.subr.mxu0 %v12208_v54  ;;  %4367 = vmatprep.subr.mxu1 %v12209_v5  ;;  %12224 = vst [vmem:[#allocation112_spill] sm:$0xff] %v10070_v7  ;;  %12226 = vst [vmem:[#allocation106_spill] sm:$0xff] %v10076_v25  ;;  %v10079_v54 = vld [vmem:[#allocation16 + $0x1d0] sm:$0xff]  ;;  %v10082_v5 = vld [vmem:[#allocation16 + $0x1a8] sm:$0xff] }
 0x912   : > { %4297 = vmatpush1.msra.mxu0 %v12210_v37  ;;  %4368 = vmatpush1.msra.mxu1 %v12211_v21  ;;  %12227 = vst [vmem:[#allocation104_spill] sm:$0xff] %v10079_v54  ;;  %12228 = vst [vmem:[#allocation32_spill] sm:$0xff] %v10082_v5  ;;  %v10085_v37 = vld [vmem:[#allocation16 + $0x1b8] sm:$0xff]  ;;  %v10088_v21 = vld [vmem:[#allocation16 + $0x1a0] sm:$0xff] }
 0x913   : > { %4298 = vmatprep.subr.mxu0 %v12212_v10  ;;  %4369 = vmatprep.subr.mxu1 %v12213_v60  ;;  %12229 = vst [vmem:[#allocation33_spill] sm:$0xff] %v10085_v37  ;;  %12230 = vst [vmem:[#allocation34_spill] sm:$0xff] %v10088_v21  ;;  %v10091_v10 = vld [vmem:[#allocation16 + $0x1b0] sm:$0xff]  ;;  %v10094_v60 = vld [vmem:[#allocation16 + $0x188] sm:$0xff] }
 0x914   : > { %4299 = vmatpush1.msra.mxu0 %v9678_v33  ;;  %4370 = vmatpush1.msra.mxu1 %v9681_v59  ;;  %v9931_v33 = vld [vmem:[#allocation15 + $0x150] sm:$0xff]  ;;  %v9937_v59 = vld [vmem:[#allocation15 + $0x138] sm:$0xff]  ;;  %12231 = vst [vmem:[#allocation35_spill] sm:$0xff] %v10091_v10  ;;  %12232 = vst [vmem:[#allocation36_spill] sm:$0xff] %v10094_v60 }
 0x915   : > { %4300 = vmatprep.subr.mxu0 %v9684_v1  ;;  %4371 = vmatprep.subr.mxu1 %v9687_v61  ;;  %v9934_v1 = vld [vmem:[#allocation15 + $0x128] sm:$0xff] }
 0x916   : > { %4301 = vmatpush1.msra.mxu0 %v9690_v57  ;;  %4372 = vmatpush1.msra.mxu1 %v9693_v2  ;;  %v9940_v57 = vld [vmem:[#allocation15 + $0x120] sm:$0xff]  ;;  %v9943_v2 = vld [vmem:[#allocation15 + $0x130] sm:$0xff]  ;;  %v9946_v61 = vld [vmem:[#allocation15 + $0x108] sm:$0xff] }
 0x917   : > { %4302 = vmatprep.subr.mxu0 %v9922_v35  ;;  %4373 = vmatprep.subr.mxu1 %v9925_v36 }
 0x918   : > { %4303 = vmatpush1.msra.mxu0 %v9928_v6  ;;  %4374 = vmatpush1.msra.mxu1 %v9931_v33 }
 0x919   : > { %4304 = vmatprep.subr.mxu0 %v9934_v1  ;;  %4375 = vmatprep.subr.mxu1 %v9937_v59 }
 0x91a   : > { %4305 = vmatpush1.msra.mxu0 %v9940_v57  ;;  %4376 = vmatpush1.msra.mxu1 %v9943_v2 }
 0x91b   : > { %4306 = vmatprep.subr.mxu0 %v9946_v61  ;;  %4377 = vmatprep.subr.mxu1 %v9949_v42 }
 0x91c   : > { %4307 = vmatpush1.msra.mxu0 %v9952_v43  ;;  %4378 = vmatpush1.msra.mxu1 %v9955_v41 }
 0x91d   : > { %4308 = vmatprep.subr.mxu0 %v9958_v44  ;;  %4379 = vmatprep.subr.mxu1 %v9961_v16 }
 0x91e   : > { %4309 = vmatpush1.msra.mxu0 %v9964_v3  ;;  %4380 = vmatpush1.msra.mxu1 %v9967_v8 }
 0x91f   : > { %4310 = vmatprep.subr.mxu0 %v9970_v11  ;;  %4381 = vmatprep.subr.mxu1 %v9973_v9 }
 0x920   : > { %4311 = vmatpush1.msra.mxu0 %v9976_v46  ;;  %4382 = vmatpush1.msra.mxu1 %v9979_v47 }
 0x921   : > { %4312 = vmatprep.subr.mxu0 %v9982_v50  ;;  %4383 = vmatprep.subr.mxu1 %v9985_v51 }
 0x922   : > { %4313 = vmatpush1.msra.mxu0 %v9988_v48  ;;  %4384 = vmatpush1.msra.mxu1 %v9991_v62 }
 0x923   : > { %4314 = vmatprep.subr.mxu0 %v9994_v63  ;;  %4385 = vmatprep.subr.mxu1 %v9997_v39 }
 0x924   : > { %4315 = vmatpush1.msra.mxu0 %v10000_v0  ;;  %4386 = vmatpush1.msra.mxu1 %v10003_v52 }
 0x925   : > { %4316 = vmatprep.subr.mxu0 %v10006_v40  ;;  %4387 = vmatprep.subr.mxu1 %v10009_v38 }
 0x926   : > { %4317 = vmatpush1.msra.mxu0 %v10012_v30  ;;  %4388 = vmatpush1.msra.mxu1 %v10015_v12 }
 0x927   : > { %4318 = vmatprep.subr.mxu0 %v10018_v15  ;;  %4389 = vmatprep.subr.mxu1 %v10021_v17 }
 0x928   : > { %4319 = vmatpush1.msra.mxu0 %v10024_v18  ;;  %4390 = vmatpush1.msra.mxu1 %v10027_v19 }
 0x929   : > { %4320 = vmatprep.subr.mxu0 %v10030_v20  ;;  %4391 = vmatprep.subr.mxu1 %v10033_v24 }
 0x92a   : > { %4321 = vmatpush1.msra.mxu0 %v10036_v26  ;;  %4392 = vmatpush1.msra.mxu1 %v10039_v28 }
 0x92b   : > { %4322 = vmatprep.subr.mxu0 %v10042_v31  ;;  %4393 = vmatprep.subr.mxu1 %v10045_v4 }
 0x92c   : > { %4323 = vmatpush1.msra.mxu0 %v10048_v34  ;;  %4356 = vmatprep.mubr.f32.mxu0 %v11505_v14 }
 0x92d   : > { %4394 = vmatpush1.msra.mxu1 %v10052_v55  ;;  %4427 = vmatprep.mubr.f32.mxu1 %v11505_v14 }
 0x92e   : > { %4357 = vmatmul.mubr.f32.vlgmr.msra.gmra.mxu0 %v9832_v32  ;;  %4428 = vmatmul.mubr.f32.vlgmr.msra.gmra.mxu1 %v9832_v32  ;;  %v10073_v32 = vld [vmem:[#allocation16 + $0x1d8] sm:$0xff] }
 0x92f   : > { %4462 = vmatprep.subr.mxu0 %v10058_v29  ;;  %4533 = vmatprep.subr.mxu1 %v10061_v56  ;;  %12225 = vst [vmem:[#allocation105_spill] sm:$0xff] %v10073_v32 }
 0x930   : > { %4463 = vmatpush1.msra.mxu0 %v10064_v13  ;;  %4534 = vmatpush1.msra.mxu1 %v10067_v58 }
 0x931   : > { %4464 = vmatprep.subr.mxu0 %v10070_v7  ;;  %4535 = vmatprep.subr.mxu1 %v10073_v32 }
 0x932   : > { %4465 = vmatpush1.msra.mxu0 %v10076_v25  ;;  %4536 = vmatpush1.msra.mxu1 %v10079_v54  ;;  %v10097_v54 = vld [vmem:[#allocation16 + $0x198] sm:$0xff] }
 0x933   : > { %4466 = vmatprep.subr.mxu0 %v10082_v5  ;;  %4537 = vmatprep.subr.mxu1 %v10085_v37  ;;  %12233 = vst [vmem:[#allocation37_spill] sm:$0xff] %v10097_v54  ;;  %v10100_v5 = vld [vmem:[#allocation16 + $0x180] sm:$0xff]  ;;  %v10103_v37 = vld [vmem:[#allocation16 + $0x190] sm:$0xff] }
 0x934   : > { %4467 = vmatpush1.msra.mxu0 %v10088_v21  ;;  %4538 = vmatpush1.msra.mxu1 %v10091_v10  ;;  %12234 = vst [vmem:[#allocation38_spill] sm:$0xff] %v10100_v5  ;;  %12235 = vst [vmem:[#allocation39_spill] sm:$0xff] %v10103_v37  ;;  %v10106_v21 = vld [vmem:[#allocation16 + $0x168] sm:$0xff]  ;;  %v10109_v10 = vld [vmem:[#allocation16 + $0x178] sm:$0xff] }
 0x935   : > { %4468 = vmatprep.subr.mxu0 %v10094_v60  ;;  %4539 = vmatprep.subr.mxu1 %v10097_v54  ;;  %12236 = vst [vmem:[#allocation40_spill] sm:$0xff] %v10106_v21  ;;  %12237 = vst [vmem:[#allocation41_spill] sm:$0xff] %v10109_v10  ;;  %v10112_v60 = vld [vmem:[#allocation16 + $0x160] sm:$0xff]  ;;  %v10115_v54 = vld [vmem:[#allocation16 + $0x170] sm:$0xff] }
 0x936   : > { %4469 = vmatpush1.msra.mxu0 %v10100_v5  ;;  %4540 = vmatpush1.msra.mxu1 %v10103_v37  ;;  %12238 = vst [vmem:[#allocation42_spill] sm:$0xff] %v10112_v60  ;;  %12239 = vst [vmem:[#allocation43_spill] sm:$0xff] %v10115_v54  ;;  %v10118_v5 = vld [vmem:[#allocation16 + $0x148] sm:$0xff]  ;;  %v10121_v37 = vld [vmem:[#allocation16 + $0x158] sm:$0xff] }
 0x937   : > { %4470 = vmatprep.subr.mxu0 %v10106_v21  ;;  %4541 = vmatprep.subr.mxu1 %v10109_v10  ;;  %12240 = vst [vmem:[#allocation44_spill] sm:$0xff] %v10118_v5  ;;  %12241 = vst [vmem:[#allocation45_spill] sm:$0xff] %v10121_v37  ;;  %v10124_v21 = vld [vmem:[#allocation16 + $0x140] sm:$0xff]  ;;  %v10127_v10 = vld [vmem:[#allocation16 + $0x150] sm:$0xff] }
 0x938   : > { %4471 = vmatpush1.msra.mxu0 %v10112_v60  ;;  %4542 = vmatpush1.msra.mxu1 %v10115_v54  ;;  %12242 = vst [vmem:[#allocation46_spill] sm:$0xff] %v10124_v21  ;;  %12243 = vst [vmem:[#allocation47_spill] sm:$0xff] %v10127_v10  ;;  %v10130_v60 = vld [vmem:[#allocation16 + $0x128] sm:$0xff]  ;;  %v10133_v54 = vld [vmem:[#allocation16 + $0x138] sm:$0xff] }
 0x939   : > { %4472 = vmatprep.subr.mxu0 %v10118_v5  ;;  %4543 = vmatprep.subr.mxu1 %v10121_v37  ;;  %12244 = vst [vmem:[#allocation48_spill] sm:$0xff] %v10130_v60  ;;  %12245 = vst [vmem:[#allocation49_spill] sm:$0xff] %v10133_v54  ;;  %v10136_v5 = vld [vmem:[#allocation16 + $0x120] sm:$0xff]  ;;  %v10139_v37 = vld [vmem:[#allocation16 + $0x130] sm:$0xff] }
 0x93a   : > { %4473 = vmatpush1.msra.mxu0 %v10124_v21  ;;  %4544 = vmatpush1.msra.mxu1 %v10127_v10  ;;  %12246 = vst [vmem:[#allocation50_spill] sm:$0xff] %v10136_v5  ;;  %12247 = vst [vmem:[#allocation51_spill] sm:$0xff] %v10139_v37  ;;  %v10142_v21 = vld [vmem:[#allocation16 + $0x108] sm:$0xff]  ;;  %v10145_v10 = vld [vmem:[#allocation16 + $0x118] sm:$0xff] }
 0x93b   : > { %4474 = vmatprep.subr.mxu0 %v10130_v60  ;;  %4545 = vmatprep.subr.mxu1 %v10133_v54  ;;  %12248 = vst [vmem:[#allocation52_spill] sm:$0xff] %v10142_v21  ;;  %12249 = vst [vmem:[#allocation53_spill] sm:$0xff] %v10145_v10  ;;  %v10148_v60 = vld [vmem:[#allocation16 + $0x100] sm:$0xff]  ;;  %v10151_v54 = vld [vmem:[#allocation16 + $0x110] sm:$0xff] }
 0x93c   : > { %4475 = vmatpush1.msra.mxu0 %v10136_v5  ;;  %4546 = vmatpush1.msra.mxu1 %v10139_v37  ;;  %12250 = vst [vmem:[#allocation54_spill] sm:$0xff] %v10148_v60  ;;  %12251 = vst [vmem:[#allocation55_spill] sm:$0xff] %v10151_v54  ;;  %v10154_v5 = vld [vmem:[#allocation16 + $0xe8] sm:$0xff]  ;;  %v10157_v37 = vld [vmem:[#allocation16 + $0xf8] sm:$0xff] }
 0x93d   : > { %4476 = vmatprep.subr.mxu0 %v10142_v21  ;;  %4547 = vmatprep.subr.mxu1 %v10145_v10  ;;  %12252 = vst [vmem:[#allocation56_spill] sm:$0xff] %v10154_v5  ;;  %12253 = vst [vmem:[#allocation57_spill] sm:$0xff] %v10157_v37  ;;  %v10160_v21 = vld [vmem:[#allocation16 + $0xe0] sm:$0xff]  ;;  %v10163_v10 = vld [vmem:[#allocation16 + $0xf0] sm:$0xff] }
 0x93e   : > { %4477 = vmatpush1.msra.mxu0 %v10148_v60  ;;  %4548 = vmatpush1.msra.mxu1 %v10151_v54  ;;  %12254 = vst [vmem:[#allocation58_spill] sm:$0xff] %v10160_v21  ;;  %12255 = vst [vmem:[#allocation59_spill] sm:$0xff] %v10163_v10  ;;  %v10166_v60 = vld [vmem:[#allocation16 + $0xc8] sm:$0xff]  ;;  %v10169_v54 = vld [vmem:[#allocation16 + $0xd8] sm:$0xff] }
 0x93f   : > { %4478 = vmatprep.subr.mxu0 %v10154_v5  ;;  %4549 = vmatprep.subr.mxu1 %v10157_v37  ;;  %12256 = vst [vmem:[#allocation60_spill] sm:$0xff] %v10166_v60  ;;  %12257 = vst [vmem:[#allocation61_spill] sm:$0xff] %v10169_v54  ;;  %v10172_v5 = vld [vmem:[#allocation16 + $0xc0] sm:$0xff]  ;;  %v10175_v37 = vld [vmem:[#allocation16 + $0xd0] sm:$0xff] }
 0x940   : > { %4479 = vmatpush1.msra.mxu0 %v10160_v21  ;;  %4550 = vmatpush1.msra.mxu1 %v10163_v10  ;;  %12258 = vst [vmem:[#allocation62_spill] sm:$0xff] %v10172_v5  ;;  %12259 = vst [vmem:[#allocation63_spill] sm:$0xff] %v10175_v37  ;;  %v10178_v21 = vld [vmem:[#allocation16 + $0xa8] sm:$0xff]  ;;  %v10181_v10 = vld [vmem:[#allocation16 + $0xb8] sm:$0xff] }
 0x941   : > { %4480 = vmatprep.subr.mxu0 %v10166_v60  ;;  %4551 = vmatprep.subr.mxu1 %v10169_v54  ;;  %12260 = vst [vmem:[#allocation64_spill] sm:$0xff] %v10178_v21  ;;  %12261 = vst [vmem:[#allocation65_spill] sm:$0xff] %v10181_v10  ;;  %v10184_v60 = vld [vmem:[#allocation16 + $0xa0] sm:$0xff]  ;;  %v10187_v54 = vld [vmem:[#allocation16 + $0xb0] sm:$0xff] }
 0x942   : > { %4481 = vmatpush1.msra.mxu0 %v10172_v5  ;;  %4552 = vmatpush1.msra.mxu1 %v10175_v37  ;;  %12262 = vst [vmem:[#allocation66_spill] sm:$0xff] %v10184_v60  ;;  %12263 = vst [vmem:[#allocation67_spill] sm:$0xff] %v10187_v54  ;;  %v10190_v5 = vld [vmem:[#allocation16 + $0x88] sm:$0xff]  ;;  %v10193_v37 = vld [vmem:[#allocation16 + $0x98] sm:$0xff] }
 0x943   : > { %4482 = vmatprep.subr.mxu0 %v10178_v21  ;;  %4553 = vmatprep.subr.mxu1 %v10181_v10  ;;  %12264 = vst [vmem:[#allocation68_spill] sm:$0xff] %v10190_v5  ;;  %12265 = vst [vmem:[#allocation69_spill] sm:$0xff] %v10193_v37  ;;  %v10196_v21 = vld [vmem:[#allocation16 + $0x80] sm:$0xff]  ;;  %v10199_v10 = vld [vmem:[#allocation16 + $0x90] sm:$0xff] }
 0x944   : > { %4483 = vmatpush1.msra.mxu0 %v10184_v60  ;;  %4554 = vmatpush1.msra.mxu1 %v10187_v54  ;;  %12266 = vst [vmem:[#allocation70_spill] sm:$0xff] %v10196_v21  ;;  %12267 = vst [vmem:[#allocation71_spill] sm:$0xff] %v10199_v10  ;;  %v10202_v60 = vld [vmem:[#allocation16 + $0x68] sm:$0xff]  ;;  %v10205_v54 = vld [vmem:[#allocation16 + $0x78] sm:$0xff] }
 0x945   : > { %4484 = vmatprep.subr.mxu0 %v10190_v5  ;;  %4555 = vmatprep.subr.mxu1 %v10193_v37  ;;  %12268 = vst [vmem:[#allocation72_spill] sm:$0xff] %v10202_v60  ;;  %12269 = vst [vmem:[#allocation73_spill] sm:$0xff] %v10205_v54  ;;  %v10208_v5 = vld [vmem:[#allocation16 + $0x60] sm:$0xff]  ;;  %v10211_v37 = vld [vmem:[#allocation16 + $0x70] sm:$0xff] }
 0x946   : > { %4485 = vmatpush1.msra.mxu0 %v10196_v21  ;;  %4556 = vmatpush1.msra.mxu1 %v10199_v10  ;;  %12270 = vst [vmem:[#allocation74_spill] sm:$0xff] %v10208_v5  ;;  %12271 = vst [vmem:[#allocation75_spill] sm:$0xff] %v10211_v37  ;;  %v10214_v21 = vld [vmem:[#allocation16 + $0x48] sm:$0xff]  ;;  %v10217_v10 = vld [vmem:[#allocation16 + $0x58] sm:$0xff] }
 0x947   : > { %4486 = vmatprep.subr.mxu0 %v10202_v60  ;;  %4557 = vmatprep.subr.mxu1 %v10205_v54  ;;  %12272 = vst [vmem:[#allocation76_spill] sm:$0xff] %v10214_v21  ;;  %12273 = vst [vmem:[#allocation77_spill] sm:$0xff] %v10217_v10  ;;  %v10220_v60 = vld [vmem:[#allocation16 + $0x40] sm:$0xff]  ;;  %v10223_v54 = vld [vmem:[#allocation16 + $0x50] sm:$0xff] }
 0x948   : > { %4487 = vmatpush1.msra.mxu0 %v10208_v5  ;;  %4558 = vmatpush1.msra.mxu1 %v10211_v37  ;;  %12274 = vst [vmem:[#allocation78_spill] sm:$0xff] %v10220_v60  ;;  %12275 = vst [vmem:[#allocation79_spill] sm:$0xff] %v10223_v54  ;;  %v10226_v5 = vld [vmem:[#allocation16 + $0x28] sm:$0xff]  ;;  %v10229_v37 = vld [vmem:[#allocation16 + $0x38] sm:$0xff] }
 0x949   : > { %4488 = vmatprep.subr.mxu0 %v10214_v21  ;;  %4559 = vmatprep.subr.mxu1 %v10217_v10  ;;  %12276 = vst [vmem:[#allocation80_spill] sm:$0xff] %v10226_v5  ;;  %12277 = vst [vmem:[#allocation81_spill] sm:$0xff] %v10229_v37  ;;  %v10232_v21 = vld [vmem:[#allocation16 + $0x20] sm:$0xff]  ;;  %v10235_v10 = vld [vmem:[#allocation16 + $0x30] sm:$0xff] }
 0x94a   : > { %4489 = vmatpush1.msra.mxu0 %v10220_v60  ;;  %4560 = vmatpush1.msra.mxu1 %v10223_v54  ;;  %12278 = vst [vmem:[#allocation82_spill] sm:$0xff] %v10232_v21  ;;  %12279 = vst [vmem:[#allocation83_spill] sm:$0xff] %v10235_v10  ;;  %v10238_v60 = vld [vmem:[#allocation16 + $0x8] sm:$0xff]  ;;  %v10241_v54 = vld [vmem:[#allocation16 + $0x18] sm:$0xff] }
 0x94b   : > { %4490 = vmatprep.subr.mxu0 %v10226_v5  ;;  %4561 = vmatprep.subr.mxu1 %v10229_v37  ;;  %12280 = vst [vmem:[#allocation84_spill] sm:$0xff] %v10238_v60  ;;  %12281 = vst [vmem:[#allocation85_spill] sm:$0xff] %v10241_v54  ;;  %v10244_v5 = vld [vmem:[#allocation16] sm:$0xff]  ;;  %v10247_v37 = vld [vmem:[#allocation16 + $0x10] sm:$0xff] }
 0x94c   : > { %4491 = vmatpush1.msra.mxu0 %v10232_v21  ;;  %4562 = vmatpush1.msra.mxu1 %v10235_v10  ;;  %12282 = vst [vmem:[#allocation86_spill] sm:$0xff] %v10244_v5  ;;  %12283 = vst [vmem:[#allocation87_spill] sm:$0xff] %v10247_v37  ;;  %v10252_v10 = vld [vmem:[#allocation18 + $0x1e8] sm:$0xff] }
 0x94d   : > { %4492 = vmatprep.subr.mxu0 %v10238_v60  ;;  %4563 = vmatprep.subr.mxu1 %v10241_v54  ;;  %12284 = vst [vmem:[#allocation88_spill] sm:$0xff] %v10252_v10  ;;  %v10255_v60 = vld [vmem:[#allocation18 + $0x1f8] sm:$0xff] }
 0x94e   : > { %4493 = vmatpush1.msra.mxu0 %v10244_v5  ;;  %4564 = vmatpush1.msra.mxu1 %v10247_v37  ;;  %12285 = vst [vmem:[#allocation89_spill] sm:$0xff] %v10255_v60 }
 0x94f   : > { %4526 = vmatprep.mubr.f32.mxu0 %v11505_v14  ;;  %4597 = vmatprep.mubr.f32.mxu1 %v11505_v14 }
 0x950   : > { %4608 = vmatprep.subr.mxu0 %v10252_v10  ;;  %4679 = vmatprep.subr.mxu1 %v10255_v60 }
 0x9ab   : > { %v4031_v54 = vpop.f32.mrf.mxu0  ;;  %v4102_v32 = vpop.f32.mrf.mxu1 }
 0x9ac   : > { %v4107_v5 = vadd.f32 %v4031_v54, %v12146_v49  ;;  %v4109_v4 = vadd.f32 %v4102_v32, %v8141_v23 }
 0x9ad   : > { %v4033_v21 = vpop.f32.mrf.mxu0  ;;  %v4104_v29 = vpop.f32.mrf.mxu1 }
 0x9ae   : > { %v4108_v37 = vadd.f32 %v4033_v21, %v8135_v53  ;;  %v4110_v60 = vadd.f32 %v4104_v29, %v8139_v22 }
 0x9cc   : > { %v4177_v25 = vpop.f32.mrf.mxu0  ;;  %v4248_v10 = vpop.f32.mrf.mxu1 }
 0x9cd   : > { %v4253_v7 = vadd.f32 %v4177_v25, %v4107_v5  ;;  %v4255_v54 = vadd.f32 %v4248_v10, %v4109_v4  ;;  %v12286_v25 = vld [vmem:[#allocation119_spill] sm:$0xff] }
 0x9ce   : > { %v4179_v58 = vpop.f32.mrf.mxu0  ;;  %v4250_v34 = vpop.f32.mrf.mxu1 }
 0x9cf   : > { %v5572_v13 = vmul.f32 -1.442695, %v4253_v7  ;;  %v4254_v56 = vadd.f32 %v4179_v58, %v4108_v37  ;;  %v4256_v31 = vadd.f32 %v4250_v34, %v4110_v60 }
 0x9d1   : > { %5926 = vpow2.f32 %v5572_v13  ;;  %v5573_v55 = vmul.f32 -1.442695, %v4254_v56  ;;  %v5574_v28 = vmul.f32 -1.442695, %v4256_v31  ;;  %v12287_v31 = vld [vmem:[#allocation121_spill] sm:$0xff] }
 0x9d3   : > { %5928 = vpow2.f32 %v5573_v55 }
 0x9d4   : > { %5930 = vtanh.f32 %v4255_v54 }
 0x9de   : > { %v5927_v49 = vpop.eup %5926 }
 0x9df   : > { %v4260_v26 = vadd.f32 1.0, %v5927_v49 }
 0x9e0   : > { %v5929_v21 = vpop.eup %5928 }
 0x9e1   : > { %5932 = vrcp.f32 %v4260_v26  ;;  %v4266_v7 = vadd.f32 1.0, %v5929_v21  ;;  %v5931_v13 = vpop.eup %5930  ;;  %v12288_v21 = vld [vmem:[#allocation122_spill] sm:$0xff] }
 0x9e2   : > { %5934 = vpow2.f32 %v5574_v28 }
 0x9e3   : > { %5936 = vrcp.f32 %v4266_v7 }
 0x9ee   : > { %v5933_v56 = vpop.eup %5932  ;;  %v4358_v58 = vpop.f32.mrf.mxu0 }
 0x9ef   : > { %v5935_v55 = vpop.eup %5934  ;;  %v4434_v5 = vadd.f32 %v4358_v58, %v12286_v25  ;;  %v4277_v32 = vmul.f32 %v5933_v56, %v5931_v13  ;;  %v4429_v26 = vpop.f32.mrf.mxu1  ;;  %v12289_v13 = vld [vmem:[#allocation120_spill] sm:$0xff] }
 0x9f0   : > { %v5937_v29 = vpop.eup %5936  ;;  %v4360_v37 = vpop.f32.mrf.mxu0  ;;  %v4273_v10 = vadd.f32 1.0, %v5935_v55  ;;  %v4436_v56 = vadd.f32 %v4429_v26, %v12289_v13 }
 0x9f1   : > { %v4276_v4 = vmul.f32 %v5937_v29, %v9819_v45  ;;  %v5576_v34 = vmul.f32 -1.442695, %v4434_v5  ;;  %v4435_v49 = vadd.f32 %v4360_v37, %v12287_v31  ;;  %v4431_v54 = vpop.f32.mrf.mxu1 }
 0x9f2   : > { %v4437_v7 = vadd.f32 %v4431_v54, %v12288_v21 }
 0x9f3   : > { %v10265_v60 = vadd.f32 %v4277_v32, %v4276_v4  ;;  %5938 = vpow2.f32 %v5576_v34  ;;  %v5577_v28 = vmul.f32 -1.442695, %v4435_v49 }
 0x9f4   : > { %v5578_v45 = vmul.f32 -1.442695, %v4437_v7 }
 0x9f5   : > { %5940 = vpow2.f32 %v5577_v28 }
 0x9f6   : > { %5942 = vrcp.f32 %v4273_v10 }
 0x9f7   : > { %5944 = vtanh.f32 %v10265_v60 }
 0x9f8   : > { %5946 = vtanh.f32 %v4436_v56  ;;  %v10282_v56 = vld [vmem:[#allocation18 + $0x1e0] sm:$0xff] }
 0x9f9   : > { %5948 = vpow2.f32 %v5578_v45  ;;  %v10285_v45 = vld [vmem:[#allocation18 + $0x1f0] sm:$0xff] }
 0xa00   : > { %v5939_v58 = vpop.eup %5938 }
 0xa01   : > { %v4441_v25 = vadd.f32 1.0, %v5939_v58  ;;  %v10291_v58 = vld [vmem:[#allocation18 + $0x1d8] sm:$0xff] }
 0xa02   : > { %v5941_v55 = vpop.eup %5940 }
 0xa03   : > { %v5943_v5 = vpop.eup %5942  ;;  %5950 = vrcp.f32 %v4441_v25  ;;  %v4447_v29 = vadd.f32 1.0, %v5941_v55  ;;  %v10294_v25 = vld [vmem:[#allocation18 + $0x1c0] sm:$0xff]  ;;  %v10297_v55 = vld [vmem:[#allocation18 + $0x1d0] sm:$0xff] }
 0xa04   : > { %v5945_v37 = vpop.eup %5944 }
 0xa05   : > { %5952 = vrcp.f32 %v4447_v29  ;;  %v10270_v32 = vmul.f32 %v5945_v37, %v5943_v5  ;;  %v5947_v4 = vpop.eup %5946  ;;  %v10300_v5 = vld [vmem:[#allocation18 + $0x1a8] sm:$0xff]  ;;  %v10303_v29 = vld [vmem:[#allocation18 + $0x1b8] sm:$0xff]  ;;  %v10306_v37 = vld [vmem:[#allocation18 + $0x1a0] sm:$0xff] }
 0xa06   : > { %v5949_v34 = vpop.eup %5948  ;;  %12290 = vst [vmem:[#allocation90_spill] sm:$0xff] %v10306_v37 }
 0xa07   : > { %5575 = vst [vmem:[%s7290_s4 + $0x28] sm:$0xff] %v10270_v32  ;;  %v4454_v26 = vadd.f32 1.0, %v5949_v34  ;;  %v10312_v34 = vld [vmem:[#allocation18 + $0x188] sm:$0xff] }
 0xa08   : > { %12292 = vst [vmem:[#allocation92_spill] sm:$0xff] %v10312_v34 }
 0xa09   : > { %5954 = vrcp.f32 %v4454_v26  ;;  %v10324_v26 = vld [vmem:[#allocation18 + $0x168] sm:$0xff] }
 0xa0a   : > { %12296 = vst [vmem:[#allocation96_spill] sm:$0xff] %v10324_v26 }
 0xa10   : > { %v5951_v31 = vpop.eup %5950 }
 0xa11   : > { %v4458_v49 = vmul.f32 %v5951_v31, %v5947_v4  ;;  %v10309_v4 = vld [vmem:[#allocation18 + $0x1b0] sm:$0xff]  ;;  %v10315_v31 = vld [vmem:[#allocation18 + $0x198] sm:$0xff] }
 0xa12   : > { %v5953_v10 = vpop.eup %5952  ;;  %12291 = vst [vmem:[#allocation91_spill] sm:$0xff] %v10309_v4  ;;  %12293 = vst [vmem:[#allocation93_spill] sm:$0xff] %v10315_v31 }
 0xa13   : > { %v4457_v28 = vmul.f32 %v5953_v10, %v9829_v27  ;;  %v10288_v27 = vld [vmem:[#allocation18 + $0x1c8] sm:$0xff]  ;;  %v10321_v10 = vld [vmem:[#allocation18 + $0x190] sm:$0xff] }
 0xa14   : > { %12295 = vst [vmem:[#allocation95_spill] sm:$0xff] %v10321_v10 }
 0xa15   : > { %v10275_v54 = vadd.f32 %v4458_v49, %v4457_v28  ;;  %v10318_v49 = vld [vmem:[#allocation18 + $0x180] sm:$0xff]  ;;  %v10327_v28 = vld [vmem:[#allocation18 + $0x178] sm:$0xff] }
 0xa16   : > { %v5955_v21 = vpop.eup %5954  ;;  %12294 = vst [vmem:[#allocation94_spill] sm:$0xff] %v10318_v49  ;;  %12297 = vst [vmem:[#allocation97_spill] sm:$0xff] %v10327_v28 }
 0xa17   : > { %5956 = vtanh.f32 %v10275_v54 }
 0xa24   : > { %v5957_v7 = vpop.eup %5956 }
 0xa25   : > { %v10278_v13 = vmul.f32 %v5957_v7, %v5955_v21  ;;  %v10330_v21 = vld [vmem:[#allocation18 + $0x160] sm:$0xff]  ;;  %v10333_v7 = vld [vmem:[#allocation18 + $0x170] sm:$0xff] }
 0xa26   : > { %12298 = vst [vmem:[#allocation98_spill] sm:$0xff] %v10330_v21  ;;  %12299 = vst [vmem:[#allocation99_spill] sm:$0xff] %v10333_v7 }
 0xa27   : > { %4527 = vmatmul.mubr.f32.vlgmr.msra.gmra.mxu0 %v10278_v13  ;;  %4598 = vmatmul.mubr.f32.vlgmr.msra.gmra.mxu1 %v10278_v13 }
 0xa28   : > { %4609 = vmatpush1.msra.mxu0 %v10282_v56  ;;  %4680 = vmatpush1.msra.mxu1 %v10285_v45 }
 0xa29   : > { %4610 = vmatprep.subr.mxu0 %v10288_v27  ;;  %4681 = vmatprep.subr.mxu1 %v10291_v58 }
 0xa2a   : > { %4611 = vmatpush1.msra.mxu0 %v10294_v25  ;;  %4682 = vmatpush1.msra.mxu1 %v10297_v55 }
 0xa2b   : > { %4612 = vmatprep.subr.mxu0 %v10300_v5  ;;  %4683 = vmatprep.subr.mxu1 %v10303_v29 }
 0xa2c   : > { %4613 = vmatpush1.msra.mxu0 %v10306_v37  ;;  %4684 = vmatpush1.msra.mxu1 %v10309_v4  ;;  %v6590_v4 = vld [vmem:[#allocation15 + $0x1a8] sm:$0xff]  ;;  %v6591_v37 = vld [vmem:[#allocation15 + $0x1b8] sm:$0xff] }
 0xa2d   : > { %4614 = vmatprep.subr.mxu0 %v10312_v34  ;;  %4685 = vmatprep.subr.mxu1 %v10315_v31  ;;  %v6587_v31 = vld [vmem:[#allocation15 + $0x1d8] sm:$0xff]  ;;  %v6588_v34 = vld [vmem:[#allocation15 + $0x1c0] sm:$0xff] }
 0xa2e   : > { %4615 = vmatpush1.msra.mxu0 %v10318_v49  ;;  %4686 = vmatpush1.msra.mxu1 %v10321_v10  ;;  %v10336_v49 = vld [vmem:[#allocation18 + $0x148] sm:$0xff]  ;;  %v10339_v10 = vld [vmem:[#allocation18 + $0x158] sm:$0xff] }
 0xa2f   : > { %4616 = vmatprep.subr.mxu0 %v10324_v26  ;;  %4687 = vmatprep.subr.mxu1 %v10327_v28  ;;  %12300 = vst [vmem:[#allocation101_spill] sm:$0xff] %v10336_v49  ;;  %12301 = vst [vmem:[#allocation115_spill] sm:$0xff] %v10339_v10  ;;  %v10342_v26 = vld [vmem:[#allocation18 + $0x140] sm:$0xff]  ;;  %v10345_v28 = vld [vmem:[#allocation18 + $0x150] sm:$0xff] }
 0xa30   : > { %4617 = vmatpush1.msra.mxu0 %v10330_v21  ;;  %4688 = vmatpush1.msra.mxu1 %v10333_v7  ;;  %12302 = vst [vmem:[#allocation117_spill] sm:$0xff] %v10342_v26  ;;  %12303 = vst [vmem:[#allocation118_spill] sm:$0xff] %v10345_v28  ;;  %v10348_v21 = vld [vmem:[#allocation18 + $0x128] sm:$0xff]  ;;  %v10351_v7 = vld [vmem:[#allocation18 + $0x138] sm:$0xff] }
 0xa31   : > { %4618 = vmatprep.subr.mxu0 %v10336_v49  ;;  %4689 = vmatprep.subr.mxu1 %v10339_v10  ;;  %12304 = vst [vmem:[#allocation116_spill] sm:$0xff] %v10348_v21  ;;  %12305 = vst [vmem:[#allocation102_spill] sm:$0xff] %v10351_v7  ;;  %v10354_v49 = vld [vmem:[#allocation18 + $0x120] sm:$0xff]  ;;  %v10357_v10 = vld [vmem:[#allocation18 + $0x130] sm:$0xff] }
 0xa32   : > { %4619 = vmatpush1.msra.mxu0 %v10342_v26  ;;  %4690 = vmatpush1.msra.mxu1 %v10345_v28  ;;  %12306 = vst [vmem:[#allocation100_spill] sm:$0xff] %v10354_v49  ;;  %12307 = vst [vmem:[#allocation127_spill] sm:$0xff] %v10357_v10  ;;  %v10360_v26 = vld [vmem:[#allocation18 + $0x108] sm:$0xff]  ;;  %v10363_v28 = vld [vmem:[#allocation18 + $0x118] sm:$0xff] }
 0xa33   : > { %4620 = vmatprep.subr.mxu0 %v10348_v21  ;;  %4691 = vmatprep.subr.mxu1 %v10351_v7  ;;  %12308 = vst [vmem:[#allocation107_spill] sm:$0xff] %v10360_v26  ;;  %12309 = vst [vmem:[#allocation109_spill] sm:$0xff] %v10363_v28  ;;  %v10366_v21 = vld [vmem:[#allocation18 + $0x100] sm:$0xff]  ;;  %v10369_v7 = vld [vmem:[#allocation18 + $0x110] sm:$0xff] }
 0xa34   : > { %4621 = vmatpush1.msra.mxu0 %v10354_v49  ;;  %4692 = vmatpush1.msra.mxu1 %v10357_v10  ;;  %12310 = vst [vmem:[#allocation110_spill] sm:$0xff] %v10366_v21  ;;  %12311 = vst [vmem:[#allocation108_spill] sm:$0xff] %v10369_v7  ;;  %v10372_v49 = vld [vmem:[#allocation18 + $0xe8] sm:$0xff]  ;;  %v10375_v10 = vld [vmem:[#allocation18 + $0xf8] sm:$0xff] }
 0xa35   : > { %4622 = vmatprep.subr.mxu0 %v10360_v26  ;;  %4693 = vmatprep.subr.mxu1 %v10363_v28  ;;  %12312 = vst [vmem:[#allocation128_spill] sm:$0xff] %v10372_v49  ;;  %12313 = vst [vmem:[#allocation129_spill] sm:$0xff] %v10375_v10  ;;  %v10378_v26 = vld [vmem:[#allocation18 + $0xe0] sm:$0xff]  ;;  %v10381_v28 = vld [vmem:[#allocation18 + $0xf0] sm:$0xff] }
 0xa36   : > { %4623 = vmatpush1.msra.mxu0 %v10366_v21  ;;  %4694 = vmatpush1.msra.mxu1 %v10369_v7  ;;  %12314 = vst [vmem:[#allocation130_spill] sm:$0xff] %v10378_v26  ;;  %12315 = vst [vmem:[#allocation131_spill] sm:$0xff] %v10381_v28  ;;  %v10384_v21 = vld [vmem:[#allocation18 + $0xc8] sm:$0xff]  ;;  %v10387_v7 = vld [vmem:[#allocation18 + $0xd8] sm:$0xff] }
 0xa37   : > { %4624 = vmatprep.subr.mxu0 %v10372_v49  ;;  %4695 = vmatprep.subr.mxu1 %v10375_v10  ;;  %12316 = vst [vmem:[#allocation132_spill] sm:$0xff] %v10384_v21  ;;  %12317 = vst [vmem:[#allocation133_spill] sm:$0xff] %v10387_v7  ;;  %v10390_v49 = vld [vmem:[#allocation18 + $0xc0] sm:$0xff]  ;;  %v10393_v10 = vld [vmem:[#allocation18 + $0xd0] sm:$0xff] }
 0xa38   : > { %4625 = vmatpush1.msra.mxu0 %v10378_v26  ;;  %4696 = vmatpush1.msra.mxu1 %v10381_v28  ;;  %12318 = vst [vmem:[#allocation134_spill] sm:$0xff] %v10390_v49  ;;  %12319 = vst [vmem:[#allocation135_spill] sm:$0xff] %v10393_v10  ;;  %v10396_v26 = vld [vmem:[#allocation18 + $0xa8] sm:$0xff]  ;;  %v10399_v28 = vld [vmem:[#allocation18 + $0xb8] sm:$0xff] }
 0xa39   : > { %4626 = vmatprep.subr.mxu0 %v10384_v21  ;;  %4697 = vmatprep.subr.mxu1 %v10387_v7  ;;  %12320 = vst [vmem:[#allocation136_spill] sm:$0xff] %v10396_v26  ;;  %12321 = vst [vmem:[#allocation137_spill] sm:$0xff] %v10399_v28  ;;  %v10402_v21 = vld [vmem:[#allocation18 + $0xa0] sm:$0xff]  ;;  %v10405_v7 = vld [vmem:[#allocation18 + $0xb0] sm:$0xff] }
 0xa3a   : > { %4627 = vmatpush1.msra.mxu0 %v10390_v49  ;;  %4698 = vmatpush1.msra.mxu1 %v10393_v10  ;;  %12322 = vst [vmem:[#allocation138_spill] sm:$0xff] %v10402_v21  ;;  %12323 = vst [vmem:[#allocation139_spill] sm:$0xff] %v10405_v7  ;;  %v10408_v49 = vld [vmem:[#allocation18 + $0x88] sm:$0xff]  ;;  %v10411_v10 = vld [vmem:[#allocation18 + $0x98] sm:$0xff] }
 0xa3b   : > { %4628 = vmatprep.subr.mxu0 %v10396_v26  ;;  %4699 = vmatprep.subr.mxu1 %v10399_v28  ;;  %12324 = vst [vmem:[#allocation140_spill] sm:$0xff] %v10408_v49  ;;  %12325 = vst [vmem:[#allocation141_spill] sm:$0xff] %v10411_v10  ;;  %v10414_v26 = vld [vmem:[#allocation18 + $0x80] sm:$0xff]  ;;  %v10417_v28 = vld [vmem:[#allocation18 + $0x90] sm:$0xff] }
 0xa3c   : > { %4629 = vmatpush1.msra.mxu0 %v10402_v21  ;;  %4700 = vmatpush1.msra.mxu1 %v10405_v7  ;;  %12326 = vst [vmem:[#allocation142_spill] sm:$0xff] %v10414_v26  ;;  %12327 = vst [vmem:[#allocation143_spill] sm:$0xff] %v10417_v28  ;;  %v10420_v21 = vld [vmem:[#allocation18 + $0x68] sm:$0xff]  ;;  %v10423_v7 = vld [vmem:[#allocation18 + $0x78] sm:$0xff] }
 0xa3d   : > { %4630 = vmatprep.subr.mxu0 %v10408_v49  ;;  %4701 = vmatprep.subr.mxu1 %v10411_v10  ;;  %12328 = vst [vmem:[#allocation144_spill] sm:$0xff] %v10420_v21  ;;  %12329 = vst [vmem:[#allocation145_spill] sm:$0xff] %v10423_v7  ;;  %v10426_v49 = vld [vmem:[#allocation18 + $0x60] sm:$0xff]  ;;  %v10429_v10 = vld [vmem:[#allocation18 + $0x70] sm:$0xff] }
 0xa3e   : > { %4631 = vmatpush1.msra.mxu0 %v10414_v26  ;;  %4702 = vmatpush1.msra.mxu1 %v10417_v28  ;;  %12330 = vst [vmem:[#allocation146_spill] sm:$0xff] %v10426_v49  ;;  %12331 = vst [vmem:[#allocation147_spill] sm:$0xff] %v10429_v10  ;;  %v10432_v26 = vld [vmem:[#allocation18 + $0x48] sm:$0xff]  ;;  %v10435_v28 = vld [vmem:[#allocation18 + $0x58] sm:$0xff] }
 0xa3f   : > { %4632 = vmatprep.subr.mxu0 %v10420_v21  ;;  %4703 = vmatprep.subr.mxu1 %v10423_v7  ;;  %12332 = vst [vmem:[#allocation148_spill] sm:$0xff] %v10432_v26  ;;  %12333 = vst [vmem:[#allocation149_spill] sm:$0xff] %v10435_v28  ;;  %v10438_v21 = vld [vmem:[#allocation18 + $0x40] sm:$0xff]  ;;  %v10441_v7 = vld [vmem:[#allocation18 + $0x50] sm:$0xff] }
 0xa40   : > { %4633 = vmatpush1.msra.mxu0 %v10426_v49  ;;  %4704 = vmatpush1.msra.mxu1 %v10429_v10  ;;  %12334 = vst [vmem:[#allocation150_spill] sm:$0xff] %v10438_v21  ;;  %12335 = vst [vmem:[#allocation151_spill] sm:$0xff] %v10441_v7  ;;  %v10444_v49 = vld [vmem:[#allocation18 + $0x28] sm:$0xff]  ;;  %v10447_v10 = vld [vmem:[#allocation18 + $0x38] sm:$0xff] }
 0xa41   : > { %4634 = vmatprep.subr.mxu0 %v10432_v26  ;;  %4705 = vmatprep.subr.mxu1 %v10435_v28  ;;  %12336 = vst [vmem:[#allocation152_spill] sm:$0xff] %v10444_v49  ;;  %12337 = vst [vmem:[#allocation153_spill] sm:$0xff] %v10447_v10  ;;  %v10450_v26 = vld [vmem:[#allocation18 + $0x20] sm:$0xff]  ;;  %v10453_v28 = vld [vmem:[#allocation18 + $0x30] sm:$0xff] }
 0xa42   : > { %4635 = vmatpush1.msra.mxu0 %v10438_v21  ;;  %4706 = vmatpush1.msra.mxu1 %v10441_v7  ;;  %12338 = vst [vmem:[#allocation154_spill] sm:$0xff] %v10450_v26  ;;  %12339 = vst [vmem:[#allocation155_spill] sm:$0xff] %v10453_v28  ;;  %v10456_v21 = vld [vmem:[#allocation18 + $0x8] sm:$0xff]  ;;  %v10459_v7 = vld [vmem:[#allocation18 + $0x18] sm:$0xff] }
 0xa43   : > { %4636 = vmatprep.subr.mxu0 %v10444_v49  ;;  %4707 = vmatprep.subr.mxu1 %v10447_v10  ;;  %12340 = vst [vmem:[#allocation156_spill] sm:$0xff] %v10456_v21  ;;  %12341 = vst [vmem:[#allocation157_spill] sm:$0xff] %v10459_v7  ;;  %v10462_v49 = vld [vmem:[#allocation18] sm:$0xff]  ;;  %v10466_v10 = vld [vmem:[#allocation18 + $0x10] sm:$0xff] }
 0xa44   : > { %4637 = vmatpush1.msra.mxu0 %v10450_v26  ;;  %4708 = vmatpush1.msra.mxu1 %v10453_v28  ;;  %12342 = vst [vmem:[#allocation158_spill] sm:$0xff] %v10462_v49  ;;  %12343 = vst [vmem:[#allocation159_spill] sm:$0xff] %v10466_v10  ;;  %v6583_v28 = vld [vmem:[#allocation15 + $0x1f8] sm:$0xff]  ;;  %v6585_v26 = vld [vmem:[#allocation15 + $0x1f0] sm:$0xff] }
 0xa45   : > { %4638 = vmatprep.subr.mxu0 %v10456_v21  ;;  %4709 = vmatprep.subr.mxu1 %v10459_v7  ;;  %v6582_v21 = vld [vmem:[#allocation15 + $0x1e8] sm:$0xff]  ;;  %v6584_v7 = vld [vmem:[#allocation15 + $0x1e0] sm:$0xff] }
 0xa46   : > { %4639 = vmatpush1.msra.mxu0 %v10462_v49  ;;  %4672 = vmatprep.mubr.f32.mxu0 %v11505_v14  ;;  %v6586_v49 = vld [vmem:[#allocation15 + $0x1c8] sm:$0xff] }
 0xa47   : > { %4710 = vmatpush1.msra.mxu1 %v10466_v10  ;;  %4743 = vmatprep.mubr.f32.mxu1 %v11505_v14  ;;  %v6589_v10 = vld [vmem:[#allocation15 + $0x1d0] sm:$0xff] }
 0xa48   : > { %4673 = vmatmul.mubr.f32.vlgmr.msra.gmra.mxu0 %v10270_v32  ;;  %4744 = vmatmul.mubr.f32.vlgmr.msra.gmra.mxu1 %v10270_v32  ;;  %v6592_v32 = vld [vmem:[#allocation15 + $0x1a0] sm:$0xff] }
 0xa49   : > { %4789 = vmatprep.subr.mxu0 %v6582_v21  ;;  %4860 = vmatprep.subr.mxu1 %v6583_v28  ;;  %v6593_v21 = vld [vmem:[#allocation15 + $0x1b0] sm:$0xff]  ;;  %v6594_v28 = vld [vmem:[#allocation15 + $0x188] sm:$0xff] }
 0xa4a   : > { %4790 = vmatpush1.msra.mxu0 %v6584_v7  ;;  %4861 = vmatpush1.msra.mxu1 %v6585_v26  ;;  %v6595_v7 = vld [vmem:[#allocation15 + $0x198] sm:$0xff]  ;;  %v6596_v26 = vld [vmem:[#allocation15 + $0x180] sm:$0xff] }
 0xa4b   : > { %4791 = vmatprep.subr.mxu0 %v6586_v49  ;;  %4862 = vmatprep.subr.mxu1 %v6587_v31  ;;  %v6597_v49 = vld [vmem:[#allocation15 + $0x190] sm:$0xff]  ;;  %v6598_v31 = vld [vmem:[#allocation15 + $0x168] sm:$0xff] }
 0xa4c   : > { %4792 = vmatpush1.msra.mxu0 %v6588_v34  ;;  %4863 = vmatpush1.msra.mxu1 %v6589_v10  ;;  %v6599_v34 = vld [vmem:[#allocation15 + $0x178] sm:$0xff]  ;;  %v6600_v10 = vld [vmem:[#allocation15 + $0x160] sm:$0xff] }
 0xa4d   : > { %4793 = vmatprep.subr.mxu0 %v6590_v4  ;;  %4864 = vmatprep.subr.mxu1 %v6591_v37  ;;  %v6601_v4 = vld [vmem:[#allocation15 + $0x170] sm:$0xff] }
 0xa4e   : > { %4794 = vmatpush1.msra.mxu0 %v6592_v32  ;;  %4865 = vmatpush1.msra.mxu1 %v6593_v21  ;;  %v12383_v37 = vld [vmem:[#allocation57_spill] sm:$0xff]  ;;  %v12384_v32 = vld [vmem:[#allocation58_spill] sm:$0xff]  ;;  %v12385_v21 = vld [vmem:[#allocation59_spill] sm:$0xff] }
 0xa4f   : > { %4795 = vmatprep.subr.mxu0 %v6594_v28  ;;  %4866 = vmatprep.subr.mxu1 %v6595_v7  ;;  %v12386_v28 = vld [vmem:[#allocation60_spill] sm:$0xff]  ;;  %v12387_v7 = vld [vmem:[#allocation61_spill] sm:$0xff] }
 0xa50   : > { %4796 = vmatpush1.msra.mxu0 %v6596_v26  ;;  %4867 = vmatpush1.msra.mxu1 %v6597_v49  ;;  %v12388_v26 = vld [vmem:[#allocation62_spill] sm:$0xff]  ;;  %v12389_v49 = vld [vmem:[#allocation63_spill] sm:$0xff] }
 0xa51   : > { %4797 = vmatprep.subr.mxu0 %v6598_v31  ;;  %4868 = vmatprep.subr.mxu1 %v6599_v34  ;;  %v12390_v31 = vld [vmem:[#allocation64_spill] sm:$0xff]  ;;  %v12391_v34 = vld [vmem:[#allocation65_spill] sm:$0xff] }
 0xa52   : > { %4798 = vmatpush1.msra.mxu0 %v6600_v10  ;;  %4869 = vmatpush1.msra.mxu1 %v6601_v4  ;;  %v12392_v10 = vld [vmem:[#allocation66_spill] sm:$0xff]  ;;  %v12393_v4 = vld [vmem:[#allocation67_spill] sm:$0xff] }
 0xa53   : > { %4799 = vmatprep.subr.mxu0 %v9922_v35  ;;  %4870 = vmatprep.subr.mxu1 %v9925_v36  ;;  %v12344_v35 = vld [vmem:[#allocation184_spill] sm:$0xff]  ;;  %v12345_v36 = vld [vmem:[#allocation185_spill] sm:$0xff] }
 0xa54   : > { %4800 = vmatpush1.msra.mxu0 %v9928_v6  ;;  %4871 = vmatpush1.msra.mxu1 %v9931_v33  ;;  %v12346_v6 = vld [vmem:[#allocation186_spill] sm:$0xff]  ;;  %v12347_v33 = vld [vmem:[#allocation187_spill] sm:$0xff] }
 0xa55   : > { %4801 = vmatprep.subr.mxu0 %v9934_v1  ;;  %4872 = vmatprep.subr.mxu1 %v9937_v59  ;;  %v12348_v1 = vld [vmem:[#allocation188_spill] sm:$0xff]  ;;  %v12349_v59 = vld [vmem:[#allocation189_spill] sm:$0xff] }
 0xa56   : > { %4802 = vmatpush1.msra.mxu0 %v9940_v57  ;;  %4873 = vmatpush1.msra.mxu1 %v9943_v2  ;;  %v12350_v57 = vld [vmem:[#allocation103_spill] sm:$0xff] }
 0xa57   : > { %4803 = vmatprep.subr.mxu0 %v9946_v61  ;;  %4874 = vmatprep.subr.mxu1 %v9949_v42  ;;  %v12351_v2 = vld [vmem:[#allocation111_spill] sm:$0xff]  ;;  %v12352_v61 = vld [vmem:[#allocation113_spill] sm:$0xff]  ;;  %v12353_v42 = vld [vmem:[#allocation114_spill] sm:$0xff] }
 0xa58   : > { %4804 = vmatpush1.msra.mxu0 %v9952_v43  ;;  %4875 = vmatpush1.msra.mxu1 %v9955_v41  ;;  %v12354_v43 = vld [vmem:[#allocation112_spill] sm:$0xff]  ;;  %v12355_v41 = vld [vmem:[#allocation105_spill] sm:$0xff] }
 0xa59   : > { %4805 = vmatprep.subr.mxu0 %v9958_v44  ;;  %4876 = vmatprep.subr.mxu1 %v9961_v16  ;;  %v12356_v44 = vld [vmem:[#allocation106_spill] sm:$0xff]  ;;  %v12357_v16 = vld [vmem:[#allocation104_spill] sm:$0xff] }
 0xa5a   : > { %4806 = vmatpush1.msra.mxu0 %v9964_v3  ;;  %4877 = vmatpush1.msra.mxu1 %v9967_v8  ;;  %v12358_v3 = vld [vmem:[#allocation32_spill] sm:$0xff]  ;;  %v12359_v8 = vld [vmem:[#allocation33_spill] sm:$0xff] }
 0xa5b   : > { %4807 = vmatprep.subr.mxu0 %v9970_v11  ;;  %4878 = vmatprep.subr.mxu1 %v9973_v9  ;;  %v12360_v11 = vld [vmem:[#allocation34_spill] sm:$0xff]  ;;  %v12361_v9 = vld [vmem:[#allocation35_spill] sm:$0xff] }
 0xa5c   : > { %4808 = vmatpush1.msra.mxu0 %v9976_v46  ;;  %4879 = vmatpush1.msra.mxu1 %v9979_v47  ;;  %v12362_v46 = vld [vmem:[#allocation36_spill] sm:$0xff]  ;;  %v12363_v47 = vld [vmem:[#allocation37_spill] sm:$0xff] }
 0xa5d   : > { %4809 = vmatprep.subr.mxu0 %v9982_v50  ;;  %4880 = vmatprep.subr.mxu1 %v9985_v51  ;;  %v12364_v50 = vld [vmem:[#allocation38_spill] sm:$0xff]  ;;  %v12365_v51 = vld [vmem:[#allocation39_spill] sm:$0xff] }
 0xa5e   : > { %4810 = vmatpush1.msra.mxu0 %v9988_v48  ;;  %4881 = vmatpush1.msra.mxu1 %v9991_v62  ;;  %v12366_v48 = vld [vmem:[#allocation40_spill] sm:$0xff]  ;;  %v12367_v62 = vld [vmem:[#allocation41_spill] sm:$0xff] }
 0xa5f   : > { %4811 = vmatprep.subr.mxu0 %v9994_v63  ;;  %4882 = vmatprep.subr.mxu1 %v9997_v39  ;;  %v12368_v63 = vld [vmem:[#allocation42_spill] sm:$0xff]  ;;  %v12369_v39 = vld [vmem:[#allocation43_spill] sm:$0xff] }
 0xa60   : > { %4812 = vmatpush1.msra.mxu0 %v10000_v0  ;;  %4883 = vmatpush1.msra.mxu1 %v10003_v52  ;;  %v12370_v0 = vld [vmem:[#allocation44_spill] sm:$0xff]  ;;  %v12371_v52 = vld [vmem:[#allocation45_spill] sm:$0xff] }
 0xa61   : > { %4813 = vmatprep.subr.mxu0 %v10006_v40  ;;  %4884 = vmatprep.subr.mxu1 %v10009_v38  ;;  %v12372_v40 = vld [vmem:[#allocation46_spill] sm:$0xff]  ;;  %v12373_v38 = vld [vmem:[#allocation47_spill] sm:$0xff] }
 0xa62   : > { %4814 = vmatpush1.msra.mxu0 %v10012_v30  ;;  %4885 = vmatpush1.msra.mxu1 %v10015_v12  ;;  %v12374_v30 = vld [vmem:[#allocation48_spill] sm:$0xff]  ;;  %v12375_v12 = vld [vmem:[#allocation49_spill] sm:$0xff] }
 0xa63   : > { %4815 = vmatprep.subr.mxu0 %v10018_v15  ;;  %4886 = vmatprep.subr.mxu1 %v10021_v17  ;;  %v12376_v15 = vld [vmem:[#allocation50_spill] sm:$0xff]  ;;  %v12377_v17 = vld [vmem:[#allocation51_spill] sm:$0xff] }
 0xa64   : > { %4816 = vmatpush1.msra.mxu0 %v10024_v18  ;;  %4887 = vmatpush1.msra.mxu1 %v10027_v19  ;;  %v12378_v18 = vld [vmem:[#allocation52_spill] sm:$0xff]  ;;  %v12379_v19 = vld [vmem:[#allocation53_spill] sm:$0xff] }
 0xa65   : > { %4817 = vmatprep.subr.mxu0 %v10030_v20  ;;  %4888 = vmatprep.subr.mxu1 %v10033_v24  ;;  %v12380_v20 = vld [vmem:[#allocation54_spill] sm:$0xff]  ;;  %v12381_v24 = vld [vmem:[#allocation55_spill] sm:$0xff] }
 0xa66   : > { %4818 = vmatpush1.msra.mxu0 %v12344_v35  ;;  %4889 = vmatpush1.msra.mxu1 %v12345_v36  ;;  %v12394_v35 = vld [vmem:[#allocation68_spill] sm:$0xff]  ;;  %v12395_v36 = vld [vmem:[#allocation69_spill] sm:$0xff] }
 0xa67   : > { %4819 = vmatprep.subr.mxu0 %v12346_v6  ;;  %4890 = vmatprep.subr.mxu1 %v12347_v33  ;;  %v12396_v6 = vld [vmem:[#allocation70_spill] sm:$0xff]  ;;  %v12397_v33 = vld [vmem:[#allocation71_spill] sm:$0xff] }
 0xa68   : > { %4820 = vmatpush1.msra.mxu0 %v12348_v1  ;;  %4853 = vmatprep.mubr.f32.mxu0 %v11505_v14  ;;  %v12398_v1 = vld [vmem:[#allocation72_spill] sm:$0xff] }
 0xa69   : > { %4891 = vmatpush1.msra.mxu1 %v12349_v59  ;;  %4924 = vmatprep.mubr.f32.mxu1 %v11505_v14  ;;  %v12399_v59 = vld [vmem:[#allocation73_spill] sm:$0xff] }
 0xa6a   : > { %4854 = vmatmul.mubr.f32.vlgmr.msra.gmra.mxu0 %v10278_v13  ;;  %4925 = vmatmul.mubr.f32.vlgmr.msra.gmra.mxu1 %v10278_v13  ;;  %v12382_v13 = vld [vmem:[#allocation56_spill] sm:$0xff] }
 0xa6b   : > { %4959 = vmatprep.subr.mxu0 %v12350_v57  ;;  %5030 = vmatprep.subr.mxu1 %v12351_v2  ;;  %v12400_v57 = vld [vmem:[#allocation74_spill] sm:$0xff]  ;;  %v12401_v2 = vld [vmem:[#allocation75_spill] sm:$0xff] }
 0xa6c   : > { %4960 = vmatpush1.msra.mxu0 %v12352_v61  ;;  %5031 = vmatpush1.msra.mxu1 %v12353_v42  ;;  %v12402_v61 = vld [vmem:[#allocation76_spill] sm:$0xff]  ;;  %v12403_v42 = vld [vmem:[#allocation77_spill] sm:$0xff] }
 0xa6d   : > { %4961 = vmatprep.subr.mxu0 %v12354_v43  ;;  %5032 = vmatprep.subr.mxu1 %v12355_v41  ;;  %v12404_v43 = vld [vmem:[#allocation78_spill] sm:$0xff]  ;;  %v12405_v41 = vld [vmem:[#allocation79_spill] sm:$0xff] }
 0xa6e   : > { %4962 = vmatpush1.msra.mxu0 %v12356_v44  ;;  %5033 = vmatpush1.msra.mxu1 %v12357_v16  ;;  %v12406_v44 = vld [vmem:[#allocation80_spill] sm:$0xff]  ;;  %v12407_v16 = vld [vmem:[#allocation81_spill] sm:$0xff] }
 0xa6f   : > { %4963 = vmatprep.subr.mxu0 %v12358_v3  ;;  %5034 = vmatprep.subr.mxu1 %v12359_v8  ;;  %v12408_v3 = vld [vmem:[#allocation82_spill] sm:$0xff]  ;;  %v12409_v8 = vld [vmem:[#allocation83_spill] sm:$0xff] }
 0xa70   : > { %4964 = vmatpush1.msra.mxu0 %v12360_v11  ;;  %5035 = vmatpush1.msra.mxu1 %v12361_v9  ;;  %v12410_v11 = vld [vmem:[#allocation84_spill] sm:$0xff]  ;;  %v12411_v9 = vld [vmem:[#allocation85_spill] sm:$0xff] }
 0xa71   : > { %4965 = vmatprep.subr.mxu0 %v12362_v46  ;;  %5036 = vmatprep.subr.mxu1 %v12363_v47  ;;  %v12412_v46 = vld [vmem:[#allocation86_spill] sm:$0xff]  ;;  %v12413_v47 = vld [vmem:[#allocation87_spill] sm:$0xff] }
 0xa72   : > { %4966 = vmatpush1.msra.mxu0 %v12364_v50  ;;  %5037 = vmatpush1.msra.mxu1 %v12365_v51  ;;  %v12414_v50 = vld [vmem:[#allocation88_spill] sm:$0xff]  ;;  %v12415_v51 = vld [vmem:[#allocation89_spill] sm:$0xff] }
 0xa73   : > { %4967 = vmatprep.subr.mxu0 %v12366_v48  ;;  %5038 = vmatprep.subr.mxu1 %v12367_v62 }
 0xa74   : > { %4968 = vmatpush1.msra.mxu0 %v12368_v63  ;;  %5039 = vmatpush1.msra.mxu1 %v12369_v39  ;;  %v12416_v63 = vld [vmem:[#allocation31_spill] sm:$0xff] }
 0xa75   : > { %4969 = vmatprep.subr.mxu0 %v12370_v0  ;;  %5040 = vmatprep.subr.mxu1 %v12371_v52 }
 0xa76   : > { %4970 = vmatpush1.msra.mxu0 %v12372_v40  ;;  %5041 = vmatpush1.msra.mxu1 %v12373_v38 }
 0xa77   : > { %4971 = vmatprep.subr.mxu0 %v12374_v30  ;;  %5042 = vmatprep.subr.mxu1 %v12375_v12 }
 0xa78   : > { %4972 = vmatpush1.msra.mxu0 %v12376_v15  ;;  %5043 = vmatpush1.msra.mxu1 %v12377_v17 }
 0xa79   : > { %4973 = vmatprep.subr.mxu0 %v12378_v18  ;;  %5044 = vmatprep.subr.mxu1 %v12379_v19 }
 0xa7a   : > { %4974 = vmatpush1.msra.mxu0 %v12380_v20  ;;  %5045 = vmatpush1.msra.mxu1 %v12381_v24 }
 0xa7b   : > { %4975 = vmatprep.subr.mxu0 %v12382_v13  ;;  %5046 = vmatprep.subr.mxu1 %v12383_v37 }
 0xa7c   : > { %4976 = vmatpush1.msra.mxu0 %v12384_v32  ;;  %5047 = vmatpush1.msra.mxu1 %v12385_v21 }
 0xa7d   : > { %4977 = vmatprep.subr.mxu0 %v12386_v28  ;;  %5048 = vmatprep.subr.mxu1 %v12387_v7 }
 0xa7e   : > { %4978 = vmatpush1.msra.mxu0 %v12388_v26  ;;  %5049 = vmatpush1.msra.mxu1 %v12389_v49 }
 0xa7f   : > { %4979 = vmatprep.subr.mxu0 %v12390_v31  ;;  %5050 = vmatprep.subr.mxu1 %v12391_v34 }
 0xa80   : > { %4980 = vmatpush1.msra.mxu0 %v12392_v10  ;;  %5051 = vmatpush1.msra.mxu1 %v12393_v4 }
 0xa81   : > { %4981 = vmatprep.subr.mxu0 %v12394_v35  ;;  %5052 = vmatprep.subr.mxu1 %v12395_v36  ;;  %v12417_v35 = vld [vmem:[#allocation123_spill] sm:$0xff] }
 0xa82   : > { %4982 = vmatpush1.msra.mxu0 %v12396_v6  ;;  %5053 = vmatpush1.msra.mxu1 %v12397_v33 }
 0xa83   : > { %4983 = vmatprep.subr.mxu0 %v12398_v1  ;;  %5054 = vmatprep.subr.mxu1 %v12399_v59 }
 0xa84   : > { %4984 = vmatpush1.msra.mxu0 %v12400_v57  ;;  %5055 = vmatpush1.msra.mxu1 %v12401_v2  ;;  %v12418_v2 = vld [vmem:[#allocation125_spill] sm:$0xff] }
 0xa85   : > { %4985 = vmatprep.subr.mxu0 %v12402_v61  ;;  %5056 = vmatprep.subr.mxu1 %v12403_v42 }
 0xa86   : > { %4986 = vmatpush1.msra.mxu0 %v12404_v43  ;;  %5057 = vmatpush1.msra.mxu1 %v12405_v41 }
 0xa87   : > { %4987 = vmatprep.subr.mxu0 %v12406_v44  ;;  %5058 = vmatprep.subr.mxu1 %v12407_v16 }
 0xa88   : > { %4988 = vmatpush1.msra.mxu0 %v12408_v3  ;;  %5059 = vmatpush1.msra.mxu1 %v12409_v8  ;;  %v12419_v3 = vld [vmem:[#allocation126_spill] sm:$0xff] }
 0xa89   : > { %4989 = vmatprep.subr.mxu0 %v12410_v11  ;;  %5060 = vmatprep.subr.mxu1 %v12411_v9  ;;  %v12420_v11 = vld [vmem:[#allocation124_spill] sm:$0xff] }
 0xa8a   : > { %4990 = vmatpush1.msra.mxu0 %v12412_v46  ;;  %5061 = vmatpush1.msra.mxu1 %v12413_v47 }
 0xa8b   : > { %5023 = vmatprep.mubr.f32.mxu0 %v11505_v14  ;;  %5094 = vmatprep.mubr.f32.mxu1 %v11505_v14 }
 0xa8c   : > { %5105 = vmatprep.subr.mxu0 %v12414_v50  ;;  %5176 = vmatprep.subr.mxu1 %v12415_v51 }
 0xae7   : > { %v4528_v48 = vpop.f32.mrf.mxu0  ;;  %v4599_v52 = vpop.f32.mrf.mxu1 }
 0xae8   : > { %v4604_v39 = vadd.f32 %v4528_v48, %v12416_v63  ;;  %v4606_v13 = vadd.f32 %v4599_v52, %v8141_v23 }
 0xae9   : > { %v4530_v62 = vpop.f32.mrf.mxu0  ;;  %v4601_v17 = vpop.f32.mrf.mxu1 }
 0xaea   : > { %v4605_v40 = vadd.f32 %v4530_v62, %v8135_v53  ;;  %v4607_v24 = vadd.f32 %v4601_v17, %v8139_v22 }
 0xb08   : > { %v4674_v0 = vpop.f32.mrf.mxu0  ;;  %v4745_v19 = vpop.f32.mrf.mxu1 }
 0xb09   : > { %v4750_v38 = vadd.f32 %v4674_v0, %v4604_v39  ;;  %v4752_v32 = vadd.f32 %v4745_v19, %v4606_v13  ;;  %v12423_v13 = vld [vmem:[#allocation92_spill] sm:$0xff] }
 0xb0a   : > { %v4676_v30 = vpop.f32.mrf.mxu0  ;;  %v4747_v20 = vpop.f32.mrf.mxu1 }
 0xb0b   : > { %v5579_v12 = vmul.f32 -1.442695, %v4750_v38  ;;  %v4751_v15 = vadd.f32 %v4676_v30, %v4605_v40  ;;  %v4753_v37 = vadd.f32 %v4747_v20, %v4607_v24  ;;  %v12422_v24 = vld [vmem:[#allocation91_spill] sm:$0xff] }
 0xb0d   : > { %5958 = vpow2.f32 %v5579_v12  ;;  %v5580_v18 = vmul.f32 -1.442695, %v4751_v15  ;;  %v5581_v28 = vmul.f32 -1.442695, %v4753_v37  ;;  %v12432_v37 = vld [vmem:[#allocation115_spill] sm:$0xff] }
 0xb0f   : > { %5960 = vpow2.f32 %v5580_v18 }
 0xb10   : > { %5962 = vtanh.f32 %v4752_v32  ;;  %v12433_v32 = vld [vmem:[#allocation117_spill] sm:$0xff] }
 0xb1a   : > { %v5959_v21 = vpop.eup %5958 }
 0xb1b   : > { %v4757_v7 = vadd.f32 1.0, %v5959_v21  ;;  %v12434_v21 = vld [vmem:[#allocation118_spill] sm:$0xff] }
 0xb1c   : > { %v5961_v26 = vpop.eup %5960 }
 0xb1d   : > { %5964 = vrcp.f32 %v4757_v7  ;;  %v4763_v49 = vadd.f32 1.0, %v5961_v26  ;;  %v5963_v31 = vpop.eup %5962  ;;  %v12436_v7 = vld [vmem:[#allocation102_spill] sm:$0xff]  ;;  %v12437_v26 = vld [vmem:[#allocation100_spill] sm:$0xff] }
 0xb1e   : > { %5966 = vpow2.f32 %v5581_v28  ;;  %v12435_v28 = vld [vmem:[#allocation116_spill] sm:$0xff] }
 0xb1f   : > { %5968 = vrcp.f32 %v4763_v49  ;;  %v12438_v49 = vld [vmem:[#allocation127_spill] sm:$0xff] }
 0xb2a   : > { %v5965_v34 = vpop.eup %5964  ;;  %v4855_v10 = vpop.f32.mrf.mxu0 }
 0xb2b   : > { %v5967_v4 = vpop.eup %5966  ;;  %v4931_v36 = vadd.f32 %v4855_v10, %v12417_v35  ;;  %v4774_v1 = vmul.f32 %v5965_v34, %v5963_v31  ;;  %v4926_v41 = vpop.f32.mrf.mxu1  ;;  %v12439_v31 = vld [vmem:[#allocation107_spill] sm:$0xff]  ;;  %v12440_v34 = vld [vmem:[#allocation109_spill] sm:$0xff]  ;;  %v12441_v10 = vld [vmem:[#allocation110_spill] sm:$0xff] }
 0xb2c   : > { %v5969_v6 = vpop.eup %5968  ;;  %v4857_v33 = vpop.f32.mrf.mxu0  ;;  %v4770_v42 = vadd.f32 1.0, %v5967_v4  ;;  %v4933_v9 = vadd.f32 %v4926_v41, %v12420_v11  ;;  %v12442_v4 = vld [vmem:[#allocation108_spill] sm:$0xff]  ;;  %v12453_v41 = vld [vmem:[#allocation138_spill] sm:$0xff]  ;;  %v12458_v11 = vld [vmem:[#allocation143_spill] sm:$0xff] }
 0xb2d   : > { %v4773_v59 = vmul.f32 %v5969_v6, %v10265_v60  ;;  %v5583_v57 = vmul.f32 -1.442695, %v4931_v36  ;;  %v4932_v61 = vadd.f32 %v4857_v33, %v12418_v2  ;;  %v4928_v16 = vpop.f32.mrf.mxu1  ;;  %v12443_v35 = vld [vmem:[#allocation128_spill] sm:$0xff]  ;;  %v12444_v36 = vld [vmem:[#allocation129_spill] sm:$0xff]  ;;  %v12445_v6 = vld [vmem:[#allocation130_spill] sm:$0xff] }
 0xb2e   : > { %v4934_v8 = vadd.f32 %v4928_v16, %v12419_v3  ;;  %v12446_v33 = vld [vmem:[#allocation131_spill] sm:$0xff]  ;;  %v12455_v16 = vld [vmem:[#allocation140_spill] sm:$0xff]  ;;  %v12456_v3 = vld [vmem:[#allocation141_spill] sm:$0xff] }
 0xb2f   : > { %v10595_v43 = vadd.f32 %v4774_v1, %v4773_v59  ;;  %5970 = vpow2.f32 %v5583_v57  ;;  %v5584_v44 = vmul.f32 -1.442695, %v4932_v61  ;;  %v12447_v1 = vld [vmem:[#allocation132_spill] sm:$0xff]  ;;  %v12448_v59 = vld [vmem:[#allocation133_spill] sm:$0xff]  ;;  %v12449_v57 = vld [vmem:[#allocation134_spill] sm:$0xff] }
 0xb30   : > { %v5585_v60 = vmul.f32 -1.442695, %v4934_v8  ;;  %v12450_v2 = vld [vmem:[#allocation135_spill] sm:$0xff]  ;;  %v12451_v61 = vld [vmem:[#allocation136_spill] sm:$0xff]  ;;  %v12457_v8 = vld [vmem:[#allocation142_spill] sm:$0xff] }
 0xb31   : > { %5972 = vpow2.f32 %v5584_v44  ;;  %v12454_v44 = vld [vmem:[#allocation139_spill] sm:$0xff] }
 0xb32   : > { %5974 = vrcp.f32 %v4770_v42  ;;  %v12452_v42 = vld [vmem:[#allocation137_spill] sm:$0xff] }
 0xb33   : > { %5976 = vtanh.f32 %v10595_v43 }
 0xb34   : > { %5978 = vtanh.f32 %v4933_v9  ;;  %v12459_v9 = vld [vmem:[#allocation144_spill] sm:$0xff] }
 0xb35   : > { %5980 = vpow2.f32 %v5585_v60  ;;  %v12460_v60 = vld [vmem:[#allocation145_spill] sm:$0xff] }
 0xb3c   : > { %v5971_v46 = vpop.eup %5970 }
 0xb3d   : > { %v4938_v47 = vadd.f32 1.0, %v5971_v46  ;;  %v12461_v46 = vld [vmem:[#allocation146_spill] sm:$0xff] }
 0xb3e   : > { %v5973_v50 = vpop.eup %5972 }
 0xb3f   : > { %v5975_v51 = vpop.eup %5974  ;;  %5982 = vrcp.f32 %v4938_v47  ;;  %v4944_v48 = vadd.f32 1.0, %v5973_v50  ;;  %v12462_v47 = vld [vmem:[#allocation147_spill] sm:$0xff]  ;;  %v12463_v50 = vld [vmem:[#allocation148_spill] sm:$0xff] }
 0xb40   : > { %v5977_v62 = vpop.eup %5976 }
 0xb41   : > { %5984 = vrcp.f32 %v4944_v48  ;;  %v10600_v39 = vmul.f32 %v5977_v62, %v5975_v51  ;;  %v5979_v0 = vpop.eup %5978  ;;  %v12464_v51 = vld [vmem:[#allocation149_spill] sm:$0xff]  ;;  %v12465_v48 = vld [vmem:[#allocation150_spill] sm:$0xff]  ;;  %v12466_v62 = vld [vmem:[#allocation151_spill] sm:$0xff] }
 0xb42   : > { %v5981_v52 = vpop.eup %5980 }
 0xb43   : > { %5582 = vst [vmem:[%s7290_s4 + $0x30] sm:$0xff] %v10600_v39  ;;  %v4951_v12 = vadd.f32 1.0, %v5981_v52  ;;  %v12468_v52 = vld [vmem:[#allocation153_spill] sm:$0xff] }
 0xb45   : > { %5986 = vrcp.f32 %v4951_v12  ;;  %v12472_v12 = vld [vmem:[#allocation157_spill] sm:$0xff] }
 0xb4c   : > { %v5983_v40 = vpop.eup %5982 }
 0xb4d   : > { %v4955_v38 = vmul.f32 %v5983_v40, %v5979_v0  ;;  %v12467_v0 = vld [vmem:[#allocation152_spill] sm:$0xff]  ;;  %v12469_v40 = vld [vmem:[#allocation154_spill] sm:$0xff] }
 0xb4e   : > { %v5985_v30 = vpop.eup %5984 }
 0xb4f   : > { %v4954_v15 = vmul.f32 %v5985_v30, %v10275_v54  ;;  %v12421_v54 = vld [vmem:[#allocation90_spill] sm:$0xff]  ;;  %v12471_v30 = vld [vmem:[#allocation156_spill] sm:$0xff] }
 0xb51   : > { %v4956_v17 = vadd.f32 %v4955_v38, %v4954_v15  ;;  %v12470_v38 = vld [vmem:[#allocation155_spill] sm:$0xff]  ;;  %v12473_v15 = vld [vmem:[#allocation158_spill] sm:$0xff] }
 0xb52   : > { %v5987_v18 = vpop.eup %5986 }
 0xb53   : > { %5279 = vst [vmem:[#allocation22] sm:$0xff] %v4956_v17  ;;  %5988 = vtanh.f32 %v4956_v17  ;;  %v12474_v17 = vld [vmem:[#allocation159_spill] sm:$0xff] }
 0xb60   : > { %v5989_v19 = vpop.eup %5988 }
 0xb61   : > { %v4958_v20 = vmul.f32 %v5989_v19, %v5987_v18 }
 0xb63   : > { %5024 = vmatmul.mubr.f32.vlgmr.msra.gmra.mxu0 %v4958_v20  ;;  %5277 = vst [vmem:[#allocation20] sm:$0xff] %v4958_v20  ;;  %5095 = vmatmul.mubr.f32.vlgmr.msra.gmra.mxu1 %v4958_v20 }
 0xb64   : > { %5106 = vmatpush1.msra.mxu0 %v10282_v56  ;;  %5177 = vmatpush1.msra.mxu1 %v10285_v45  ;;  %v12424_v56 = vld [vmem:[#allocation93_spill] sm:$0xff]  ;;  %v12425_v45 = vld [vmem:[#allocation94_spill] sm:$0xff] }
 0xb65   : > { %5107 = vmatprep.subr.mxu0 %v10288_v27  ;;  %5178 = vmatprep.subr.mxu1 %v10291_v58  ;;  %v12426_v27 = vld [vmem:[#allocation95_spill] sm:$0xff]  ;;  %v12427_v58 = vld [vmem:[#allocation96_spill] sm:$0xff] }
 0xb66   : > { %5108 = vmatpush1.msra.mxu0 %v10294_v25  ;;  %5179 = vmatpush1.msra.mxu1 %v10297_v55  ;;  %v12428_v25 = vld [vmem:[#allocation97_spill] sm:$0xff]  ;;  %v12429_v55 = vld [vmem:[#allocation98_spill] sm:$0xff] }
 0xb67   : > { %5109 = vmatprep.subr.mxu0 %v10300_v5  ;;  %5180 = vmatprep.subr.mxu1 %v10303_v29  ;;  %v12430_v5 = vld [vmem:[#allocation99_spill] sm:$0xff]  ;;  %v12431_v29 = vld [vmem:[#allocation101_spill] sm:$0xff] }
 0xb68   : > { %5110 = vmatpush1.msra.mxu0 %v12421_v54  ;;  %5181 = vmatpush1.msra.mxu1 %v12422_v24 }
 0xb69   : > { %5111 = vmatprep.subr.mxu0 %v12423_v13  ;;  %5182 = vmatprep.subr.mxu1 %v12424_v56 }
 0xb6a   : > { %5112 = vmatpush1.msra.mxu0 %v12425_v45  ;;  %5183 = vmatpush1.msra.mxu1 %v12426_v27 }
 0xb6b   : > { %5113 = vmatprep.subr.mxu0 %v12427_v58  ;;  %5184 = vmatprep.subr.mxu1 %v12428_v25 }
 0xb6c   : > { %5114 = vmatpush1.msra.mxu0 %v12429_v55  ;;  %5185 = vmatpush1.msra.mxu1 %v12430_v5 }
 0xb6d   : > { %5115 = vmatprep.subr.mxu0 %v12431_v29  ;;  %5186 = vmatprep.subr.mxu1 %v12432_v37 }
 0xb6e   : > { %5116 = vmatpush1.msra.mxu0 %v12433_v32  ;;  %5187 = vmatpush1.msra.mxu1 %v12434_v21 }
 0xb6f   : > { %5117 = vmatprep.subr.mxu0 %v12435_v28  ;;  %5188 = vmatprep.subr.mxu1 %v12436_v7 }
 0xb70   : > { %5118 = vmatpush1.msra.mxu0 %v12437_v26  ;;  %5189 = vmatpush1.msra.mxu1 %v12438_v49 }
 0xb71   : > { %5119 = vmatprep.subr.mxu0 %v12439_v31  ;;  %5190 = vmatprep.subr.mxu1 %v12440_v34 }
 0xb72   : > { %5120 = vmatpush1.msra.mxu0 %v12441_v10  ;;  %5191 = vmatpush1.msra.mxu1 %v12442_v4 }
 0xb73   : > { %5121 = vmatprep.subr.mxu0 %v12443_v35  ;;  %5192 = vmatprep.subr.mxu1 %v12444_v36 }
 0xb74   : > { %5122 = vmatpush1.msra.mxu0 %v12445_v6  ;;  %5193 = vmatpush1.msra.mxu1 %v12446_v33 }
 0xb75   : > { %5123 = vmatprep.subr.mxu0 %v12447_v1  ;;  %5194 = vmatprep.subr.mxu1 %v12448_v59 }
 0xb76   : > { %5124 = vmatpush1.msra.mxu0 %v12449_v57  ;;  %5195 = vmatpush1.msra.mxu1 %v12450_v2 }
 0xb77   : > { %5125 = vmatprep.subr.mxu0 %v12451_v61  ;;  %5196 = vmatprep.subr.mxu1 %v12452_v42 }
 0xb78   : > { %5126 = vmatpush1.msra.mxu0 %v12453_v41  ;;  %5197 = vmatpush1.msra.mxu1 %v12454_v44 }
 0xb79   : > { %5127 = vmatprep.subr.mxu0 %v12455_v16  ;;  %5198 = vmatprep.subr.mxu1 %v12456_v3 }
 0xb7a   : > { %5128 = vmatpush1.msra.mxu0 %v12457_v8  ;;  %5199 = vmatpush1.msra.mxu1 %v12458_v11 }
 0xb7b   : > { %5129 = vmatprep.subr.mxu0 %v12459_v9  ;;  %5200 = vmatprep.subr.mxu1 %v12460_v60 }
 0xb7c   : > { %5130 = vmatpush1.msra.mxu0 %v12461_v46  ;;  %5201 = vmatpush1.msra.mxu1 %v12462_v47 }
 0xb7d   : > { %5131 = vmatprep.subr.mxu0 %v12463_v50  ;;  %5202 = vmatprep.subr.mxu1 %v12464_v51 }
 0xb7e   : > { %5132 = vmatpush1.msra.mxu0 %v12465_v48  ;;  %5203 = vmatpush1.msra.mxu1 %v12466_v62 }
 0xb7f   : > { %5133 = vmatprep.subr.mxu0 %v12467_v0  ;;  %5204 = vmatprep.subr.mxu1 %v12468_v52 }
 0xb80   : > { %5134 = vmatpush1.msra.mxu0 %v12469_v40  ;;  %5205 = vmatpush1.msra.mxu1 %v12470_v38 }
 0xb81   : > { %5135 = vmatprep.subr.mxu0 %v12471_v30  ;;  %5206 = vmatprep.subr.mxu1 %v12472_v12 }
 0xb82   : > { %5136 = vmatpush1.msra.mxu0 %v12473_v15  ;;  %5169 = vmatprep.mubr.f32.mxu0 %v11505_v14 }
 0xb83   : > { %5207 = vmatpush1.msra.mxu1 %v12474_v17  ;;  %5240 = vmatprep.mubr.f32.mxu1 %v11505_v14 }
 0xb84   : > { %5170 = vmatmul.mubr.f32.vlgmr.msra.gmra.mxu0 %v10600_v39  ;;  %5241 = vmatmul.mubr.f32.vlgmr.msra.gmra.mxu1 %v10600_v39 }
 0xc23   : > { %v5025_v18 = vpop.f32.mrf.mxu0  ;;  %v5096_v54 = vpop.f32.mrf.mxu1 }
 0xc24   : > { %v5101_v20 = vadd.f32 %v5025_v18, %v12416_v63  ;;  %v5103_v37 = vadd.f32 %v5096_v54, %v8141_v23 }
 0xc25   : > { %v5027_v19 = vpop.f32.mrf.mxu0  ;;  %v5098_v27 = vpop.f32.mrf.mxu1 }
 0xc26   : > { %v5102_v13 = vadd.f32 %v5027_v19, %v8135_v53  ;;  %v5104_v39 = vadd.f32 %v5098_v27, %v8139_v22 }
 0xc44   : > { %v5171_v24 = vpop.f32.mrf.mxu0  ;;  %v5242_v55 = vpop.f32.mrf.mxu1 }
 0xc45   : > { %v5247_v56 = vadd.f32 %v5171_v24, %v5101_v20  ;;  %v5249_v21 = vadd.f32 %v5242_v55, %v5103_v37 }
 0xc46   : > { %v5173_v45 = vpop.f32.mrf.mxu0  ;;  %v5244_v5 = vpop.f32.mrf.mxu1 }
 0xc47   : > { %v5586_v58 = vmul.f32 -1.442695, %v5247_v56  ;;  %v5248_v25 = vadd.f32 %v5173_v45, %v5102_v13  ;;  %v5250_v29 = vadd.f32 %v5244_v5, %v5104_v39 }
 0xc49   : > { %5990 = vpow2.f32 %v5586_v58  ;;  %v5587_v14 = vmul.f32 -1.442695, %v5248_v25  ;;  %v5588_v63 = vmul.f32 -1.442695, %v5250_v29 }
 0xc4b   : > { %5992 = vpow2.f32 %v5587_v14 }
 0xc4c   : > { %5994 = vpow2.f32 %v5588_v63 }
 0xc56   : > { %v5991_v32 = vpop.eup %5990 }
 0xc57   : > { %v5254_v28 = vadd.f32 1.0, %v5991_v32 }
 0xc58   : > { %v5993_v53 = vpop.eup %5992 }
 0xc59   : > { %5996 = vrcp.f32 %v5254_v28  ;;  %v5260_v7 = vadd.f32 1.0, %v5993_v53  ;;  %v5995_v26 = vpop.eup %5994 }
 0xc5a   : > { %5998 = vtanh.f32 %v5249_v21  ;;  %v5267_v22 = vadd.f32 1.0, %v5995_v26 }
 0xc5b   : > { %6000 = vrcp.f32 %v5260_v7 }
 0xc5c   : > { %6002 = vrcp.f32 %v5267_v22 }
 0xc66   : > { %v5997_v49 = vpop.eup %5996 }
 0xc67   : > { %v5999_v31 = vpop.eup %5998 }
 0xc68   : > { %v6001_v34 = vpop.eup %6000  ;;  %v5271_v10 = vmul.f32 %v5999_v31, %v5997_v49 }
 0xc69   : > { %v5270_v23 = vmul.f32 %v6001_v34, %v10595_v43  ;;  %v6003_v35 = vpop.eup %6002 }
 0xc6b   : > { %v5272_v4 = vadd.f32 %v5271_v10, %v5270_v23 }
 0xc6d   : > { %5280 = vst [vmem:[#allocation22 + $0x8] sm:$0xff] %v5272_v4  ;;  %6004 = vtanh.f32 %v5272_v4 }
 0xc7a   : > { %v6005_v36 = vpop.eup %6004 }
 0xc7b   : > { %v5274_v6 = vmul.f32 %v6005_v36, %v6003_v35 }
 0xc7d   : > { %5589 = vst [vmem:[%s7290_s4 + $0x38] sm:$0xff] %v5274_v6  ;;  %5278 = vst [vmem:[#allocation20 + $0x8] sm:$0xff] %v5274_v6 }
 0xc7e   : > { %6851 = shalt.err (!%p6848_p4)
}
 0xc7f   : > { %s6989_s29 = smov 128   ;;  %s6990_s4 = smov 8  }
 0xc80   : > { %p12476_p8 = pmov %p12475_p12  ;;  %s5282_s8 = scalar_lea.sflag [#allocation6], %s7264_s9 }
 0xc81   : > { %s6862_s15 = scalar_lea.vmem %s10683_s16, 1024  ;;  %p12477_p2 = scmp.ne.s32.totalorder %s11346_s23, 0 }
 0xc82   : > { %5637 = dma.vmem_to_hbm [thread:$0]  (%p12476_p8), %s5309_s22, 256, %s10771_s12, [#allocation21], %s6989_s29, %s6989_s29, %s6990_s4  }
 0xc83   : > { %p6863_p0 = scmp.ne.s32.totalorder %s10683_s16, %s6862_s15  ;;  %s6991_s1 = smov [#allocation19]  }
 0xc84   : > { %s6866_s19 = sshll.u32 %s6991_s1, 4  ;;  %s6867_s19 = int_to_ptr.vmem [resolvable:$false] %s6866_s19 }
 0xc85   : > { %p6864_p6 = pnand %p6863_p0, %p12477_p2  ;;  %s6868_s18 = scalar_lea.vmem %s6867_s19, 2048 }
 0xc86   : > { %p6869_p5 = scmp.lt.s32.totalorder %s10683_s16, %s6867_s19  ;;  %p6870_p11 = scmp.lt.s32.totalorder %s6868_s18, %s6862_s15 }
 0xc87   : > { %p6865_p9 = pneg %p6864_p6 }
 0xc88   : > { %p6871_p12 = por %p6870_p11, %p6869_p5 }
 0xc8a   : > { %p6872_p13 = pnand %p6871_p12, %p6865_p9 }
 0xc8c   : > { %6875 = shalt.err (!%p6872_p13)
}
 0xc8d   : > { %s6876_s22 = scalar_lea.hbm %s10681_s17, 1024  ;;  %s6880_s2 = scalar_lea.hbm %s10770_s11, 2048 }
 0xc8e   : > { %p6877_p10 = scmp.ne.s32.totalorder %s10681_s17, %s6876_s22  ;;  %p6881_p3 = scmp.lt.s32.totalorder %s10681_s17, %s10770_s11 }
 0xc8f   : > { %p6882_p4 = scmp.lt.s32.totalorder %s6880_s2, %s6876_s22 }
 0xc90   : > { %p6878_p7 = pnand %p6877_p10, %p12477_p2 }
 0xc91   : > { %p6883_p8 = por %p6882_p4, %p6881_p3 }
 0xc92   : > { %p6879_p1 = pneg %p6878_p7 }
 0xc94   : > { %p6884_p0 = pnand %p6883_p8, %p6879_p1 }
 0xc96   : > { %6887 = shalt.err (!%p6884_p0)
}
 0xc97   : > { %5635 = dma.vmem_to_hbm [thread:$0]  (%p12477_p2), %s10683_s16, 1024, %s10681_s17, %s5282_s8, %s6989_s29, %s6989_s29, %s6990_s4  }
 0xc98   : > { %s6888_s6 = scalar_lea.vmem %s10686_s20, 256  ;;  %p12478_p9 = scmp.eq.s32.totalorder %s7083_s14, 1 }
 0xc99   : > { %p6889_p6 = scmp.ne.s32.totalorder %s10686_s20, %s6888_s6  ;;  %p6895_p12 = scmp.lt.s32.totalorder %s10686_s20, %s10686_s20 }
 0xc9a   : > { %p6896_p13 = scmp.lt.s32.totalorder %s6888_s6, %s6888_s6 }
 0xc9b   : > { %p6890_p5 = pnand %p6889_p6, %p12478_p9 }
 0xc9c   : > { %p6897_p10 = por %p6896_p13, %p6895_p12 }
 0xc9d   : > { %p6891_p11 = pneg %p6890_p5 }
 0xc9f   : > { %p6898_p7 = pnand %p6897_p10, %p6891_p11 }
 0xca1   : > { %6901 = shalt.err (!%p6898_p7)
}
 0xca2   : > { %p12479_p1 = pmov %p12478_p9 }
 0xca4   : > { %5639 = dma.vmem_to_hbm [thread:$0]  (%p12479_p1), %s10686_s20, 256, %s10772_s13, [#allocation21], %s6989_s29, %s6989_s29, %s6990_s4  }
 0xca5   : > { %p12480_p2 = pmov %p12479_p1 }
 0xca6   : > { %p12481_p3 = pmov %p12479_p1 }
 0xca7   : > { %6949 = dma.done.wait (%p12480_p2), [#allocation21], 512  }
 0xca8   : > { %6951 = vsyncadd (%p12481_p3), [#allocation21], 4294966784 }
 0xca9 PF: > { %s5344_s16 = sand.u32 1, %s6958_s25   ;;  %p12482_p4 = scmp.ne.s32.totalorder %s11347_s24, 0 }
 0xcaa   : > { %p12483_p8 = scmp.ge.s32.totalorder %s6970_s28, 2  ;;  %s5345_s17 = scalar_lea.sflag [#allocation6], %s5344_s16 }
 0xcac   : > { %p5675_p0 = pnand %p12483_p8, %p12482_p4 }
 0xcae   : > { %p5676_p6 = pneg %p5675_p0 }
 0xcb0   : > { %6953 = dma.done.wait (%p5676_p6), %s5345_s17, 1024  }
 0xcb1   : > { %6955 = vsyncadd (%p5676_p6), %s5345_s17, 4294966272  ;;  %s12484_s20 = sld [smem:[#allocation30_spill]]  ;;  %p32_p9 = scmp.ge.s32.totalorder %s7187_s21, 4  }
 0xcb2   : > { %s12485_s25 = smov %s6962_s26  ;;  %s12486_s26 = smov %s6966_s27 }
 0xcb3   : > { %s12488_s28 = smov %s7187_s21  ;;  %34 = sbr.rel (!%p32_p9) target bundleno = 19 (0x13), region = 177 }
 0xcb7   : > { %s12487_s27 = smov %s12484_s20 }
 0xcb8   :  { %5350 = vsyncpa [#allocation5], 1 }
 0xcb9   :  { %5352 = vsyncpa [#allocation5 + $0x1], 1 }
 0xcba   :  { %5353 = vsyncpa [#allocation8], 1 }
 0xcbb   :  { %5354 = vsyncpa [#allocation11], 1 }
 0xcbc   :  { %5355 = vsyncpa [#allocation14], 1 }
 0xcbd   :  { %5356 = vsyncpa [#allocation17], 1 }
 0xcbe   :  { %5357 = vsyncpa [#allocation6], 1 }
 0xcbf   :  { %5359 = vsyncpa [#allocation6 + $0x1], 1 }
 0xcc0   :  { %5360 = vsyncpa [#allocation21], 1 }

</bundles_post_ra>
